<compile_context>
chip_gen: v7x
topology: tpu7x:2x2x1
jax: 0.10.0
libtpu: 0.0.40
codegen_flags: <defaults>
</compile_context>

<pallas_src>
import math

import numpy as np
import jax
import jax.numpy as jnp
from jax import lax
from jax.experimental import pallas as pl
from jax.experimental.pallas import tpu as pltpu

OUT_CHANNEL_M = 4        # synthetic small stand-in for out_channel_M
OUT_CHANNEL_RESN = 8     # synthetic small stand-in for out_channel_resN

C = OUT_CHANNEL_RESN     # in-kernel channel width (input zero-padded 4 -> 8)
N_BATCH = 2

# Static network geometry for the fused kernel (input is 16x16).
H0 = W0 = 16             # conv1 input
H1 = W1 = 8              # conv1 output / res1 / conv2 input
H2 = W2 = 4              # conv2 output / res2 / conv3 input
H3 = W3 = 2              # conv3 output

WC0 = W0 * C             # 128  (fully lane-dense)
WC1 = W1 * C             # 64
WC2 = W2 * C             # 32
WC3 = W3 * C             # 16

PAD_TOP = 2              # rows of zeros above/below the interior in every pad buffer


# ------------------------------ fused Pallas kernel ------------------------------

def _fused_kernel(x_ref, w1_ref, b1_ref, rw1_ref, rb1_ref, w2_ref, b2_ref,
                  rw2_ref, rb2_ref, w3_ref, b3_ref, o_ref,
                  pad0_ref, pad1_ref, pad2_ref):
    f32 = jnp.float32

    # Zero the H-padding rings ONCE (interiors are fully overwritten by every conv).
    pad0_ref[...] = jnp.zeros(pad0_ref.shape, f32)
    pad1_ref[...] = jnp.zeros(pad1_ref.shape, f32)
    pad2_ref[...] = jnp.zeros(pad2_ref.shape, f32)

    def conv(pad_ref, h_out, wc_out, k, stride, padding, w_ref, w_base, bias):
        """Conv on the zero-H-padded activation held in pad_ref (interior at rows
        PAD_TOP..PAD_TOP+H-1).  w_ref[w_base + kh] is the (Win*C, Wout*C) GEMM matrix for
        row-tap kh with kw, W-padding and the conv stride folded in.  bias: (1, wc_out).
        Returns the (h_out, wc_out) output value (accumulated in vregs)."""
        acc = jnp.broadcast_to(bias, (h_out, wc_out))        # bias folded into acc init
        for kh in range(k):
            start = PAD_TOP - padding + kh
            if stride == 1:
                rows = pad_ref[start:start + h_out, :]
            else:                                            # strided sublane read
                rows = pad_ref[pl.ds(start, h_out, stride=stride), :]
            acc = acc + jnp.dot(rows, w_ref[w_base + kh],
                                preferred_element_type=f32)
        return acc

    def resblocks(pad_ref, h0, h_sp, wc, rw_ref, rb_ref):
        # Resblocks(x) = x + RB3(RB2(RB1(x)));  RB(h) = h + conv(relu(conv(relu(h)))).
        h = h0
        for blk in range(3):
            i1, i2 = 2 * blk, 2 * blk + 1
            pad_ref[PAD_TOP:PAD_TOP + h_sp, :] = jnp.maximum(h, 0.0)
            y = conv(pad_ref, h_sp, wc, 3, 1, 1, rw_ref, 3 * i1, rb_ref[i1])
            pad_ref[PAD_TOP:PAD_TOP + h_sp, :] = jnp.maximum(y, 0.0)
            h = h + conv(pad_ref, h_sp, wc, 3, 1, 1, rw_ref, 3 * i2, rb_ref[i2])
        return h0 + h

    for n in range(N_BATCH):                                  # static unroll over images
        pad0_ref[PAD_TOP:PAD_TOP + H0, :] = x_ref[n]                          # (16, 128)
        a = conv(pad0_ref, H1, WC1, 5, 2, 2, w1_ref, 0, b1_ref[...])          # (8, 64)
        a = resblocks(pad1_ref, a, H1, WC1, rw1_ref, rb1_ref)

        pad1_ref[PAD_TOP:PAD_TOP + H1, :] = a
        a = conv(pad1_ref, H2, WC2, 5, 2, 2, w2_ref, 0, b2_ref[...])          # (4, 32)
        a = resblocks(pad2_ref, a, H2, WC2, rw2_ref, rb2_ref)

        pad2_ref[PAD_TOP:PAD_TOP + H2, :] = a
        o_ref[n] = conv(pad2_ref, H3, WC3, 5, 2, 2, w3_ref, 0, b3_ref[...])   # (2, 16)


def _fused_forward(x_lanes, packed):
    def full_spec(a):
        nd = a.ndim
        return pl.BlockSpec(a.shape, lambda i, _nd=nd: (0,) * _nd)

    args = (x_lanes,) + packed
    return pl.pallas_call(
        _fused_kernel,
        out_shape=jax.ShapeDtypeStruct((N_BATCH, H3, WC3), jnp.float32),
        grid=(1,),
        in_specs=[full_spec(a) for a in args],
        out_specs=pl.BlockSpec((N_BATCH, H3, WC3), lambda i: (0, 0, 0)),
        scratch_shapes=[pltpu.VMEM((H0 + 2 * PAD_TOP, WC0), jnp.float32),   # (20, 128)
                        pltpu.VMEM((H1 + 2 * PAD_TOP, WC1), jnp.float32),   # (12, 64)
                        pltpu.VMEM((H2 + 2 * PAD_TOP, WC2), jnp.float32)],  # (8, 32)
        compiler_params=pltpu.CompilerParams(
            dimension_semantics=("arbitrary",)),
    )(*args)


# ------------------------- weight packing (wrapper side) -------------------------

def _matricize(w_hwio, w_in, w_out, stride, padding):
    """(k, k, cin, cout) HWIO conv weight -> (k, w_in*cin, w_out*cout) per-row-tap GEMM
    matrices with kw, the W-direction zero padding and the conv stride folded in."""
    k, _, cin, cout = w_hwio.shape
    sel = np.zeros((w_in, w_out, k), np.float32)
    for wo in range(w_out):
        for kw in range(k):
            wi = wo * stride - padding + kw
            if 0 <= wi < w_in:
                sel[wi, wo, kw] = 1.0
    m = jnp.einsum('iok,hkab->hiaob', jnp.asarray(sel), w_hwio)   # (k, w_in, cin, w_out, cout)
    return m.reshape(k, w_in * cin, w_out * cout)


def _tile_bias(b, w_out):
    # lane index = w*C + c  ->  bias tiled W_out times along lanes
    return jnp.tile(b, (w_out,)).reshape(1, w_out * b.shape[0])


def _pack_params(params):
    w1, b1 = params["conv1"]
    w1 = jnp.pad(w1, ((0, 0), (0, 0), (0, C - OUT_CHANNEL_M), (0, 0)))   # cin 4 -> 8
    w1m = _matricize(w1, W0, W1, 2, 2)                 # (5, 128, 64)
    b1m = _tile_bias(b1, W1)                           # (1, 64)

    def pack_res(blocks, w_sp):
        ws, bs = [], []
        for blk in blocks:
            ws.append(_matricize(blk["w1"], w_sp, w_sp, 1, 1))
            bs.append(_tile_bias(blk["b1"], w_sp))
            ws.append(_matricize(blk["w2"], w_sp, w_sp, 1, 1))
            bs.append(_tile_bias(blk["b2"], w_sp))
        return jnp.concatenate(ws, axis=0), jnp.stack(bs)   # (18, wc, wc), (6, 1, wc)

    rw1, rb1 = pack_res(params["res1"], W1)            # (18, 64, 64), (6, 1, 64)
    rw2, rb2 = pack_res(params["res2"], W2)            # (18, 32, 32), (6, 1, 32)

    w2m = _matricize(params["conv2"][0], W1, W2, 2, 2)  # (5, 64, 32)
    b2m = _tile_bias(params["conv2"][1], W2)            # (1, 32)
    w3m = _matricize(params["conv3"][0], W2, W3, 2, 2)  # (5, 32, 16)
    b3m = _tile_bias(params["conv3"][1], W3)            # (1, 16)
    return (w1m, b1m, rw1, rb1, w2m, b2m, rw2, rb2, w3m, b3m)


# ------------------------------- public entry point -------------------------------

@jax.jit
def res_encode_net(x_nchw, params):
    n, cin, h, w = x_nchw.shape
    assert (n, cin, h, w) == (N_BATCH, OUT_CHANNEL_M, H0, W0), \
        "fused kernel specialized to 2x4x16x16 input"

    # NCHW -> NHWC -> (N, H, W*C) with lane = w*C + c; input channels zero-padded 4 -> 8.
    x = jnp.transpose(x_nchw, (0, 2, 3, 1))
    x = jnp.pad(x, ((0, 0), (0, 0), (0, 0), (0, C - OUT_CHANNEL_M)))
    x = x.reshape(n, H0, WC0)

    y = _fused_forward(x, _pack_params(params))        # (N, H3, W3*C)
    y = y.reshape(n, H3, W3, C)
    return jnp.transpose(y, (0, 3, 1, 2))              # NHWC -> NCHW


# ------------------------------ pure-JAX reference ------------------------------

def _conv_ref(x, w, b, stride, pad):
    y = lax.conv_general_dilated(
        x, w, (stride, stride), [(pad, pad), (pad, pad)],
        dimension_numbers=("NHWC", "HWIO", "NHWC"))
    return y + b


def _resblocks_ref(x, blocks):
    h = x
    for p in blocks:
        y = _conv_ref(jnp.maximum(h, 0.0), p["w1"], p["b1"], 1, 1)
        y = _conv_ref(jnp.maximum(y, 0.0), p["w2"], p["b2"], 1, 1)
        h = h + y
    return x + h


def res_encode_net_ref(x_nchw, params):
    x = jnp.transpose(x_nchw, (0, 2, 3, 1))
    x = _conv_ref(x, *params["conv1"], 2, 2)
    x = _resblocks_ref(x, params["res1"])
    x = _conv_ref(x, *params["conv2"], 2, 2)
    x = _resblocks_ref(x, params["res2"])
    x = _conv_ref(x, *params["conv3"], 2, 2)
    return jnp.transpose(x, (0, 3, 1, 2))


# ------------------------------- parameter init -------------------------------

def init_params(key):
    def conv_init(k_, ksz, cin, cout):
        kw, kb = jax.random.split(k_)
        bound = 1.0 / math.sqrt(cin * ksz * ksz)
        w = jax.random.uniform(kw, (ksz, ksz, cin, cout), jnp.float32, -bound, bound)
        b = jax.random.uniform(kb, (cout,), jnp.float32, -bound, bound)
        return w, b

    def resblocks_init(k_):
        blocks = []
        for kk in jax.random.split(k_, 3):
            k1, k2 = jax.random.split(kk)
            w1, b1 = conv_init(k1, 3, OUT_CHANNEL_RESN, OUT_CHANNEL_RESN)
            w2, b2 = conv_init(k2, 3, OUT_CHANNEL_RESN, OUT_CHANNEL_RESN)
            blocks.append({"w1": w1, "b1": b1, "w2": w2, "b2": b2})
        return blocks

    ks = jax.random.split(key, 5)
    return {
        "conv1": conv_init(ks[0], 5, OUT_CHANNEL_M, OUT_CHANNEL_RESN),
        "conv2": conv_init(ks[1], 5, OUT_CHANNEL_RESN, OUT_CHANNEL_RESN),
        "conv3": conv_init(ks[2], 5, OUT_CHANNEL_RESN, OUT_CHANNEL_RESN),
        "res1": resblocks_init(ks[3]),
        "res2": resblocks_init(ks[4]),
    }


if __name__ == "__main__":
    key = jax.random.PRNGKey(0)
    kx, kp = jax.random.split(key)

    x = jax.random.normal(kx, (N_BATCH, OUT_CHANNEL_M, H0, W0), jnp.float32)
    params = init_params(kp)

    y = jax.block_until_ready(res_encode_net(x, params))
    assert y.shape == (N_BATCH, OUT_CHANNEL_RESN, H3, W3), y.shape

    y_ref = res_encode_net_ref(x, params)
    err = float(jnp.max(jnp.abs(y - y_ref)))
    assert err < 1e-3, f"mismatch vs reference: max abs err {err}"

    print("KERNEL_OK")
</pallas_src>

<mosaic_0001>
module attributes {stable_mosaic.version = 11 : i64} {
  func.func @_fused_kernel(%arg0: i32, %arg1: memref<2x16x128xf32, #tpu.memory_space<vmem>>, %arg2: memref<5x128x64xf32, #tpu.memory_space<vmem>>, %arg3: memref<1x64xf32, #tpu.memory_space<vmem>>, %arg4: memref<18x64x64xf32, #tpu.memory_space<vmem>>, %arg5: memref<6x1x64xf32, #tpu.memory_space<vmem>>, %arg6: memref<5x64x32xf32, #tpu.memory_space<vmem>>, %arg7: memref<1x32xf32, #tpu.memory_space<vmem>>, %arg8: memref<18x32x32xf32, #tpu.memory_space<vmem>>, %arg9: memref<6x1x32xf32, #tpu.memory_space<vmem>>, %arg10: memref<5x32x16xf32, #tpu.memory_space<vmem>>, %arg11: memref<1x16xf32, #tpu.memory_space<vmem>>, %arg12: memref<2x2x16xf32, #tpu.memory_space<vmem>>, %arg13: memref<20x128xf32, #tpu.memory_space<vmem>>, %arg14: memref<12x64xf32, #tpu.memory_space<vmem>>, %arg15: memref<8x32xf32, #tpu.memory_space<vmem>>) attributes {dimension_semantics = [#tpu.dimension_semantics<arbitrary>], iteration_bounds = array<i64: 1>, scalar_prefetch = 0 : i64, scratch_operands = 3 : i64, tpu.core_type = #tpu.core_type<tc>, window_params = [{pipeline_mode = #tpu.pipeline_mode<synchronous>, transform_indices = @transform_0, window_bounds = array<i64: 2, 16, 128>}, {pipeline_mode = #tpu.pipeline_mode<synchronous>, transform_indices = @transform_1, window_bounds = array<i64: 5, 128, 64>}, {pipeline_mode = #tpu.pipeline_mode<synchronous>, transform_indices = @transform_2, window_bounds = array<i64: 1, 64>}, {pipeline_mode = #tpu.pipeline_mode<synchronous>, transform_indices = @transform_3, window_bounds = array<i64: 18, 64, 64>}, {pipeline_mode = #tpu.pipeline_mode<synchronous>, transform_indices = @transform_4, window_bounds = array<i64: 6, 1, 64>}, {pipeline_mode = #tpu.pipeline_mode<synchronous>, transform_indices = @transform_5, window_bounds = array<i64: 5, 64, 32>}, {pipeline_mode = #tpu.pipeline_mode<synchronous>, transform_indices = @transform_6, window_bounds = array<i64: 1, 32>}, {pipeline_mode = #tpu.pipeline_mode<synchronous>, transform_indices = @transform_7, window_bounds = array<i64: 18, 32, 32>}, {pipeline_mode = #tpu.pipeline_mode<synchronous>, transform_indices = @transform_8, window_bounds = array<i64: 6, 1, 32>}, {pipeline_mode = #tpu.pipeline_mode<synchronous>, transform_indices = @transform_9, window_bounds = array<i64: 5, 32, 16>}, {pipeline_mode = #tpu.pipeline_mode<synchronous>, transform_indices = @transform_10, window_bounds = array<i64: 1, 16>}, {pipeline_mode = #tpu.pipeline_mode<synchronous>, transform_indices = @transform_11, window_bounds = array<i64: 2, 2, 16>}]} {
    %cst = arith.constant 0.000000e+00 : f32
    %0 = vector.broadcast %cst : f32 to vector<20x128xf32>
    %c0 = arith.constant 0 : index
    %c0_0 = arith.constant 0 : index
    %1 = vector.load %arg13[%c0, %c0_0] : memref<20x128xf32, #tpu.memory_space<vmem>>, vector<20x128xf32>
    tpu.vector_store %arg13[%c0, %c0_0], %0 {strides = array<i32>} : memref<20x128xf32, #tpu.memory_space<vmem>>, vector<20x128xf32>,
    %cst_1 = arith.constant 0.000000e+00 : f32
    %2 = vector.broadcast %cst_1 : f32 to vector<12x64xf32>
    %c0_2 = arith.constant 0 : index
    %c0_3 = arith.constant 0 : index
    %3 = vector.load %arg14[%c0_2, %c0_3] : memref<12x64xf32, #tpu.memory_space<vmem>>, vector<12x64xf32>
    tpu.vector_store %arg14[%c0_2, %c0_3], %2 {strides = array<i32>} : memref<12x64xf32, #tpu.memory_space<vmem>>, vector<12x64xf32>,
    %cst_4 = arith.constant 0.000000e+00 : f32
    %4 = vector.broadcast %cst_4 : f32 to vector<8x32xf32>
    %c0_5 = arith.constant 0 : index
    %c0_6 = arith.constant 0 : index
    %5 = vector.load %arg15[%c0_5, %c0_6] : memref<8x32xf32, #tpu.memory_space<vmem>>, vector<8x32xf32>
    tpu.vector_store %arg15[%c0_5, %c0_6], %4 {strides = array<i32>} : memref<8x32xf32, #tpu.memory_space<vmem>>, vector<8x32xf32>,
    %c0_7 = arith.constant 0 : index
    %c0_8 = arith.constant 0 : index
    %c0_9 = arith.constant 0 : index
    %6 = vector.load %arg1[%c0_7, %c0_8, %c0_9] : memref<2x16x128xf32, #tpu.memory_space<vmem>>, vector<1x16x128xf32>
    %7 = vector.shape_cast %6 : vector<1x16x128xf32> to vector<16x128xf32>
    %c2 = arith.constant 2 : index
    %c0_10 = arith.constant 0 : index
    %8 = vector.load %arg13[%c2, %c0_10] : memref<20x128xf32, #tpu.memory_space<vmem>>, vector<16x128xf32>
    tpu.vector_store %arg13[%c2, %c0_10], %7 {strides = array<i32>} : memref<20x128xf32, #tpu.memory_space<vmem>>, vector<16x128xf32>,
    %c0_11 = arith.constant 0 : index
    %c0_12 = arith.constant 0 : index
    %9 = vector.load %arg3[%c0_11, %c0_12] : memref<1x64xf32, #tpu.memory_space<vmem>>, vector<1x64xf32>
    %10 = vector.shape_cast %9 : vector<1x64xf32> to vector<1x64xf32>
    %11 = vector.broadcast %10 : vector<1x64xf32> to vector<8x64xf32>
    %c0_13 = arith.constant 0 : index
    %c0_14 = arith.constant 0 : index
    %12 = tpu.strided_load %arg13[%c0_13, %c0_14] {strides = array<i32: 2, 1>} : memref<20x128xf32, #tpu.memory_space<vmem>>, vector<8x128xf32>
    %c0_15 = arith.constant 0 : index
    %c0_16 = arith.constant 0 : index
    %c0_17 = arith.constant 0 : index
    %13 = vector.load %arg2[%c0_15, %c0_16, %c0_17] : memref<5x128x64xf32, #tpu.memory_space<vmem>>, vector<1x128x64xf32>
    %14 = vector.shape_cast %13 : vector<1x128x64xf32> to vector<128x64xf32>
    %cst_18 = arith.constant dense<0.000000e+00> : vector<8x64xf32>
    %15 = tpu.matmul %12, %14, %cst_18 {dimension_numbers = #tpu.dot_dimension_numbers<[1], [0], [0], [1], [0, 0, 1, 1], [], []>} : vector<8x128xf32>, vector<128x64xf32>, vector<8x64xf32> -> vector<8x64xf32>
    %16 = arith.addf %11, %15 : vector<8x64xf32>
    %c1 = arith.constant 1 : index
    %c0_19 = arith.constant 0 : index
    %17 = tpu.strided_load %arg13[%c1, %c0_19] {strides = array<i32: 2, 1>} : memref<20x128xf32, #tpu.memory_space<vmem>>, vector<8x128xf32>
    %c1_20 = arith.constant 1 : index
    %c0_21 = arith.constant 0 : index
    %c0_22 = arith.constant 0 : index
    %18 = vector.load %arg2[%c1_20, %c0_21, %c0_22] : memref<5x128x64xf32, #tpu.memory_space<vmem>>, vector<1x128x64xf32>
    %19 = vector.shape_cast %18 : vector<1x128x64xf32> to vector<128x64xf32>
    %cst_23 = arith.constant dense<0.000000e+00> : vector<8x64xf32>
    %20 = tpu.matmul %17, %19, %cst_23 {dimension_numbers = #tpu.dot_dimension_numbers<[1], [0], [0], [1], [0, 0, 1, 1], [], []>} : vector<8x128xf32>, vector<128x64xf32>, vector<8x64xf32> -> vector<8x64xf32>
    %21 = arith.addf %16, %20 : vector<8x64xf32>
    %c2_24 = arith.constant 2 : index
    %c0_25 = arith.constant 0 : index
    %22 = tpu.strided_load %arg13[%c2_24, %c0_25] {strides = array<i32: 2, 1>} : memref<20x128xf32, #tpu.memory_space<vmem>>, vector<8x128xf32>
    %c2_26 = arith.constant 2 : index
    %c0_27 = arith.constant 0 : index
    %c0_28 = arith.constant 0 : index
    %23 = vector.load %arg2[%c2_26, %c0_27, %c0_28] : memref<5x128x64xf32, #tpu.memory_space<vmem>>, vector<1x128x64xf32>
    %24 = vector.shape_cast %23 : vector<1x128x64xf32> to vector<128x64xf32>
    %cst_29 = arith.constant dense<0.000000e+00> : vector<8x64xf32>
    %25 = tpu.matmul %22, %24, %cst_29 {dimension_numbers = #tpu.dot_dimension_numbers<[1], [0], [0], [1], [0, 0, 1, 1], [], []>} : vector<8x128xf32>, vector<128x64xf32>, vector<8x64xf32> -> vector<8x64xf32>
    %26 = arith.addf %21, %25 : vector<8x64xf32>
    %c3 = arith.constant 3 : index
    %c0_30 = arith.constant 0 : index
    %27 = tpu.strided_load %arg13[%c3, %c0_30] {strides = array<i32: 2, 1>} : memref<20x128xf32, #tpu.memory_space<vmem>>, vector<8x128xf32>
    %c3_31 = arith.constant 3 : index
    %c0_32 = arith.constant 0 : index
    %c0_33 = arith.constant 0 : index
    %28 = vector.load %arg2[%c3_31, %c0_32, %c0_33] : memref<5x128x64xf32, #tpu.memory_space<vmem>>, vector<1x128x64xf32>
    %29 = vector.shape_cast %28 : vector<1x128x64xf32> to vector<128x64xf32>
    %cst_34 = arith.constant dense<0.000000e+00> : vector<8x64xf32>
    %30 = tpu.matmul %27, %29, %cst_34 {dimension_numbers = #tpu.dot_dimension_numbers<[1], [0], [0], [1], [0, 0, 1, 1], [], []>} : vector<8x128xf32>, vector<128x64xf32>, vector<8x64xf32> -> vector<8x64xf32>
    %31 = arith.addf %26, %30 : vector<8x64xf32>
    %c4 = arith.constant 4 : index
    %c0_35 = arith.constant 0 : index
    %32 = tpu.strided_load %arg13[%c4, %c0_35] {strides = array<i32: 2, 1>} : memref<20x128xf32, #tpu.memory_space<vmem>>, vector<8x128xf32>
    %c4_36 = arith.constant 4 : index
    %c0_37 = arith.constant 0 : index
    %c0_38 = arith.constant 0 : index
    %33 = vector.load %arg2[%c4_36, %c0_37, %c0_38] : memref<5x128x64xf32, #tpu.memory_space<vmem>>, vector<1x128x64xf32>
    %34 = vector.shape_cast %33 : vector<1x128x64xf32> to vector<128x64xf32>
    %cst_39 = arith.constant dense<0.000000e+00> : vector<8x64xf32>
    %35 = tpu.matmul %32, %34, %cst_39 {dimension_numbers = #tpu.dot_dimension_numbers<[1], [0], [0], [1], [0, 0, 1, 1], [], []>} : vector<8x128xf32>, vector<128x64xf32>, vector<8x64xf32> -> vector<8x64xf32>
    %36 = arith.addf %31, %35 : vector<8x64xf32>
    %cst_40 = arith.constant 0.000000e+00 : f32
    %37 = vector.broadcast %cst_40 : f32 to vector<8x64xf32>
    %38 = arith.maximumf %36, %37 : vector<8x64xf32>
    %c2_41 = arith.constant 2 : index
    %c0_42 = arith.constant 0 : index
    %39 = vector.load %arg14[%c2_41, %c0_42] : memref<12x64xf32, #tpu.memory_space<vmem>>, vector<8x64xf32>
    tpu.vector_store %arg14[%c2_41, %c0_42], %38 {strides = array<i32>} : memref<12x64xf32, #tpu.memory_space<vmem>>, vector<8x64xf32>,
    %c0_43 = arith.constant 0 : index
    %c0_44 = arith.constant 0 : index
    %c0_45 = arith.constant 0 : index
    %40 = vector.load %arg5[%c0_43, %c0_44, %c0_45] : memref<6x1x64xf32, #tpu.memory_space<vmem>>, vector<1x1x64xf32>
    %41 = vector.shape_cast %40 : vector<1x1x64xf32> to vector<1x64xf32>
    %42 = vector.shape_cast %41 : vector<1x64xf32> to vector<1x64xf32>
    %43 = vector.broadcast %42 : vector<1x64xf32> to vector<8x64xf32>
    %c1_46 = arith.constant 1 : index
    %c0_47 = arith.constant 0 : index
    %44 = vector.load %arg14[%c1_46, %c0_47] : memref<12x64xf32, #tpu.memory_space<vmem>>, vector<8x64xf32>
    %c0_48 = arith.constant 0 : index
    %c0_49 = arith.constant 0 : index
    %c0_50 = arith.constant 0 : index
    %45 = vector.load %arg4[%c0_48, %c0_49, %c0_50] : memref<18x64x64xf32, #tpu.memory_space<vmem>>, vector<1x64x64xf32>
    %46 = vector.shape_cast %45 : vector<1x64x64xf32> to vector<64x64xf32>
    %cst_51 = arith.constant dense<0.000000e+00> : vector<8x64xf32>
    %47 = tpu.matmul %44, %46, %cst_51 {dimension_numbers = #tpu.dot_dimension_numbers<[1], [0], [0], [1], [0, 0, 1, 1], [], []>} : vector<8x64xf32>, vector<64x64xf32>, vector<8x64xf32> -> vector<8x64xf32>
    %48 = arith.addf %43, %47 : vector<8x64xf32>
    %c2_52 = arith.constant 2 : index
    %c0_53 = arith.constant 0 : index
    %49 = vector.load %arg14[%c2_52, %c0_53] : memref<12x64xf32, #tpu.memory_space<vmem>>, vector<8x64xf32>
    %c1_54 = arith.constant 1 : index
    %c0_55 = arith.constant 0 : index
    %c0_56 = arith.constant 0 : index
    %50 = vector.load %arg4[%c1_54, %c0_55, %c0_56] : memref<18x64x64xf32, #tpu.memory_space<vmem>>, vector<1x64x64xf32>
    %51 = vector.shape_cast %50 : vector<1x64x64xf32> to vector<64x64xf32>
    %cst_57 = arith.constant dense<0.000000e+00> : vector<8x64xf32>
    %52 = tpu.matmul %49, %51, %cst_57 {dimension_numbers = #tpu.dot_dimension_numbers<[1], [0], [0], [1], [0, 0, 1, 1], [], []>} : vector<8x64xf32>, vector<64x64xf32>, vector<8x64xf32> -> vector<8x64xf32>
    %53 = arith.addf %48, %52 : vector<8x64xf32>
    %c3_58 = arith.constant 3 : index
    %c0_59 = arith.constant 0 : index
    %54 = vector.load %arg14[%c3_58, %c0_59] : memref<12x64xf32, #tpu.memory_space<vmem>>, vector<8x64xf32>
    %c2_60 = arith.constant 2 : index
    %c0_61 = arith.constant 0 : index
    %c0_62 = arith.constant 0 : index
    %55 = vector.load %arg4[%c2_60, %c0_61, %c0_62] : memref<18x64x64xf32, #tpu.memory_space<vmem>>, vector<1x64x64xf32>
    %56 = vector.shape_cast %55 : vector<1x64x64xf32> to vector<64x64xf32>
    %cst_63 = arith.constant dense<0.000000e+00> : vector<8x64xf32>
    %57 = tpu.matmul %54, %56, %cst_63 {dimension_numbers = #tpu.dot_dimension_numbers<[1], [0], [0], [1], [0, 0, 1, 1], [], []>} : vector<8x64xf32>, vector<64x64xf32>, vector<8x64xf32> -> vector<8x64xf32>
    %58 = arith.addf %53, %57 : vector<8x64xf32>
    %cst_64 = arith.constant 0.000000e+00 : f32
    %59 = vector.broadcast %cst_64 : f32 to vector<8x64xf32>
    %60 = arith.maximumf %58, %59 : vector<8x64xf32>
    %c2_65 = arith.constant 2 : index
    %c0_66 = arith.constant 0 : index
    %61 = vector.load %arg14[%c2_65, %c0_66] : memref<12x64xf32, #tpu.memory_space<vmem>>, vector<8x64xf32>
    tpu.vector_store %arg14[%c2_65, %c0_66], %60 {strides = array<i32>} : memref<12x64xf32, #tpu.memory_space<vmem>>, vector<8x64xf32>,
    %c1_67 = arith.constant 1 : index
    %c0_68 = arith.constant 0 : index
    %c0_69 = arith.constant 0 : index
    %62 = vector.load %arg5[%c1_67, %c0_68, %c0_69] : memref<6x1x64xf32, #tpu.memory_space<vmem>>, vector<1x1x64xf32>
    %63 = vector.shape_cast %62 : vector<1x1x64xf32> to vector<1x64xf32>
    %64 = vector.shape_cast %63 : vector<1x64xf32> to vector<1x64xf32>
    %65 = vector.broadcast %64 : vector<1x64xf32> to vector<8x64xf32>
    %c1_70 = arith.constant 1 : index
    %c0_71 = arith.constant 0 : index
    %66 = vector.load %arg14[%c1_70, %c0_71] : memref<12x64xf32, #tpu.memory_space<vmem>>, vector<8x64xf32>
    %c3_72 = arith.constant 3 : index
    %c0_73 = arith.constant 0 : index
    %c0_74 = arith.constant 0 : index
    %67 = vector.load %arg4[%c3_72, %c0_73, %c0_74] : memref<18x64x64xf32, #tpu.memory_space<vmem>>, vector<1x64x64xf32>
    %68 = vector.shape_cast %67 : vector<1x64x64xf32> to vector<64x64xf32>
    %cst_75 = arith.constant dense<0.000000e+00> : vector<8x64xf32>
    %69 = tpu.matmul %66, %68, %cst_75 {dimension_numbers = #tpu.dot_dimension_numbers<[1], [0], [0], [1], [0, 0, 1, 1], [], []>} : vector<8x64xf32>, vector<64x64xf32>, vector<8x64xf32> -> vector<8x64xf32>
    %70 = arith.addf %65, %69 : vector<8x64xf32>
    %c2_76 = arith.constant 2 : index
    %c0_77 = arith.constant 0 : index
    %71 = vector.load %arg14[%c2_76, %c0_77] : memref<12x64xf32, #tpu.memory_space<vmem>>, vector<8x64xf32>
    %c4_78 = arith.constant 4 : index
    %c0_79 = arith.constant 0 : index
    %c0_80 = arith.constant 0 : index
    %72 = vector.load %arg4[%c4_78, %c0_79, %c0_80] : memref<18x64x64xf32, #tpu.memory_space<vmem>>, vector<1x64x64xf32>
    %73 = vector.shape_cast %72 : vector<1x64x64xf32> to vector<64x64xf32>
    %cst_81 = arith.constant dense<0.000000e+00> : vector<8x64xf32>
    %74 = tpu.matmul %71, %73, %cst_81 {dimension_numbers = #tpu.dot_dimension_numbers<[1], [0], [0], [1], [0, 0, 1, 1], [], []>} : vector<8x64xf32>, vector<64x64xf32>, vector<8x64xf32> -> vector<8x64xf32>
    %75 = arith.addf %70, %74 : vector<8x64xf32>
    %c3_82 = arith.constant 3 : index
    %c0_83 = arith.constant 0 : index
    %76 = vector.load %arg14[%c3_82, %c0_83] : memref<12x64xf32, #tpu.memory_space<vmem>>, vector<8x64xf32>
    %c5 = arith.constant 5 : index
    %c0_84 = arith.constant 0 : index
    %c0_85 = arith.constant 0 : index
    %77 = vector.load %arg4[%c5, %c0_84, %c0_85] : memref<18x64x64xf32, #tpu.memory_space<vmem>>, vector<1x64x64xf32>
    %78 = vector.shape_cast %77 : vector<1x64x64xf32> to vector<64x64xf32>
    %cst_86 = arith.constant dense<0.000000e+00> : vector<8x64xf32>
    %79 = tpu.matmul %76, %78, %cst_86 {dimension_numbers = #tpu.dot_dimension_numbers<[1], [0], [0], [1], [0, 0, 1, 1], [], []>} : vector<8x64xf32>, vector<64x64xf32>, vector<8x64xf32> -> vector<8x64xf32>
    %80 = arith.addf %75, %79 : vector<8x64xf32>
    %81 = arith.addf %36, %80 : vector<8x64xf32>
    %cst_87 = arith.constant 0.000000e+00 : f32
    %82 = vector.broadcast %cst_87 : f32 to vector<8x64xf32>
    %83 = arith.maximumf %81, %82 : vector<8x64xf32>
    %c2_88 = arith.constant 2 : index
    %c0_89 = arith.constant 0 : index
    %84 = vector.load %arg14[%c2_88, %c0_89] : memref<12x64xf32, #tpu.memory_space<vmem>>, vector<8x64xf32>
    tpu.vector_store %arg14[%c2_88, %c0_89], %83 {strides = array<i32>} : memref<12x64xf32, #tpu.memory_space<vmem>>, vector<8x64xf32>,
    %c2_90 = arith.constant 2 : index
    %c0_91 = arith.constant 0 : index
    %c0_92 = arith.constant 0 : index
    %85 = vector.load %arg5[%c2_90, %c0_91, %c0_92] : memref<6x1x64xf32, #tpu.memory_space<vmem>>, vector<1x1x64xf32>
    %86 = vector.shape_cast %85 : vector<1x1x64xf32> to vector<1x64xf32>
    %87 = vector.shape_cast %86 : vector<1x64xf32> to vector<1x64xf32>
    %88 = vector.broadcast %87 : vector<1x64xf32> to vector<8x64xf32>
    %c1_93 = arith.constant 1 : index
    %c0_94 = arith.constant 0 : index
    %89 = vector.load %arg14[%c1_93, %c0_94] : memref<12x64xf32, #tpu.memory_space<vmem>>, vector<8x64xf32>
    %c6 = arith.constant 6 : index
    %c0_95 = arith.constant 0 : index
    %c0_96 = arith.constant 0 : index
    %90 = vector.load %arg4[%c6, %c0_95, %c0_96] : memref<18x64x64xf32, #tpu.memory_space<vmem>>, vector<1x64x64xf32>
    %91 = vector.shape_cast %90 : vector<1x64x64xf32> to vector<64x64xf32>
    %cst_97 = arith.constant dense<0.000000e+00> : vector<8x64xf32>
    %92 = tpu.matmul %89, %91, %cst_97 {dimension_numbers = #tpu.dot_dimension_numbers<[1], [0], [0], [1], [0, 0, 1, 1], [], []>} : vector<8x64xf32>, vector<64x64xf32>, vector<8x64xf32> -> vector<8x64xf32>
    %93 = arith.addf %88, %92 : vector<8x64xf32>
    %c2_98 = arith.constant 2 : index
    %c0_99 = arith.constant 0 : index
    %94 = vector.load %arg14[%c2_98, %c0_99] : memref<12x64xf32, #tpu.memory_space<vmem>>, vector<8x64xf32>
    %c7 = arith.constant 7 : index
    %c0_100 = arith.constant 0 : index
    %c0_101 = arith.constant 0 : index
    %95 = vector.load %arg4[%c7, %c0_100, %c0_101] : memref<18x64x64xf32, #tpu.memory_space<vmem>>, vector<1x64x64xf32>
    %96 = vector.shape_cast %95 : vector<1x64x64xf32> to vector<64x64xf32>
    %cst_102 = arith.constant dense<0.000000e+00> : vector<8x64xf32>
    %97 = tpu.matmul %94, %96, %cst_102 {dimension_numbers = #tpu.dot_dimension_numbers<[1], [0], [0], [1], [0, 0, 1, 1], [], []>} : vector<8x64xf32>, vector<64x64xf32>, vector<8x64xf32> -> vector<8x64xf32>
    %98 = arith.addf %93, %97 : vector<8x64xf32>
    %c3_103 = arith.constant 3 : index
    %c0_104 = arith.constant 0 : index
    %99 = vector.load %arg14[%c3_103, %c0_104] : memref<12x64xf32, #tpu.memory_space<vmem>>, vector<8x64xf32>
    %c8 = arith.constant 8 : index
    %c0_105 = arith.constant 0 : index
    %c0_106 = arith.constant 0 : index
    %100 = vector.load %arg4[%c8, %c0_105, %c0_106] : memref<18x64x64xf32, #tpu.memory_space<vmem>>, vector<1x64x64xf32>
    %101 = vector.shape_cast %100 : vector<1x64x64xf32> to vector<64x64xf32>
    %cst_107 = arith.constant dense<0.000000e+00> : vector<8x64xf32>
    %102 = tpu.matmul %99, %101, %cst_107 {dimension_numbers = #tpu.dot_dimension_numbers<[1], [0], [0], [1], [0, 0, 1, 1], [], []>} : vector<8x64xf32>, vector<64x64xf32>, vector<8x64xf32> -> vector<8x64xf32>
    %103 = arith.addf %98, %102 : vector<8x64xf32>
    %cst_108 = arith.constant 0.000000e+00 : f32
    %104 = vector.broadcast %cst_108 : f32 to vector<8x64xf32>
    %105 = arith.maximumf %103, %104 : vector<8x64xf32>
    %c2_109 = arith.constant 2 : index
    %c0_110 = arith.constant 0 : index
    %106 = vector.load %arg14[%c2_109, %c0_110] : memref<12x64xf32, #tpu.memory_space<vmem>>, vector<8x64xf32>
    tpu.vector_store %arg14[%c2_109, %c0_110], %105 {strides = array<i32>} : memref<12x64xf32, #tpu.memory_space<vmem>>, vector<8x64xf32>,
    %c3_111 = arith.constant 3 : index
    %c0_112 = arith.constant 0 : index
    %c0_113 = arith.constant 0 : index
    %107 = vector.load %arg5[%c3_111, %c0_112, %c0_113] : memref<6x1x64xf32, #tpu.memory_space<vmem>>, vector<1x1x64xf32>
    %108 = vector.shape_cast %107 : vector<1x1x64xf32> to vector<1x64xf32>
    %109 = vector.shape_cast %108 : vector<1x64xf32> to vector<1x64xf32>
    %110 = vector.broadcast %109 : vector<1x64xf32> to vector<8x64xf32>
    %c1_114 = arith.constant 1 : index
    %c0_115 = arith.constant 0 : index
    %111 = vector.load %arg14[%c1_114, %c0_115] : memref<12x64xf32, #tpu.memory_space<vmem>>, vector<8x64xf32>
    %c9 = arith.constant 9 : index
    %c0_116 = arith.constant 0 : index
    %c0_117 = arith.constant 0 : index
    %112 = vector.load %arg4[%c9, %c0_116, %c0_117] : memref<18x64x64xf32, #tpu.memory_space<vmem>>, vector<1x64x64xf32>
    %113 = vector.shape_cast %112 : vector<1x64x64xf32> to vector<64x64xf32>
    %cst_118 = arith.constant dense<0.000000e+00> : vector<8x64xf32>
    %114 = tpu.matmul %111, %113, %cst_118 {dimension_numbers = #tpu.dot_dimension_numbers<[1], [0], [0], [1], [0, 0, 1, 1], [], []>} : vector<8x64xf32>, vector<64x64xf32>, vector<8x64xf32> -> vector<8x64xf32>
    %115 = arith.addf %110, %114 : vector<8x64xf32>
    %c2_119 = arith.constant 2 : index
    %c0_120 = arith.constant 0 : index
    %116 = vector.load %arg14[%c2_119, %c0_120] : memref<12x64xf32, #tpu.memory_space<vmem>>, vector<8x64xf32>
    %c10 = arith.constant 10 : index
    %c0_121 = arith.constant 0 : index
    %c0_122 = arith.constant 0 : index
    %117 = vector.load %arg4[%c10, %c0_121, %c0_122] : memref<18x64x64xf32, #tpu.memory_space<vmem>>, vector<1x64x64xf32>
    %118 = vector.shape_cast %117 : vector<1x64x64xf32> to vector<64x64xf32>
    %cst_123 = arith.constant dense<0.000000e+00> : vector<8x64xf32>
    %119 = tpu.matmul %116, %118, %cst_123 {dimension_numbers = #tpu.dot_dimension_numbers<[1], [0], [0], [1], [0, 0, 1, 1], [], []>} : vector<8x64xf32>, vector<64x64xf32>, vector<8x64xf32> -> vector<8x64xf32>
    %120 = arith.addf %115, %119 : vector<8x64xf32>
    %c3_124 = arith.constant 3 : index
    %c0_125 = arith.constant 0 : index
    %121 = vector.load %arg14[%c3_124, %c0_125] : memref<12x64xf32, #tpu.memory_space<vmem>>, vector<8x64xf32>
    %c11 = arith.constant 11 : index
    %c0_126 = arith.constant 0 : index
    %c0_127 = arith.constant 0 : index
    %122 = vector.load %arg4[%c11, %c0_126, %c0_127] : memref<18x64x64xf32, #tpu.memory_space<vmem>>, vector<1x64x64xf32>
    %123 = vector.shape_cast %122 : vector<1x64x64xf32> to vector<64x64xf32>
    %cst_128 = arith.constant dense<0.000000e+00> : vector<8x64xf32>
    %124 = tpu.matmul %121, %123, %cst_128 {dimension_numbers = #tpu.dot_dimension_numbers<[1], [0], [0], [1], [0, 0, 1, 1], [], []>} : vector<8x64xf32>, vector<64x64xf32>, vector<8x64xf32> -> vector<8x64xf32>
    %125 = arith.addf %120, %124 : vector<8x64xf32>
    %126 = arith.addf %81, %125 : vector<8x64xf32>
    %cst_129 = arith.constant 0.000000e+00 : f32
    %127 = vector.broadcast %cst_129 : f32 to vector<8x64xf32>
    %128 = arith.maximumf %126, %127 : vector<8x64xf32>
    %c2_130 = arith.constant 2 : index
    %c0_131 = arith.constant 0 : index
    %129 = vector.load %arg14[%c2_130, %c0_131] : memref<12x64xf32, #tpu.memory_space<vmem>>, vector<8x64xf32>
    tpu.vector_store %arg14[%c2_130, %c0_131], %128 {strides = array<i32>} : memref<12x64xf32, #tpu.memory_space<vmem>>, vector<8x64xf32>,
    %c4_132 = arith.constant 4 : index
    %c0_133 = arith.constant 0 : index
    %c0_134 = arith.constant 0 : index
    %130 = vector.load %arg5[%c4_132, %c0_133, %c0_134] : memref<6x1x64xf32, #tpu.memory_space<vmem>>, vector<1x1x64xf32>
    %131 = vector.shape_cast %130 : vector<1x1x64xf32> to vector<1x64xf32>
    %132 = vector.shape_cast %131 : vector<1x64xf32> to vector<1x64xf32>
    %133 = vector.broadcast %132 : vector<1x64xf32> to vector<8x64xf32>
    %c1_135 = arith.constant 1 : index
    %c0_136 = arith.constant 0 : index
    %134 = vector.load %arg14[%c1_135, %c0_136] : memref<12x64xf32, #tpu.memory_space<vmem>>, vector<8x64xf32>
    %c12 = arith.constant 12 : index
    %c0_137 = arith.constant 0 : index
    %c0_138 = arith.constant 0 : index
    %135 = vector.load %arg4[%c12, %c0_137, %c0_138] : memref<18x64x64xf32, #tpu.memory_space<vmem>>, vector<1x64x64xf32>
    %136 = vector.shape_cast %135 : vector<1x64x64xf32> to vector<64x64xf32>
    %cst_139 = arith.constant dense<0.000000e+00> : vector<8x64xf32>
    %137 = tpu.matmul %134, %136, %cst_139 {dimension_numbers = #tpu.dot_dimension_numbers<[1], [0], [0], [1], [0, 0, 1, 1], [], []>} : vector<8x64xf32>, vector<64x64xf32>, vector<8x64xf32> -> vector<8x64xf32>
    %138 = arith.addf %133, %137 : vector<8x64xf32>
    %c2_140 = arith.constant 2 : index
    %c0_141 = arith.constant 0 : index
    %139 = vector.load %arg14[%c2_140, %c0_141] : memref<12x64xf32, #tpu.memory_space<vmem>>, vector<8x64xf32>
    %c13 = arith.constant 13 : index
    %c0_142 = arith.constant 0 : index
    %c0_143 = arith.constant 0 : index
    %140 = vector.load %arg4[%c13, %c0_142, %c0_143] : memref<18x64x64xf32, #tpu.memory_space<vmem>>, vector<1x64x64xf32>
    %141 = vector.shape_cast %140 : vector<1x64x64xf32> to vector<64x64xf32>
    %cst_144 = arith.constant dense<0.000000e+00> : vector<8x64xf32>
    %142 = tpu.matmul %139, %141, %cst_144 {dimension_numbers = #tpu.dot_dimension_numbers<[1], [0], [0], [1], [0, 0, 1, 1], [], []>} : vector<8x64xf32>, vector<64x64xf32>, vector<8x64xf32> -> vector<8x64xf32>
    %143 = arith.addf %138, %142 : vector<8x64xf32>
    %c3_145 = arith.constant 3 : index
    %c0_146 = arith.constant 0 : index
    %144 = vector.load %arg14[%c3_145, %c0_146] : memref<12x64xf32, #tpu.memory_space<vmem>>, vector<8x64xf32>
    %c14 = arith.constant 14 : index
    %c0_147 = arith.constant 0 : index
    %c0_148 = arith.constant 0 : index
    %145 = vector.load %arg4[%c14, %c0_147, %c0_148] : memref<18x64x64xf32, #tpu.memory_space<vmem>>, vector<1x64x64xf32>
    %146 = vector.shape_cast %145 : vector<1x64x64xf32> to vector<64x64xf32>
    %cst_149 = arith.constant dense<0.000000e+00> : vector<8x64xf32>
    %147 = tpu.matmul %144, %146, %cst_149 {dimension_numbers = #tpu.dot_dimension_numbers<[1], [0], [0], [1], [0, 0, 1, 1], [], []>} : vector<8x64xf32>, vector<64x64xf32>, vector<8x64xf32> -> vector<8x64xf32>
    %148 = arith.addf %143, %147 : vector<8x64xf32>
    %cst_150 = arith.constant 0.000000e+00 : f32
    %149 = vector.broadcast %cst_150 : f32 to vector<8x64xf32>
    %150 = arith.maximumf %148, %149 : vector<8x64xf32>
    %c2_151 = arith.constant 2 : index
    %c0_152 = arith.constant 0 : index
    %151 = vector.load %arg14[%c2_151, %c0_152] : memref<12x64xf32, #tpu.memory_space<vmem>>, vector<8x64xf32>
    tpu.vector_store %arg14[%c2_151, %c0_152], %150 {strides = array<i32>} : memref<12x64xf32, #tpu.memory_space<vmem>>, vector<8x64xf32>,
    %c5_153 = arith.constant 5 : index
    %c0_154 = arith.constant 0 : index
    %c0_155 = arith.constant 0 : index
    %152 = vector.load %arg5[%c5_153, %c0_154, %c0_155] : memref<6x1x64xf32, #tpu.memory_space<vmem>>, vector<1x1x64xf32>
    %153 = vector.shape_cast %152 : vector<1x1x64xf32> to vector<1x64xf32>
    %154 = vector.shape_cast %153 : vector<1x64xf32> to vector<1x64xf32>
    %155 = vector.broadcast %154 : vector<1x64xf32> to vector<8x64xf32>
    %c1_156 = arith.constant 1 : index
    %c0_157 = arith.constant 0 : index
    %156 = vector.load %arg14[%c1_156, %c0_157] : memref<12x64xf32, #tpu.memory_space<vmem>>, vector<8x64xf32>
    %c15 = arith.constant 15 : index
    %c0_158 = arith.constant 0 : index
    %c0_159 = arith.constant 0 : index
    %157 = vector.load %arg4[%c15, %c0_158, %c0_159] : memref<18x64x64xf32, #tpu.memory_space<vmem>>, vector<1x64x64xf32>
    %158 = vector.shape_cast %157 : vector<1x64x64xf32> to vector<64x64xf32>
    %cst_160 = arith.constant dense<0.000000e+00> : vector<8x64xf32>
    %159 = tpu.matmul %156, %158, %cst_160 {dimension_numbers = #tpu.dot_dimension_numbers<[1], [0], [0], [1], [0, 0, 1, 1], [], []>} : vector<8x64xf32>, vector<64x64xf32>, vector<8x64xf32> -> vector<8x64xf32>
    %160 = arith.addf %155, %159 : vector<8x64xf32>
    %c2_161 = arith.constant 2 : index
    %c0_162 = arith.constant 0 : index
    %161 = vector.load %arg14[%c2_161, %c0_162] : memref<12x64xf32, #tpu.memory_space<vmem>>, vector<8x64xf32>
    %c16 = arith.constant 16 : index
    %c0_163 = arith.constant 0 : index
    %c0_164 = arith.constant 0 : index
    %162 = vector.load %arg4[%c16, %c0_163, %c0_164] : memref<18x64x64xf32, #tpu.memory_space<vmem>>, vector<1x64x64xf32>
    %163 = vector.shape_cast %162 : vector<1x64x64xf32> to vector<64x64xf32>
    %cst_165 = arith.constant dense<0.000000e+00> : vector<8x64xf32>
    %164 = tpu.matmul %161, %163, %cst_165 {dimension_numbers = #tpu.dot_dimension_numbers<[1], [0], [0], [1], [0, 0, 1, 1], [], []>} : vector<8x64xf32>, vector<64x64xf32>, vector<8x64xf32> -> vector<8x64xf32>
    %165 = arith.addf %160, %164 : vector<8x64xf32>
    %c3_166 = arith.constant 3 : index
    %c0_167 = arith.constant 0 : index
    %166 = vector.load %arg14[%c3_166, %c0_167] : memref<12x64xf32, #tpu.memory_space<vmem>>, vector<8x64xf32>
    %c17 = arith.constant 17 : index
    %c0_168 = arith.constant 0 : index
    %c0_169 = arith.constant 0 : index
    %167 = vector.load %arg4[%c17, %c0_168, %c0_169] : memref<18x64x64xf32, #tpu.memory_space<vmem>>, vector<1x64x64xf32>
    %168 = vector.shape_cast %167 : vector<1x64x64xf32> to vector<64x64xf32>
    %cst_170 = arith.constant dense<0.000000e+00> : vector<8x64xf32>
    %169 = tpu.matmul %166, %168, %cst_170 {dimension_numbers = #tpu.dot_dimension_numbers<[1], [0], [0], [1], [0, 0, 1, 1], [], []>} : vector<8x64xf32>, vector<64x64xf32>, vector<8x64xf32> -> vector<8x64xf32>
    %170 = arith.addf %165, %169 : vector<8x64xf32>
    %171 = arith.addf %126, %170 : vector<8x64xf32>
    %172 = arith.addf %36, %171 : vector<8x64xf32>
    %c2_171 = arith.constant 2 : index
    %c0_172 = arith.constant 0 : index
    %173 = vector.load %arg14[%c2_171, %c0_172] : memref<12x64xf32, #tpu.memory_space<vmem>>, vector<8x64xf32>
    tpu.vector_store %arg14[%c2_171, %c0_172], %172 {strides = array<i32>} : memref<12x64xf32, #tpu.memory_space<vmem>>, vector<8x64xf32>,
    %c0_173 = arith.constant 0 : index
    %c0_174 = arith.constant 0 : index
    %174 = vector.load %arg7[%c0_173, %c0_174] : memref<1x32xf32, #tpu.memory_space<vmem>>, vector<1x32xf32>
    %175 = vector.shape_cast %174 : vector<1x32xf32> to vector<1x32xf32>
    %176 = vector.broadcast %175 : vector<1x32xf32> to vector<4x32xf32>
    %c0_175 = arith.constant 0 : index
    %c0_176 = arith.constant 0 : index
    %177 = tpu.strided_load %arg14[%c0_175, %c0_176] {strides = array<i32: 2, 1>} : memref<12x64xf32, #tpu.memory_space<vmem>>, vector<4x64xf32>
    %c0_177 = arith.constant 0 : index
    %c0_178 = arith.constant 0 : index
    %c0_179 = arith.constant 0 : index
    %178 = vector.load %arg6[%c0_177, %c0_178, %c0_179] : memref<5x64x32xf32, #tpu.memory_space<vmem>>, vector<1x64x32xf32>
    %179 = vector.shape_cast %178 : vector<1x64x32xf32> to vector<64x32xf32>
    %cst_180 = arith.constant dense<0.000000e+00> : vector<4x32xf32>
    %180 = tpu.matmul %177, %179, %cst_180 {dimension_numbers = #tpu.dot_dimension_numbers<[1], [0], [0], [1], [0, 0, 1, 1], [], []>} : vector<4x64xf32>, vector<64x32xf32>, vector<4x32xf32> -> vector<4x32xf32>
    %181 = arith.addf %176, %180 : vector<4x32xf32>
    %c1_181 = arith.constant 1 : index
    %c0_182 = arith.constant 0 : index
    %182 = tpu.strided_load %arg14[%c1_181, %c0_182] {strides = array<i32: 2, 1>} : memref<12x64xf32, #tpu.memory_space<vmem>>, vector<4x64xf32>
    %c1_183 = arith.constant 1 : index
    %c0_184 = arith.constant 0 : index
    %c0_185 = arith.constant 0 : index
    %183 = vector.load %arg6[%c1_183, %c0_184, %c0_185] : memref<5x64x32xf32, #tpu.memory_space<vmem>>, vector<1x64x32xf32>
    %184 = vector.shape_cast %183 : vector<1x64x32xf32> to vector<64x32xf32>
    %cst_186 = arith.constant dense<0.000000e+00> : vector<4x32xf32>
    %185 = tpu.matmul %182, %184, %cst_186 {dimension_numbers = #tpu.dot_dimension_numbers<[1], [0], [0], [1], [0, 0, 1, 1], [], []>} : vector<4x64xf32>, vector<64x32xf32>, vector<4x32xf32> -> vector<4x32xf32>
    %186 = arith.addf %181, %185 : vector<4x32xf32>
    %c2_187 = arith.constant 2 : index
    %c0_188 = arith.constant 0 : index
    %187 = tpu.strided_load %arg14[%c2_187, %c0_188] {strides = array<i32: 2, 1>} : memref<12x64xf32, #tpu.memory_space<vmem>>, vector<4x64xf32>
    %c2_189 = arith.constant 2 : index
    %c0_190 = arith.constant 0 : index
    %c0_191 = arith.constant 0 : index
    %188 = vector.load %arg6[%c2_189, %c0_190, %c0_191] : memref<5x64x32xf32, #tpu.memory_space<vmem>>, vector<1x64x32xf32>
    %189 = vector.shape_cast %188 : vector<1x64x32xf32> to vector<64x32xf32>
    %cst_192 = arith.constant dense<0.000000e+00> : vector<4x32xf32>
    %190 = tpu.matmul %187, %189, %cst_192 {dimension_numbers = #tpu.dot_dimension_numbers<[1], [0], [0], [1], [0, 0, 1, 1], [], []>} : vector<4x64xf32>, vector<64x32xf32>, vector<4x32xf32> -> vector<4x32xf32>
    %191 = arith.addf %186, %190 : vector<4x32xf32>
    %c3_193 = arith.constant 3 : index
    %c0_194 = arith.constant 0 : index
    %192 = tpu.strided_load %arg14[%c3_193, %c0_194] {strides = array<i32: 2, 1>} : memref<12x64xf32, #tpu.memory_space<vmem>>, vector<4x64xf32>
    %c3_195 = arith.constant 3 : index
    %c0_196 = arith.constant 0 : index
    %c0_197 = arith.constant 0 : index
    %193 = vector.load %arg6[%c3_195, %c0_196, %c0_197] : memref<5x64x32xf32, #tpu.memory_space<vmem>>, vector<1x64x32xf32>
    %194 = vector.shape_cast %193 : vector<1x64x32xf32> to vector<64x32xf32>
    %cst_198 = arith.constant dense<0.000000e+00> : vector<4x32xf32>
    %195 = tpu.matmul %192, %194, %cst_198 {dimension_numbers = #tpu.dot_dimension_numbers<[1], [0], [0], [1], [0, 0, 1, 1], [], []>} : vector<4x64xf32>, vector<64x32xf32>, vector<4x32xf32> -> vector<4x32xf32>
    %196 = arith.addf %191, %195 : vector<4x32xf32>
    %c4_199 = arith.constant 4 : index
    %c0_200 = arith.constant 0 : index
    %197 = tpu.strided_load %arg14[%c4_199, %c0_200] {strides = array<i32: 2, 1>} : memref<12x64xf32, #tpu.memory_space<vmem>>, vector<4x64xf32>
    %c4_201 = arith.constant 4 : index
    %c0_202 = arith.constant 0 : index
    %c0_203 = arith.constant 0 : index
    %198 = vector.load %arg6[%c4_201, %c0_202, %c0_203] : memref<5x64x32xf32, #tpu.memory_space<vmem>>, vector<1x64x32xf32>
    %199 = vector.shape_cast %198 : vector<1x64x32xf32> to vector<64x32xf32>
    %cst_204 = arith.constant dense<0.000000e+00> : vector<4x32xf32>
    %200 = tpu.matmul %197, %199, %cst_204 {dimension_numbers = #tpu.dot_dimension_numbers<[1], [0], [0], [1], [0, 0, 1, 1], [], []>} : vector<4x64xf32>, vector<64x32xf32>, vector<4x32xf32> -> vector<4x32xf32>
    %201 = arith.addf %196, %200 : vector<4x32xf32>
    %cst_205 = arith.constant 0.000000e+00 : f32
    %202 = vector.broadcast %cst_205 : f32 to vector<4x32xf32>
    %203 = arith.maximumf %201, %202 : vector<4x32xf32>
    %c2_206 = arith.constant 2 : index
    %c0_207 = arith.constant 0 : index
    %204 = vector.load %arg15[%c2_206, %c0_207] : memref<8x32xf32, #tpu.memory_space<vmem>>, vector<4x32xf32>
    tpu.vector_store %arg15[%c2_206, %c0_207], %203 {strides = array<i32>} : memref<8x32xf32, #tpu.memory_space<vmem>>, vector<4x32xf32>,
    %c0_208 = arith.constant 0 : index
    %c0_209 = arith.constant 0 : index
    %c0_210 = arith.constant 0 : index
    %205 = vector.load %arg9[%c0_208, %c0_209, %c0_210] : memref<6x1x32xf32, #tpu.memory_space<vmem>>, vector<1x1x32xf32>
    %206 = vector.shape_cast %205 : vector<1x1x32xf32> to vector<1x32xf32>
    %207 = vector.shape_cast %206 : vector<1x32xf32> to vector<1x32xf32>
    %208 = vector.broadcast %207 : vector<1x32xf32> to vector<4x32xf32>
    %c1_211 = arith.constant 1 : index
    %c0_212 = arith.constant 0 : index
    %209 = vector.load %arg15[%c1_211, %c0_212] : memref<8x32xf32, #tpu.memory_space<vmem>>, vector<4x32xf32>
    %c0_213 = arith.constant 0 : index
    %c0_214 = arith.constant 0 : index
    %c0_215 = arith.constant 0 : index
    %210 = vector.load %arg8[%c0_213, %c0_214, %c0_215] : memref<18x32x32xf32, #tpu.memory_space<vmem>>, vector<1x32x32xf32>
    %211 = vector.shape_cast %210 : vector<1x32x32xf32> to vector<32x32xf32>
    %cst_216 = arith.constant dense<0.000000e+00> : vector<4x32xf32>
    %212 = tpu.matmul %209, %211, %cst_216 {dimension_numbers = #tpu.dot_dimension_numbers<[1], [0], [0], [1], [0, 0, 1, 1], [], []>} : vector<4x32xf32>, vector<32x32xf32>, vector<4x32xf32> -> vector<4x32xf32>
    %213 = arith.addf %208, %212 : vector<4x32xf32>
    %c2_217 = arith.constant 2 : index
    %c0_218 = arith.constant 0 : index
    %214 = vector.load %arg15[%c2_217, %c0_218] : memref<8x32xf32, #tpu.memory_space<vmem>>, vector<4x32xf32>
    %c1_219 = arith.constant 1 : index
    %c0_220 = arith.constant 0 : index
    %c0_221 = arith.constant 0 : index
    %215 = vector.load %arg8[%c1_219, %c0_220, %c0_221] : memref<18x32x32xf32, #tpu.memory_space<vmem>>, vector<1x32x32xf32>
    %216 = vector.shape_cast %215 : vector<1x32x32xf32> to vector<32x32xf32>
    %cst_222 = arith.constant dense<0.000000e+00> : vector<4x32xf32>
    %217 = tpu.matmul %214, %216, %cst_222 {dimension_numbers = #tpu.dot_dimension_numbers<[1], [0], [0], [1], [0, 0, 1, 1], [], []>} : vector<4x32xf32>, vector<32x32xf32>, vector<4x32xf32> -> vector<4x32xf32>
    %218 = arith.addf %213, %217 : vector<4x32xf32>
    %c3_223 = arith.constant 3 : index
    %c0_224 = arith.constant 0 : index
    %219 = vector.load %arg15[%c3_223, %c0_224] : memref<8x32xf32, #tpu.memory_space<vmem>>, vector<4x32xf32>
    %c2_225 = arith.constant 2 : index
    %c0_226 = arith.constant 0 : index
    %c0_227 = arith.constant 0 : index
    %220 = vector.load %arg8[%c2_225, %c0_226, %c0_227] : memref<18x32x32xf32, #tpu.memory_space<vmem>>, vector<1x32x32xf32>
    %221 = vector.shape_cast %220 : vector<1x32x32xf32> to vector<32x32xf32>
    %cst_228 = arith.constant dense<0.000000e+00> : vector<4x32xf32>
    %222 = tpu.matmul %219, %221, %cst_228 {dimension_numbers = #tpu.dot_dimension_numbers<[1], [0], [0], [1], [0, 0, 1, 1], [], []>} : vector<4x32xf32>, vector<32x32xf32>, vector<4x32xf32> -> vector<4x32xf32>
    %223 = arith.addf %218, %222 : vector<4x32xf32>
    %cst_229 = arith.constant 0.000000e+00 : f32
    %224 = vector.broadcast %cst_229 : f32 to vector<4x32xf32>
    %225 = arith.maximumf %223, %224 : vector<4x32xf32>
    %c2_230 = arith.constant 2 : index
    %c0_231 = arith.constant 0 : index
    %226 = vector.load %arg15[%c2_230, %c0_231] : memref<8x32xf32, #tpu.memory_space<vmem>>, vector<4x32xf32>
    tpu.vector_store %arg15[%c2_230, %c0_231], %225 {strides = array<i32>} : memref<8x32xf32, #tpu.memory_space<vmem>>, vector<4x32xf32>,
    %c1_232 = arith.constant 1 : index
    %c0_233 = arith.constant 0 : index
    %c0_234 = arith.constant 0 : index
    %227 = vector.load %arg9[%c1_232, %c0_233, %c0_234] : memref<6x1x32xf32, #tpu.memory_space<vmem>>, vector<1x1x32xf32>
    %228 = vector.shape_cast %227 : vector<1x1x32xf32> to vector<1x32xf32>
    %229 = vector.shape_cast %228 : vector<1x32xf32> to vector<1x32xf32>
    %230 = vector.broadcast %229 : vector<1x32xf32> to vector<4x32xf32>
    %c1_235 = arith.constant 1 : index
    %c0_236 = arith.constant 0 : index
    %231 = vector.load %arg15[%c1_235, %c0_236] : memref<8x32xf32, #tpu.memory_space<vmem>>, vector<4x32xf32>
    %c3_237 = arith.constant 3 : index
    %c0_238 = arith.constant 0 : index
    %c0_239 = arith.constant 0 : index
    %232 = vector.load %arg8[%c3_237, %c0_238, %c0_239] : memref<18x32x32xf32, #tpu.memory_space<vmem>>, vector<1x32x32xf32>
    %233 = vector.shape_cast %232 : vector<1x32x32xf32> to vector<32x32xf32>
    %cst_240 = arith.constant dense<0.000000e+00> : vector<4x32xf32>
    %234 = tpu.matmul %231, %233, %cst_240 {dimension_numbers = #tpu.dot_dimension_numbers<[1], [0], [0], [1], [0, 0, 1, 1], [], []>} : vector<4x32xf32>, vector<32x32xf32>, vector<4x32xf32> -> vector<4x32xf32>
    %235 = arith.addf %230, %234 : vector<4x32xf32>
    %c2_241 = arith.constant 2 : index
    %c0_242 = arith.constant 0 : index
    %236 = vector.load %arg15[%c2_241, %c0_242] : memref<8x32xf32, #tpu.memory_space<vmem>>, vector<4x32xf32>
    %c4_243 = arith.constant 4 : index
    %c0_244 = arith.constant 0 : index
    %c0_245 = arith.constant 0 : index
    %237 = vector.load %arg8[%c4_243, %c0_244, %c0_245] : memref<18x32x32xf32, #tpu.memory_space<vmem>>, vector<1x32x32xf32>
    %238 = vector.shape_cast %237 : vector<1x32x32xf32> to vector<32x32xf32>
    %cst_246 = arith.constant dense<0.000000e+00> : vector<4x32xf32>
    %239 = tpu.matmul %236, %238, %cst_246 {dimension_numbers = #tpu.dot_dimension_numbers<[1], [0], [0], [1], [0, 0, 1, 1], [], []>} : vector<4x32xf32>, vector<32x32xf32>, vector<4x32xf32> -> vector<4x32xf32>
    %240 = arith.addf %235, %239 : vector<4x32xf32>
    %c3_247 = arith.constant 3 : index
    %c0_248 = arith.constant 0 : index
    %241 = vector.load %arg15[%c3_247, %c0_248] : memref<8x32xf32, #tpu.memory_space<vmem>>, vector<4x32xf32>
    %c5_249 = arith.constant 5 : index
    %c0_250 = arith.constant 0 : index
    %c0_251 = arith.constant 0 : index
    %242 = vector.load %arg8[%c5_249, %c0_250, %c0_251] : memref<18x32x32xf32, #tpu.memory_space<vmem>>, vector<1x32x32xf32>
    %243 = vector.shape_cast %242 : vector<1x32x32xf32> to vector<32x32xf32>
    %cst_252 = arith.constant dense<0.000000e+00> : vector<4x32xf32>
    %244 = tpu.matmul %241, %243, %cst_252 {dimension_numbers = #tpu.dot_dimension_numbers<[1], [0], [0], [1], [0, 0, 1, 1], [], []>} : vector<4x32xf32>, vector<32x32xf32>, vector<4x32xf32> -> vector<4x32xf32>
    %245 = arith.addf %240, %244 : vector<4x32xf32>
    %246 = arith.addf %201, %245 : vector<4x32xf32>
    %cst_253 = arith.constant 0.000000e+00 : f32
    %247 = vector.broadcast %cst_253 : f32 to vector<4x32xf32>
    %248 = arith.maximumf %246, %247 : vector<4x32xf32>
    %c2_254 = arith.constant 2 : index
    %c0_255 = arith.constant 0 : index
    %249 = vector.load %arg15[%c2_254, %c0_255] : memref<8x32xf32, #tpu.memory_space<vmem>>, vector<4x32xf32>
    tpu.vector_store %arg15[%c2_254, %c0_255], %248 {strides = array<i32>} : memref<8x32xf32, #tpu.memory_space<vmem>>, vector<4x32xf32>,
    %c2_256 = arith.constant 2 : index
    %c0_257 = arith.constant 0 : index
    %c0_258 = arith.constant 0 : index
    %250 = vector.load %arg9[%c2_256, %c0_257, %c0_258] : memref<6x1x32xf32, #tpu.memory_space<vmem>>, vector<1x1x32xf32>
    %251 = vector.shape_cast %250 : vector<1x1x32xf32> to vector<1x32xf32>
    %252 = vector.shape_cast %251 : vector<1x32xf32> to vector<1x32xf32>
    %253 = vector.broadcast %252 : vector<1x32xf32> to vector<4x32xf32>
    %c1_259 = arith.constant 1 : index
    %c0_260 = arith.constant 0 : index
    %254 = vector.load %arg15[%c1_259, %c0_260] : memref<8x32xf32, #tpu.memory_space<vmem>>, vector<4x32xf32>
    %c6_261 = arith.constant 6 : index
    %c0_262 = arith.constant 0 : index
    %c0_263 = arith.constant 0 : index
    %255 = vector.load %arg8[%c6_261, %c0_262, %c0_263] : memref<18x32x32xf32, #tpu.memory_space<vmem>>, vector<1x32x32xf32>
    %256 = vector.shape_cast %255 : vector<1x32x32xf32> to vector<32x32xf32>
    %cst_264 = arith.constant dense<0.000000e+00> : vector<4x32xf32>
    %257 = tpu.matmul %254, %256, %cst_264 {dimension_numbers = #tpu.dot_dimension_numbers<[1], [0], [0], [1], [0, 0, 1, 1], [], []>} : vector<4x32xf32>, vector<32x32xf32>, vector<4x32xf32> -> vector<4x32xf32>
    %258 = arith.addf %253, %257 : vector<4x32xf32>
    %c2_265 = arith.constant 2 : index
    %c0_266 = arith.constant 0 : index
    %259 = vector.load %arg15[%c2_265, %c0_266] : memref<8x32xf32, #tpu.memory_space<vmem>>, vector<4x32xf32>
    %c7_267 = arith.constant 7 : index
    %c0_268 = arith.constant 0 : index
    %c0_269 = arith.constant 0 : index
    %260 = vector.load %arg8[%c7_267, %c0_268, %c0_269] : memref<18x32x32xf32, #tpu.memory_space<vmem>>, vector<1x32x32xf32>
    %261 = vector.shape_cast %260 : vector<1x32x32xf32> to vector<32x32xf32>
    %cst_270 = arith.constant dense<0.000000e+00> : vector<4x32xf32>
    %262 = tpu.matmul %259, %261, %cst_270 {dimension_numbers = #tpu.dot_dimension_numbers<[1], [0], [0], [1], [0, 0, 1, 1], [], []>} : vector<4x32xf32>, vector<32x32xf32>, vector<4x32xf32> -> vector<4x32xf32>
    %263 = arith.addf %258, %262 : vector<4x32xf32>
    %c3_271 = arith.constant 3 : index
    %c0_272 = arith.constant 0 : index
    %264 = vector.load %arg15[%c3_271, %c0_272] : memref<8x32xf32, #tpu.memory_space<vmem>>, vector<4x32xf32>
    %c8_273 = arith.constant 8 : index
    %c0_274 = arith.constant 0 : index
    %c0_275 = arith.constant 0 : index
    %265 = vector.load %arg8[%c8_273, %c0_274, %c0_275] : memref<18x32x32xf32, #tpu.memory_space<vmem>>, vector<1x32x32xf32>
    %266 = vector.shape_cast %265 : vector<1x32x32xf32> to vector<32x32xf32>
    %cst_276 = arith.constant dense<0.000000e+00> : vector<4x32xf32>
    %267 = tpu.matmul %264, %266, %cst_276 {dimension_numbers = #tpu.dot_dimension_numbers<[1], [0], [0], [1], [0, 0, 1, 1], [], []>} : vector<4x32xf32>, vector<32x32xf32>, vector<4x32xf32> -> vector<4x32xf32>
    %268 = arith.addf %263, %267 : vector<4x32xf32>
    %cst_277 = arith.constant 0.000000e+00 : f32
    %269 = vector.broadcast %cst_277 : f32 to vector<4x32xf32>
    %270 = arith.maximumf %268, %269 : vector<4x32xf32>
    %c2_278 = arith.constant 2 : index
    %c0_279 = arith.constant 0 : index
    %271 = vector.load %arg15[%c2_278, %c0_279] : memref<8x32xf32, #tpu.memory_space<vmem>>, vector<4x32xf32>
    tpu.vector_store %arg15[%c2_278, %c0_279], %270 {strides = array<i32>} : memref<8x32xf32, #tpu.memory_space<vmem>>, vector<4x32xf32>,
    %c3_280 = arith.constant 3 : index
    %c0_281 = arith.constant 0 : index
    %c0_282 = arith.constant 0 : index
    %272 = vector.load %arg9[%c3_280, %c0_281, %c0_282] : memref<6x1x32xf32, #tpu.memory_space<vmem>>, vector<1x1x32xf32>
    %273 = vector.shape_cast %272 : vector<1x1x32xf32> to vector<1x32xf32>
    %274 = vector.shape_cast %273 : vector<1x32xf32> to vector<1x32xf32>
    %275 = vector.broadcast %274 : vector<1x32xf32> to vector<4x32xf32>
    %c1_283 = arith.constant 1 : index
    %c0_284 = arith.constant 0 : index
    %276 = vector.load %arg15[%c1_283, %c0_284] : memref<8x32xf32, #tpu.memory_space<vmem>>, vector<4x32xf32>
    %c9_285 = arith.constant 9 : index
    %c0_286 = arith.constant 0 : index
    %c0_287 = arith.constant 0 : index
    %277 = vector.load %arg8[%c9_285, %c0_286, %c0_287] : memref<18x32x32xf32, #tpu.memory_space<vmem>>, vector<1x32x32xf32>
    %278 = vector.shape_cast %277 : vector<1x32x32xf32> to vector<32x32xf32>
    %cst_288 = arith.constant dense<0.000000e+00> : vector<4x32xf32>
    %279 = tpu.matmul %276, %278, %cst_288 {dimension_numbers = #tpu.dot_dimension_numbers<[1], [0], [0], [1], [0, 0, 1, 1], [], []>} : vector<4x32xf32>, vector<32x32xf32>, vector<4x32xf32> -> vector<4x32xf32>
    %280 = arith.addf %275, %279 : vector<4x32xf32>
    %c2_289 = arith.constant 2 : index
    %c0_290 = arith.constant 0 : index
    %281 = vector.load %arg15[%c2_289, %c0_290] : memref<8x32xf32, #tpu.memory_space<vmem>>, vector<4x32xf32>
    %c10_291 = arith.constant 10 : index
    %c0_292 = arith.constant 0 : index
    %c0_293 = arith.constant 0 : index
    %282 = vector.load %arg8[%c10_291, %c0_292, %c0_293] : memref<18x32x32xf32, #tpu.memory_space<vmem>>, vector<1x32x32xf32>
    %283 = vector.shape_cast %282 : vector<1x32x32xf32> to vector<32x32xf32>
    %cst_294 = arith.constant dense<0.000000e+00> : vector<4x32xf32>
    %284 = tpu.matmul %281, %283, %cst_294 {dimension_numbers = #tpu.dot_dimension_numbers<[1], [0], [0], [1], [0, 0, 1, 1], [], []>} : vector<4x32xf32>, vector<32x32xf32>, vector<4x32xf32> -> vector<4x32xf32>
    %285 = arith.addf %280, %284 : vector<4x32xf32>
    %c3_295 = arith.constant 3 : index
    %c0_296 = arith.constant 0 : index
    %286 = vector.load %arg15[%c3_295, %c0_296] : memref<8x32xf32, #tpu.memory_space<vmem>>, vector<4x32xf32>
    %c11_297 = arith.constant 11 : index
    %c0_298 = arith.constant 0 : index
    %c0_299 = arith.constant 0 : index
    %287 = vector.load %arg8[%c11_297, %c0_298, %c0_299] : memref<18x32x32xf32, #tpu.memory_space<vmem>>, vector<1x32x32xf32>
    %288 = vector.shape_cast %287 : vector<1x32x32xf32> to vector<32x32xf32>
    %cst_300 = arith.constant dense<0.000000e+00> : vector<4x32xf32>
    %289 = tpu.matmul %286, %288, %cst_300 {dimension_numbers = #tpu.dot_dimension_numbers<[1], [0], [0], [1], [0, 0, 1, 1], [], []>} : vector<4x32xf32>, vector<32x32xf32>, vector<4x32xf32> -> vector<4x32xf32>
    %290 = arith.addf %285, %289 : vector<4x32xf32>
    %291 = arith.addf %246, %290 : vector<4x32xf32>
    %cst_301 = arith.constant 0.000000e+00 : f32
    %292 = vector.broadcast %cst_301 : f32 to vector<4x32xf32>
    %293 = arith.maximumf %291, %292 : vector<4x32xf32>
    %c2_302 = arith.constant 2 : index
    %c0_303 = arith.constant 0 : index
    %294 = vector.load %arg15[%c2_302, %c0_303] : memref<8x32xf32, #tpu.memory_space<vmem>>, vector<4x32xf32>
    tpu.vector_store %arg15[%c2_302, %c0_303], %293 {strides = array<i32>} : memref<8x32xf32, #tpu.memory_space<vmem>>, vector<4x32xf32>,
    %c4_304 = arith.constant 4 : index
    %c0_305 = arith.constant 0 : index
    %c0_306 = arith.constant 0 : index
    %295 = vector.load %arg9[%c4_304, %c0_305, %c0_306] : memref<6x1x32xf32, #tpu.memory_space<vmem>>, vector<1x1x32xf32>
    %296 = vector.shape_cast %295 : vector<1x1x32xf32> to vector<1x32xf32>
    %297 = vector.shape_cast %296 : vector<1x32xf32> to vector<1x32xf32>
    %298 = vector.broadcast %297 : vector<1x32xf32> to vector<4x32xf32>
    %c1_307 = arith.constant 1 : index
    %c0_308 = arith.constant 0 : index
    %299 = vector.load %arg15[%c1_307, %c0_308] : memref<8x32xf32, #tpu.memory_space<vmem>>, vector<4x32xf32>
    %c12_309 = arith.constant 12 : index
    %c0_310 = arith.constant 0 : index
    %c0_311 = arith.constant 0 : index
    %300 = vector.load %arg8[%c12_309, %c0_310, %c0_311] : memref<18x32x32xf32, #tpu.memory_space<vmem>>, vector<1x32x32xf32>
    %301 = vector.shape_cast %300 : vector<1x32x32xf32> to vector<32x32xf32>
    %cst_312 = arith.constant dense<0.000000e+00> : vector<4x32xf32>
    %302 = tpu.matmul %299, %301, %cst_312 {dimension_numbers = #tpu.dot_dimension_numbers<[1], [0], [0], [1], [0, 0, 1, 1], [], []>} : vector<4x32xf32>, vector<32x32xf32>, vector<4x32xf32> -> vector<4x32xf32>
    %303 = arith.addf %298, %302 : vector<4x32xf32>
    %c2_313 = arith.constant 2 : index
    %c0_314 = arith.constant 0 : index
    %304 = vector.load %arg15[%c2_313, %c0_314] : memref<8x32xf32, #tpu.memory_space<vmem>>, vector<4x32xf32>
    %c13_315 = arith.constant 13 : index
    %c0_316 = arith.constant 0 : index
    %c0_317 = arith.constant 0 : index
    %305 = vector.load %arg8[%c13_315, %c0_316, %c0_317] : memref<18x32x32xf32, #tpu.memory_space<vmem>>, vector<1x32x32xf32>
    %306 = vector.shape_cast %305 : vector<1x32x32xf32> to vector<32x32xf32>
    %cst_318 = arith.constant dense<0.000000e+00> : vector<4x32xf32>
    %307 = tpu.matmul %304, %306, %cst_318 {dimension_numbers = #tpu.dot_dimension_numbers<[1], [0], [0], [1], [0, 0, 1, 1], [], []>} : vector<4x32xf32>, vector<32x32xf32>, vector<4x32xf32> -> vector<4x32xf32>
    %308 = arith.addf %303, %307 : vector<4x32xf32>
    %c3_319 = arith.constant 3 : index
    %c0_320 = arith.constant 0 : index
    %309 = vector.load %arg15[%c3_319, %c0_320] : memref<8x32xf32, #tpu.memory_space<vmem>>, vector<4x32xf32>
    %c14_321 = arith.constant 14 : index
    %c0_322 = arith.constant 0 : index
    %c0_323 = arith.constant 0 : index
    %310 = vector.load %arg8[%c14_321, %c0_322, %c0_323] : memref<18x32x32xf32, #tpu.memory_space<vmem>>, vector<1x32x32xf32>
    %311 = vector.shape_cast %310 : vector<1x32x32xf32> to vector<32x32xf32>
    %cst_324 = arith.constant dense<0.000000e+00> : vector<4x32xf32>
    %312 = tpu.matmul %309, %311, %cst_324 {dimension_numbers = #tpu.dot_dimension_numbers<[1], [0], [0], [1], [0, 0, 1, 1], [], []>} : vector<4x32xf32>, vector<32x32xf32>, vector<4x32xf32> -> vector<4x32xf32>
    %313 = arith.addf %308, %312 : vector<4x32xf32>
    %cst_325 = arith.constant 0.000000e+00 : f32
    %314 = vector.broadcast %cst_325 : f32 to vector<4x32xf32>
    %315 = arith.maximumf %313, %314 : vector<4x32xf32>
    %c2_326 = arith.constant 2 : index
    %c0_327 = arith.constant 0 : index
    %316 = vector.load %arg15[%c2_326, %c0_327] : memref<8x32xf32, #tpu.memory_space<vmem>>, vector<4x32xf32>
    tpu.vector_store %arg15[%c2_326, %c0_327], %315 {strides = array<i32>} : memref<8x32xf32, #tpu.memory_space<vmem>>, vector<4x32xf32>,
    %c5_328 = arith.constant 5 : index
    %c0_329 = arith.constant 0 : index
    %c0_330 = arith.constant 0 : index
    %317 = vector.load %arg9[%c5_328, %c0_329, %c0_330] : memref<6x1x32xf32, #tpu.memory_space<vmem>>, vector<1x1x32xf32>
    %318 = vector.shape_cast %317 : vector<1x1x32xf32> to vector<1x32xf32>
    %319 = vector.shape_cast %318 : vector<1x32xf32> to vector<1x32xf32>
    %320 = vector.broadcast %319 : vector<1x32xf32> to vector<4x32xf32>
    %c1_331 = arith.constant 1 : index
    %c0_332 = arith.constant 0 : index
    %321 = vector.load %arg15[%c1_331, %c0_332] : memref<8x32xf32, #tpu.memory_space<vmem>>, vector<4x32xf32>
    %c15_333 = arith.constant 15 : index
    %c0_334 = arith.constant 0 : index
    %c0_335 = arith.constant 0 : index
    %322 = vector.load %arg8[%c15_333, %c0_334, %c0_335] : memref<18x32x32xf32, #tpu.memory_space<vmem>>, vector<1x32x32xf32>
    %323 = vector.shape_cast %322 : vector<1x32x32xf32> to vector<32x32xf32>
    %cst_336 = arith.constant dense<0.000000e+00> : vector<4x32xf32>
    %324 = tpu.matmul %321, %323, %cst_336 {dimension_numbers = #tpu.dot_dimension_numbers<[1], [0], [0], [1], [0, 0, 1, 1], [], []>} : vector<4x32xf32>, vector<32x32xf32>, vector<4x32xf32> -> vector<4x32xf32>
    %325 = arith.addf %320, %324 : vector<4x32xf32>
    %c2_337 = arith.constant 2 : index
    %c0_338 = arith.constant 0 : index
    %326 = vector.load %arg15[%c2_337, %c0_338] : memref<8x32xf32, #tpu.memory_space<vmem>>, vector<4x32xf32>
    %c16_339 = arith.constant 16 : index
    %c0_340 = arith.constant 0 : index
    %c0_341 = arith.constant 0 : index
    %327 = vector.load %arg8[%c16_339, %c0_340, %c0_341] : memref<18x32x32xf32, #tpu.memory_space<vmem>>, vector<1x32x32xf32>
    %328 = vector.shape_cast %327 : vector<1x32x32xf32> to vector<32x32xf32>
    %cst_342 = arith.constant dense<0.000000e+00> : vector<4x32xf32>
    %329 = tpu.matmul %326, %328, %cst_342 {dimension_numbers = #tpu.dot_dimension_numbers<[1], [0], [0], [1], [0, 0, 1, 1], [], []>} : vector<4x32xf32>, vector<32x32xf32>, vector<4x32xf32> -> vector<4x32xf32>
    %330 = arith.addf %325, %329 : vector<4x32xf32>
    %c3_343 = arith.constant 3 : index
    %c0_344 = arith.constant 0 : index
    %331 = vector.load %arg15[%c3_343, %c0_344] : memref<8x32xf32, #tpu.memory_space<vmem>>, vector<4x32xf32>
    %c17_345 = arith.constant 17 : index
    %c0_346 = arith.constant 0 : index
    %c0_347 = arith.constant 0 : index
    %332 = vector.load %arg8[%c17_345, %c0_346, %c0_347] : memref<18x32x32xf32, #tpu.memory_space<vmem>>, vector<1x32x32xf32>
    %333 = vector.shape_cast %332 : vector<1x32x32xf32> to vector<32x32xf32>
    %cst_348 = arith.constant dense<0.000000e+00> : vector<4x32xf32>
    %334 = tpu.matmul %331, %333, %cst_348 {dimension_numbers = #tpu.dot_dimension_numbers<[1], [0], [0], [1], [0, 0, 1, 1], [], []>} : vector<4x32xf32>, vector<32x32xf32>, vector<4x32xf32> -> vector<4x32xf32>
    %335 = arith.addf %330, %334 : vector<4x32xf32>
    %336 = arith.addf %291, %335 : vector<4x32xf32>
    %337 = arith.addf %201, %336 : vector<4x32xf32>
    %c2_349 = arith.constant 2 : index
    %c0_350 = arith.constant 0 : index
    %338 = vector.load %arg15[%c2_349, %c0_350] : memref<8x32xf32, #tpu.memory_space<vmem>>, vector<4x32xf32>
    tpu.vector_store %arg15[%c2_349, %c0_350], %337 {strides = array<i32>} : memref<8x32xf32, #tpu.memory_space<vmem>>, vector<4x32xf32>,
    %c0_351 = arith.constant 0 : index
    %c0_352 = arith.constant 0 : index
    %339 = vector.load %arg11[%c0_351, %c0_352] : memref<1x16xf32, #tpu.memory_space<vmem>>, vector<1x16xf32>
    %340 = vector.shape_cast %339 : vector<1x16xf32> to vector<1x16xf32>
    %341 = vector.broadcast %340 : vector<1x16xf32> to vector<2x16xf32>
    %c0_353 = arith.constant 0 : index
    %c0_354 = arith.constant 0 : index
    %342 = tpu.strided_load %arg15[%c0_353, %c0_354] {strides = array<i32: 2, 1>} : memref<8x32xf32, #tpu.memory_space<vmem>>, vector<2x32xf32>
    %c0_355 = arith.constant 0 : index
    %c0_356 = arith.constant 0 : index
    %c0_357 = arith.constant 0 : index
    %343 = vector.load %arg10[%c0_355, %c0_356, %c0_357] : memref<5x32x16xf32, #tpu.memory_space<vmem>>, vector<1x32x16xf32>
    %344 = vector.shape_cast %343 : vector<1x32x16xf32> to vector<32x16xf32>
    %cst_358 = arith.constant dense<0.000000e+00> : vector<2x16xf32>
    %345 = tpu.matmul %342, %344, %cst_358 {dimension_numbers = #tpu.dot_dimension_numbers<[1], [0], [0], [1], [0, 0, 1, 1], [], []>} : vector<2x32xf32>, vector<32x16xf32>, vector<2x16xf32> -> vector<2x16xf32>
    %346 = arith.addf %341, %345 : vector<2x16xf32>
    %c1_359 = arith.constant 1 : index
    %c0_360 = arith.constant 0 : index
    %347 = tpu.strided_load %arg15[%c1_359, %c0_360] {strides = array<i32: 2, 1>} : memref<8x32xf32, #tpu.memory_space<vmem>>, vector<2x32xf32>
    %c1_361 = arith.constant 1 : index
    %c0_362 = arith.constant 0 : index
    %c0_363 = arith.constant 0 : index
    %348 = vector.load %arg10[%c1_361, %c0_362, %c0_363] : memref<5x32x16xf32, #tpu.memory_space<vmem>>, vector<1x32x16xf32>
    %349 = vector.shape_cast %348 : vector<1x32x16xf32> to vector<32x16xf32>
    %cst_364 = arith.constant dense<0.000000e+00> : vector<2x16xf32>
    %350 = tpu.matmul %347, %349, %cst_364 {dimension_numbers = #tpu.dot_dimension_numbers<[1], [0], [0], [1], [0, 0, 1, 1], [], []>} : vector<2x32xf32>, vector<32x16xf32>, vector<2x16xf32> -> vector<2x16xf32>
    %351 = arith.addf %346, %350 : vector<2x16xf32>
    %c2_365 = arith.constant 2 : index
    %c0_366 = arith.constant 0 : index
    %352 = tpu.strided_load %arg15[%c2_365, %c0_366] {strides = array<i32: 2, 1>} : memref<8x32xf32, #tpu.memory_space<vmem>>, vector<2x32xf32>
    %c2_367 = arith.constant 2 : index
    %c0_368 = arith.constant 0 : index
    %c0_369 = arith.constant 0 : index
    %353 = vector.load %arg10[%c2_367, %c0_368, %c0_369] : memref<5x32x16xf32, #tpu.memory_space<vmem>>, vector<1x32x16xf32>
    %354 = vector.shape_cast %353 : vector<1x32x16xf32> to vector<32x16xf32>
    %cst_370 = arith.constant dense<0.000000e+00> : vector<2x16xf32>
    %355 = tpu.matmul %352, %354, %cst_370 {dimension_numbers = #tpu.dot_dimension_numbers<[1], [0], [0], [1], [0, 0, 1, 1], [], []>} : vector<2x32xf32>, vector<32x16xf32>, vector<2x16xf32> -> vector<2x16xf32>
    %356 = arith.addf %351, %355 : vector<2x16xf32>
    %c3_371 = arith.constant 3 : index
    %c0_372 = arith.constant 0 : index
    %357 = tpu.strided_load %arg15[%c3_371, %c0_372] {strides = array<i32: 2, 1>} : memref<8x32xf32, #tpu.memory_space<vmem>>, vector<2x32xf32>
    %c3_373 = arith.constant 3 : index
    %c0_374 = arith.constant 0 : index
    %c0_375 = arith.constant 0 : index
    %358 = vector.load %arg10[%c3_373, %c0_374, %c0_375] : memref<5x32x16xf32, #tpu.memory_space<vmem>>, vector<1x32x16xf32>
    %359 = vector.shape_cast %358 : vector<1x32x16xf32> to vector<32x16xf32>
    %cst_376 = arith.constant dense<0.000000e+00> : vector<2x16xf32>
    %360 = tpu.matmul %357, %359, %cst_376 {dimension_numbers = #tpu.dot_dimension_numbers<[1], [0], [0], [1], [0, 0, 1, 1], [], []>} : vector<2x32xf32>, vector<32x16xf32>, vector<2x16xf32> -> vector<2x16xf32>
    %361 = arith.addf %356, %360 : vector<2x16xf32>
    %c4_377 = arith.constant 4 : index
    %c0_378 = arith.constant 0 : index
    %362 = tpu.strided_load %arg15[%c4_377, %c0_378] {strides = array<i32: 2, 1>} : memref<8x32xf32, #tpu.memory_space<vmem>>, vector<2x32xf32>
    %c4_379 = arith.constant 4 : index
    %c0_380 = arith.constant 0 : index
    %c0_381 = arith.constant 0 : index
    %363 = vector.load %arg10[%c4_379, %c0_380, %c0_381] : memref<5x32x16xf32, #tpu.memory_space<vmem>>, vector<1x32x16xf32>
    %364 = vector.shape_cast %363 : vector<1x32x16xf32> to vector<32x16xf32>
    %cst_382 = arith.constant dense<0.000000e+00> : vector<2x16xf32>
    %365 = tpu.matmul %362, %364, %cst_382 {dimension_numbers = #tpu.dot_dimension_numbers<[1], [0], [0], [1], [0, 0, 1, 1], [], []>} : vector<2x32xf32>, vector<32x16xf32>, vector<2x16xf32> -> vector<2x16xf32>
    %366 = arith.addf %361, %365 : vector<2x16xf32>
    %c0_383 = arith.constant 0 : index
    %c0_384 = arith.constant 0 : index
    %c0_385 = arith.constant 0 : index
    %367 = vector.load %arg12[%c0_383, %c0_384, %c0_385] : memref<2x2x16xf32, #tpu.memory_space<vmem>>, vector<1x2x16xf32>
    %368 = vector.shape_cast %367 : vector<1x2x16xf32> to vector<2x16xf32>
    %369 = vector.shape_cast %366 : vector<2x16xf32> to vector<1x2x16xf32>
    tpu.vector_store %arg12[%c0_383, %c0_384, %c0_385], %369 {strides = array<i32>} : memref<2x2x16xf32, #tpu.memory_space<vmem>>, vector<1x2x16xf32>,
    %c1_386 = arith.constant 1 : index
    %c0_387 = arith.constant 0 : index
    %c0_388 = arith.constant 0 : index
    %370 = vector.load %arg1[%c1_386, %c0_387, %c0_388] : memref<2x16x128xf32, #tpu.memory_space<vmem>>, vector<1x16x128xf32>
    %371 = vector.shape_cast %370 : vector<1x16x128xf32> to vector<16x128xf32>
    %c2_389 = arith.constant 2 : index
    %c0_390 = arith.constant 0 : index
    %372 = vector.load %arg13[%c2_389, %c0_390] : memref<20x128xf32, #tpu.memory_space<vmem>>, vector<16x128xf32>
    tpu.vector_store %arg13[%c2_389, %c0_390], %371 {strides = array<i32>} : memref<20x128xf32, #tpu.memory_space<vmem>>, vector<16x128xf32>,
    %c0_391 = arith.constant 0 : index
    %c0_392 = arith.constant 0 : index
    %373 = vector.load %arg3[%c0_391, %c0_392] : memref<1x64xf32, #tpu.memory_space<vmem>>, vector<1x64xf32>
    %374 = vector.shape_cast %373 : vector<1x64xf32> to vector<1x64xf32>
    %375 = vector.broadcast %374 : vector<1x64xf32> to vector<8x64xf32>
    %c0_393 = arith.constant 0 : index
    %c0_394 = arith.constant 0 : index
    %376 = tpu.strided_load %arg13[%c0_393, %c0_394] {strides = array<i32: 2, 1>} : memref<20x128xf32, #tpu.memory_space<vmem>>, vector<8x128xf32>
    %c0_395 = arith.constant 0 : index
    %c0_396 = arith.constant 0 : index
    %c0_397 = arith.constant 0 : index
    %377 = vector.load %arg2[%c0_395, %c0_396, %c0_397] : memref<5x128x64xf32, #tpu.memory_space<vmem>>, vector<1x128x64xf32>
    %378 = vector.shape_cast %377 : vector<1x128x64xf32> to vector<128x64xf32>
    %cst_398 = arith.constant dense<0.000000e+00> : vector<8x64xf32>
    %379 = tpu.matmul %376, %378, %cst_398 {dimension_numbers = #tpu.dot_dimension_numbers<[1], [0], [0], [1], [0, 0, 1, 1], [], []>} : vector<8x128xf32>, vector<128x64xf32>, vector<8x64xf32> -> vector<8x64xf32>
    %380 = arith.addf %375, %379 : vector<8x64xf32>
    %c1_399 = arith.constant 1 : index
    %c0_400 = arith.constant 0 : index
    %381 = tpu.strided_load %arg13[%c1_399, %c0_400] {strides = array<i32: 2, 1>} : memref<20x128xf32, #tpu.memory_space<vmem>>, vector<8x128xf32>
    %c1_401 = arith.constant 1 : index
    %c0_402 = arith.constant 0 : index
    %c0_403 = arith.constant 0 : index
    %382 = vector.load %arg2[%c1_401, %c0_402, %c0_403] : memref<5x128x64xf32, #tpu.memory_space<vmem>>, vector<1x128x64xf32>
    %383 = vector.shape_cast %382 : vector<1x128x64xf32> to vector<128x64xf32>
    %cst_404 = arith.constant dense<0.000000e+00> : vector<8x64xf32>
    %384 = tpu.matmul %381, %383, %cst_404 {dimension_numbers = #tpu.dot_dimension_numbers<[1], [0], [0], [1], [0, 0, 1, 1], [], []>} : vector<8x128xf32>, vector<128x64xf32>, vector<8x64xf32> -> vector<8x64xf32>
    %385 = arith.addf %380, %384 : vector<8x64xf32>
    %c2_405 = arith.constant 2 : index
    %c0_406 = arith.constant 0 : index
    %386 = tpu.strided_load %arg13[%c2_405, %c0_406] {strides = array<i32: 2, 1>} : memref<20x128xf32, #tpu.memory_space<vmem>>, vector<8x128xf32>
    %c2_407 = arith.constant 2 : index
    %c0_408 = arith.constant 0 : index
    %c0_409 = arith.constant 0 : index
    %387 = vector.load %arg2[%c2_407, %c0_408, %c0_409] : memref<5x128x64xf32, #tpu.memory_space<vmem>>, vector<1x128x64xf32>
    %388 = vector.shape_cast %387 : vector<1x128x64xf32> to vector<128x64xf32>
    %cst_410 = arith.constant dense<0.000000e+00> : vector<8x64xf32>
    %389 = tpu.matmul %386, %388, %cst_410 {dimension_numbers = #tpu.dot_dimension_numbers<[1], [0], [0], [1], [0, 0, 1, 1], [], []>} : vector<8x128xf32>, vector<128x64xf32>, vector<8x64xf32> -> vector<8x64xf32>
    %390 = arith.addf %385, %389 : vector<8x64xf32>
    %c3_411 = arith.constant 3 : index
    %c0_412 = arith.constant 0 : index
    %391 = tpu.strided_load %arg13[%c3_411, %c0_412] {strides = array<i32: 2, 1>} : memref<20x128xf32, #tpu.memory_space<vmem>>, vector<8x128xf32>
    %c3_413 = arith.constant 3 : index
    %c0_414 = arith.constant 0 : index
    %c0_415 = arith.constant 0 : index
    %392 = vector.load %arg2[%c3_413, %c0_414, %c0_415] : memref<5x128x64xf32, #tpu.memory_space<vmem>>, vector<1x128x64xf32>
    %393 = vector.shape_cast %392 : vector<1x128x64xf32> to vector<128x64xf32>
    %cst_416 = arith.constant dense<0.000000e+00> : vector<8x64xf32>
    %394 = tpu.matmul %391, %393, %cst_416 {dimension_numbers = #tpu.dot_dimension_numbers<[1], [0], [0], [1], [0, 0, 1, 1], [], []>} : vector<8x128xf32>, vector<128x64xf32>, vector<8x64xf32> -> vector<8x64xf32>
    %395 = arith.addf %390, %394 : vector<8x64xf32>
    %c4_417 = arith.constant 4 : index
    %c0_418 = arith.constant 0 : index
    %396 = tpu.strided_load %arg13[%c4_417, %c0_418] {strides = array<i32: 2, 1>} : memref<20x128xf32, #tpu.memory_space<vmem>>, vector<8x128xf32>
    %c4_419 = arith.constant 4 : index
    %c0_420 = arith.constant 0 : index
    %c0_421 = arith.constant 0 : index
    %397 = vector.load %arg2[%c4_419, %c0_420, %c0_421] : memref<5x128x64xf32, #tpu.memory_space<vmem>>, vector<1x128x64xf32>
    %398 = vector.shape_cast %397 : vector<1x128x64xf32> to vector<128x64xf32>
    %cst_422 = arith.constant dense<0.000000e+00> : vector<8x64xf32>
    %399 = tpu.matmul %396, %398, %cst_422 {dimension_numbers = #tpu.dot_dimension_numbers<[1], [0], [0], [1], [0, 0, 1, 1], [], []>} : vector<8x128xf32>, vector<128x64xf32>, vector<8x64xf32> -> vector<8x64xf32>
    %400 = arith.addf %395, %399 : vector<8x64xf32>
    %cst_423 = arith.constant 0.000000e+00 : f32
    %401 = vector.broadcast %cst_423 : f32 to vector<8x64xf32>
    %402 = arith.maximumf %400, %401 : vector<8x64xf32>
    %c2_424 = arith.constant 2 : index
    %c0_425 = arith.constant 0 : index
    %403 = vector.load %arg14[%c2_424, %c0_425] : memref<12x64xf32, #tpu.memory_space<vmem>>, vector<8x64xf32>
    tpu.vector_store %arg14[%c2_424, %c0_425], %402 {strides = array<i32>} : memref<12x64xf32, #tpu.memory_space<vmem>>, vector<8x64xf32>,
    %c0_426 = arith.constant 0 : index
    %c0_427 = arith.constant 0 : index
    %c0_428 = arith.constant 0 : index
    %404 = vector.load %arg5[%c0_426, %c0_427, %c0_428] : memref<6x1x64xf32, #tpu.memory_space<vmem>>, vector<1x1x64xf32>
    %405 = vector.shape_cast %404 : vector<1x1x64xf32> to vector<1x64xf32>
    %406 = vector.shape_cast %405 : vector<1x64xf32> to vector<1x64xf32>
    %407 = vector.broadcast %406 : vector<1x64xf32> to vector<8x64xf32>
    %c1_429 = arith.constant 1 : index
    %c0_430 = arith.constant 0 : index
    %408 = vector.load %arg14[%c1_429, %c0_430] : memref<12x64xf32, #tpu.memory_space<vmem>>, vector<8x64xf32>
    %c0_431 = arith.constant 0 : index
    %c0_432 = arith.constant 0 : index
    %c0_433 = arith.constant 0 : index
    %409 = vector.load %arg4[%c0_431, %c0_432, %c0_433] : memref<18x64x64xf32, #tpu.memory_space<vmem>>, vector<1x64x64xf32>
    %410 = vector.shape_cast %409 : vector<1x64x64xf32> to vector<64x64xf32>
    %cst_434 = arith.constant dense<0.000000e+00> : vector<8x64xf32>
    %411 = tpu.matmul %408, %410, %cst_434 {dimension_numbers = #tpu.dot_dimension_numbers<[1], [0], [0], [1], [0, 0, 1, 1], [], []>} : vector<8x64xf32>, vector<64x64xf32>, vector<8x64xf32> -> vector<8x64xf32>
    %412 = arith.addf %407, %411 : vector<8x64xf32>
    %c2_435 = arith.constant 2 : index
    %c0_436 = arith.constant 0 : index
    %413 = vector.load %arg14[%c2_435, %c0_436] : memref<12x64xf32, #tpu.memory_space<vmem>>, vector<8x64xf32>
    %c1_437 = arith.constant 1 : index
    %c0_438 = arith.constant 0 : index
    %c0_439 = arith.constant 0 : index
    %414 = vector.load %arg4[%c1_437, %c0_438, %c0_439] : memref<18x64x64xf32, #tpu.memory_space<vmem>>, vector<1x64x64xf32>
    %415 = vector.shape_cast %414 : vector<1x64x64xf32> to vector<64x64xf32>
    %cst_440 = arith.constant dense<0.000000e+00> : vector<8x64xf32>
    %416 = tpu.matmul %413, %415, %cst_440 {dimension_numbers = #tpu.dot_dimension_numbers<[1], [0], [0], [1], [0, 0, 1, 1], [], []>} : vector<8x64xf32>, vector<64x64xf32>, vector<8x64xf32> -> vector<8x64xf32>
    %417 = arith.addf %412, %416 : vector<8x64xf32>
    %c3_441 = arith.constant 3 : index
    %c0_442 = arith.constant 0 : index
    %418 = vector.load %arg14[%c3_441, %c0_442] : memref<12x64xf32, #tpu.memory_space<vmem>>, vector<8x64xf32>
    %c2_443 = arith.constant 2 : index
    %c0_444 = arith.constant 0 : index
    %c0_445 = arith.constant 0 : index
    %419 = vector.load %arg4[%c2_443, %c0_444, %c0_445] : memref<18x64x64xf32, #tpu.memory_space<vmem>>, vector<1x64x64xf32>
    %420 = vector.shape_cast %419 : vector<1x64x64xf32> to vector<64x64xf32>
    %cst_446 = arith.constant dense<0.000000e+00> : vector<8x64xf32>
    %421 = tpu.matmul %418, %420, %cst_446 {dimension_numbers = #tpu.dot_dimension_numbers<[1], [0], [0], [1], [0, 0, 1, 1], [], []>} : vector<8x64xf32>, vector<64x64xf32>, vector<8x64xf32> -> vector<8x64xf32>
    %422 = arith.addf %417, %421 : vector<8x64xf32>
    %cst_447 = arith.constant 0.000000e+00 : f32
    %423 = vector.broadcast %cst_447 : f32 to vector<8x64xf32>
    %424 = arith.maximumf %422, %423 : vector<8x64xf32>
    %c2_448 = arith.constant 2 : index
    %c0_449 = arith.constant 0 : index
    %425 = vector.load %arg14[%c2_448, %c0_449] : memref<12x64xf32, #tpu.memory_space<vmem>>, vector<8x64xf32>
    tpu.vector_store %arg14[%c2_448, %c0_449], %424 {strides = array<i32>} : memref<12x64xf32, #tpu.memory_space<vmem>>, vector<8x64xf32>,
    %c1_450 = arith.constant 1 : index
    %c0_451 = arith.constant 0 : index
    %c0_452 = arith.constant 0 : index
    %426 = vector.load %arg5[%c1_450, %c0_451, %c0_452] : memref<6x1x64xf32, #tpu.memory_space<vmem>>, vector<1x1x64xf32>
    %427 = vector.shape_cast %426 : vector<1x1x64xf32> to vector<1x64xf32>
    %428 = vector.shape_cast %427 : vector<1x64xf32> to vector<1x64xf32>
    %429 = vector.broadcast %428 : vector<1x64xf32> to vector<8x64xf32>
    %c1_453 = arith.constant 1 : index
    %c0_454 = arith.constant 0 : index
    %430 = vector.load %arg14[%c1_453, %c0_454] : memref<12x64xf32, #tpu.memory_space<vmem>>, vector<8x64xf32>
    %c3_455 = arith.constant 3 : index
    %c0_456 = arith.constant 0 : index
    %c0_457 = arith.constant 0 : index
    %431 = vector.load %arg4[%c3_455, %c0_456, %c0_457] : memref<18x64x64xf32, #tpu.memory_space<vmem>>, vector<1x64x64xf32>
    %432 = vector.shape_cast %431 : vector<1x64x64xf32> to vector<64x64xf32>
    %cst_458 = arith.constant dense<0.000000e+00> : vector<8x64xf32>
    %433 = tpu.matmul %430, %432, %cst_458 {dimension_numbers = #tpu.dot_dimension_numbers<[1], [0], [0], [1], [0, 0, 1, 1], [], []>} : vector<8x64xf32>, vector<64x64xf32>, vector<8x64xf32> -> vector<8x64xf32>
    %434 = arith.addf %429, %433 : vector<8x64xf32>
    %c2_459 = arith.constant 2 : index
    %c0_460 = arith.constant 0 : index
    %435 = vector.load %arg14[%c2_459, %c0_460] : memref<12x64xf32, #tpu.memory_space<vmem>>, vector<8x64xf32>
    %c4_461 = arith.constant 4 : index
    %c0_462 = arith.constant 0 : index
    %c0_463 = arith.constant 0 : index
    %436 = vector.load %arg4[%c4_461, %c0_462, %c0_463] : memref<18x64x64xf32, #tpu.memory_space<vmem>>, vector<1x64x64xf32>
    %437 = vector.shape_cast %436 : vector<1x64x64xf32> to vector<64x64xf32>
    %cst_464 = arith.constant dense<0.000000e+00> : vector<8x64xf32>
    %438 = tpu.matmul %435, %437, %cst_464 {dimension_numbers = #tpu.dot_dimension_numbers<[1], [0], [0], [1], [0, 0, 1, 1], [], []>} : vector<8x64xf32>, vector<64x64xf32>, vector<8x64xf32> -> vector<8x64xf32>
    %439 = arith.addf %434, %438 : vector<8x64xf32>
    %c3_465 = arith.constant 3 : index
    %c0_466 = arith.constant 0 : index
    %440 = vector.load %arg14[%c3_465, %c0_466] : memref<12x64xf32, #tpu.memory_space<vmem>>, vector<8x64xf32>
    %c5_467 = arith.constant 5 : index
    %c0_468 = arith.constant 0 : index
    %c0_469 = arith.constant 0 : index
    %441 = vector.load %arg4[%c5_467, %c0_468, %c0_469] : memref<18x64x64xf32, #tpu.memory_space<vmem>>, vector<1x64x64xf32>
    %442 = vector.shape_cast %441 : vector<1x64x64xf32> to vector<64x64xf32>
    %cst_470 = arith.constant dense<0.000000e+00> : vector<8x64xf32>
    %443 = tpu.matmul %440, %442, %cst_470 {dimension_numbers = #tpu.dot_dimension_numbers<[1], [0], [0], [1], [0, 0, 1, 1], [], []>} : vector<8x64xf32>, vector<64x64xf32>, vector<8x64xf32> -> vector<8x64xf32>
    %444 = arith.addf %439, %443 : vector<8x64xf32>
    %445 = arith.addf %400, %444 : vector<8x64xf32>
    %cst_471 = arith.constant 0.000000e+00 : f32
    %446 = vector.broadcast %cst_471 : f32 to vector<8x64xf32>
    %447 = arith.maximumf %445, %446 : vector<8x64xf32>
    %c2_472 = arith.constant 2 : index
    %c0_473 = arith.constant 0 : index
    %448 = vector.load %arg14[%c2_472, %c0_473] : memref<12x64xf32, #tpu.memory_space<vmem>>, vector<8x64xf32>
    tpu.vector_store %arg14[%c2_472, %c0_473], %447 {strides = array<i32>} : memref<12x64xf32, #tpu.memory_space<vmem>>, vector<8x64xf32>,
    %c2_474 = arith.constant 2 : index
    %c0_475 = arith.constant 0 : index
    %c0_476 = arith.constant 0 : index
    %449 = vector.load %arg5[%c2_474, %c0_475, %c0_476] : memref<6x1x64xf32, #tpu.memory_space<vmem>>, vector<1x1x64xf32>
    %450 = vector.shape_cast %449 : vector<1x1x64xf32> to vector<1x64xf32>
    %451 = vector.shape_cast %450 : vector<1x64xf32> to vector<1x64xf32>
    %452 = vector.broadcast %451 : vector<1x64xf32> to vector<8x64xf32>
    %c1_477 = arith.constant 1 : index
    %c0_478 = arith.constant 0 : index
    %453 = vector.load %arg14[%c1_477, %c0_478] : memref<12x64xf32, #tpu.memory_space<vmem>>, vector<8x64xf32>
    %c6_479 = arith.constant 6 : index
    %c0_480 = arith.constant 0 : index
    %c0_481 = arith.constant 0 : index
    %454 = vector.load %arg4[%c6_479, %c0_480, %c0_481] : memref<18x64x64xf32, #tpu.memory_space<vmem>>, vector<1x64x64xf32>
    %455 = vector.shape_cast %454 : vector<1x64x64xf32> to vector<64x64xf32>
    %cst_482 = arith.constant dense<0.000000e+00> : vector<8x64xf32>
    %456 = tpu.matmul %453, %455, %cst_482 {dimension_numbers = #tpu.dot_dimension_numbers<[1], [0], [0], [1], [0, 0, 1, 1], [], []>} : vector<8x64xf32>, vector<64x64xf32>, vector<8x64xf32> -> vector<8x64xf32>
    %457 = arith.addf %452, %456 : vector<8x64xf32>
    %c2_483 = arith.constant 2 : index
    %c0_484 = arith.constant 0 : index
    %458 = vector.load %arg14[%c2_483, %c0_484] : memref<12x64xf32, #tpu.memory_space<vmem>>, vector<8x64xf32>
    %c7_485 = arith.constant 7 : index
    %c0_486 = arith.constant 0 : index
    %c0_487 = arith.constant 0 : index
    %459 = vector.load %arg4[%c7_485, %c0_486, %c0_487] : memref<18x64x64xf32, #tpu.memory_space<vmem>>, vector<1x64x64xf32>
    %460 = vector.shape_cast %459 : vector<1x64x64xf32> to vector<64x64xf32>
    %cst_488 = arith.constant dense<0.000000e+00> : vector<8x64xf32>
    %461 = tpu.matmul %458, %460, %cst_488 {dimension_numbers = #tpu.dot_dimension_numbers<[1], [0], [0], [1], [0, 0, 1, 1], [], []>} : vector<8x64xf32>, vector<64x64xf32>, vector<8x64xf32> -> vector<8x64xf32>
    %462 = arith.addf %457, %461 : vector<8x64xf32>
    %c3_489 = arith.constant 3 : index
    %c0_490 = arith.constant 0 : index
    %463 = vector.load %arg14[%c3_489, %c0_490] : memref<12x64xf32, #tpu.memory_space<vmem>>, vector<8x64xf32>
    %c8_491 = arith.constant 8 : index
    %c0_492 = arith.constant 0 : index
    %c0_493 = arith.constant 0 : index
    %464 = vector.load %arg4[%c8_491, %c0_492, %c0_493] : memref<18x64x64xf32, #tpu.memory_space<vmem>>, vector<1x64x64xf32>
    %465 = vector.shape_cast %464 : vector<1x64x64xf32> to vector<64x64xf32>
    %cst_494 = arith.constant dense<0.000000e+00> : vector<8x64xf32>
    %466 = tpu.matmul %463, %465, %cst_494 {dimension_numbers = #tpu.dot_dimension_numbers<[1], [0], [0], [1], [0, 0, 1, 1], [], []>} : vector<8x64xf32>, vector<64x64xf32>, vector<8x64xf32> -> vector<8x64xf32>
    %467 = arith.addf %462, %466 : vector<8x64xf32>
    %cst_495 = arith.constant 0.000000e+00 : f32
    %468 = vector.broadcast %cst_495 : f32 to vector<8x64xf32>
    %469 = arith.maximumf %467, %468 : vector<8x64xf32>
    %c2_496 = arith.constant 2 : index
    %c0_497 = arith.constant 0 : index
    %470 = vector.load %arg14[%c2_496, %c0_497] : memref<12x64xf32, #tpu.memory_space<vmem>>, vector<8x64xf32>
    tpu.vector_store %arg14[%c2_496, %c0_497], %469 {strides = array<i32>} : memref<12x64xf32, #tpu.memory_space<vmem>>, vector<8x64xf32>,
    %c3_498 = arith.constant 3 : index
    %c0_499 = arith.constant 0 : index
    %c0_500 = arith.constant 0 : index
    %471 = vector.load %arg5[%c3_498, %c0_499, %c0_500] : memref<6x1x64xf32, #tpu.memory_space<vmem>>, vector<1x1x64xf32>
    %472 = vector.shape_cast %471 : vector<1x1x64xf32> to vector<1x64xf32>
    %473 = vector.shape_cast %472 : vector<1x64xf32> to vector<1x64xf32>
    %474 = vector.broadcast %473 : vector<1x64xf32> to vector<8x64xf32>
    %c1_501 = arith.constant 1 : index
    %c0_502 = arith.constant 0 : index
    %475 = vector.load %arg14[%c1_501, %c0_502] : memref<12x64xf32, #tpu.memory_space<vmem>>, vector<8x64xf32>
    %c9_503 = arith.constant 9 : index
    %c0_504 = arith.constant 0 : index
    %c0_505 = arith.constant 0 : index
    %476 = vector.load %arg4[%c9_503, %c0_504, %c0_505] : memref<18x64x64xf32, #tpu.memory_space<vmem>>, vector<1x64x64xf32>
    %477 = vector.shape_cast %476 : vector<1x64x64xf32> to vector<64x64xf32>
    %cst_506 = arith.constant dense<0.000000e+00> : vector<8x64xf32>
    %478 = tpu.matmul %475, %477, %cst_506 {dimension_numbers = #tpu.dot_dimension_numbers<[1], [0], [0], [1], [0, 0, 1, 1], [], []>} : vector<8x64xf32>, vector<64x64xf32>, vector<8x64xf32> -> vector<8x64xf32>
    %479 = arith.addf %474, %478 : vector<8x64xf32>
    %c2_507 = arith.constant 2 : index
    %c0_508 = arith.constant 0 : index
    %480 = vector.load %arg14[%c2_507, %c0_508] : memref<12x64xf32, #tpu.memory_space<vmem>>, vector<8x64xf32>
    %c10_509 = arith.constant 10 : index
    %c0_510 = arith.constant 0 : index
    %c0_511 = arith.constant 0 : index
    %481 = vector.load %arg4[%c10_509, %c0_510, %c0_511] : memref<18x64x64xf32, #tpu.memory_space<vmem>>, vector<1x64x64xf32>
    %482 = vector.shape_cast %481 : vector<1x64x64xf32> to vector<64x64xf32>
    %cst_512 = arith.constant dense<0.000000e+00> : vector<8x64xf32>
    %483 = tpu.matmul %480, %482, %cst_512 {dimension_numbers = #tpu.dot_dimension_numbers<[1], [0], [0], [1], [0, 0, 1, 1], [], []>} : vector<8x64xf32>, vector<64x64xf32>, vector<8x64xf32> -> vector<8x64xf32>
    %484 = arith.addf %479, %483 : vector<8x64xf32>
    %c3_513 = arith.constant 3 : index
    %c0_514 = arith.constant 0 : index
    %485 = vector.load %arg14[%c3_513, %c0_514] : memref<12x64xf32, #tpu.memory_space<vmem>>, vector<8x64xf32>
    %c11_515 = arith.constant 11 : index
    %c0_516 = arith.constant 0 : index
    %c0_517 = arith.constant 0 : index
    %486 = vector.load %arg4[%c11_515, %c0_516, %c0_517] : memref<18x64x64xf32, #tpu.memory_space<vmem>>, vector<1x64x64xf32>
    %487 = vector.shape_cast %486 : vector<1x64x64xf32> to vector<64x64xf32>
    %cst_518 = arith.constant dense<0.000000e+00> : vector<8x64xf32>
    %488 = tpu.matmul %485, %487, %cst_518 {dimension_numbers = #tpu.dot_dimension_numbers<[1], [0], [0], [1], [0, 0, 1, 1], [], []>} : vector<8x64xf32>, vector<64x64xf32>, vector<8x64xf32> -> vector<8x64xf32>
    %489 = arith.addf %484, %488 : vector<8x64xf32>
    %490 = arith.addf %445, %489 : vector<8x64xf32>
    %cst_519 = arith.constant 0.000000e+00 : f32
    %491 = vector.broadcast %cst_519 : f32 to vector<8x64xf32>
    %492 = arith.maximumf %490, %491 : vector<8x64xf32>
    %c2_520 = arith.constant 2 : index
    %c0_521 = arith.constant 0 : index
    %493 = vector.load %arg14[%c2_520, %c0_521] : memref<12x64xf32, #tpu.memory_space<vmem>>, vector<8x64xf32>
    tpu.vector_store %arg14[%c2_520, %c0_521], %492 {strides = array<i32>} : memref<12x64xf32, #tpu.memory_space<vmem>>, vector<8x64xf32>,
    %c4_522 = arith.constant 4 : index
    %c0_523 = arith.constant 0 : index
    %c0_524 = arith.constant 0 : index
    %494 = vector.load %arg5[%c4_522, %c0_523, %c0_524] : memref<6x1x64xf32, #tpu.memory_space<vmem>>, vector<1x1x64xf32>
    %495 = vector.shape_cast %494 : vector<1x1x64xf32> to vector<1x64xf32>
    %496 = vector.shape_cast %495 : vector<1x64xf32> to vector<1x64xf32>
    %497 = vector.broadcast %496 : vector<1x64xf32> to vector<8x64xf32>
    %c1_525 = arith.constant 1 : index
    %c0_526 = arith.constant 0 : index
    %498 = vector.load %arg14[%c1_525, %c0_526] : memref<12x64xf32, #tpu.memory_space<vmem>>, vector<8x64xf32>
    %c12_527 = arith.constant 12 : index
    %c0_528 = arith.constant 0 : index
    %c0_529 = arith.constant 0 : index
    %499 = vector.load %arg4[%c12_527, %c0_528, %c0_529] : memref<18x64x64xf32, #tpu.memory_space<vmem>>, vector<1x64x64xf32>
    %500 = vector.shape_cast %499 : vector<1x64x64xf32> to vector<64x64xf32>
    %cst_530 = arith.constant dense<0.000000e+00> : vector<8x64xf32>
    %501 = tpu.matmul %498, %500, %cst_530 {dimension_numbers = #tpu.dot_dimension_numbers<[1], [0], [0], [1], [0, 0, 1, 1], [], []>} : vector<8x64xf32>, vector<64x64xf32>, vector<8x64xf32> -> vector<8x64xf32>
    %502 = arith.addf %497, %501 : vector<8x64xf32>
    %c2_531 = arith.constant 2 : index
    %c0_532 = arith.constant 0 : index
    %503 = vector.load %arg14[%c2_531, %c0_532] : memref<12x64xf32, #tpu.memory_space<vmem>>, vector<8x64xf32>
    %c13_533 = arith.constant 13 : index
    %c0_534 = arith.constant 0 : index
    %c0_535 = arith.constant 0 : index
    %504 = vector.load %arg4[%c13_533, %c0_534, %c0_535] : memref<18x64x64xf32, #tpu.memory_space<vmem>>, vector<1x64x64xf32>
    %505 = vector.shape_cast %504 : vector<1x64x64xf32> to vector<64x64xf32>
    %cst_536 = arith.constant dense<0.000000e+00> : vector<8x64xf32>
    %506 = tpu.matmul %503, %505, %cst_536 {dimension_numbers = #tpu.dot_dimension_numbers<[1], [0], [0], [1], [0, 0, 1, 1], [], []>} : vector<8x64xf32>, vector<64x64xf32>, vector<8x64xf32> -> vector<8x64xf32>
    %507 = arith.addf %502, %506 : vector<8x64xf32>
    %c3_537 = arith.constant 3 : index
    %c0_538 = arith.constant 0 : index
    %508 = vector.load %arg14[%c3_537, %c0_538] : memref<12x64xf32, #tpu.memory_space<vmem>>, vector<8x64xf32>
    %c14_539 = arith.constant 14 : index
    %c0_540 = arith.constant 0 : index
    %c0_541 = arith.constant 0 : index
    %509 = vector.load %arg4[%c14_539, %c0_540, %c0_541] : memref<18x64x64xf32, #tpu.memory_space<vmem>>, vector<1x64x64xf32>
    %510 = vector.shape_cast %509 : vector<1x64x64xf32> to vector<64x64xf32>
    %cst_542 = arith.constant dense<0.000000e+00> : vector<8x64xf32>
    %511 = tpu.matmul %508, %510, %cst_542 {dimension_numbers = #tpu.dot_dimension_numbers<[1], [0], [0], [1], [0, 0, 1, 1], [], []>} : vector<8x64xf32>, vector<64x64xf32>, vector<8x64xf32> -> vector<8x64xf32>
    %512 = arith.addf %507, %511 : vector<8x64xf32>
    %cst_543 = arith.constant 0.000000e+00 : f32
    %513 = vector.broadcast %cst_543 : f32 to vector<8x64xf32>
    %514 = arith.maximumf %512, %513 : vector<8x64xf32>
    %c2_544 = arith.constant 2 : index
    %c0_545 = arith.constant 0 : index
    %515 = vector.load %arg14[%c2_544, %c0_545] : memref<12x64xf32, #tpu.memory_space<vmem>>, vector<8x64xf32>
    tpu.vector_store %arg14[%c2_544, %c0_545], %514 {strides = array<i32>} : memref<12x64xf32, #tpu.memory_space<vmem>>, vector<8x64xf32>,
    %c5_546 = arith.constant 5 : index
    %c0_547 = arith.constant 0 : index
    %c0_548 = arith.constant 0 : index
    %516 = vector.load %arg5[%c5_546, %c0_547, %c0_548] : memref<6x1x64xf32, #tpu.memory_space<vmem>>, vector<1x1x64xf32>
    %517 = vector.shape_cast %516 : vector<1x1x64xf32> to vector<1x64xf32>
    %518 = vector.shape_cast %517 : vector<1x64xf32> to vector<1x64xf32>
    %519 = vector.broadcast %518 : vector<1x64xf32> to vector<8x64xf32>
    %c1_549 = arith.constant 1 : index
    %c0_550 = arith.constant 0 : index
    %520 = vector.load %arg14[%c1_549, %c0_550] : memref<12x64xf32, #tpu.memory_space<vmem>>, vector<8x64xf32>
    %c15_551 = arith.constant 15 : index
    %c0_552 = arith.constant 0 : index
    %c0_553 = arith.constant 0 : index
    %521 = vector.load %arg4[%c15_551, %c0_552, %c0_553] : memref<18x64x64xf32, #tpu.memory_space<vmem>>, vector<1x64x64xf32>
    %522 = vector.shape_cast %521 : vector<1x64x64xf32> to vector<64x64xf32>
    %cst_554 = arith.constant dense<0.000000e+00> : vector<8x64xf32>
    %523 = tpu.matmul %520, %522, %cst_554 {dimension_numbers = #tpu.dot_dimension_numbers<[1], [0], [0], [1], [0, 0, 1, 1], [], []>} : vector<8x64xf32>, vector<64x64xf32>, vector<8x64xf32> -> vector<8x64xf32>
    %524 = arith.addf %519, %523 : vector<8x64xf32>
    %c2_555 = arith.constant 2 : index
    %c0_556 = arith.constant 0 : index
    %525 = vector.load %arg14[%c2_555, %c0_556] : memref<12x64xf32, #tpu.memory_space<vmem>>, vector<8x64xf32>
    %c16_557 = arith.constant 16 : index
    %c0_558 = arith.constant 0 : index
    %c0_559 = arith.constant 0 : index
    %526 = vector.load %arg4[%c16_557, %c0_558, %c0_559] : memref<18x64x64xf32, #tpu.memory_space<vmem>>, vector<1x64x64xf32>
    %527 = vector.shape_cast %526 : vector<1x64x64xf32> to vector<64x64xf32>
    %cst_560 = arith.constant dense<0.000000e+00> : vector<8x64xf32>
    %528 = tpu.matmul %525, %527, %cst_560 {dimension_numbers = #tpu.dot_dimension_numbers<[1], [0], [0], [1], [0, 0, 1, 1], [], []>} : vector<8x64xf32>, vector<64x64xf32>, vector<8x64xf32> -> vector<8x64xf32>
    %529 = arith.addf %524, %528 : vector<8x64xf32>
    %c3_561 = arith.constant 3 : index
    %c0_562 = arith.constant 0 : index
    %530 = vector.load %arg14[%c3_561, %c0_562] : memref<12x64xf32, #tpu.memory_space<vmem>>, vector<8x64xf32>
    %c17_563 = arith.constant 17 : index
    %c0_564 = arith.constant 0 : index
    %c0_565 = arith.constant 0 : index
    %531 = vector.load %arg4[%c17_563, %c0_564, %c0_565] : memref<18x64x64xf32, #tpu.memory_space<vmem>>, vector<1x64x64xf32>
    %532 = vector.shape_cast %531 : vector<1x64x64xf32> to vector<64x64xf32>
    %cst_566 = arith.constant dense<0.000000e+00> : vector<8x64xf32>
    %533 = tpu.matmul %530, %532, %cst_566 {dimension_numbers = #tpu.dot_dimension_numbers<[1], [0], [0], [1], [0, 0, 1, 1], [], []>} : vector<8x64xf32>, vector<64x64xf32>, vector<8x64xf32> -> vector<8x64xf32>
    %534 = arith.addf %529, %533 : vector<8x64xf32>
    %535 = arith.addf %490, %534 : vector<8x64xf32>
    %536 = arith.addf %400, %535 : vector<8x64xf32>
    %c2_567 = arith.constant 2 : index
    %c0_568 = arith.constant 0 : index
    %537 = vector.load %arg14[%c2_567, %c0_568] : memref<12x64xf32, #tpu.memory_space<vmem>>, vector<8x64xf32>
    tpu.vector_store %arg14[%c2_567, %c0_568], %536 {strides = array<i32>} : memref<12x64xf32, #tpu.memory_space<vmem>>, vector<8x64xf32>,
    %c0_569 = arith.constant 0 : index
    %c0_570 = arith.constant 0 : index
    %538 = vector.load %arg7[%c0_569, %c0_570] : memref<1x32xf32, #tpu.memory_space<vmem>>, vector<1x32xf32>
    %539 = vector.shape_cast %538 : vector<1x32xf32> to vector<1x32xf32>
    %540 = vector.broadcast %539 : vector<1x32xf32> to vector<4x32xf32>
    %c0_571 = arith.constant 0 : index
    %c0_572 = arith.constant 0 : index
    %541 = tpu.strided_load %arg14[%c0_571, %c0_572] {strides = array<i32: 2, 1>} : memref<12x64xf32, #tpu.memory_space<vmem>>, vector<4x64xf32>
    %c0_573 = arith.constant 0 : index
    %c0_574 = arith.constant 0 : index
    %c0_575 = arith.constant 0 : index
    %542 = vector.load %arg6[%c0_573, %c0_574, %c0_575] : memref<5x64x32xf32, #tpu.memory_space<vmem>>, vector<1x64x32xf32>
    %543 = vector.shape_cast %542 : vector<1x64x32xf32> to vector<64x32xf32>
    %cst_576 = arith.constant dense<0.000000e+00> : vector<4x32xf32>
    %544 = tpu.matmul %541, %543, %cst_576 {dimension_numbers = #tpu.dot_dimension_numbers<[1], [0], [0], [1], [0, 0, 1, 1], [], []>} : vector<4x64xf32>, vector<64x32xf32>, vector<4x32xf32> -> vector<4x32xf32>
    %545 = arith.addf %540, %544 : vector<4x32xf32>
    %c1_577 = arith.constant 1 : index
    %c0_578 = arith.constant 0 : index
    %546 = tpu.strided_load %arg14[%c1_577, %c0_578] {strides = array<i32: 2, 1>} : memref<12x64xf32, #tpu.memory_space<vmem>>, vector<4x64xf32>
    %c1_579 = arith.constant 1 : index
    %c0_580 = arith.constant 0 : index
    %c0_581 = arith.constant 0 : index
    %547 = vector.load %arg6[%c1_579, %c0_580, %c0_581] : memref<5x64x32xf32, #tpu.memory_space<vmem>>, vector<1x64x32xf32>
    %548 = vector.shape_cast %547 : vector<1x64x32xf32> to vector<64x32xf32>
    %cst_582 = arith.constant dense<0.000000e+00> : vector<4x32xf32>
    %549 = tpu.matmul %546, %548, %cst_582 {dimension_numbers = #tpu.dot_dimension_numbers<[1], [0], [0], [1], [0, 0, 1, 1], [], []>} : vector<4x64xf32>, vector<64x32xf32>, vector<4x32xf32> -> vector<4x32xf32>
    %550 = arith.addf %545, %549 : vector<4x32xf32>
    %c2_583 = arith.constant 2 : index
    %c0_584 = arith.constant 0 : index
    %551 = tpu.strided_load %arg14[%c2_583, %c0_584] {strides = array<i32: 2, 1>} : memref<12x64xf32, #tpu.memory_space<vmem>>, vector<4x64xf32>
    %c2_585 = arith.constant 2 : index
    %c0_586 = arith.constant 0 : index
    %c0_587 = arith.constant 0 : index
    %552 = vector.load %arg6[%c2_585, %c0_586, %c0_587] : memref<5x64x32xf32, #tpu.memory_space<vmem>>, vector<1x64x32xf32>
    %553 = vector.shape_cast %552 : vector<1x64x32xf32> to vector<64x32xf32>
    %cst_588 = arith.constant dense<0.000000e+00> : vector<4x32xf32>
    %554 = tpu.matmul %551, %553, %cst_588 {dimension_numbers = #tpu.dot_dimension_numbers<[1], [0], [0], [1], [0, 0, 1, 1], [], []>} : vector<4x64xf32>, vector<64x32xf32>, vector<4x32xf32> -> vector<4x32xf32>
    %555 = arith.addf %550, %554 : vector<4x32xf32>
    %c3_589 = arith.constant 3 : index
    %c0_590 = arith.constant 0 : index
    %556 = tpu.strided_load %arg14[%c3_589, %c0_590] {strides = array<i32: 2, 1>} : memref<12x64xf32, #tpu.memory_space<vmem>>, vector<4x64xf32>
    %c3_591 = arith.constant 3 : index
    %c0_592 = arith.constant 0 : index
    %c0_593 = arith.constant 0 : index
    %557 = vector.load %arg6[%c3_591, %c0_592, %c0_593] : memref<5x64x32xf32, #tpu.memory_space<vmem>>, vector<1x64x32xf32>
    %558 = vector.shape_cast %557 : vector<1x64x32xf32> to vector<64x32xf32>
    %cst_594 = arith.constant dense<0.000000e+00> : vector<4x32xf32>
    %559 = tpu.matmul %556, %558, %cst_594 {dimension_numbers = #tpu.dot_dimension_numbers<[1], [0], [0], [1], [0, 0, 1, 1], [], []>} : vector<4x64xf32>, vector<64x32xf32>, vector<4x32xf32> -> vector<4x32xf32>
    %560 = arith.addf %555, %559 : vector<4x32xf32>
    %c4_595 = arith.constant 4 : index
    %c0_596 = arith.constant 0 : index
    %561 = tpu.strided_load %arg14[%c4_595, %c0_596] {strides = array<i32: 2, 1>} : memref<12x64xf32, #tpu.memory_space<vmem>>, vector<4x64xf32>
    %c4_597 = arith.constant 4 : index
    %c0_598 = arith.constant 0 : index
    %c0_599 = arith.constant 0 : index
    %562 = vector.load %arg6[%c4_597, %c0_598, %c0_599] : memref<5x64x32xf32, #tpu.memory_space<vmem>>, vector<1x64x32xf32>
    %563 = vector.shape_cast %562 : vector<1x64x32xf32> to vector<64x32xf32>
    %cst_600 = arith.constant dense<0.000000e+00> : vector<4x32xf32>
    %564 = tpu.matmul %561, %563, %cst_600 {dimension_numbers = #tpu.dot_dimension_numbers<[1], [0], [0], [1], [0, 0, 1, 1], [], []>} : vector<4x64xf32>, vector<64x32xf32>, vector<4x32xf32> -> vector<4x32xf32>
    %565 = arith.addf %560, %564 : vector<4x32xf32>
    %cst_601 = arith.constant 0.000000e+00 : f32
    %566 = vector.broadcast %cst_601 : f32 to vector<4x32xf32>
    %567 = arith.maximumf %565, %566 : vector<4x32xf32>
    %c2_602 = arith.constant 2 : index
    %c0_603 = arith.constant 0 : index
    %568 = vector.load %arg15[%c2_602, %c0_603] : memref<8x32xf32, #tpu.memory_space<vmem>>, vector<4x32xf32>
    tpu.vector_store %arg15[%c2_602, %c0_603], %567 {strides = array<i32>} : memref<8x32xf32, #tpu.memory_space<vmem>>, vector<4x32xf32>,
    %c0_604 = arith.constant 0 : index
    %c0_605 = arith.constant 0 : index
    %c0_606 = arith.constant 0 : index
    %569 = vector.load %arg9[%c0_604, %c0_605, %c0_606] : memref<6x1x32xf32, #tpu.memory_space<vmem>>, vector<1x1x32xf32>
    %570 = vector.shape_cast %569 : vector<1x1x32xf32> to vector<1x32xf32>
    %571 = vector.shape_cast %570 : vector<1x32xf32> to vector<1x32xf32>
    %572 = vector.broadcast %571 : vector<1x32xf32> to vector<4x32xf32>
    %c1_607 = arith.constant 1 : index
    %c0_608 = arith.constant 0 : index
    %573 = vector.load %arg15[%c1_607, %c0_608] : memref<8x32xf32, #tpu.memory_space<vmem>>, vector<4x32xf32>
    %c0_609 = arith.constant 0 : index
    %c0_610 = arith.constant 0 : index
    %c0_611 = arith.constant 0 : index
    %574 = vector.load %arg8[%c0_609, %c0_610, %c0_611] : memref<18x32x32xf32, #tpu.memory_space<vmem>>, vector<1x32x32xf32>
    %575 = vector.shape_cast %574 : vector<1x32x32xf32> to vector<32x32xf32>
    %cst_612 = arith.constant dense<0.000000e+00> : vector<4x32xf32>
    %576 = tpu.matmul %573, %575, %cst_612 {dimension_numbers = #tpu.dot_dimension_numbers<[1], [0], [0], [1], [0, 0, 1, 1], [], []>} : vector<4x32xf32>, vector<32x32xf32>, vector<4x32xf32> -> vector<4x32xf32>
    %577 = arith.addf %572, %576 : vector<4x32xf32>
    %c2_613 = arith.constant 2 : index
    %c0_614 = arith.constant 0 : index
    %578 = vector.load %arg15[%c2_613, %c0_614] : memref<8x32xf32, #tpu.memory_space<vmem>>, vector<4x32xf32>
    %c1_615 = arith.constant 1 : index
    %c0_616 = arith.constant 0 : index
    %c0_617 = arith.constant 0 : index
    %579 = vector.load %arg8[%c1_615, %c0_616, %c0_617] : memref<18x32x32xf32, #tpu.memory_space<vmem>>, vector<1x32x32xf32>
    %580 = vector.shape_cast %579 : vector<1x32x32xf32> to vector<32x32xf32>
    %cst_618 = arith.constant dense<0.000000e+00> : vector<4x32xf32>
    %581 = tpu.matmul %578, %580, %cst_618 {dimension_numbers = #tpu.dot_dimension_numbers<[1], [0], [0], [1], [0, 0, 1, 1], [], []>} : vector<4x32xf32>, vector<32x32xf32>, vector<4x32xf32> -> vector<4x32xf32>
    %582 = arith.addf %577, %581 : vector<4x32xf32>
    %c3_619 = arith.constant 3 : index
    %c0_620 = arith.constant 0 : index
    %583 = vector.load %arg15[%c3_619, %c0_620] : memref<8x32xf32, #tpu.memory_space<vmem>>, vector<4x32xf32>
    %c2_621 = arith.constant 2 : index
    %c0_622 = arith.constant 0 : index
    %c0_623 = arith.constant 0 : index
    %584 = vector.load %arg8[%c2_621, %c0_622, %c0_623] : memref<18x32x32xf32, #tpu.memory_space<vmem>>, vector<1x32x32xf32>
    %585 = vector.shape_cast %584 : vector<1x32x32xf32> to vector<32x32xf32>
    %cst_624 = arith.constant dense<0.000000e+00> : vector<4x32xf32>
    %586 = tpu.matmul %583, %585, %cst_624 {dimension_numbers = #tpu.dot_dimension_numbers<[1], [0], [0], [1], [0, 0, 1, 1], [], []>} : vector<4x32xf32>, vector<32x32xf32>, vector<4x32xf32> -> vector<4x32xf32>
    %587 = arith.addf %582, %586 : vector<4x32xf32>
    %cst_625 = arith.constant 0.000000e+00 : f32
    %588 = vector.broadcast %cst_625 : f32 to vector<4x32xf32>
    %589 = arith.maximumf %587, %588 : vector<4x32xf32>
    %c2_626 = arith.constant 2 : index
    %c0_627 = arith.constant 0 : index
    %590 = vector.load %arg15[%c2_626, %c0_627] : memref<8x32xf32, #tpu.memory_space<vmem>>, vector<4x32xf32>
    tpu.vector_store %arg15[%c2_626, %c0_627], %589 {strides = array<i32>} : memref<8x32xf32, #tpu.memory_space<vmem>>, vector<4x32xf32>,
    %c1_628 = arith.constant 1 : index
    %c0_629 = arith.constant 0 : index
    %c0_630 = arith.constant 0 : index
    %591 = vector.load %arg9[%c1_628, %c0_629, %c0_630] : memref<6x1x32xf32, #tpu.memory_space<vmem>>, vector<1x1x32xf32>
    %592 = vector.shape_cast %591 : vector<1x1x32xf32> to vector<1x32xf32>
    %593 = vector.shape_cast %592 : vector<1x32xf32> to vector<1x32xf32>
    %594 = vector.broadcast %593 : vector<1x32xf32> to vector<4x32xf32>
    %c1_631 = arith.constant 1 : index
    %c0_632 = arith.constant 0 : index
    %595 = vector.load %arg15[%c1_631, %c0_632] : memref<8x32xf32, #tpu.memory_space<vmem>>, vector<4x32xf32>
    %c3_633 = arith.constant 3 : index
    %c0_634 = arith.constant 0 : index
    %c0_635 = arith.constant 0 : index
    %596 = vector.load %arg8[%c3_633, %c0_634, %c0_635] : memref<18x32x32xf32, #tpu.memory_space<vmem>>, vector<1x32x32xf32>
    %597 = vector.shape_cast %596 : vector<1x32x32xf32> to vector<32x32xf32>
    %cst_636 = arith.constant dense<0.000000e+00> : vector<4x32xf32>
    %598 = tpu.matmul %595, %597, %cst_636 {dimension_numbers = #tpu.dot_dimension_numbers<[1], [0], [0], [1], [0, 0, 1, 1], [], []>} : vector<4x32xf32>, vector<32x32xf32>, vector<4x32xf32> -> vector<4x32xf32>
    %599 = arith.addf %594, %598 : vector<4x32xf32>
    %c2_637 = arith.constant 2 : index
    %c0_638 = arith.constant 0 : index
    %600 = vector.load %arg15[%c2_637, %c0_638] : memref<8x32xf32, #tpu.memory_space<vmem>>, vector<4x32xf32>
    %c4_639 = arith.constant 4 : index
    %c0_640 = arith.constant 0 : index
    %c0_641 = arith.constant 0 : index
    %601 = vector.load %arg8[%c4_639, %c0_640, %c0_641] : memref<18x32x32xf32, #tpu.memory_space<vmem>>, vector<1x32x32xf32>
    %602 = vector.shape_cast %601 : vector<1x32x32xf32> to vector<32x32xf32>
    %cst_642 = arith.constant dense<0.000000e+00> : vector<4x32xf32>
    %603 = tpu.matmul %600, %602, %cst_642 {dimension_numbers = #tpu.dot_dimension_numbers<[1], [0], [0], [1], [0, 0, 1, 1], [], []>} : vector<4x32xf32>, vector<32x32xf32>, vector<4x32xf32> -> vector<4x32xf32>
    %604 = arith.addf %599, %603 : vector<4x32xf32>
    %c3_643 = arith.constant 3 : index
    %c0_644 = arith.constant 0 : index
    %605 = vector.load %arg15[%c3_643, %c0_644] : memref<8x32xf32, #tpu.memory_space<vmem>>, vector<4x32xf32>
    %c5_645 = arith.constant 5 : index
    %c0_646 = arith.constant 0 : index
    %c0_647 = arith.constant 0 : index
    %606 = vector.load %arg8[%c5_645, %c0_646, %c0_647] : memref<18x32x32xf32, #tpu.memory_space<vmem>>, vector<1x32x32xf32>
    %607 = vector.shape_cast %606 : vector<1x32x32xf32> to vector<32x32xf32>
    %cst_648 = arith.constant dense<0.000000e+00> : vector<4x32xf32>
    %608 = tpu.matmul %605, %607, %cst_648 {dimension_numbers = #tpu.dot_dimension_numbers<[1], [0], [0], [1], [0, 0, 1, 1], [], []>} : vector<4x32xf32>, vector<32x32xf32>, vector<4x32xf32> -> vector<4x32xf32>
    %609 = arith.addf %604, %608 : vector<4x32xf32>
    %610 = arith.addf %565, %609 : vector<4x32xf32>
    %cst_649 = arith.constant 0.000000e+00 : f32
    %611 = vector.broadcast %cst_649 : f32 to vector<4x32xf32>
    %612 = arith.maximumf %610, %611 : vector<4x32xf32>
    %c2_650 = arith.constant 2 : index
    %c0_651 = arith.constant 0 : index
    %613 = vector.load %arg15[%c2_650, %c0_651] : memref<8x32xf32, #tpu.memory_space<vmem>>, vector<4x32xf32>
    tpu.vector_store %arg15[%c2_650, %c0_651], %612 {strides = array<i32>} : memref<8x32xf32, #tpu.memory_space<vmem>>, vector<4x32xf32>,
    %c2_652 = arith.constant 2 : index
    %c0_653 = arith.constant 0 : index
    %c0_654 = arith.constant 0 : index
    %614 = vector.load %arg9[%c2_652, %c0_653, %c0_654] : memref<6x1x32xf32, #tpu.memory_space<vmem>>, vector<1x1x32xf32>
    %615 = vector.shape_cast %614 : vector<1x1x32xf32> to vector<1x32xf32>
    %616 = vector.shape_cast %615 : vector<1x32xf32> to vector<1x32xf32>
    %617 = vector.broadcast %616 : vector<1x32xf32> to vector<4x32xf32>
    %c1_655 = arith.constant 1 : index
    %c0_656 = arith.constant 0 : index
    %618 = vector.load %arg15[%c1_655, %c0_656] : memref<8x32xf32, #tpu.memory_space<vmem>>, vector<4x32xf32>
    %c6_657 = arith.constant 6 : index
    %c0_658 = arith.constant 0 : index
    %c0_659 = arith.constant 0 : index
    %619 = vector.load %arg8[%c6_657, %c0_658, %c0_659] : memref<18x32x32xf32, #tpu.memory_space<vmem>>, vector<1x32x32xf32>
    %620 = vector.shape_cast %619 : vector<1x32x32xf32> to vector<32x32xf32>
    %cst_660 = arith.constant dense<0.000000e+00> : vector<4x32xf32>
    %621 = tpu.matmul %618, %620, %cst_660 {dimension_numbers = #tpu.dot_dimension_numbers<[1], [0], [0], [1], [0, 0, 1, 1], [], []>} : vector<4x32xf32>, vector<32x32xf32>, vector<4x32xf32> -> vector<4x32xf32>
    %622 = arith.addf %617, %621 : vector<4x32xf32>
    %c2_661 = arith.constant 2 : index
    %c0_662 = arith.constant 0 : index
    %623 = vector.load %arg15[%c2_661, %c0_662] : memref<8x32xf32, #tpu.memory_space<vmem>>, vector<4x32xf32>
    %c7_663 = arith.constant 7 : index
    %c0_664 = arith.constant 0 : index
    %c0_665 = arith.constant 0 : index
    %624 = vector.load %arg8[%c7_663, %c0_664, %c0_665] : memref<18x32x32xf32, #tpu.memory_space<vmem>>, vector<1x32x32xf32>
    %625 = vector.shape_cast %624 : vector<1x32x32xf32> to vector<32x32xf32>
    %cst_666 = arith.constant dense<0.000000e+00> : vector<4x32xf32>
    %626 = tpu.matmul %623, %625, %cst_666 {dimension_numbers = #tpu.dot_dimension_numbers<[1], [0], [0], [1], [0, 0, 1, 1], [], []>} : vector<4x32xf32>, vector<32x32xf32>, vector<4x32xf32> -> vector<4x32xf32>
    %627 = arith.addf %622, %626 : vector<4x32xf32>
    %c3_667 = arith.constant 3 : index
    %c0_668 = arith.constant 0 : index
    %628 = vector.load %arg15[%c3_667, %c0_668] : memref<8x32xf32, #tpu.memory_space<vmem>>, vector<4x32xf32>
    %c8_669 = arith.constant 8 : index
    %c0_670 = arith.constant 0 : index
    %c0_671 = arith.constant 0 : index
    %629 = vector.load %arg8[%c8_669, %c0_670, %c0_671] : memref<18x32x32xf32, #tpu.memory_space<vmem>>, vector<1x32x32xf32>
    %630 = vector.shape_cast %629 : vector<1x32x32xf32> to vector<32x32xf32>
    %cst_672 = arith.constant dense<0.000000e+00> : vector<4x32xf32>
    %631 = tpu.matmul %628, %630, %cst_672 {dimension_numbers = #tpu.dot_dimension_numbers<[1], [0], [0], [1], [0, 0, 1, 1], [], []>} : vector<4x32xf32>, vector<32x32xf32>, vector<4x32xf32> -> vector<4x32xf32>
    %632 = arith.addf %627, %631 : vector<4x32xf32>
    %cst_673 = arith.constant 0.000000e+00 : f32
    %633 = vector.broadcast %cst_673 : f32 to vector<4x32xf32>
    %634 = arith.maximumf %632, %633 : vector<4x32xf32>
    %c2_674 = arith.constant 2 : index
    %c0_675 = arith.constant 0 : index
    %635 = vector.load %arg15[%c2_674, %c0_675] : memref<8x32xf32, #tpu.memory_space<vmem>>, vector<4x32xf32>
    tpu.vector_store %arg15[%c2_674, %c0_675], %634 {strides = array<i32>} : memref<8x32xf32, #tpu.memory_space<vmem>>, vector<4x32xf32>,
    %c3_676 = arith.constant 3 : index
    %c0_677 = arith.constant 0 : index
    %c0_678 = arith.constant 0 : index
    %636 = vector.load %arg9[%c3_676, %c0_677, %c0_678] : memref<6x1x32xf32, #tpu.memory_space<vmem>>, vector<1x1x32xf32>
    %637 = vector.shape_cast %636 : vector<1x1x32xf32> to vector<1x32xf32>
    %638 = vector.shape_cast %637 : vector<1x32xf32> to vector<1x32xf32>
    %639 = vector.broadcast %638 : vector<1x32xf32> to vector<4x32xf32>
    %c1_679 = arith.constant 1 : index
    %c0_680 = arith.constant 0 : index
    %640 = vector.load %arg15[%c1_679, %c0_680] : memref<8x32xf32, #tpu.memory_space<vmem>>, vector<4x32xf32>
    %c9_681 = arith.constant 9 : index
    %c0_682 = arith.constant 0 : index
    %c0_683 = arith.constant 0 : index
    %641 = vector.load %arg8[%c9_681, %c0_682, %c0_683] : memref<18x32x32xf32, #tpu.memory_space<vmem>>, vector<1x32x32xf32>
    %642 = vector.shape_cast %641 : vector<1x32x32xf32> to vector<32x32xf32>
    %cst_684 = arith.constant dense<0.000000e+00> : vector<4x32xf32>
    %643 = tpu.matmul %640, %642, %cst_684 {dimension_numbers = #tpu.dot_dimension_numbers<[1], [0], [0], [1], [0, 0, 1, 1], [], []>} : vector<4x32xf32>, vector<32x32xf32>, vector<4x32xf32> -> vector<4x32xf32>
    %644 = arith.addf %639, %643 : vector<4x32xf32>
    %c2_685 = arith.constant 2 : index
    %c0_686 = arith.constant 0 : index
    %645 = vector.load %arg15[%c2_685, %c0_686] : memref<8x32xf32, #tpu.memory_space<vmem>>, vector<4x32xf32>
    %c10_687 = arith.constant 10 : index
    %c0_688 = arith.constant 0 : index
    %c0_689 = arith.constant 0 : index
    %646 = vector.load %arg8[%c10_687, %c0_688, %c0_689] : memref<18x32x32xf32, #tpu.memory_space<vmem>>, vector<1x32x32xf32>
    %647 = vector.shape_cast %646 : vector<1x32x32xf32> to vector<32x32xf32>
    %cst_690 = arith.constant dense<0.000000e+00> : vector<4x32xf32>
    %648 = tpu.matmul %645, %647, %cst_690 {dimension_numbers = #tpu.dot_dimension_numbers<[1], [0], [0], [1], [0, 0, 1, 1], [], []>} : vector<4x32xf32>, vector<32x32xf32>, vector<4x32xf32> -> vector<4x32xf32>
    %649 = arith.addf %644, %648 : vector<4x32xf32>
    %c3_691 = arith.constant 3 : index
    %c0_692 = arith.constant 0 : index
    %650 = vector.load %arg15[%c3_691, %c0_692] : memref<8x32xf32, #tpu.memory_space<vmem>>, vector<4x32xf32>
    %c11_693 = arith.constant 11 : index
    %c0_694 = arith.constant 0 : index
    %c0_695 = arith.constant 0 : index
    %651 = vector.load %arg8[%c11_693, %c0_694, %c0_695] : memref<18x32x32xf32, #tpu.memory_space<vmem>>, vector<1x32x32xf32>
    %652 = vector.shape_cast %651 : vector<1x32x32xf32> to vector<32x32xf32>
    %cst_696 = arith.constant dense<0.000000e+00> : vector<4x32xf32>
    %653 = tpu.matmul %650, %652, %cst_696 {dimension_numbers = #tpu.dot_dimension_numbers<[1], [0], [0], [1], [0, 0, 1, 1], [], []>} : vector<4x32xf32>, vector<32x32xf32>, vector<4x32xf32> -> vector<4x32xf32>
    %654 = arith.addf %649, %653 : vector<4x32xf32>
    %655 = arith.addf %610, %654 : vector<4x32xf32>
    %cst_697 = arith.constant 0.000000e+00 : f32
    %656 = vector.broadcast %cst_697 : f32 to vector<4x32xf32>
    %657 = arith.maximumf %655, %656 : vector<4x32xf32>
    %c2_698 = arith.constant 2 : index
    %c0_699 = arith.constant 0 : index
    %658 = vector.load %arg15[%c2_698, %c0_699] : memref<8x32xf32, #tpu.memory_space<vmem>>, vector<4x32xf32>
    tpu.vector_store %arg15[%c2_698, %c0_699], %657 {strides = array<i32>} : memref<8x32xf32, #tpu.memory_space<vmem>>, vector<4x32xf32>,
    %c4_700 = arith.constant 4 : index
    %c0_701 = arith.constant 0 : index
    %c0_702 = arith.constant 0 : index
    %659 = vector.load %arg9[%c4_700, %c0_701, %c0_702] : memref<6x1x32xf32, #tpu.memory_space<vmem>>, vector<1x1x32xf32>
    %660 = vector.shape_cast %659 : vector<1x1x32xf32> to vector<1x32xf32>
    %661 = vector.shape_cast %660 : vector<1x32xf32> to vector<1x32xf32>
    %662 = vector.broadcast %661 : vector<1x32xf32> to vector<4x32xf32>
    %c1_703 = arith.constant 1 : index
    %c0_704 = arith.constant 0 : index
    %663 = vector.load %arg15[%c1_703, %c0_704] : memref<8x32xf32, #tpu.memory_space<vmem>>, vector<4x32xf32>
    %c12_705 = arith.constant 12 : index
    %c0_706 = arith.constant 0 : index
    %c0_707 = arith.constant 0 : index
    %664 = vector.load %arg8[%c12_705, %c0_706, %c0_707] : memref<18x32x32xf32, #tpu.memory_space<vmem>>, vector<1x32x32xf32>
    %665 = vector.shape_cast %664 : vector<1x32x32xf32> to vector<32x32xf32>
    %cst_708 = arith.constant dense<0.000000e+00> : vector<4x32xf32>
    %666 = tpu.matmul %663, %665, %cst_708 {dimension_numbers = #tpu.dot_dimension_numbers<[1], [0], [0], [1], [0, 0, 1, 1], [], []>} : vector<4x32xf32>, vector<32x32xf32>, vector<4x32xf32> -> vector<4x32xf32>
    %667 = arith.addf %662, %666 : vector<4x32xf32>
    %c2_709 = arith.constant 2 : index
    %c0_710 = arith.constant 0 : index
    %668 = vector.load %arg15[%c2_709, %c0_710] : memref<8x32xf32, #tpu.memory_space<vmem>>, vector<4x32xf32>
    %c13_711 = arith.constant 13 : index
    %c0_712 = arith.constant 0 : index
    %c0_713 = arith.constant 0 : index
    %669 = vector.load %arg8[%c13_711, %c0_712, %c0_713] : memref<18x32x32xf32, #tpu.memory_space<vmem>>, vector<1x32x32xf32>
    %670 = vector.shape_cast %669 : vector<1x32x32xf32> to vector<32x32xf32>
    %cst_714 = arith.constant dense<0.000000e+00> : vector<4x32xf32>
    %671 = tpu.matmul %668, %670, %cst_714 {dimension_numbers = #tpu.dot_dimension_numbers<[1], [0], [0], [1], [0, 0, 1, 1], [], []>} : vector<4x32xf32>, vector<32x32xf32>, vector<4x32xf32> -> vector<4x32xf32>
    %672 = arith.addf %667, %671 : vector<4x32xf32>
    %c3_715 = arith.constant 3 : index
    %c0_716 = arith.constant 0 : index
    %673 = vector.load %arg15[%c3_715, %c0_716] : memref<8x32xf32, #tpu.memory_space<vmem>>, vector<4x32xf32>
    %c14_717 = arith.constant 14 : index
    %c0_718 = arith.constant 0 : index
    %c0_719 = arith.constant 0 : index
    %674 = vector.load %arg8[%c14_717, %c0_718, %c0_719] : memref<18x32x32xf32, #tpu.memory_space<vmem>>, vector<1x32x32xf32>
    %675 = vector.shape_cast %674 : vector<1x32x32xf32> to vector<32x32xf32>
    %cst_720 = arith.constant dense<0.000000e+00> : vector<4x32xf32>
    %676 = tpu.matmul %673, %675, %cst_720 {dimension_numbers = #tpu.dot_dimension_numbers<[1], [0], [0], [1], [0, 0, 1, 1], [], []>} : vector<4x32xf32>, vector<32x32xf32>, vector<4x32xf32> -> vector<4x32xf32>
    %677 = arith.addf %672, %676 : vector<4x32xf32>
    %cst_721 = arith.constant 0.000000e+00 : f32
    %678 = vector.broadcast %cst_721 : f32 to vector<4x32xf32>
    %679 = arith.maximumf %677, %678 : vector<4x32xf32>
    %c2_722 = arith.constant 2 : index
    %c0_723 = arith.constant 0 : index
    %680 = vector.load %arg15[%c2_722, %c0_723] : memref<8x32xf32, #tpu.memory_space<vmem>>, vector<4x32xf32>
    tpu.vector_store %arg15[%c2_722, %c0_723], %679 {strides = array<i32>} : memref<8x32xf32, #tpu.memory_space<vmem>>, vector<4x32xf32>,
    %c5_724 = arith.constant 5 : index
    %c0_725 = arith.constant 0 : index
    %c0_726 = arith.constant 0 : index
    %681 = vector.load %arg9[%c5_724, %c0_725, %c0_726] : memref<6x1x32xf32, #tpu.memory_space<vmem>>, vector<1x1x32xf32>
    %682 = vector.shape_cast %681 : vector<1x1x32xf32> to vector<1x32xf32>
    %683 = vector.shape_cast %682 : vector<1x32xf32> to vector<1x32xf32>
    %684 = vector.broadcast %683 : vector<1x32xf32> to vector<4x32xf32>
    %c1_727 = arith.constant 1 : index
    %c0_728 = arith.constant 0 : index
    %685 = vector.load %arg15[%c1_727, %c0_728] : memref<8x32xf32, #tpu.memory_space<vmem>>, vector<4x32xf32>
    %c15_729 = arith.constant 15 : index
    %c0_730 = arith.constant 0 : index
    %c0_731 = arith.constant 0 : index
    %686 = vector.load %arg8[%c15_729, %c0_730, %c0_731] : memref<18x32x32xf32, #tpu.memory_space<vmem>>, vector<1x32x32xf32>
    %687 = vector.shape_cast %686 : vector<1x32x32xf32> to vector<32x32xf32>
    %cst_732 = arith.constant dense<0.000000e+00> : vector<4x32xf32>
    %688 = tpu.matmul %685, %687, %cst_732 {dimension_numbers = #tpu.dot_dimension_numbers<[1], [0], [0], [1], [0, 0, 1, 1], [], []>} : vector<4x32xf32>, vector<32x32xf32>, vector<4x32xf32> -> vector<4x32xf32>
    %689 = arith.addf %684, %688 : vector<4x32xf32>
    %c2_733 = arith.constant 2 : index
    %c0_734 = arith.constant 0 : index
    %690 = vector.load %arg15[%c2_733, %c0_734] : memref<8x32xf32, #tpu.memory_space<vmem>>, vector<4x32xf32>
    %c16_735 = arith.constant 16 : index
    %c0_736 = arith.constant 0 : index
    %c0_737 = arith.constant 0 : index
    %691 = vector.load %arg8[%c16_735, %c0_736, %c0_737] : memref<18x32x32xf32, #tpu.memory_space<vmem>>, vector<1x32x32xf32>
    %692 = vector.shape_cast %691 : vector<1x32x32xf32> to vector<32x32xf32>
    %cst_738 = arith.constant dense<0.000000e+00> : vector<4x32xf32>
    %693 = tpu.matmul %690, %692, %cst_738 {dimension_numbers = #tpu.dot_dimension_numbers<[1], [0], [0], [1], [0, 0, 1, 1], [], []>} : vector<4x32xf32>, vector<32x32xf32>, vector<4x32xf32> -> vector<4x32xf32>
    %694 = arith.addf %689, %693 : vector<4x32xf32>
    %c3_739 = arith.constant 3 : index
    %c0_740 = arith.constant 0 : index
    %695 = vector.load %arg15[%c3_739, %c0_740] : memref<8x32xf32, #tpu.memory_space<vmem>>, vector<4x32xf32>
    %c17_741 = arith.constant 17 : index
    %c0_742 = arith.constant 0 : index
    %c0_743 = arith.constant 0 : index
    %696 = vector.load %arg8[%c17_741, %c0_742, %c0_743] : memref<18x32x32xf32, #tpu.memory_space<vmem>>, vector<1x32x32xf32>
    %697 = vector.shape_cast %696 : vector<1x32x32xf32> to vector<32x32xf32>
    %cst_744 = arith.constant dense<0.000000e+00> : vector<4x32xf32>
    %698 = tpu.matmul %695, %697, %cst_744 {dimension_numbers = #tpu.dot_dimension_numbers<[1], [0], [0], [1], [0, 0, 1, 1], [], []>} : vector<4x32xf32>, vector<32x32xf32>, vector<4x32xf32> -> vector<4x32xf32>
    %699 = arith.addf %694, %698 : vector<4x32xf32>
    %700 = arith.addf %655, %699 : vector<4x32xf32>
    %701 = arith.addf %565, %700 : vector<4x32xf32>
    %c2_745 = arith.constant 2 : index
    %c0_746 = arith.constant 0 : index
    %702 = vector.load %arg15[%c2_745, %c0_746] : memref<8x32xf32, #tpu.memory_space<vmem>>, vector<4x32xf32>
    tpu.vector_store %arg15[%c2_745, %c0_746], %701 {strides = array<i32>} : memref<8x32xf32, #tpu.memory_space<vmem>>, vector<4x32xf32>,
    %c0_747 = arith.constant 0 : index
    %c0_748 = arith.constant 0 : index
    %703 = vector.load %arg11[%c0_747, %c0_748] : memref<1x16xf32, #tpu.memory_space<vmem>>, vector<1x16xf32>
    %704 = vector.shape_cast %703 : vector<1x16xf32> to vector<1x16xf32>
    %705 = vector.broadcast %704 : vector<1x16xf32> to vector<2x16xf32>
    %c0_749 = arith.constant 0 : index
    %c0_750 = arith.constant 0 : index
    %706 = tpu.strided_load %arg15[%c0_749, %c0_750] {strides = array<i32: 2, 1>} : memref<8x32xf32, #tpu.memory_space<vmem>>, vector<2x32xf32>
    %c0_751 = arith.constant 0 : index
    %c0_752 = arith.constant 0 : index
    %c0_753 = arith.constant 0 : index
    %707 = vector.load %arg10[%c0_751, %c0_752, %c0_753] : memref<5x32x16xf32, #tpu.memory_space<vmem>>, vector<1x32x16xf32>
    %708 = vector.shape_cast %707 : vector<1x32x16xf32> to vector<32x16xf32>
    %cst_754 = arith.constant dense<0.000000e+00> : vector<2x16xf32>
    %709 = tpu.matmul %706, %708, %cst_754 {dimension_numbers = #tpu.dot_dimension_numbers<[1], [0], [0], [1], [0, 0, 1, 1], [], []>} : vector<2x32xf32>, vector<32x16xf32>, vector<2x16xf32> -> vector<2x16xf32>
    %710 = arith.addf %705, %709 : vector<2x16xf32>
    %c1_755 = arith.constant 1 : index
    %c0_756 = arith.constant 0 : index
    %711 = tpu.strided_load %arg15[%c1_755, %c0_756] {strides = array<i32: 2, 1>} : memref<8x32xf32, #tpu.memory_space<vmem>>, vector<2x32xf32>
    %c1_757 = arith.constant 1 : index
    %c0_758 = arith.constant 0 : index
    %c0_759 = arith.constant 0 : index
    %712 = vector.load %arg10[%c1_757, %c0_758, %c0_759] : memref<5x32x16xf32, #tpu.memory_space<vmem>>, vector<1x32x16xf32>
    %713 = vector.shape_cast %712 : vector<1x32x16xf32> to vector<32x16xf32>
    %cst_760 = arith.constant dense<0.000000e+00> : vector<2x16xf32>
    %714 = tpu.matmul %711, %713, %cst_760 {dimension_numbers = #tpu.dot_dimension_numbers<[1], [0], [0], [1], [0, 0, 1, 1], [], []>} : vector<2x32xf32>, vector<32x16xf32>, vector<2x16xf32> -> vector<2x16xf32>
    %715 = arith.addf %710, %714 : vector<2x16xf32>
    %c2_761 = arith.constant 2 : index
    %c0_762 = arith.constant 0 : index
    %716 = tpu.strided_load %arg15[%c2_761, %c0_762] {strides = array<i32: 2, 1>} : memref<8x32xf32, #tpu.memory_space<vmem>>, vector<2x32xf32>
    %c2_763 = arith.constant 2 : index
    %c0_764 = arith.constant 0 : index
    %c0_765 = arith.constant 0 : index
    %717 = vector.load %arg10[%c2_763, %c0_764, %c0_765] : memref<5x32x16xf32, #tpu.memory_space<vmem>>, vector<1x32x16xf32>
    %718 = vector.shape_cast %717 : vector<1x32x16xf32> to vector<32x16xf32>
    %cst_766 = arith.constant dense<0.000000e+00> : vector<2x16xf32>
    %719 = tpu.matmul %716, %718, %cst_766 {dimension_numbers = #tpu.dot_dimension_numbers<[1], [0], [0], [1], [0, 0, 1, 1], [], []>} : vector<2x32xf32>, vector<32x16xf32>, vector<2x16xf32> -> vector<2x16xf32>
    %720 = arith.addf %715, %719 : vector<2x16xf32>
    %c3_767 = arith.constant 3 : index
    %c0_768 = arith.constant 0 : index
    %721 = tpu.strided_load %arg15[%c3_767, %c0_768] {strides = array<i32: 2, 1>} : memref<8x32xf32, #tpu.memory_space<vmem>>, vector<2x32xf32>
    %c3_769 = arith.constant 3 : index
    %c0_770 = arith.constant 0 : index
    %c0_771 = arith.constant 0 : index
    %722 = vector.load %arg10[%c3_769, %c0_770, %c0_771] : memref<5x32x16xf32, #tpu.memory_space<vmem>>, vector<1x32x16xf32>
    %723 = vector.shape_cast %722 : vector<1x32x16xf32> to vector<32x16xf32>
    %cst_772 = arith.constant dense<0.000000e+00> : vector<2x16xf32>
    %724 = tpu.matmul %721, %723, %cst_772 {dimension_numbers = #tpu.dot_dimension_numbers<[1], [0], [0], [1], [0, 0, 1, 1], [], []>} : vector<2x32xf32>, vector<32x16xf32>, vector<2x16xf32> -> vector<2x16xf32>
    %725 = arith.addf %720, %724 : vector<2x16xf32>
    %c4_773 = arith.constant 4 : index
    %c0_774 = arith.constant 0 : index
    %726 = tpu.strided_load %arg15[%c4_773, %c0_774] {strides = array<i32: 2, 1>} : memref<8x32xf32, #tpu.memory_space<vmem>>, vector<2x32xf32>
    %c4_775 = arith.constant 4 : index
    %c0_776 = arith.constant 0 : index
    %c0_777 = arith.constant 0 : index
    %727 = vector.load %arg10[%c4_775, %c0_776, %c0_777] : memref<5x32x16xf32, #tpu.memory_space<vmem>>, vector<1x32x16xf32>
    %728 = vector.shape_cast %727 : vector<1x32x16xf32> to vector<32x16xf32>
    %cst_778 = arith.constant dense<0.000000e+00> : vector<2x16xf32>
    %729 = tpu.matmul %726, %728, %cst_778 {dimension_numbers = #tpu.dot_dimension_numbers<[1], [0], [0], [1], [0, 0, 1, 1], [], []>} : vector<2x32xf32>, vector<32x16xf32>, vector<2x16xf32> -> vector<2x16xf32>
    %730 = arith.addf %725, %729 : vector<2x16xf32>
    %c1_779 = arith.constant 1 : index
    %c0_780 = arith.constant 0 : index
    %c0_781 = arith.constant 0 : index
    %731 = vector.load %arg12[%c1_779, %c0_780, %c0_781] : memref<2x2x16xf32, #tpu.memory_space<vmem>>, vector<1x2x16xf32>
    %732 = vector.shape_cast %731 : vector<1x2x16xf32> to vector<2x16xf32>
    %733 = vector.shape_cast %730 : vector<2x16xf32> to vector<1x2x16xf32>
    tpu.vector_store %arg12[%c1_779, %c0_780, %c0_781], %733 {strides = array<i32>} : memref<2x2x16xf32, #tpu.memory_space<vmem>>, vector<1x2x16xf32>,
    return
  }
  func.func @transform_0(%arg0: i32) -> (i32, i32, i32) {
    %c0_i32 = arith.constant 0 : i32
    %c0_i32_0 = arith.constant 0 : i32
    %c0_i32_1 = arith.constant 0 : i32
    %c0_i32_2 = arith.constant 0 : i32
    return %c0_i32, %c0_i32_0, %c0_i32_1 : i32, i32, i32
  }
  func.func @transform_1(%arg0: i32) -> (i32, i32, i32) {
    %c0_i32 = arith.constant 0 : i32
    %c0_i32_0 = arith.constant 0 : i32
    %c0_i32_1 = arith.constant 0 : i32
    %c0_i32_2 = arith.constant 0 : i32
    return %c0_i32, %c0_i32_0, %c0_i32_1 : i32, i32, i32
  }
  func.func @transform_2(%arg0: i32) -> (i32, i32) {
    %c0_i32 = arith.constant 0 : i32
    %c0_i32_0 = arith.constant 0 : i32
    %c0_i32_1 = arith.constant 0 : i32
    return %c0_i32, %c0_i32_0 : i32, i32
  }
  func.func @transform_3(%arg0: i32) -> (i32, i32, i32) {
    %c0_i32 = arith.constant 0 : i32
    %c0_i32_0 = arith.constant 0 : i32
    %c0_i32_1 = arith.constant 0 : i32
    %c0_i32_2 = arith.constant 0 : i32
    return %c0_i32, %c0_i32_0, %c0_i32_1 : i32, i32, i32
  }
  func.func @transform_4(%arg0: i32) -> (i32, i32, i32) {
    %c0_i32 = arith.constant 0 : i32
    %c0_i32_0 = arith.constant 0 : i32
    %c0_i32_1 = arith.constant 0 : i32
    %c0_i32_2 = arith.constant 0 : i32
    return %c0_i32, %c0_i32_0, %c0_i32_1 : i32, i32, i32
  }
  func.func @transform_5(%arg0: i32) -> (i32, i32, i32) {
    %c0_i32 = arith.constant 0 : i32
    %c0_i32_0 = arith.constant 0 : i32
    %c0_i32_1 = arith.constant 0 : i32
    %c0_i32_2 = arith.constant 0 : i32
    return %c0_i32, %c0_i32_0, %c0_i32_1 : i32, i32, i32
  }
  func.func @transform_6(%arg0: i32) -> (i32, i32) {
    %c0_i32 = arith.constant 0 : i32
    %c0_i32_0 = arith.constant 0 : i32
    %c0_i32_1 = arith.constant 0 : i32
    return %c0_i32, %c0_i32_0 : i32, i32
  }
  func.func @transform_7(%arg0: i32) -> (i32, i32, i32) {
    %c0_i32 = arith.constant 0 : i32
    %c0_i32_0 = arith.constant 0 : i32
    %c0_i32_1 = arith.constant 0 : i32
    %c0_i32_2 = arith.constant 0 : i32
    return %c0_i32, %c0_i32_0, %c0_i32_1 : i32, i32, i32
  }
  func.func @transform_8(%arg0: i32) -> (i32, i32, i32) {
    %c0_i32 = arith.constant 0 : i32
    %c0_i32_0 = arith.constant 0 : i32
    %c0_i32_1 = arith.constant 0 : i32
    %c0_i32_2 = arith.constant 0 : i32
    return %c0_i32, %c0_i32_0, %c0_i32_1 : i32, i32, i32
  }
  func.func @transform_9(%arg0: i32) -> (i32, i32, i32) {
    %c0_i32 = arith.constant 0 : i32
    %c0_i32_0 = arith.constant 0 : i32
    %c0_i32_1 = arith.constant 0 : i32
    %c0_i32_2 = arith.constant 0 : i32
    return %c0_i32, %c0_i32_0, %c0_i32_1 : i32, i32, i32
  }
  func.func @transform_10(%arg0: i32) -> (i32, i32) {
    %c0_i32 = arith.constant 0 : i32
    %c0_i32_0 = arith.constant 0 : i32
    %c0_i32_1 = arith.constant 0 : i32
    return %c0_i32, %c0_i32_0 : i32, i32
  }
  func.func @transform_11(%arg0: i32) -> (i32, i32, i32) {
    %c0_i32 = arith.constant 0 : i32
    %c0_i32_0 = arith.constant 0 : i32
    %c0_i32_1 = arith.constant 0 : i32
    %c0_i32_2 = arith.constant 0 : i32
    return %c0_i32, %c0_i32_0, %c0_i32_1 : i32, i32, i32
  }
}

</mosaic_0001>

<bundles_post_ra>
// kernel: tile.78
= control target key start
LH: loop header
LB: loop body
LE: loop exit
PB: predicated region body
PF: predicated region fallthrough
CT: control target
= control target key end

     0   :  { %s22_s0 = inlined_call_operand.vmem [shape: f32[8], index: 0, kind: input, shape index: {}]   ;;  %s23_s1 = inlined_call_operand.vmem [shape: f32[8,8], index: 1, kind: output, shape index: {}]  }
   0x1   :  { %v4_v0 = vld [vmem:[%s22_s0] ss:$0 sm:$0xff] }
   0x2   :  { %5 = vst [vmem:[%s23_s1] sm:$0xff] %v4_v0 }

// kernel: tile.79
= control target key start
LH: loop header
LB: loop body
LE: loop exit
PB: predicated region body
PF: predicated region fallthrough
CT: control target
= control target key end

     0   :  { %s67_s10 = smov 56   ;;  %s68_s11 = smov 40   ;;  %vm3_vm0 = vcmask 64512   ;;  %vm9_vm1 = vcmask 523712   ;;  %vm15_vm2 = vcmask 458112   ;;  %vm21_vm3 = vcmask 392512   ;;  %s111_s0 = inlined_call_operand.vmem [shape: f32[8,8], index: 0, kind: input, shape index: {}]   ;;  %s112_s1 = inlined_call_operand.vmem [shape: f32[1,64], index: 1, kind: output, shape index: {}]  }
   0x1   :  { %v53_v0 = vld [vmem:[%s111_s0 + $0x7] sm:$0x1]   ;;  %v55_v1 = vld [vmem:[%s111_s0 + $0x5] sm:$0x1]   ;;  %v54_v2 = vld [vmem:[%s111_s0 + $0x6] sm:$0x1]  }
   0x2   :  { %7 = vrot.lane.b32.xlu0 %v53_v0, %s67_s10  ;;  %19 = vrot.lane.b32.xlu1 %v55_v1, %s68_s11  ;;  %v56_v3 = vld [vmem:[%s111_s0 + $0x4] sm:$0x1]   ;;  %v2_v4 = vld [vmem:[%s111_s0] sm:$0x1]   ;;  %s69_s18 = smov 48   ;;  %s70_s19 = smov 32  }
   0x3   :  { %4 = vst.msk [vmem:[#allocation0] sm:$0x1] %vm3_vm0, %v2_v4   ;;  %v57_v5 = vld [vmem:[%s111_s0 + $0x3] sm:$0x1]   ;;  %v58_v6 = vld [vmem:[%s111_s0 + $0x2] sm:$0x1]  }
   0x4   :  { %s71_s24 = smov 24   ;;  %s72_s25 = smov 16   ;;  %v59_v7 = vld [vmem:[%s111_s0 + $0x1] sm:$0x1]   ;;  %vm27_vm4 = vcmask 326912   ;;  %vm33_vm5 = vcmask 261312  }
   0x5   :  { %s73_s0 = smov 8   ;;  %vm39_vm6 = vcmask 195712   ;;  %vm45_vm7 = vcmask 130112  }
   0x6   :  { %13 = vrot.lane.b32.xlu0 %v54_v2, %s69_s18  ;;  %25 = vrot.lane.b32.xlu1 %v56_v3, %s70_s19 }
   0xa   :  { %31 = vrot.lane.b32.xlu0 %v57_v5, %s71_s24  ;;  %37 = vrot.lane.b32.xlu1 %v58_v6, %s72_s25 }
   0xe   :  { %43 = vrot.lane.b32.xlu0 %v59_v7, %s73_s0 }
  0x74   :  { %v8_v8 = vpop.permute.xlu0 %7   ;;  %v20_v9 = vpop.permute.xlu1 %19  }
  0x75   :  { %10 = vst.msk [vmem:[#allocation0] sm:$0x1] %vm9_vm1, %v8_v8  }
  0x78   :  { %v14_v10 = vpop.permute.xlu0 %13   ;;  %v26_v11 = vpop.permute.xlu1 %25  }
  0x79   :  { %16 = vst.msk [vmem:[#allocation0] sm:$0x1] %vm15_vm2, %v14_v10  }
  0x7a   :  { %22 = vst.msk [vmem:[#allocation0] sm:$0x1] %vm21_vm3, %v20_v9  }
  0x7b   :  { %28 = vst.msk [vmem:[#allocation0] sm:$0x1] %vm27_vm4, %v26_v11  }
  0x7c   :  { %v32_v12 = vpop.permute.xlu0 %31   ;;  %v38_v13 = vpop.permute.xlu1 %37  }
  0x7d   :  { %34 = vst.msk [vmem:[#allocation0] sm:$0x1] %vm33_vm5, %v32_v12  }
  0x7e   :  { %40 = vst.msk [vmem:[#allocation0] sm:$0x1] %vm39_vm6, %v38_v13  }
  0x80   :  { %v44_v14 = vpop.permute.xlu0 %43  }
  0x81   :  { %46 = vst.msk [vmem:[#allocation0] sm:$0x1] %vm45_vm7, %v44_v14  }
  0x88   :  { %v50_v15 = vld [vmem:[#allocation0] sm:$0x1] }
  0x89   :  { %52 = vst [vmem:[%s112_s1] sm:$0x1] %v50_v15 }

// kernel: tile.104
= control target key start
LH: loop header
LB: loop body
LE: loop exit
PB: predicated region body
PF: predicated region fallthrough
CT: control target
= control target key end

     0   :  { %s67_s10 = smov 56   ;;  %s68_s11 = smov 40   ;;  %vm3_vm0 = vcmask 64512   ;;  %vm9_vm1 = vcmask 523712   ;;  %vm15_vm2 = vcmask 458112   ;;  %vm21_vm3 = vcmask 392512   ;;  %s111_s0 = inlined_call_operand.vmem [shape: f32[8,8], index: 0, kind: input, shape index: {}]   ;;  %s112_s1 = inlined_call_operand.vmem [shape: f32[1,1,64], index: 1, kind: output, shape index: {}]  }
   0x1   :  { %v53_v0 = vld [vmem:[%s111_s0 + $0x7] sm:$0x1]   ;;  %v55_v1 = vld [vmem:[%s111_s0 + $0x5] sm:$0x1]   ;;  %v54_v2 = vld [vmem:[%s111_s0 + $0x6] sm:$0x1]  }
   0x2   :  { %7 = vrot.lane.b32.xlu0 %v53_v0, %s67_s10  ;;  %19 = vrot.lane.b32.xlu1 %v55_v1, %s68_s11  ;;  %v56_v3 = vld [vmem:[%s111_s0 + $0x4] sm:$0x1]   ;;  %v2_v4 = vld [vmem:[%s111_s0] sm:$0x1]   ;;  %s69_s18 = smov 48   ;;  %s70_s19 = smov 32  }
   0x3   :  { %4 = vst.msk [vmem:[#allocation0] sm:$0x1] %vm3_vm0, %v2_v4   ;;  %v57_v5 = vld [vmem:[%s111_s0 + $0x3] sm:$0x1]   ;;  %v58_v6 = vld [vmem:[%s111_s0 + $0x2] sm:$0x1]  }
   0x4   :  { %s71_s24 = smov 24   ;;  %s72_s25 = smov 16   ;;  %v59_v7 = vld [vmem:[%s111_s0 + $0x1] sm:$0x1]   ;;  %vm27_vm4 = vcmask 326912   ;;  %vm33_vm5 = vcmask 261312  }
   0x5   :  { %s73_s0 = smov 8   ;;  %vm39_vm6 = vcmask 195712   ;;  %vm45_vm7 = vcmask 130112  }
   0x6   :  { %13 = vrot.lane.b32.xlu0 %v54_v2, %s69_s18  ;;  %25 = vrot.lane.b32.xlu1 %v56_v3, %s70_s19 }
   0xa   :  { %31 = vrot.lane.b32.xlu0 %v57_v5, %s71_s24  ;;  %37 = vrot.lane.b32.xlu1 %v58_v6, %s72_s25 }
   0xe   :  { %43 = vrot.lane.b32.xlu0 %v59_v7, %s73_s0 }
  0x74   :  { %v8_v8 = vpop.permute.xlu0 %7   ;;  %v20_v9 = vpop.permute.xlu1 %19  }
  0x75   :  { %10 = vst.msk [vmem:[#allocation0] sm:$0x1] %vm9_vm1, %v8_v8  }
  0x78   :  { %v14_v10 = vpop.permute.xlu0 %13   ;;  %v26_v11 = vpop.permute.xlu1 %25  }
  0x79   :  { %16 = vst.msk [vmem:[#allocation0] sm:$0x1] %vm15_vm2, %v14_v10  }
  0x7a   :  { %22 = vst.msk [vmem:[#allocation0] sm:$0x1] %vm21_vm3, %v20_v9  }
  0x7b   :  { %28 = vst.msk [vmem:[#allocation0] sm:$0x1] %vm27_vm4, %v26_v11  }
  0x7c   :  { %v32_v12 = vpop.permute.xlu0 %31   ;;  %v38_v13 = vpop.permute.xlu1 %37  }
  0x7d   :  { %34 = vst.msk [vmem:[#allocation0] sm:$0x1] %vm33_vm5, %v32_v12  }
  0x7e   :  { %40 = vst.msk [vmem:[#allocation0] sm:$0x1] %vm39_vm6, %v38_v13  }
  0x80   :  { %v44_v14 = vpop.permute.xlu0 %43  }
  0x81   :  { %46 = vst.msk [vmem:[#allocation0] sm:$0x1] %vm45_vm7, %v44_v14  }
  0x88   :  { %v50_v15 = vld [vmem:[#allocation0] sm:$0x1] }
  0x89   :  { %52 = vst [vmem:[%s112_s1] sm:$0x1] %v50_v15 }

// kernel: tile.143
= control target key start
LH: loop header
LB: loop body
LE: loop exit
PB: predicated region body
PF: predicated region fallthrough
CT: control target
= control target key end

     0   :  { %s22_s0 = inlined_call_operand.vmem [shape: f32[8], index: 0, kind: input, shape index: {}]   ;;  %s23_s1 = inlined_call_operand.vmem [shape: f32[4,8], index: 1, kind: output, shape index: {}]  }
   0x1   :  { %v4_v0 = vld [vmem:[%s22_s0] ss:$0 sm:$0xff] }
   0x2   :  { %5 = vst [vmem:[%s23_s1] sm:$0xf] %v4_v0 }

// kernel: tile.144
= control target key start
LH: loop header
LB: loop body
LE: loop exit
PB: predicated region body
PF: predicated region fallthrough
CT: control target
= control target key end

     0   :  { %vm7_vm0 = vcmask 64512   ;;  %s37_s8 = smov 8   ;;  %s38_s9 = smov 16   ;;  %vm13_vm1 = vcmask 261312   ;;  %vm19_vm2 = vcmask 195712   ;;  %vm25_vm3 = vcmask 130112   ;;  %s55_s0 = inlined_call_operand.vmem [shape: f32[4,8], index: 0, kind: input, shape index: {}]   ;;  %s56_s1 = inlined_call_operand.vmem [shape: f32[1,32], index: 1, kind: output, shape index: {}]  }
   0x1   :  { %v4_v0 = vld [vmem:[%s55_s0] sm:$0xf]  ;;  %s36_s0 = smov 24  }
   0x2   :  { %5 = vst [vmem:[#allocation1] sm:$0xf] %v4_v0 }
   0x9   :  { %v10_v1 = vld [vmem:[#allocation1 + $0x3] sm:$0x1]   ;;  %v22_v2 = vld [vmem:[#allocation1 + $0x1] sm:$0x1]   ;;  %v6_v3 = vld [vmem:[#allocation1] sm:$0x1]  }
   0xa   :  { %11 = vrot.lane.b32.xlu0 %v10_v1, %s36_s0  ;;  %23 = vrot.lane.b32.xlu1 %v22_v2, %s37_s8  ;;  %v16_v4 = vld [vmem:[#allocation1 + $0x2] sm:$0x1]   ;;  %8 = vst.msk [vmem:[#allocation0] sm:$0x1] %vm7_vm0, %v6_v3  }
   0xe   :  { %17 = vrot.lane.b32.xlu0 %v16_v4, %s38_s9 }
  0x7c   :  { %v12_v5 = vpop.permute.xlu0 %11   ;;  %v24_v6 = vpop.permute.xlu1 %23  }
  0x7d   :  { %14 = vst.msk [vmem:[#allocation0] sm:$0x1] %vm13_vm1, %v12_v5  }
  0x80   :  { %v18_v7 = vpop.permute.xlu0 %17  }
  0x81   :  { %20 = vst.msk [vmem:[#allocation0] sm:$0x1] %vm19_vm2, %v18_v7  }
  0x82   :  { %26 = vst.msk [vmem:[#allocation0] sm:$0x1] %vm25_vm3, %v24_v6  }
  0x89   :  { %v30_v8 = vld [vmem:[#allocation0] sm:$0x1] }
  0x8a   :  { %32 = vst [vmem:[%s56_s1] sm:$0x1] %v30_v8 }

// kernel: tile.134
= control target key start
LH: loop header
LB: loop body
LE: loop exit
PB: predicated region body
PF: predicated region fallthrough
CT: control target
= control target key end

     0   :  { %vm7_vm0 = vcmask 64512   ;;  %s37_s8 = smov 8   ;;  %s38_s9 = smov 16   ;;  %vm13_vm1 = vcmask 261312   ;;  %vm19_vm2 = vcmask 195712   ;;  %vm25_vm3 = vcmask 130112   ;;  %s55_s0 = inlined_call_operand.vmem [shape: f32[4,8], index: 0, kind: input, shape index: {}]   ;;  %s56_s1 = inlined_call_operand.vmem [shape: f32[1,1,32], index: 1, kind: output, shape index: {}]  }
   0x1   :  { %v4_v0 = vld [vmem:[%s55_s0] sm:$0xf]  ;;  %s36_s0 = smov 24  }
   0x2   :  { %5 = vst [vmem:[#allocation1] sm:$0xf] %v4_v0 }
   0x9   :  { %v10_v1 = vld [vmem:[#allocation1 + $0x3] sm:$0x1]   ;;  %v22_v2 = vld [vmem:[#allocation1 + $0x1] sm:$0x1]   ;;  %v6_v3 = vld [vmem:[#allocation1] sm:$0x1]  }
   0xa   :  { %11 = vrot.lane.b32.xlu0 %v10_v1, %s36_s0  ;;  %23 = vrot.lane.b32.xlu1 %v22_v2, %s37_s8  ;;  %v16_v4 = vld [vmem:[#allocation1 + $0x2] sm:$0x1]   ;;  %8 = vst.msk [vmem:[#allocation0] sm:$0x1] %vm7_vm0, %v6_v3  }
   0xe   :  { %17 = vrot.lane.b32.xlu0 %v16_v4, %s38_s9 }
  0x7c   :  { %v12_v5 = vpop.permute.xlu0 %11   ;;  %v24_v6 = vpop.permute.xlu1 %23  }
  0x7d   :  { %14 = vst.msk [vmem:[#allocation0] sm:$0x1] %vm13_vm1, %v12_v5  }
  0x80   :  { %v18_v7 = vpop.permute.xlu0 %17  }
  0x81   :  { %20 = vst.msk [vmem:[#allocation0] sm:$0x1] %vm19_vm2, %v18_v7  }
  0x82   :  { %26 = vst.msk [vmem:[#allocation0] sm:$0x1] %vm25_vm3, %v24_v6  }
  0x89   :  { %v30_v8 = vld [vmem:[#allocation0] sm:$0x1] }
  0x8a   :  { %32 = vst [vmem:[%s56_s1] sm:$0x1] %v30_v8 }

// kernel: tile.148
= control target key start
LH: loop header
LB: loop body
LE: loop exit
PB: predicated region body
PF: predicated region fallthrough
CT: control target
= control target key end

     0   :  { %s22_s0 = inlined_call_operand.vmem [shape: f32[8], index: 0, kind: input, shape index: {}]   ;;  %s23_s1 = inlined_call_operand.vmem [shape: f32[2,8], index: 1, kind: output, shape index: {}]  }
   0x1   :  { %v4_v0 = vld [vmem:[%s22_s0] ss:$0 sm:$0xff] }
   0x2   :  { %5 = vst [vmem:[%s23_s1] sm:$0x3] %v4_v0 }

// kernel: tile.149
= control target key start
LH: loop header
LB: loop body
LE: loop exit
PB: predicated region body
PF: predicated region fallthrough
CT: control target
= control target key end

     0   :  { %vm7_vm0 = vcmask 64512   ;;  %vm13_vm1 = vcmask 130112   ;;  %s39_s0 = inlined_call_operand.vmem [shape: f32[2,8], index: 0, kind: input, shape index: {}]   ;;  %s40_s1 = inlined_call_operand.vmem [shape: f32[1,16], index: 1, kind: output, shape index: {}]  }
   0x1   :  { %v4_v0 = vld [vmem:[%s39_s0] sm:$0x3]  ;;  %s22_s0 = smov 8  }
   0x2   :  { %5 = vst [vmem:[#allocation1] sm:$0x3] %v4_v0 }
   0x9   :  { %v10_v1 = vld [vmem:[#allocation1 + $0x1] sm:$0x1]   ;;  %v6_v2 = vld [vmem:[#allocation1] sm:$0x1]  }
   0xa   :  { %11 = vrot.lane.b32.xlu0 %v10_v1, %s22_s0  ;;  %8 = vst.msk [vmem:[#allocation0] sm:$0x1] %vm7_vm0, %v6_v2  }
  0x7c   :  { %v12_v3 = vpop.permute.xlu0 %11  }
  0x7d   :  { %14 = vst.msk [vmem:[#allocation0] sm:$0x1] %vm13_vm1, %v12_v3  }
  0x84   :  { %v18_v4 = vld [vmem:[#allocation0] sm:$0x1] }
  0x85   :  { %20 = vst [vmem:[%s40_s1] sm:$0x1] %v18_v4 }

// kernel: res_encode_net.1
= control target key start
LH: loop header
LB: loop body
LE: loop exit
PB: predicated region body
PF: predicated region fallthrough
CT: control target
= control target key end

     0   :  { %v13248_v0 = vmov 0.0|0.0   ;;  %vm13249_vm0 = vmmov 0   ;;  %v13250_v4 = vmov 0.0   ;;  %vm41_vm1 = vcmask 523264   ;;  %s16306_s1 = inlined_call_operand.vmem [shape: f32[5,128,64], index: 1, kind: input, shape index: {}]   ;;  %s16307_s0 = inlined_call_operand.vmem [shape: f32[2,16,128], index: 0, kind: input, shape index: {}]   ;;  %s16308_s3 = inlined_call_operand.vmem [shape: f32[18,64,64], index: 3, kind: input, shape index: {}]   ;;  %s16309_s2 = inlined_call_operand.vmem [shape: f32[1,64], index: 2, kind: input, shape index: {}]   ;;  %s16310_s4 = inlined_call_operand.vmem [shape: f32[6,1,64], index: 4, kind: input, shape index: {}]   ;;  %s16311_s5 = inlined_call_operand.vmem [shape: f32[5,64,32], index: 5, kind: input, shape index: {}]   ;;  %s16312_s7 = inlined_call_operand.vmem [shape: f32[18,32,32], index: 7, kind: input, shape index: {}]   ;;  %s16313_s6 = inlined_call_operand.vmem [shape: f32[1,32], index: 6, kind: input, shape index: {}]   ;;  %s16314_s8 = inlined_call_operand.vmem [shape: f32[6,1,32], index: 8, kind: input, shape index: {}]   ;;  %s16315_s9 = inlined_call_operand.vmem [shape: f32[5,32,16], index: 9, kind: input, shape index: {}]   ;;  %s16316_s10 = inlined_call_operand.vmem [shape: f32[1,16], index: 10, kind: input, shape index: {}]   ;;  %s16317_s11 = inlined_call_operand.vmem [shape: f32[2,2,16], index: 11, kind: output, shape index: {}]  }
   0x1   :  { %12064 = vmatprep.subr.bf16.mxu0 %v13248_v0  ;;  %v59_v1 = vld [vmem:[%s16306_s1] sm:$0xff]  ;;  %v60_v2 = vld [vmem:[%s16306_s1 + $0x8] sm:$0xff]  ;;  %v61_v3 = vld [vmem:[%s16306_s1 + $0x10] sm:$0xff]  ;;  %10366 = vmatprep.mubr.msk.f32.mxu0 %vm13249_vm0, %v13250_v4  ;;  %38 = vst [vmem:[#allocation2] sm:$0xff] %v13250_v4  ;;  %vm43_vm2 = vcmask 519168   ;;  %vm45_vm3 = vcmask 261120  }
   0x2   :  { %39 = vst [vmem:[#allocation2 + $0x8] sm:$0xff] %v13250_v4  ;;  %40 = vst [vmem:[#allocation2 + $0x10] sm:$0xf] %v13250_v4  ;;  %v12065_v5 = vpack.c.bf16 %v60_v2, %v59_v1  ;;  %v62_v6 = vld [vmem:[%s16306_s1 + $0x18] sm:$0xff]  ;;  %12196 = vmatprep.subr.bf16.mxu1 %v13248_v0  ;;  %10544 = vmatprep.mubr.msk.f32.mxu1 %vm13249_vm0, %v13250_v4  ;;  %v63_v8 = vld [vmem:[%s16306_s1 + $0x20] sm:$0xff]  ;;  %vm2512_vm4 = vcmask 257024  }
   0x3   :  { %v12068_v7 = vpack.c.bf16 %v62_v6, %v61_v3  ;;  %v64_v9 = vld [vmem:[%s16306_s1 + $0x28] sm:$0xff]  ;;  %v47_v10 = vld [vmem:[%s16307_s0] sm:$0xff]  ;;  %v65_v13 = vld [vmem:[%s16306_s1 + $0x30] sm:$0xff]  ;;  %42 = vst.msk [vmem:[#allocation3] sm:$0xff] %vm41_vm1, %v13250_v4  ;;  %vm4425_vm5 = vcmask 123904  }
   0x4   :  { %12066 = vmatpush3.bf16.msra.mxu0 %v12065_v5  ;;  %v48_v11 = vld [vmem:[%s16307_s0 + $0x8] sm:$0xff]  ;;  %49 = vst [vmem:[#allocation2 + $0x2] sm:$0xff] %v47_v10  ;;  %v12071_v12 = vpack.c.bf16 %v64_v9, %v63_v8  ;;  %v66_v14 = vld [vmem:[%s16306_s1 + $0x38] sm:$0xff]  ;;  %v67_v16 = vld [vmem:[%s16306_s1 + $0x40] sm:$0xff] }
   0x5   :  { %12067 = vmatprep.subr.bf16.mxu0 %v13248_v0  ;;  %50 = vst [vmem:[#allocation2 + $0xa] sm:$0xff] %v48_v11  ;;  %v12074_v15 = vpack.c.bf16 %v66_v14, %v65_v13  ;;  %v68_v17 = vld [vmem:[%s16306_s1 + $0x48] sm:$0xff]  ;;  %v69_v19 = vld [vmem:[%s16306_s1 + $0x50] sm:$0xff]  ;;  %v70_v20 = vld [vmem:[%s16306_s1 + $0x58] sm:$0xff] }
   0x6   :  { %v12077_v18 = vpack.c.bf16 %v68_v17, %v67_v16  ;;  %v12080_v21 = vpack.c.bf16 %v70_v20, %v69_v19  ;;  %v71_v22 = vld [vmem:[%s16306_s1 + $0x60] sm:$0xff]  ;;  %v72_v23 = vld [vmem:[%s16306_s1 + $0x68] sm:$0xff]  ;;  %v73_v25 = vld [vmem:[%s16306_s1 + $0x70] sm:$0xff]  ;;  %44 = vst.msk [vmem:[#allocation3 + $0x8] sm:$0xf] %vm43_vm2, %v13250_v4 }
   0x7   :  { %v12083_v24 = vpack.c.bf16 %v72_v23, %v71_v22  ;;  %v74_v26 = vld [vmem:[%s16306_s1 + $0x78] sm:$0xff]  ;;  %v8744_v28 = vld [vmem:[%s16306_s1 + $0x80] sm:$0xff]  ;;  %v8745_v29 = vld [vmem:[%s16306_s1 + $0x88] sm:$0xff]  ;;  %46 = vst.msk [vmem:[#allocation4] sm:$0xff] %vm45_vm3, %v13250_v4 }
   0x8   :  { %12069 = vmatpush3.bf16.msra.mxu0 %v12068_v7  ;;  %v12086_v27 = vpack.c.bf16 %v74_v26, %v73_v25  ;;  %v12089_v31 = vpack.c.bf16 %v8745_v29, %v8744_v28  ;;  %v8746_v32 = vld [vmem:[%s16306_s1 + $0x90] sm:$0xff]  ;;  %v8747_v33 = vld [vmem:[%s16306_s1 + $0x98] sm:$0xff]  ;;  %v8810_v41 = vld [vmem:[%s16308_s3 + $0x40] sm:$0xff] }
   0x9   :  { %12070 = vmatprep.subr.bf16.mxu0 %v13248_v0  ;;  %v9130_v38 = vld [vmem:[%s16307_s0 + $0x10] sm:$0xff]  ;;  %v9131_v39 = vld [vmem:[%s16307_s0 + $0x18] sm:$0xff]  ;;  %v12092_v40 = vpack.c.bf16 %v8747_v33, %v8746_v32  ;;  %v8811_v42 = vld [vmem:[%s16308_s3 + $0x48] sm:$0xff] }
   0xa   :  { %v8748_v43 = vld [vmem:[%s16306_s1 + $0xa0] sm:$0xff]  ;;  %v8749_v44 = vld [vmem:[%s16306_s1 + $0xa8] sm:$0xff]  ;;  %v12197_v45 = vpack.c.bf16 %v8811_v42, %v8810_v41  ;;  %v8750_v47 = vld [vmem:[%s16306_s1 + $0xb0] sm:$0xff] }
   0xb   :  { %v12095_v46 = vpack.c.bf16 %v8749_v44, %v8748_v43  ;;  %v8751_v48 = vld [vmem:[%s16306_s1 + $0xb8] sm:$0xff]  ;;  %v8752_v50 = vld [vmem:[%s16306_s1 + $0xc0] sm:$0xff]  ;;  %v8753_v51 = vld [vmem:[%s16306_s1 + $0xc8] sm:$0xff] }
   0xc   :  { %12072 = vmatpush3.bf16.msra.mxu0 %v12071_v12  ;;  %v58_v30 = vld [vmem:[#allocation2] ss:$2 sm:$0xff]  ;;  %v147_v34 = vld [vmem:[#allocation2 + $0x1] ss:$2 sm:$0xff]  ;;  %12198 = vmatpush3.bf16.msra.mxu1 %v12197_v45  ;;  %v12098_v49 = vpack.c.bf16 %v8751_v48, %v8750_v47  ;;  %v12101_v52 = vpack.c.bf16 %v8753_v51, %v8752_v50  ;;  %v8754_v53 = vld [vmem:[%s16306_s1 + $0xd0] sm:$0xff] }
   0xd   :  { %12073 = vmatprep.subr.bf16.mxu0 %v13248_v0  ;;  %v13394_v35 = vld [vmem:[#allocation2 + $0x2] ss:$2 sm:$0xff]  ;;  %v13396_v36 = vld [vmem:[#allocation2 + $0x3] ss:$2 sm:$0xff]  ;;  %12199 = vmatprep.subr.bf16.mxu1 %v13248_v0  ;;  %v8755_v54 = vld [vmem:[%s16306_s1 + $0xd8] sm:$0xff] }
   0xe   :  { %v13398_v37 = vld [vmem:[#allocation2 + $0x4] ss:$2 sm:$0xff]  ;;  %v12104_v55 = vpack.c.bf16 %v8755_v54, %v8754_v53  ;;  %v8759_v60 = vld [vmem:[%s16306_s1 + $0xf8] sm:$0xff] }
   0xf   :  { %4430 = vst [vmem:[#allocation2 + $0x2] sm:$0xff] %v9130_v38  ;;  %4431 = vst [vmem:[#allocation2 + $0xa] sm:$0xff] %v9131_v39  ;;  %v8756_v56 = vld [vmem:[%s16306_s1 + $0xe0] sm:$0xff]  ;;  %v8757_v57 = vld [vmem:[%s16306_s1 + $0xe8] sm:$0xff] }
  0x10   :  { %12075 = vmatpush3.bf16.msra.mxu0 %v12074_v15  ;;  %v12107_v58 = vpack.c.bf16 %v8757_v57, %v8756_v56  ;;  %v8758_v59 = vld [vmem:[%s16306_s1 + $0xf0] sm:$0xff]  ;;  %v8760_v62 = vld [vmem:[%s16306_s1 + $0x100] sm:$0xff]  ;;  %v8761_v63 = vld [vmem:[%s16306_s1 + $0x108] sm:$0xff] }
  0x11   :  { %12076 = vmatprep.subr.bf16.mxu0 %v13248_v0  ;;  %v12110_v61 = vpack.c.bf16 %v8759_v60, %v8758_v59  ;;  %v12113_v1 = vpack.c.bf16 %v8761_v63, %v8760_v62  ;;  %v8762_v2 = vld [vmem:[%s16306_s1 + $0x110] sm:$0xff]  ;;  %v8763_v3 = vld [vmem:[%s16306_s1 + $0x118] sm:$0xff]  ;;  %v8764_v6 = vld [vmem:[%s16306_s1 + $0x120] sm:$0xff] }
  0x12   :  { %v12116_v5 = vpack.c.bf16 %v8763_v3, %v8762_v2  ;;  %v8765_v7 = vld [vmem:[%s16306_s1 + $0x128] sm:$0xff]  ;;  %v8766_v9 = vld [vmem:[%s16306_s1 + $0x130] sm:$0xff]  ;;  %v8767_v10 = vld [vmem:[%s16306_s1 + $0x138] sm:$0xff] }
  0x13   :  { %v12119_v8 = vpack.c.bf16 %v8765_v7, %v8764_v6  ;;  %v12122_v11 = vpack.c.bf16 %v8767_v10, %v8766_v9  ;;  %v8768_v12 = vld [vmem:[%s16306_s1 + $0x140] sm:$0xff]  ;;  %v8769_v13 = vld [vmem:[%s16306_s1 + $0x148] sm:$0xff]  ;;  %v8770_v15 = vld [vmem:[%s16306_s1 + $0x150] sm:$0xff] }
  0x14   :  { %12078 = vmatpush3.bf16.msra.mxu0 %v12077_v18  ;;  %v12125_v14 = vpack.c.bf16 %v8769_v13, %v8768_v12  ;;  %v8771_v16 = vld [vmem:[%s16306_s1 + $0x158] sm:$0xff]  ;;  %v8772_v18 = vld [vmem:[%s16306_s1 + $0x160] sm:$0xff]  ;;  %v8773_v19 = vld [vmem:[%s16306_s1 + $0x168] sm:$0xff] }
  0x15   :  { %12079 = vmatprep.subr.bf16.mxu0 %v13248_v0  ;;  %v12128_v17 = vpack.c.bf16 %v8771_v16, %v8770_v15  ;;  %v12131_v20 = vpack.c.bf16 %v8773_v19, %v8772_v18  ;;  %v8775_v22 = vld [vmem:[%s16306_s1 + $0x178] sm:$0xff]  ;;  %v8777_v25 = vld [vmem:[%s16306_s1 + $0x188] sm:$0xff]  ;;  %v8782_v33 = vld [vmem:[%s16306_s1 + $0x1b0] sm:$0xff] }
  0x16   :  { %v8779_v28 = vld [vmem:[%s16306_s1 + $0x198] sm:$0xff]  ;;  %v8784_v38 = vld [vmem:[%s16306_s1 + $0x1c0] sm:$0xff]  ;;  %v8785_v39 = vld [vmem:[%s16306_s1 + $0x1c8] sm:$0xff] }
  0x17   :  { %v8786_v41 = vld [vmem:[%s16306_s1 + $0x1d0] sm:$0xff]  ;;  %v8787_v42 = vld [vmem:[%s16306_s1 + $0x1d8] sm:$0xff]  ;;  %v8788_v44 = vld [vmem:[%s16306_s1 + $0x1e0] sm:$0xff] }
  0x18   :  { %12081 = vmatpush3.bf16.msra.mxu0 %v12080_v21  ;;  %v8774_v21 = vld [vmem:[%s16306_s1 + $0x170] sm:$0xff]  ;;  %v12152_v43 = vpack.c.bf16 %v8787_v42, %v8786_v41  ;;  %v8789_v45 = vld [vmem:[%s16306_s1 + $0x1e8] sm:$0xff]  ;;  %v8791_v48 = vld [vmem:[%s16306_s1 + $0x1f8] sm:$0xff] }
  0x19   :  { %12082 = vmatprep.subr.bf16.mxu0 %v13248_v0  ;;  %v12134_v23 = vpack.c.bf16 %v8775_v22, %v8774_v21  ;;  %v8790_v47 = vld [vmem:[%s16306_s1 + $0x1f0] sm:$0xff]  ;;  %v8792_v50 = vld [vmem:[%s16306_s1 + $0x200] sm:$0xff]  ;;  %v8793_v51 = vld [vmem:[%s16306_s1 + $0x208] sm:$0xff] }
  0x1a   :  { %v8794_v53 = vld [vmem:[%s16306_s1 + $0x210] sm:$0xff]  ;;  %v8795_v54 = vld [vmem:[%s16306_s1 + $0x218] sm:$0xff]  ;;  %v8796_v56 = vld [vmem:[%s16306_s1 + $0x220] sm:$0xff] }
  0x1b   :  { %v8797_v57 = vld [vmem:[%s16306_s1 + $0x228] sm:$0xff]  ;;  %v8799_v59 = vld [vmem:[%s16306_s1 + $0x238] sm:$0xff]  ;;  %v8814_v19 = vld [vmem:[%s16308_s3 + $0x60] sm:$0xff] }
  0x1c   :  { %12084 = vmatpush3.bf16.msra.mxu0 %v12083_v24  ;;  %v8776_v24 = vld [vmem:[%s16306_s1 + $0x180] sm:$0xff]  ;;  %v8801_v62 = vld [vmem:[%s16306_s1 + $0x248] sm:$0xff]  ;;  %v8803_v2 = vld [vmem:[%s16306_s1 + $0x258] sm:$0xff] }
  0x1d   :  { %12085 = vmatprep.subr.bf16.mxu0 %v13248_v0  ;;  %v12137_v26 = vpack.c.bf16 %v8777_v25, %v8776_v24  ;;  %v8805_v6 = vld [vmem:[%s16306_s1 + $0x268] sm:$0xff]  ;;  %v8807_v9 = vld [vmem:[%s16306_s1 + $0x278] sm:$0xff]  ;;  %v520_v22 = vld [vmem:[%s16308_s3 + $0x20] sm:$0xff] }
  0x1e   :  { %v517_v12 = vld [vmem:[%s16308_s3 + $0x8] sm:$0xff]  ;;  %v8813_v15 = vld [vmem:[%s16308_s3 + $0x58] sm:$0xff]  ;;  %v8816_v25 = vld [vmem:[%s16308_s3 + $0x70] sm:$0xff] }
  0x1f   :  { %v8821_v41 = vld [vmem:[%s16308_s3 + $0x90] sm:$0xff]  ;;  %v8822_v42 = vld [vmem:[%s16308_s3 + $0x98] sm:$0xff] }
  0x20   :  { %12087 = vmatpush3.bf16.msra.mxu0 %v12086_v27  ;;  %v8778_v27 = vld [vmem:[%s16306_s1 + $0x190] sm:$0xff] }
  0x21   :  { %12088 = vmatprep.subr.bf16.mxu0 %v13248_v0  ;;  %v12140_v29 = vpack.c.bf16 %v8779_v28, %v8778_v27  ;;  %v522_v28 = vld [vmem:[%s16308_s3 + $0x30] sm:$0xff] }
  0x23   :  { %10367 = vmatmul.mubr.f32.vlgmr.msra.gmra.mrb[0].mxu0 %v58_v30  ;;  %v8780_v30 = vld [vmem:[%s16306_s1 + $0x1a0] sm:$0xff] }
  0x24   :  { %12090 = vmatpush3.bf16.msra.mxu0 %v12089_v31  ;;  %10401 = vmatprep.mubr.msk.f32.mxu0 %vm13249_vm0, %v13250_v4  ;;  %v8781_v31 = vld [vmem:[%s16306_s1 + $0x1a8] sm:$0xff] }
  0x25   :  { %12091 = vmatprep.subr.bf16.mxu0 %v13248_v0  ;;  %v12143_v32 = vpack.c.bf16 %v8781_v31, %v8780_v30  ;;  %v8743_v31 = vld [vmem:[%s16309_s2] ss:$0 sm:$0xff] }
  0x28   :  { %12093 = vmatpush3.bf16.msra.mxu0 %v12092_v40  ;;  %v12149_v40 = vpack.c.bf16 %v8785_v39, %v8784_v38  ;;  %v8819_v38 = vld [vmem:[%s16308_s3 + $0x80] sm:$0xff]  ;;  %v8820_v39 = vld [vmem:[%s16308_s3 + $0x88] sm:$0xff] }
  0x29   :  { %12094 = vmatprep.subr.bf16.mxu0 %v13248_v0 }
  0x2c   :  { %12096 = vmatpush3.bf16.msra.mxu0 %v12095_v46  ;;  %v12155_v46 = vpack.c.bf16 %v8789_v45, %v8788_v44  ;;  %v12212_v45 = vpack.c.bf16 %v8822_v42, %v8821_v41  ;;  %v8861_v42 = vld [vmem:[%s16308_s3 + $0x190] sm:$0xff] }
  0x2d   :  { %12097 = vmatprep.subr.bf16.mxu0 %v13248_v0 }
  0x30   :  { %12099 = vmatpush3.bf16.msra.mxu0 %v12098_v49  ;;  %v12158_v49 = vpack.c.bf16 %v8791_v48, %v8790_v47  ;;  %v8824_v47 = vld [vmem:[%s16308_s3 + $0xa8] sm:$0xff] }
  0x31   :  { %12100 = vmatprep.subr.bf16.mxu0 %v13248_v0 }
  0x34   :  { %12102 = vmatpush3.bf16.msra.mxu0 %v12101_v52  ;;  %v12161_v52 = vpack.c.bf16 %v8793_v51, %v8792_v50  ;;  %v8826_v50 = vld [vmem:[%s16308_s3 + $0xb8] sm:$0xff] }
  0x35   :  { %12103 = vmatprep.subr.bf16.mxu0 %v13248_v0 }
  0x38   :  { %12105 = vmatpush3.bf16.msra.mxu0 %v12104_v55  ;;  %v12164_v55 = vpack.c.bf16 %v8795_v54, %v8794_v53  ;;  %v8830_v53 = vld [vmem:[%s16308_s3 + $0xc0] sm:$0xff]  ;;  %v8831_v54 = vld [vmem:[%s16308_s3 + $0xc8] sm:$0xff] }
  0x39   :  { %12106 = vmatprep.subr.bf16.mxu0 %v13248_v0 }
  0x3c   :  { %12108 = vmatpush3.bf16.msra.mxu0 %v12107_v58  ;;  %v12167_v58 = vpack.c.bf16 %v8797_v57, %v8796_v56  ;;  %v8832_v56 = vld [vmem:[%s16308_s3 + $0xd0] sm:$0xff]  ;;  %v8833_v57 = vld [vmem:[%s16308_s3 + $0xd8] sm:$0xff] }
  0x3d   :  { %12109 = vmatprep.subr.bf16.mxu0 %v13248_v0 }
  0x40   :  { %12111 = vmatpush3.bf16.msra.mxu0 %v12110_v61  ;;  %v8800_v61 = vld [vmem:[%s16306_s1 + $0x240] sm:$0xff] }
  0x41   :  { %12112 = vmatprep.subr.bf16.mxu0 %v13248_v0  ;;  %v12173_v63 = vpack.c.bf16 %v8801_v62, %v8800_v61  ;;  %v8836_v61 = vld [vmem:[%s16308_s3 + $0xf0] sm:$0xff]  ;;  %v8837_v62 = vld [vmem:[%s16308_s3 + $0xf8] sm:$0xff] }
  0x43   :  { %10402 = vmatmul.mubr.f32.vlgmr.msra.gmra.mrb[0].mxu0 %v147_v34  ;;  %v8783_v34 = vld [vmem:[%s16306_s1 + $0x1b8] sm:$0xff] }
  0x44   :  { %12114 = vmatpush3.bf16.msra.mxu0 %v12113_v1  ;;  %10436 = vmatprep.mubr.msk.f32.mxu0 %vm13249_vm0, %v13250_v4  ;;  %v8802_v1 = vld [vmem:[%s16306_s1 + $0x250] sm:$0xff] }
  0x45   :  { %12115 = vmatprep.subr.bf16.mxu0 %v13248_v0  ;;  %v12176_v3 = vpack.c.bf16 %v8803_v2, %v8802_v1 }
  0x48   :  { %12117 = vmatpush3.bf16.msra.mxu0 %v12116_v5  ;;  %v8804_v5 = vld [vmem:[%s16306_s1 + $0x260] sm:$0xff] }
  0x49   :  { %12118 = vmatprep.subr.bf16.mxu0 %v13248_v0  ;;  %v12179_v7 = vpack.c.bf16 %v8805_v6, %v8804_v5 }
  0x4c   :  { %12120 = vmatpush3.bf16.msra.mxu0 %v12119_v8  ;;  %v8806_v8 = vld [vmem:[%s16306_s1 + $0x270] sm:$0xff] }
  0x4d   :  { %12121 = vmatprep.subr.bf16.mxu0 %v13248_v0  ;;  %v12182_v10 = vpack.c.bf16 %v8807_v9, %v8806_v8 }
  0x50   :  { %12123 = vmatpush3.bf16.msra.mxu0 %v12122_v11  ;;  %v516_v11 = vld [vmem:[%s16308_s3] sm:$0xff] }
  0x51   :  { %12124 = vmatprep.subr.bf16.mxu0 %v13248_v0  ;;  %v12185_v13 = vpack.c.bf16 %v517_v12, %v516_v11  ;;  %v8840_v11 = vld [vmem:[%s16308_s3 + $0x108] sm:$0xff] }
  0x54   :  { %12126 = vmatpush3.bf16.msra.mxu0 %v12125_v14  ;;  %v8812_v14 = vld [vmem:[%s16308_s3 + $0x50] sm:$0xff] }
  0x55   :  { %12127 = vmatprep.subr.bf16.mxu0 %v13248_v0  ;;  %v12200_v16 = vpack.c.bf16 %v8813_v15, %v8812_v14  ;;  %v8842_v14 = vld [vmem:[%s16308_s3 + $0x118] sm:$0xff] }
  0x57   :  { %12201 = vmatpush3.bf16.msra.mxu1 %v12200_v16 }
  0x58   :  { %12129 = vmatpush3.bf16.msra.mxu0 %v12128_v17  ;;  %v518_v17 = vld [vmem:[%s16308_s3 + $0x10] sm:$0xff]  ;;  %12202 = vmatprep.subr.bf16.mxu1 %v13248_v0 }
  0x59   :  { %12130 = vmatprep.subr.bf16.mxu0 %v13248_v0 }
  0x5c   :  { %12132 = vmatpush3.bf16.msra.mxu0 %v12131_v20  ;;  %v8815_v20 = vld [vmem:[%s16308_s3 + $0x68] sm:$0xff] }
  0x5d   :  { %12133 = vmatprep.subr.bf16.mxu0 %v13248_v0  ;;  %v12203_v21 = vpack.c.bf16 %v8815_v20, %v8814_v19  ;;  %v8845_v19 = vld [vmem:[%s16308_s3 + $0x130] sm:$0xff]  ;;  %v8846_v20 = vld [vmem:[%s16308_s3 + $0x138] sm:$0xff] }
  0x5f   :  { %12204 = vmatpush3.bf16.msra.mxu1 %v12203_v21  ;;  %v12242_v21 = vpack.c.bf16 %v8846_v20, %v8845_v19  ;;  %v8880_v19 = vld [vmem:[%s16308_s3 + $0x218] sm:$0xff] }
  0x60   :  { %12135 = vmatpush3.bf16.msra.mxu0 %v12134_v23  ;;  %v521_v23 = vld [vmem:[%s16308_s3 + $0x28] sm:$0xff]  ;;  %12205 = vmatprep.subr.bf16.mxu1 %v13248_v0 }
  0x61   :  { %12136 = vmatprep.subr.bf16.mxu0 %v13248_v0  ;;  %v12191_v24 = vpack.c.bf16 %v521_v23, %v520_v22  ;;  %v8848_v22 = vld [vmem:[%s16308_s3 + $0x140] sm:$0xff]  ;;  %v8849_v23 = vld [vmem:[%s16308_s3 + $0x148] sm:$0xff] }
  0x63   :  { %10437 = vmatmul.mubr.f32.vlgmr.msra.gmra.mrb[0].mxu0 %v13394_v35  ;;  %v12146_v35 = vpack.c.bf16 %v8783_v34, %v8782_v33 }
  0x64   :  { %12138 = vmatpush3.bf16.msra.mxu0 %v12137_v26  ;;  %10471 = vmatprep.mubr.msk.f32.mxu0 %vm13249_vm0, %v13250_v4  ;;  %v8817_v26 = vld [vmem:[%s16308_s3 + $0x78] sm:$0xff] }
  0x65   :  { %12139 = vmatprep.subr.bf16.mxu0 %v13248_v0  ;;  %v12206_v27 = vpack.c.bf16 %v8817_v26, %v8816_v25  ;;  %v8850_v25 = vld [vmem:[%s16308_s3 + $0x150] sm:$0xff]  ;;  %v8851_v26 = vld [vmem:[%s16308_s3 + $0x158] sm:$0xff] }
  0x67   :  { %12207 = vmatpush3.bf16.msra.mxu1 %v12206_v27 }
  0x68   :  { %12141 = vmatpush3.bf16.msra.mxu0 %v12140_v29  ;;  %v523_v29 = vld [vmem:[%s16308_s3 + $0x38] sm:$0xff]  ;;  %12208 = vmatprep.subr.bf16.mxu1 %v13248_v0 }
  0x69   :  { %12142 = vmatprep.subr.bf16.mxu0 %v13248_v0  ;;  %v12194_v30 = vpack.c.bf16 %v523_v29, %v522_v28  ;;  %v12248_v28 = vpack.c.bf16 %v8851_v26, %v8850_v25  ;;  %v8852_v29 = vld [vmem:[%s16308_s3 + $0x160] sm:$0xff]  ;;  %v8883_v25 = vld [vmem:[%s16308_s3 + $0x230] sm:$0xff]  ;;  %v8884_v26 = vld [vmem:[%s16308_s3 + $0x238] sm:$0xff] }
  0x6c   :  { %12144 = vmatpush3.bf16.msra.mxu0 %v12143_v32 }
  0x6d   :  { %12145 = vmatprep.subr.bf16.mxu0 %v13248_v0 }
  0x70   :  { %12147 = vmatpush3.bf16.msra.mxu0 %v12146_v35 }
  0x71   :  { %12148 = vmatprep.subr.bf16.mxu0 %v13248_v0 }
  0x74   :  { %12150 = vmatpush3.bf16.msra.mxu0 %v12149_v40  ;;  %v12209_v40 = vpack.c.bf16 %v8820_v39, %v8819_v38  ;;  %v8859_v39 = vld [vmem:[%s16308_s3 + $0x180] sm:$0xff] }
  0x75   :  { %12151 = vmatprep.subr.bf16.mxu0 %v13248_v0 }
  0x78   :  { %12153 = vmatpush3.bf16.msra.mxu0 %v12152_v43 }
  0x79   :  { %12154 = vmatprep.subr.bf16.mxu0 %v13248_v0 }
  0x7c   :  { %12156 = vmatpush3.bf16.msra.mxu0 %v12155_v46  ;;  %v8823_v46 = vld [vmem:[%s16308_s3 + $0xa0] sm:$0xff] }
  0x7d   :  { %12157 = vmatprep.subr.bf16.mxu0 %v13248_v0  ;;  %v12215_v48 = vpack.c.bf16 %v8824_v47, %v8823_v46  ;;  %v8864_v46 = vld [vmem:[%s16308_s3 + $0x1a8] sm:$0xff] }
  0x80   :  { %12159 = vmatpush3.bf16.msra.mxu0 %v12158_v49  ;;  %v8825_v49 = vld [vmem:[%s16308_s3 + $0xb0] sm:$0xff] }
  0x81   :  { %12160 = vmatprep.subr.bf16.mxu0 %v13248_v0  ;;  %v12218_v51 = vpack.c.bf16 %v8826_v50, %v8825_v49  ;;  %v8866_v49 = vld [vmem:[%s16308_s3 + $0x1b8] sm:$0xff] }
  0x83   :  { %10472 = vmatmul.mubr.f32.vlgmr.msra.gmra.mrb[0].mxu0 %v13396_v36  ;;  %v8798_v36 = vld [vmem:[%s16306_s1 + $0x230] sm:$0xff] }
  0x84   :  { %12162 = vmatpush3.bf16.msra.mxu0 %v12161_v52  ;;  %10506 = vmatprep.mubr.msk.f32.mxu0 %vm13249_vm0, %v13250_v4  ;;  %v12170_v60 = vpack.c.bf16 %v8799_v59, %v8798_v36  ;;  %v8834_v36 = vld [vmem:[%s16308_s3 + $0xe0] sm:$0xff]  ;;  %v8835_v59 = vld [vmem:[%s16308_s3 + $0xe8] sm:$0xff] }
  0x85   :  { %12163 = vmatprep.subr.bf16.mxu0 %v13248_v0 }
  0x88   :  { %12165 = vmatpush3.bf16.msra.mxu0 %v12164_v55  ;;  %v12221_v55 = vpack.c.bf16 %v8831_v54, %v8830_v53 }
  0x89   :  { %12166 = vmatprep.subr.bf16.mxu0 %v13248_v0 }
  0x8c   :  { %12168 = vmatpush3.bf16.msra.mxu0 %v12167_v58  ;;  %v12224_v58 = vpack.c.bf16 %v8833_v57, %v8832_v56  ;;  %v8829_v56 = vld [vmem:[%s16310_s4 + $0x1] ss:$0 sm:$0xff] }
  0x8d   :  { %12169 = vmatprep.subr.bf16.mxu0 %v13248_v0 }
  0x90   :  { %12171 = vmatpush3.bf16.msra.mxu0 %v12170_v60  ;;  %v12227_v60 = vpack.c.bf16 %v8835_v59, %v8834_v36 }
  0x91   :  { %12172 = vmatprep.subr.bf16.mxu0 %v13248_v0 }
  0x94   :  { %12174 = vmatpush3.bf16.msra.mxu0 %v12173_v63  ;;  %v12230_v63 = vpack.c.bf16 %v8837_v62, %v8836_v61 }
  0x95   :  { %12175 = vmatprep.subr.bf16.mxu0 %v13248_v0 }
  0x98   :  { %12177 = vmatpush3.bf16.msra.mxu0 %v12176_v3  ;;  %v8808_v3 = vld [vmem:[%s16310_s4] ss:$0 sm:$0xff] }
  0x99   :  { %12178 = vmatprep.subr.bf16.mxu0 %v13248_v0 }
  0x9c   :  { %12180 = vmatpush3.bf16.msra.mxu0 %v12179_v7 }
  0x9d   :  { %12181 = vmatprep.subr.bf16.mxu0 %v13248_v0 }
  0xa0   :  { %12183 = vmatpush3.bf16.msra.mxu0 %v12182_v10  ;;  %v8839_v10 = vld [vmem:[%s16308_s3 + $0x100] sm:$0xff] }
  0xa1   :  { %12184 = vmatprep.subr.bf16.mxu0 %v13248_v0  ;;  %v12233_v12 = vpack.c.bf16 %v8840_v11, %v8839_v10  ;;  %v8872_v10 = vld [vmem:[%s16308_s3 + $0x1e0] sm:$0xff]  ;;  %v8873_v11 = vld [vmem:[%s16308_s3 + $0x1e8] sm:$0xff] }
  0xa3   :  { %10507 = vmatmul.mubr.f32.vlgmr.msra.gmra.mrb[0].mxu0 %v13398_v37  ;;  %v519_v37 = vld [vmem:[%s16308_s3 + $0x18] sm:$0xff] }
  0xa4   :  { %12186 = vmatpush3.bf16.msra.mxu0 %v12185_v13  ;;  %10525 = vmatprep.mubr.msk.f32.mxu0 %vm13249_vm0, %v13250_v4  ;;  %v12188_v18 = vpack.c.bf16 %v519_v37, %v518_v17  ;;  %v8841_v13 = vld [vmem:[%s16308_s3 + $0x110] sm:$0xff]  ;;  %v8843_v17 = vld [vmem:[%s16308_s3 + $0x120] sm:$0xff]  ;;  %v8844_v37 = vld [vmem:[%s16308_s3 + $0x128] sm:$0xff] }
  0xa5   :  { %12187 = vmatprep.subr.bf16.mxu0 %v13248_v0  ;;  %v12236_v16 = vpack.c.bf16 %v8842_v14, %v8841_v13  ;;  %v8874_v13 = vld [vmem:[%s16308_s3 + $0x1f0] sm:$0xff]  ;;  %v8875_v14 = vld [vmem:[%s16308_s3 + $0x1f8] sm:$0xff] }
  0xa8   :  { %12189 = vmatpush3.bf16.msra.mxu0 %v12188_v18  ;;  %v12239_v18 = vpack.c.bf16 %v8844_v37, %v8843_v17  ;;  %v8878_v17 = vld [vmem:[%s16308_s3 + $0x208] sm:$0xff] }
  0xa9   :  { %12190 = vmatprep.subr.bf16.mxu0 %v13248_v0 }
  0xac   :  { %12192 = vmatpush3.bf16.msra.mxu0 %v12191_v24  ;;  %v12245_v24 = vpack.c.bf16 %v8849_v23, %v8848_v22  ;;  %v8881_v22 = vld [vmem:[%s16308_s3 + $0x220] sm:$0xff]  ;;  %v8882_v23 = vld [vmem:[%s16308_s3 + $0x228] sm:$0xff] }
  0xad   :  { %12193 = vmatprep.subr.bf16.mxu0 %v13248_v0 }
  0xb0   :  { %12195 = vmatpush3.bf16.msra.mxu0 %v12194_v30  ;;  %v8853_v30 = vld [vmem:[%s16308_s3 + $0x168] sm:$0xff] }
  0xb1   :  { %12304 = vmatprep.subr.bf16.mxu0 %v13248_v0 }
 0x176   :  { %v501_v32 = vpop.f32.mrb[0].mxu0 }
 0x177   :  { %v13693_v33 = vadd.f32 %v8743_v31, %v501_v32  ;;  %v10508_v34 = vpop.f32.mrb[1].mxu0  ;;  %v12251_v31 = vpack.c.bf16 %v8853_v30, %v8852_v29  ;;  %v8854_v32 = vld [vmem:[%s16308_s3 + $0x170] sm:$0xff]  ;;  %v8889_v29 = vld [vmem:[%s16308_s3 + $0x248] sm:$0xff] }
 0x178   :  { %v8855_v34 = vld [vmem:[%s16308_s3 + $0x178] sm:$0xff] }
 0x179   :  { %v506_v35 = vmax.f32 %v13693_v33, 0.0 }
 0x17b   :  { %507 = vst.msk [vmem:[#allocation3 + $0x2] sm:$0xff] %vm41_vm1, %v506_v35  ;;  %v12254_v35 = vpack.c.bf16 %v8855_v34, %v8854_v32  ;;  %v8890_v32 = vld [vmem:[%s16308_s3 + $0x250] sm:$0xff]  ;;  %v8891_v34 = vld [vmem:[%s16308_s3 + $0x258] sm:$0xff] }
 0x182   :  { %v515_v43 = vld [vmem:[#allocation3 + $0x1] sm:$0xff] }
 0x183   :  { %v598_v44 = vld [vmem:[#allocation3 + $0x2] sm:$0xff]  ;;  %10526 = vmatmul.mubr.msk.f32.vlgmr.msra.gmra.mrb[2].mxu0 %vm41_vm1, %v515_v43 }
 0x184   :  { %10545 = vmatmul.mubr.msk.f32.vlgmr.msra.gmra.mrb[0].mxu1 %vm41_vm1, %v598_v44  ;;  %10715 = vmatprep.mubr.msk.f32.mxu0 %vm13249_vm0, %v13250_v4  ;;  %v682_v52 = vld [vmem:[#allocation3 + $0x3] sm:$0xff] }
 0x185   :  { %12210 = vmatpush3.bf16.msra.mxu1 %v12209_v40  ;;  %10563 = vmatprep.mubr.msk.f32.mxu1 %vm13249_vm0, %v13250_v4  ;;  %v8860_v40 = vld [vmem:[%s16308_s3 + $0x188] sm:$0xff]  ;;  %v8862_v43 = vld [vmem:[%s16308_s3 + $0x198] sm:$0xff] }
 0x186   :  { %12211 = vmatprep.subr.bf16.mxu1 %v13248_v0  ;;  %v12257_v41 = vpack.c.bf16 %v8860_v40, %v8859_v39  ;;  %v12260_v44 = vpack.c.bf16 %v8862_v43, %v8861_v42  ;;  %v8900_v39 = vld [vmem:[%s16308_s3 + $0x298] sm:$0xff]  ;;  %v8893_v42 = vld [vmem:[%s16308_s3 + $0x268] sm:$0xff] }
 0x189   :  { %12213 = vmatpush3.bf16.msra.mxu1 %v12212_v45  ;;  %v8863_v45 = vld [vmem:[%s16308_s3 + $0x1a0] sm:$0xff] }
 0x18a   :  { %12214 = vmatprep.subr.bf16.mxu1 %v13248_v0  ;;  %v12263_v47 = vpack.c.bf16 %v8864_v46, %v8863_v45  ;;  %v8902_v45 = vld [vmem:[%s16308_s3 + $0x2a8] sm:$0xff] }
 0x18d   :  { %12216 = vmatpush3.bf16.msra.mxu1 %v12215_v48  ;;  %v8865_v48 = vld [vmem:[%s16308_s3 + $0x1b0] sm:$0xff] }
 0x18e   :  { %12217 = vmatprep.subr.bf16.mxu1 %v13248_v0  ;;  %v12266_v50 = vpack.c.bf16 %v8866_v49, %v8865_v48  ;;  %v8895_v48 = vld [vmem:[%s16308_s3 + $0x278] sm:$0xff]  ;;  %v8903_v49 = vld [vmem:[%s16308_s3 + $0x2b0] sm:$0xff] }
 0x191   :  { %12219 = vmatpush3.bf16.msra.mxu1 %v12218_v51  ;;  %v8897_v51 = vld [vmem:[%s16308_s3 + $0x280] sm:$0xff] }
 0x192   :  { %12220 = vmatprep.subr.bf16.mxu1 %v13248_v0 }
 0x194   :  { %10564 = vmatmul.mubr.msk.f32.vlgmr.msra.gmra.mrb[0].mxu1 %vm41_vm1, %v682_v52  ;;  %v8898_v52 = vld [vmem:[%s16308_s3 + $0x288] sm:$0xff] }
 0x195   :  { %10582 = vmatprep.mubr.msk.f32.mxu1 %vm13249_vm0, %v13250_v4  ;;  %12222 = vmatpush3.bf16.msra.mxu1 %v12221_v55  ;;  %v12305_v53 = vpack.c.bf16 %v8898_v52, %v8897_v51  ;;  %v8904_v51 = vld [vmem:[%s16308_s3 + $0x2b8] sm:$0xff] }
 0x196   :  { %12223 = vmatprep.subr.bf16.mxu1 %v13248_v0  ;;  %v12314_v52 = vpack.c.bf16 %v8904_v51, %v8903_v49  ;;  %v8932_v49 = vld [vmem:[%s16308_s3 + $0x370] sm:$0xff] }
 0x197   :  { %12306 = vmatpush3.bf16.msra.mxu0 %v12305_v53  ;;  %v8858_v53 = vld [vmem:[%s16310_s4 + $0x2] ss:$0 sm:$0xff] }
 0x198   :  { %12307 = vmatprep.subr.bf16.mxu0 %v13248_v0 }
 0x199   :  { %12225 = vmatpush3.bf16.msra.mxu1 %v12224_v58 }
 0x19a   :  { %12226 = vmatprep.subr.bf16.mxu1 %v13248_v0 }
 0x19d   :  { %12228 = vmatpush3.bf16.msra.mxu1 %v12227_v60 }
 0x19e   :  { %12229 = vmatprep.subr.bf16.mxu1 %v13248_v0 }
 0x1a1   :  { %12231 = vmatpush3.bf16.msra.mxu1 %v12230_v63 }
 0x1a2   :  { %12232 = vmatprep.subr.bf16.mxu1 %v13248_v0 }
 0x256   :  { %v593_v1 = vpop.f32.mrb[2].mxu0 }
 0x257   :  { %v10527_v2 = vpop.f32.mrb[3].mxu0  ;;  %v597_v5 = vadd.f32 %v8808_v3, %v593_v1  ;;  %v8869_v3 = vld [vmem:[%s16308_s3 + $0x1c8] sm:$0xff] }
 0x258   :  { %v8868_v2 = vld [vmem:[%s16308_s3 + $0x1c0] sm:$0xff] }
 0x267   :  { %v761_v6 = vpop.f32.mrb[0].mxu1 }
 0x268   :  { %v13134_v7 = vadd.f32 %v761_v6, %v597_v5  ;;  %v10565_v8 = vpop.f32.mrb[1].mxu1  ;;  %v12269_v5 = vpack.c.bf16 %v8869_v3, %v8868_v2  ;;  %v8870_v6 = vld [vmem:[%s16308_s3 + $0x1d0] sm:$0xff]  ;;  %v8910_v3 = vld [vmem:[%s16308_s3 + $0x2e0] sm:$0xff] }
 0x26a   :  { %v766_v9 = vmax.f32 %v13134_v7, 0.0  ;;  %v8871_v7 = vld [vmem:[%s16308_s3 + $0x1d8] sm:$0xff] }
 0x26c   :  { %767 = vst.msk [vmem:[#allocation3 + $0x2] sm:$0xff] %vm41_vm1, %v766_v9  ;;  %v12272_v9 = vpack.c.bf16 %v8871_v7, %v8870_v6  ;;  %v8912_v7 = vld [vmem:[%s16308_s3 + $0x2f0] sm:$0xff] }
 0x273   :  { %v776_v15 = vld [vmem:[#allocation3 + $0x1] sm:$0xff] }
 0x274   :  { %10583 = vmatmul.mubr.msk.f32.vlgmr.msra.gmra.mrb[2].mxu1 %vm41_vm1, %v776_v15  ;;  %v860_v27 = vld [vmem:[#allocation3 + $0x2] sm:$0xff]  ;;  %v12278_v15 = vpack.c.bf16 %v8875_v14, %v8874_v13  ;;  %v8919_v14 = vld [vmem:[%s16308_s3 + $0x310] sm:$0xff] }
 0x275   :  { %12234 = vmatpush3.bf16.msra.mxu1 %v12233_v12  ;;  %10601 = vmatprep.mubr.msk.f32.mxu1 %vm13249_vm0, %v13250_v4  ;;  %v944_v38 = vld [vmem:[#allocation3 + $0x3] sm:$0xff]  ;;  %v12275_v12 = vpack.c.bf16 %v8873_v11, %v8872_v10 }
 0x276   :  { %12235 = vmatprep.subr.bf16.mxu1 %v13248_v0  ;;  %v8917_v11 = vld [vmem:[%s16308_s3 + $0x300] sm:$0xff] }
 0x279   :  { %12237 = vmatpush3.bf16.msra.mxu1 %v12236_v16  ;;  %v8877_v16 = vld [vmem:[%s16308_s3 + $0x200] sm:$0xff] }
 0x27a   :  { %12238 = vmatprep.subr.bf16.mxu1 %v13248_v0  ;;  %v12281_v37 = vpack.c.bf16 %v8878_v17, %v8877_v16  ;;  %v8921_v17 = vld [vmem:[%s16308_s3 + $0x320] sm:$0xff] }
 0x27d   :  { %12240 = vmatpush3.bf16.msra.mxu1 %v12239_v18  ;;  %v8879_v18 = vld [vmem:[%s16308_s3 + $0x210] sm:$0xff] }
 0x27e   :  { %12241 = vmatprep.subr.bf16.mxu1 %v13248_v0 }
 0x281   :  { %12243 = vmatpush3.bf16.msra.mxu1 %v12242_v21  ;;  %v12284_v21 = vpack.c.bf16 %v8880_v19, %v8879_v18  ;;  %v8923_v19 = vld [vmem:[%s16308_s3 + $0x330] sm:$0xff] }
 0x282   :  { %12244 = vmatprep.subr.bf16.mxu1 %v13248_v0 }
 0x284   :  { %10602 = vmatmul.mubr.msk.f32.vlgmr.msra.gmra.mrb[4].mxu1 %vm41_vm1, %v860_v27  ;;  %v12290_v27 = vpack.c.bf16 %v8884_v26, %v8883_v25  ;;  %v8887_v25 = vld [vmem:[%s16310_s4 + $0x3] ss:$0 sm:$0xff] }
 0x285   :  { %12246 = vmatpush3.bf16.msra.mxu1 %v12245_v24  ;;  %10620 = vmatprep.mubr.msk.f32.mxu1 %vm13249_vm0, %v13250_v4  ;;  %v12287_v24 = vpack.c.bf16 %v8882_v23, %v8881_v22  ;;  %v8946_v22 = vld [vmem:[%s16308_s3 + $0x3c0] sm:$0xff]  ;;  %v8947_v23 = vld [vmem:[%s16308_s3 + $0x3c8] sm:$0xff] }
 0x286   :  { %12247 = vmatprep.subr.bf16.mxu1 %v13248_v0 }
 0x289   :  { %12249 = vmatpush3.bf16.msra.mxu1 %v12248_v28  ;;  %v8888_v28 = vld [vmem:[%s16308_s3 + $0x240] sm:$0xff] }
 0x28a   :  { %12250 = vmatprep.subr.bf16.mxu1 %v13248_v0  ;;  %v12293_v30 = vpack.c.bf16 %v8889_v29, %v8888_v28 }
 0x28d   :  { %12252 = vmatpush3.bf16.msra.mxu1 %v12251_v31 }
 0x28e   :  { %12253 = vmatprep.subr.bf16.mxu1 %v13248_v0 }
 0x291   :  { %12255 = vmatpush3.bf16.msra.mxu1 %v12254_v35  ;;  %v12296_v35 = vpack.c.bf16 %v8891_v34, %v8890_v32 }
 0x292   :  { %12256 = vmatprep.subr.bf16.mxu1 %v13248_v0 }
 0x294   :  { %10621 = vmatmul.mubr.msk.f32.vlgmr.msra.gmra.mrb[6].mxu1 %vm41_vm1, %v944_v38  ;;  %v8899_v38 = vld [vmem:[%s16308_s3 + $0x290] sm:$0xff] }
 0x295   :  { %10639 = vmatprep.mubr.msk.f32.mxu1 %vm13249_vm0, %v13250_v4  ;;  %12258 = vmatpush3.bf16.msra.mxu1 %v12257_v41  ;;  %v12308_v40 = vpack.c.bf16 %v8900_v39, %v8899_v38  ;;  %v8892_v41 = vld [vmem:[%s16308_s3 + $0x260] sm:$0xff] }
 0x296   :  { %12259 = vmatprep.subr.bf16.mxu1 %v13248_v0  ;;  %v12299_v43 = vpack.c.bf16 %v8893_v42, %v8892_v41  ;;  %v8927_v41 = vld [vmem:[%s16308_s3 + $0x348] sm:$0xff] }
 0x297   :  { %12309 = vmatpush3.bf16.msra.mxu0 %v12308_v40  ;;  %v8926_v40 = vld [vmem:[%s16308_s3 + $0x340] sm:$0xff] }
 0x298   :  { %12310 = vmatprep.subr.bf16.mxu0 %v13248_v0  ;;  %v12341_v42 = vpack.c.bf16 %v8927_v41, %v8926_v40  ;;  %v8968_v41 = vld [vmem:[%s16308_s3 + $0x460] sm:$0xff] }
 0x299   :  { %12261 = vmatpush3.bf16.msra.mxu1 %v12260_v44  ;;  %v8901_v44 = vld [vmem:[%s16308_s3 + $0x2a0] sm:$0xff] }
 0x29a   :  { %12262 = vmatprep.subr.bf16.mxu1 %v13248_v0  ;;  %v12311_v46 = vpack.c.bf16 %v8902_v45, %v8901_v44 }
 0x29c   :  { %12312 = vmatpush3.bf16.msra.mxu0 %v12311_v46  ;;  %v8930_v46 = vld [vmem:[%s16308_s3 + $0x360] sm:$0xff] }
 0x29d   :  { %12264 = vmatpush3.bf16.msra.mxu1 %v12263_v47  ;;  %v8894_v47 = vld [vmem:[%s16308_s3 + $0x270] sm:$0xff]  ;;  %12313 = vmatprep.subr.bf16.mxu0 %v13248_v0 }
 0x29e   :  { %12265 = vmatprep.subr.bf16.mxu1 %v13248_v0 }
 0x2a0   :  { %12315 = vmatpush3.bf16.msra.mxu0 %v12314_v52  ;;  %v8935_v52 = vld [vmem:[%s16308_s3 + $0x380] sm:$0xff] }
 0x2a1   :  { %12267 = vmatpush3.bf16.msra.mxu1 %v12266_v50  ;;  %v12302_v50 = vpack.c.bf16 %v8895_v48, %v8894_v47  ;;  %12328 = vmatprep.subr.bf16.mxu0 %v13248_v0  ;;  %v8931_v47 = vld [vmem:[%s16308_s3 + $0x368] sm:$0xff] }
 0x2a2   :  { %12268 = vmatprep.subr.bf16.mxu1 %v13248_v0  ;;  %v12347_v48 = vpack.c.bf16 %v8931_v47, %v8930_v46  ;;  %v2089_v47 = vld [vmem:[%s16311_s5] sm:$0xff] }
 0x347   :  { %v855_v54 = vpop.f32.mrb[2].mxu1 }
 0x348   :  { %v10584_v55 = vpop.f32.mrb[3].mxu1  ;;  %v859_v57 = vadd.f32 %v8829_v56, %v855_v54 }
 0x357   :  { %v939_v58 = vpop.f32.mrb[4].mxu1 }
 0x358   :  { %v943_v36 = vadd.f32 %v939_v58, %v859_v57  ;;  %v10603_v59 = vpop.f32.mrb[5].mxu1  ;;  %v8906_v58 = vld [vmem:[%s16308_s3 + $0x2c0] sm:$0xff] }
 0x367   :  { %v1023_v60 = vpop.f32.mrb[6].mxu1 }
 0x368   :  { %v1027_v61 = vadd.f32 %v1023_v60, %v943_v36  ;;  %v10622_v62 = vpop.f32.mrb[7].mxu1  ;;  %v8907_v36 = vld [vmem:[%s16308_s3 + $0x2c8] sm:$0xff]  ;;  %v8908_v60 = vld [vmem:[%s16308_s3 + $0x2d0] sm:$0xff] }
 0x369   :  { %v12317_v59 = vpack.c.bf16 %v8907_v36, %v8906_v58  ;;  %v8939_v36 = vld [vmem:[%s16308_s3 + $0x3a0] sm:$0xff] }
 0x36a   :  { %v13870_v63 = vadd.f32 %v13693_v33, %v1027_v61  ;;  %v8909_v61 = vld [vmem:[%s16308_s3 + $0x2d8] sm:$0xff] }
 0x36b   :  { %v12320_v2 = vpack.c.bf16 %v8909_v61, %v8908_v60  ;;  %v8941_v61 = vld [vmem:[%s16308_s3 + $0x3b0] sm:$0xff] }
 0x36c   :  { %v1029_v1 = vmax.f32 %v13870_v63, 0.0 }
 0x36e   :  { %1030 = vst.msk [vmem:[#allocation3 + $0x2] sm:$0xff] %vm41_vm1, %v1029_v1 }
 0x375   :  { %v1039_v8 = vld [vmem:[#allocation3 + $0x1] sm:$0xff] }
 0x376   :  { %10640 = vmatmul.mubr.msk.f32.vlgmr.msra.gmra.mrb[8].mxu1 %vm41_vm1, %v1039_v8  ;;  %v1123_v20 = vld [vmem:[#allocation3 + $0x2] sm:$0xff] }
 0x377   :  { %12270 = vmatpush3.bf16.msra.mxu1 %v12269_v5  ;;  %10658 = vmatprep.mubr.msk.f32.mxu1 %vm13249_vm0, %v13250_v4  ;;  %v1207_v31 = vld [vmem:[#allocation3 + $0x3] sm:$0xff]  ;;  %v8911_v5 = vld [vmem:[%s16308_s3 + $0x2e8] sm:$0xff] }
 0x378   :  { %12271 = vmatprep.subr.bf16.mxu1 %v13248_v0  ;;  %v12323_v6 = vpack.c.bf16 %v8911_v5, %v8910_v3  ;;  %v8913_v8 = vld [vmem:[%s16308_s3 + $0x2f8] sm:$0xff]  ;;  %v8948_v3 = vld [vmem:[%s16308_s3 + $0x3d0] sm:$0xff] }
 0x379   :  { %v8949_v5 = vld [vmem:[%s16308_s3 + $0x3d8] sm:$0xff] }
 0x37b   :  { %12273 = vmatpush3.bf16.msra.mxu1 %v12272_v9  ;;  %v12326_v9 = vpack.c.bf16 %v8913_v8, %v8912_v7  ;;  %v8950_v7 = vld [vmem:[%s16308_s3 + $0x3e0] sm:$0xff]  ;;  %v8951_v8 = vld [vmem:[%s16308_s3 + $0x3e8] sm:$0xff] }
 0x37c   :  { %12274 = vmatprep.subr.bf16.mxu1 %v13248_v0 }
 0x37f   :  { %12276 = vmatpush3.bf16.msra.mxu1 %v12275_v12  ;;  %v8918_v12 = vld [vmem:[%s16308_s3 + $0x308] sm:$0xff] }
 0x380   :  { %12277 = vmatprep.subr.bf16.mxu1 %v13248_v0  ;;  %v12329_v13 = vpack.c.bf16 %v8918_v12, %v8917_v11  ;;  %v8953_v11 = vld [vmem:[%s16308_s3 + $0x3f8] sm:$0xff] }
 0x383   :  { %12279 = vmatpush3.bf16.msra.mxu1 %v12278_v15  ;;  %v8920_v15 = vld [vmem:[%s16308_s3 + $0x318] sm:$0xff] }
 0x384   :  { %12280 = vmatprep.subr.bf16.mxu1 %v13248_v0  ;;  %v12332_v16 = vpack.c.bf16 %v8920_v15, %v8919_v14 }
 0x386   :  { %10659 = vmatmul.mubr.msk.f32.vlgmr.msra.gmra.mrb[8].mxu1 %vm41_vm1, %v1123_v20  ;;  %v8924_v20 = vld [vmem:[%s16308_s3 + $0x338] sm:$0xff] }
 0x387   :  { %12282 = vmatpush3.bf16.msra.mxu1 %v12281_v37  ;;  %10677 = vmatprep.mubr.msk.f32.mxu1 %vm13249_vm0, %v13250_v4  ;;  %v8922_v37 = vld [vmem:[%s16308_s3 + $0x328] sm:$0xff] }
 0x388   :  { %12283 = vmatprep.subr.bf16.mxu1 %v13248_v0  ;;  %v12335_v18 = vpack.c.bf16 %v8922_v37, %v8921_v17  ;;  %v8955_v37 = vld [vmem:[%s16308_s3 + $0x400] sm:$0xff] }
 0x38b   :  { %12285 = vmatpush3.bf16.msra.mxu1 %v12284_v21  ;;  %v12338_v21 = vpack.c.bf16 %v8924_v20, %v8923_v19  ;;  %v8957_v20 = vld [vmem:[%s16308_s3 + $0x410] sm:$0xff] }
 0x38c   :  { %12286 = vmatprep.subr.bf16.mxu1 %v13248_v0 }
 0x38f   :  { %12288 = vmatpush3.bf16.msra.mxu1 %v12287_v24  ;;  %v12365_v24 = vpack.c.bf16 %v8947_v23, %v8946_v22 }
 0x390   :  { %12289 = vmatprep.subr.bf16.mxu1 %v13248_v0 }
 0x393   :  { %12291 = vmatpush3.bf16.msra.mxu1 %v12290_v27 }
 0x394   :  { %12292 = vmatprep.subr.bf16.mxu1 %v13248_v0 }
 0x396   :  { %10678 = vmatmul.mubr.msk.f32.vlgmr.msra.gmra.mrb[8].mxu1 %vm41_vm1, %v1207_v31 }
 0x397   :  { %12294 = vmatpush3.bf16.msra.mxu1 %v12293_v30  ;;  %10696 = vmatprep.mubr.msk.f32.mxu1 %vm13249_vm0, %v13250_v4 }
 0x398   :  { %12295 = vmatprep.subr.bf16.mxu1 %v13248_v0 }
 0x39b   :  { %12297 = vmatpush3.bf16.msra.mxu1 %v12296_v35 }
 0x39c   :  { %12298 = vmatprep.subr.bf16.mxu1 %v13248_v0 }
 0x39f   :  { %12300 = vmatpush3.bf16.msra.mxu1 %v12299_v43  ;;  %v8928_v43 = vld [vmem:[%s16308_s3 + $0x350] sm:$0xff] }
 0x3a0   :  { %12301 = vmatprep.subr.bf16.mxu1 %v13248_v0 }
 0x3a3   :  { %12303 = vmatpush3.bf16.msra.mxu1 %v12302_v50  ;;  %v8933_v50 = vld [vmem:[%s16308_s3 + $0x378] sm:$0xff] }
 0x3a4   :  { %12316 = vmatprep.subr.bf16.mxu1 %v13248_v0  ;;  %v12350_v51 = vpack.c.bf16 %v8933_v50, %v8932_v49  ;;  %v2091_v50 = vld [vmem:[%s16311_s5 + $0x10] sm:$0xff] }
 0x469   :  { %v1286_v54 = vpop.f32.mrb[8].mxu1 }
 0x46a   :  { %v13135_v55 = vadd.f32 %v8858_v53, %v1286_v54  ;;  %v10679_v56 = vpop.f32.mrb[9].mxu1  ;;  %v8936_v53 = vld [vmem:[%s16308_s3 + $0x388] sm:$0xff] }
 0x46b   :  { %v12353_v54 = vpack.c.bf16 %v8936_v53, %v8935_v52  ;;  %v8938_v56 = vld [vmem:[%s16308_s3 + $0x398] sm:$0xff]  ;;  %v2093_v53 = vld [vmem:[%s16311_s5 + $0x20] sm:$0xff] }
 0x46c   :  { %v1291_v57 = vmax.f32 %v13135_v55, 0.0  ;;  %v8937_v55 = vld [vmem:[%s16308_s3 + $0x390] sm:$0xff] }
 0x46d   :  { %v12356_v58 = vpack.c.bf16 %v8938_v56, %v8937_v55  ;;  %v2095_v56 = vld [vmem:[%s16311_s5 + $0x30] sm:$0xff] }
 0x46e   :  { %1292 = vst.msk [vmem:[#allocation3 + $0x2] sm:$0xff] %vm41_vm1, %v1291_v57 }
 0x475   :  { %v1301_v62 = vld [vmem:[#allocation3 + $0x1] sm:$0xff] }
 0x476   :  { %v1385_v1 = vld [vmem:[#allocation3 + $0x2] sm:$0xff]  ;;  %10697 = vmatmul.mubr.msk.f32.vlgmr.msra.gmra.mrb[10].mxu1 %vm41_vm1, %v1301_v62 }
 0x477   :  { %10716 = vmatmul.mubr.msk.f32.vlgmr.msra.gmra.mrb[4].mxu0 %vm41_vm1, %v1385_v1  ;;  %12318 = vmatpush3.bf16.msra.mxu1 %v12317_v59  ;;  %v1469_v10 = vld [vmem:[#allocation3 + $0x3] sm:$0xff]  ;;  %v8940_v59 = vld [vmem:[%s16308_s3 + $0x3a8] sm:$0xff] }
 0x478   :  { %10734 = vmatprep.mubr.msk.f32.mxu1 %vm13249_vm0, %v13250_v4  ;;  %12319 = vmatprep.subr.bf16.mxu1 %v13248_v0  ;;  %v12359_v60 = vpack.c.bf16 %v8940_v59, %v8939_v36  ;;  %v8942_v62 = vld [vmem:[%s16308_s3 + $0x3b8] sm:$0xff] }
 0x479   :  { %10753 = vmatprep.mubr.msk.f32.mxu0 %vm13249_vm0, %v13250_v4  ;;  %12330 = vmatpush3.bf16.msra.mxu0 %v12329_v13  ;;  %v12362_v1 = vpack.c.bf16 %v8942_v62, %v8941_v61  ;;  %v8916_v13 = vld [vmem:[%s16310_s4 + $0x4] ss:$0 sm:$0xff] }
 0x47a   :  { %12331 = vmatprep.subr.bf16.mxu0 %v13248_v0 }
 0x47b   :  { %12321 = vmatpush3.bf16.msra.mxu1 %v12320_v2 }
 0x47c   :  { %12322 = vmatprep.subr.bf16.mxu1 %v13248_v0 }
 0x47d   :  { %12333 = vmatpush3.bf16.msra.mxu0 %v12332_v16 }
 0x47e   :  { %12334 = vmatprep.subr.bf16.mxu0 %v13248_v0 }
 0x47f   :  { %12324 = vmatpush3.bf16.msra.mxu1 %v12323_v6  ;;  %v12368_v6 = vpack.c.bf16 %v8949_v5, %v8948_v3 }
 0x480   :  { %12325 = vmatprep.subr.bf16.mxu1 %v13248_v0 }
 0x481   :  { %12336 = vmatpush3.bf16.msra.mxu0 %v12335_v18  ;;  %v8956_v18 = vld [vmem:[%s16308_s3 + $0x408] sm:$0xff] }
 0x482   :  { %12337 = vmatprep.subr.bf16.mxu0 %v13248_v0  ;;  %v12377_v19 = vpack.c.bf16 %v8956_v18, %v8955_v37  ;;  %v8982_v37 = vld [vmem:[%s16311_s5 + $0x78] sm:$0xff] }
 0x483   :  { %12327 = vmatpush3.bf16.msra.mxu1 %v12326_v9  ;;  %v12371_v9 = vpack.c.bf16 %v8951_v8, %v8950_v7 }
 0x484   :  { %12364 = vmatprep.subr.bf16.mxu1 %v13248_v0 }
 0x485   :  { %12339 = vmatpush3.bf16.msra.mxu0 %v12338_v21  ;;  %v8958_v21 = vld [vmem:[%s16308_s3 + $0x418] sm:$0xff] }
 0x486   :  { %10735 = vmatmul.mubr.msk.f32.vlgmr.msra.gmra.mrb[12].mxu1 %vm41_vm1, %v1469_v10  ;;  %12340 = vmatprep.subr.bf16.mxu0 %v13248_v0  ;;  %v8952_v10 = vld [vmem:[%s16308_s3 + $0x3f0] sm:$0xff]  ;;  %v12380_v23 = vpack.c.bf16 %v8958_v21, %v8957_v20  ;;  %v8985_v20 = vld [vmem:[%s16311_s5 + $0x88] sm:$0xff] }
 0x487   :  { %10810 = vmatprep.mubr.msk.f32.mxu1 %vm13249_vm0, %v13250_v4  ;;  %12366 = vmatpush3.bf16.msra.mxu1 %v12365_v24  ;;  %v12374_v12 = vpack.c.bf16 %v8953_v11, %v8952_v10  ;;  %v8959_v24 = vld [vmem:[%s16308_s3 + $0x420] sm:$0xff]  ;;  %v8976_v10 = vld [vmem:[%s16311_s5 + $0x48] sm:$0xff] }
 0x488   :  { %12367 = vmatprep.subr.bf16.mxu1 %v13248_v0 }
 0x48b   :  { %12369 = vmatpush3.bf16.msra.mxu1 %v12368_v6 }
 0x48c   :  { %12370 = vmatprep.subr.bf16.mxu1 %v13248_v0 }
 0x48f   :  { %12372 = vmatpush3.bf16.msra.mxu1 %v12371_v9  ;;  %v8975_v9 = vld [vmem:[%s16311_s5 + $0x40] sm:$0xff] }
 0x490   :  { %12373 = vmatprep.subr.bf16.mxu1 %v13248_v0  ;;  %v12413_v11 = vpack.c.bf16 %v8976_v10, %v8975_v9 }
 0x493   :  { %12375 = vmatpush3.bf16.msra.mxu1 %v12374_v12  ;;  %v8977_v12 = vld [vmem:[%s16311_s5 + $0x50] sm:$0xff] }
 0x494   :  { %12376 = vmatprep.subr.bf16.mxu1 %v13248_v0 }
 0x549   :  { %v1380_v26 = vpop.f32.mrb[10].mxu1 }
 0x54a   :  { %v1464_v27 = vpop.f32.mrb[4].mxu0  ;;  %v1384_v28 = vadd.f32 %v8887_v25, %v1380_v26  ;;  %v10698_v29 = vpop.f32.mrb[11].mxu1  ;;  %v8960_v25 = vld [vmem:[%s16308_s3 + $0x428] sm:$0xff] }
 0x54b   :  { %v10717_v30 = vpop.f32.mrb[5].mxu0  ;;  %v12383_v26 = vpack.c.bf16 %v8960_v25, %v8959_v24 }
 0x54c   :  { %v1468_v31 = vadd.f32 %v1464_v27, %v1384_v28  ;;  %v8961_v27 = vld [vmem:[%s16308_s3 + $0x430] sm:$0xff]  ;;  %v8962_v28 = vld [vmem:[%s16308_s3 + $0x438] sm:$0xff]  ;;  %v8964_v30 = vld [vmem:[%s16308_s3 + $0x440] sm:$0xff] }
 0x54d   :  { %v12386_v29 = vpack.c.bf16 %v8962_v28, %v8961_v27  ;;  %v8989_v27 = vld [vmem:[%s16311_s5 + $0xa8] sm:$0xff] }
 0x559   :  { %v1548_v32 = vpop.f32.mrb[12].mxu1 }
 0x55a   :  { %v1552_v34 = vadd.f32 %v1548_v32, %v1468_v31  ;;  %v10736_v35 = vpop.f32.mrb[13].mxu1  ;;  %v8965_v31 = vld [vmem:[%s16308_s3 + $0x448] sm:$0xff] }
 0x55b   :  { %v12389_v32 = vpack.c.bf16 %v8965_v31, %v8964_v30  ;;  %v8967_v35 = vld [vmem:[%s16308_s3 + $0x458] sm:$0xff] }
 0x55c   :  { %v14068_v38 = vadd.f32 %v1552_v34, %v13870_v63  ;;  %v8929_v63 = vld [vmem:[%s16308_s3 + $0x358] sm:$0xff]  ;;  %v8966_v34 = vld [vmem:[%s16308_s3 + $0x450] sm:$0xff] }
 0x55d   :  { %v12344_v45 = vpack.c.bf16 %v8929_v63, %v8928_v43  ;;  %v12392_v40 = vpack.c.bf16 %v8967_v35, %v8966_v34  ;;  %v8970_v63 = vld [vmem:[%s16308_s3 + $0x470] sm:$0xff]  ;;  %v8991_v30 = vld [vmem:[%s16311_s5 + $0xb8] sm:$0xff]  ;;  %v8994_v34 = vld [vmem:[%s16311_s5 + $0xc8] sm:$0xff] }
 0x55e   :  { %v1554_v39 = vmax.f32 %v14068_v38, 0.0 }
 0x560   :  { %1555 = vst.msk [vmem:[#allocation3 + $0x2] sm:$0xff] %vm41_vm1, %v1554_v39 }
 0x567   :  { %v1564_v44 = vld [vmem:[#allocation3 + $0x1] sm:$0xff] }
 0x568   :  { %10754 = vmatmul.mubr.msk.f32.vlgmr.msra.gmra.mrb[6].mxu0 %vm41_vm1, %v1564_v44  ;;  %v1648_v57 = vld [vmem:[#allocation3 + $0x2] sm:$0xff] }
 0x569   :  { %12342 = vmatpush3.bf16.msra.mxu0 %v12341_v42  ;;  %10772 = vmatprep.mubr.msk.f32.mxu0 %vm13249_vm0, %v13250_v4  ;;  %v1732_v2 = vld [vmem:[#allocation3 + $0x3] sm:$0xff]  ;;  %v8969_v42 = vld [vmem:[%s16308_s3 + $0x468] sm:$0xff] }
 0x56a   :  { %12343 = vmatprep.subr.bf16.mxu0 %v13248_v0  ;;  %v12395_v43 = vpack.c.bf16 %v8969_v42, %v8968_v41  ;;  %v8971_v44 = vld [vmem:[%s16308_s3 + $0x478] sm:$0xff] }
 0x56d   :  { %12345 = vmatpush3.bf16.msra.mxu0 %v12344_v45  ;;  %v12398_v45 = vpack.c.bf16 %v8971_v44, %v8970_v63  ;;  %v8998_v63 = vld [vmem:[%s16311_s5 + $0xe8] sm:$0xff] }
 0x56e   :  { %12346 = vmatprep.subr.bf16.mxu0 %v13248_v0 }
 0x571   :  { %12348 = vmatpush3.bf16.msra.mxu0 %v12347_v48  ;;  %v2090_v48 = vld [vmem:[%s16311_s5 + $0x8] sm:$0xff] }
 0x572   :  { %12349 = vmatprep.subr.bf16.mxu0 %v13248_v0  ;;  %v12401_v49 = vpack.c.bf16 %v2090_v48, %v2089_v47  ;;  %v9002_v48 = vld [vmem:[%s16311_s5 + $0x100] sm:$0xff] }
 0x575   :  { %12351 = vmatpush3.bf16.msra.mxu0 %v12350_v51  ;;  %v2092_v51 = vld [vmem:[%s16311_s5 + $0x18] sm:$0xff] }
 0x576   :  { %12352 = vmatprep.subr.bf16.mxu0 %v13248_v0  ;;  %v12404_v52 = vpack.c.bf16 %v2092_v51, %v2091_v50  ;;  %v9004_v51 = vld [vmem:[%s16311_s5 + $0x110] sm:$0xff] }
 0x578   :  { %10773 = vmatmul.mubr.msk.f32.vlgmr.msra.gmra.mrb[6].mxu0 %vm41_vm1, %v1648_v57  ;;  %v2096_v57 = vld [vmem:[%s16311_s5 + $0x38] sm:$0xff] }
 0x579   :  { %12354 = vmatpush3.bf16.msra.mxu0 %v12353_v54  ;;  %10791 = vmatprep.mubr.msk.f32.mxu0 %vm13249_vm0, %v13250_v4  ;;  %v2094_v54 = vld [vmem:[%s16311_s5 + $0x28] sm:$0xff] }
 0x57a   :  { %12355 = vmatprep.subr.bf16.mxu0 %v13248_v0  ;;  %v12407_v55 = vpack.c.bf16 %v2094_v54, %v2093_v53 }
 0x57d   :  { %12357 = vmatpush3.bf16.msra.mxu0 %v12356_v58  ;;  %v12410_v58 = vpack.c.bf16 %v2096_v57, %v2095_v56  ;;  %v9007_v56 = vld [vmem:[%s16311_s5 + $0x128] sm:$0xff] }
 0x57e   :  { %12358 = vmatprep.subr.bf16.mxu0 %v13248_v0 }
 0x581   :  { %12360 = vmatpush3.bf16.msra.mxu0 %v12359_v60  ;;  %v8945_v60 = vld [vmem:[%s16310_s4 + $0x5] ss:$0 sm:$0xff] }
 0x582   :  { %12361 = vmatprep.subr.bf16.mxu0 %v13248_v0 }
 0x585   :  { %12363 = vmatpush3.bf16.msra.mxu0 %v12362_v1 }
 0x586   :  { %12400 = vmatprep.subr.bf16.mxu0 %v13248_v0 }
 0x588   :  { %10792 = vmatmul.mubr.msk.f32.vlgmr.msra.gmra.mrb[6].mxu0 %vm41_vm1, %v1732_v2 }
 0x589   :  { %10867 = vmatprep.mubr.msk.f32.mxu0 %vm13249_vm0, %v13250_v4  ;;  %12402 = vmatpush3.bf16.msra.mxu0 %v12401_v49  ;;  %v9003_v49 = vld [vmem:[%s16311_s5 + $0x108] sm:$0xff] }
 0x58a   :  { %12403 = vmatprep.subr.bf16.mxu0 %v13248_v0  ;;  %v12449_v50 = vpack.c.bf16 %v9003_v49, %v9002_v48  ;;  %v9038_v48 = vld [vmem:[%s16312_s7 + $0xb8] sm:$0xff] }
 0x58d   :  { %12405 = vmatpush3.bf16.msra.mxu0 %v12404_v52  ;;  %v9005_v52 = vld [vmem:[%s16311_s5 + $0x118] sm:$0xff] }
 0x58e   :  { %12406 = vmatprep.subr.bf16.mxu0 %v13248_v0  ;;  %v12452_v54 = vpack.c.bf16 %v9005_v52, %v9004_v51  ;;  %v9042_v52 = vld [vmem:[%s16312_s7 + $0xc0] sm:$0xff] }
 0x591   :  { %12408 = vmatpush3.bf16.msra.mxu0 %v12407_v55  ;;  %v9006_v55 = vld [vmem:[%s16311_s5 + $0x120] sm:$0xff] }
 0x592   :  { %12409 = vmatprep.subr.bf16.mxu0 %v13248_v0  ;;  %v12455_v57 = vpack.c.bf16 %v9007_v56, %v9006_v55  ;;  %v9044_v55 = vld [vmem:[%s16312_s7 + $0xd0] sm:$0xff]  ;;  %v9045_v56 = vld [vmem:[%s16312_s7 + $0xd8] sm:$0xff] }
 0x595   :  { %12411 = vmatpush3.bf16.msra.mxu0 %v12410_v58  ;;  %v9008_v58 = vld [vmem:[%s16311_s5 + $0x130] sm:$0xff] }
 0x596   :  { %12412 = vmatprep.subr.bf16.mxu0 %v13248_v0 }
 0x65b   :  { %v1811_v14 = vpop.f32.mrb[6].mxu0 }
 0x65c   :  { %v13136_v15 = vadd.f32 %v8916_v13, %v1811_v14  ;;  %v10793_v16 = vpop.f32.mrb[7].mxu0  ;;  %v8979_v14 = vld [vmem:[%s16311_s5 + $0x60] sm:$0xff] }
 0x65e   :  { %v1816_v17 = vmax.f32 %v13136_v15, 0.0  ;;  %v8980_v15 = vld [vmem:[%s16311_s5 + $0x68] sm:$0xff] }
 0x65f   :  { %v12419_v16 = vpack.c.bf16 %v8980_v15, %v8979_v14 }
 0x660   :  { %1817 = vst.msk [vmem:[#allocation3 + $0x2] sm:$0xff] %vm41_vm1, %v1816_v17  ;;  %v8981_v17 = vld [vmem:[%s16311_s5 + $0x70] sm:$0xff] }
 0x661   :  { %v12422_v18 = vpack.c.bf16 %v8982_v37, %v8981_v17  ;;  %v9019_v17 = vld [vmem:[%s16312_s7 + $0x48] sm:$0xff] }
 0x667   :  { %v1826_v22 = vld [vmem:[#allocation3 + $0x1] sm:$0xff] }
 0x668   :  { %10811 = vmatmul.mubr.msk.f32.vlgmr.msra.gmra.mrb[14].mxu1 %vm41_vm1, %v1826_v22  ;;  %v1910_v39 = vld [vmem:[#allocation3 + $0x2] sm:$0xff]  ;;  %v8986_v22 = vld [vmem:[%s16311_s5 + $0x90] sm:$0xff] }
 0x669   :  { %12378 = vmatpush3.bf16.msra.mxu1 %v12377_v19  ;;  %10829 = vmatprep.mubr.msk.f32.mxu1 %vm13249_vm0, %v13250_v4  ;;  %v1994_v46 = vld [vmem:[#allocation3 + $0x3] sm:$0xff] }
 0x66a   :  { %12379 = vmatprep.subr.bf16.mxu1 %v13248_v0  ;;  %v8984_v19 = vld [vmem:[%s16311_s5 + $0x80] sm:$0xff] }
 0x66b   :  { %v12425_v21 = vpack.c.bf16 %v8985_v20, %v8984_v19  ;;  %v9021_v19 = vld [vmem:[%s16312_s7 + $0x58] sm:$0xff] }
 0x66d   :  { %12381 = vmatpush3.bf16.msra.mxu1 %v12380_v23  ;;  %v8987_v23 = vld [vmem:[%s16311_s5 + $0x98] sm:$0xff] }
 0x66e   :  { %12382 = vmatprep.subr.bf16.mxu1 %v13248_v0  ;;  %v12428_v25 = vpack.c.bf16 %v8987_v23, %v8986_v22  ;;  %v9025_v23 = vld [vmem:[%s16312_s7 + $0x60] sm:$0xff] }
 0x671   :  { %12384 = vmatpush3.bf16.msra.mxu1 %v12383_v26  ;;  %v8988_v26 = vld [vmem:[%s16311_s5 + $0xa0] sm:$0xff] }
 0x672   :  { %12385 = vmatprep.subr.bf16.mxu1 %v13248_v0  ;;  %v12431_v28 = vpack.c.bf16 %v8989_v27, %v8988_v26  ;;  %v9027_v26 = vld [vmem:[%s16312_s7 + $0x70] sm:$0xff]  ;;  %v9028_v27 = vld [vmem:[%s16312_s7 + $0x78] sm:$0xff] }
 0x675   :  { %12387 = vmatpush3.bf16.msra.mxu1 %v12386_v29  ;;  %v8990_v29 = vld [vmem:[%s16311_s5 + $0xb0] sm:$0xff] }
 0x676   :  { %12388 = vmatprep.subr.bf16.mxu1 %v13248_v0  ;;  %v12434_v31 = vpack.c.bf16 %v8991_v30, %v8990_v29  ;;  %v9011_v29 = vld [vmem:[%s16314_s8] ss:$0 sm:$0xff] }
 0x678   :  { %10830 = vmatmul.mubr.msk.f32.vlgmr.msra.gmra.mrb[16].mxu1 %vm41_vm1, %v1910_v39  ;;  %v8995_v39 = vld [vmem:[%s16311_s5 + $0xd0] sm:$0xff] }
 0x679   :  { %12390 = vmatpush3.bf16.msra.mxu1 %v12389_v32  ;;  %10848 = vmatprep.mubr.msk.f32.mxu1 %vm13249_vm0, %v13250_v4  ;;  %v8993_v32 = vld [vmem:[%s16311_s5 + $0xc0] sm:$0xff] }
 0x67a   :  { %12391 = vmatprep.subr.bf16.mxu1 %v13248_v0  ;;  %v12437_v35 = vpack.c.bf16 %v8994_v34, %v8993_v32 }
 0x67d   :  { %12393 = vmatpush3.bf16.msra.mxu1 %v12392_v40  ;;  %v8996_v40 = vld [vmem:[%s16311_s5 + $0xd8] sm:$0xff] }
 0x67e   :  { %12394 = vmatprep.subr.bf16.mxu1 %v13248_v0  ;;  %v12440_v42 = vpack.c.bf16 %v8996_v40, %v8995_v39  ;;  %v9031_v39 = vld [vmem:[%s16312_s7 + $0x88] sm:$0xff] }
 0x681   :  { %12396 = vmatpush3.bf16.msra.mxu1 %v12395_v43  ;;  %v8997_v43 = vld [vmem:[%s16311_s5 + $0xe0] sm:$0xff] }
 0x682   :  { %12397 = vmatprep.subr.bf16.mxu1 %v13248_v0  ;;  %v12443_v44 = vpack.c.bf16 %v8998_v63, %v8997_v43 }
 0x685   :  { %12399 = vmatpush3.bf16.msra.mxu1 %v12398_v45  ;;  %v8999_v45 = vld [vmem:[%s16311_s5 + $0xf0] sm:$0xff] }
 0x686   :  { %12460 = vmatprep.subr.bf16.mxu1 %v13248_v0 }
 0x688   :  { %10849 = vmatmul.mubr.msk.f32.vlgmr.msra.gmra.mrb[18].mxu1 %vm41_vm1, %v1994_v46  ;;  %v9000_v46 = vld [vmem:[%s16311_s5 + $0xf8] sm:$0xff] }
 0x689   :  { %10954 = vmatprep.mubr.msk.f32.mxu1 %vm13249_vm0, %v13250_v4  ;;  %v12446_v47 = vpack.c.bf16 %v9000_v46, %v8999_v45  ;;  %v9036_v45 = vld [vmem:[%s16312_s7 + $0xa8] sm:$0xff] }
 0x73b   :  { %v1905_v36 = vpop.f32.mrb[14].mxu1 }
 0x73c   :  { %v10812_v59 = vpop.f32.mrb[15].mxu1  ;;  %v1909_v61 = vadd.f32 %v8945_v60, %v1905_v36  ;;  %v9009_v36 = vld [vmem:[%s16311_s5 + $0x138] sm:$0xff] }
 0x73d   :  { %v12458_v59 = vpack.c.bf16 %v9009_v36, %v9008_v58 }
 0x74b   :  { %v1989_v62 = vpop.f32.mrb[16].mxu1 }
 0x74c   :  { %v1993_v1 = vadd.f32 %v1989_v62, %v1909_v61  ;;  %v10831_v2 = vpop.f32.mrb[17].mxu1  ;;  %v2522_v61 = vld [vmem:[%s16312_s7] sm:$0xff]  ;;  %v2523_v62 = vld [vmem:[%s16312_s7 + $0x8] sm:$0xff] }
 0x74d   :  { %v2524_v2 = vld [vmem:[%s16312_s7 + $0x10] sm:$0xff] }
 0x75b   :  { %v2073_v3 = vpop.f32.mrb[18].mxu1 }
 0x75c   :  { %v2077_v5 = vadd.f32 %v2073_v3, %v1993_v1  ;;  %v10850_v6 = vpop.f32.mrb[19].mxu1  ;;  %v12461_v1 = vpack.c.bf16 %v2523_v62, %v2522_v61  ;;  %v2525_v3 = vld [vmem:[%s16312_s7 + $0x18] sm:$0xff] }
 0x75d   :  { %v8973_v6 = vld [vmem:[%s16313_s6] ss:$0 sm:$0xff] }
 0x75e   :  { %v2078_v7 = vadd.f32 %v2077_v5, %v14068_v38  ;;  %v8978_v38 = vld [vmem:[%s16311_s5 + $0x58] sm:$0xff]  ;;  %12462 = vmatpush3.bf16.msra.mxu1 %v12461_v1  ;;  %v12464_v5 = vpack.c.bf16 %v2525_v3, %v2524_v2 }
 0x75f   :  { %v12416_v13 = vpack.c.bf16 %v8978_v38, %v8977_v12  ;;  %12463 = vmatprep.subr.bf16.mxu1 %v13248_v0  ;;  %v9014_v12 = vld [vmem:[%s16312_s7 + $0x28] sm:$0xff] }
 0x760   :  { %v2079_v8 = vadd.f32 %v13693_v33, %v2078_v7 }
 0x762   :  { %2080 = vst.msk [vmem:[#allocation3 + $0x2] sm:$0xff] %vm41_vm1, %v2079_v8  ;;  %12465 = vmatpush3.bf16.msra.mxu1 %v12464_v5 }
 0x763   :  { %12466 = vmatprep.subr.bf16.mxu1 %v13248_v0 }
 0x769   :  { %v2088_v33 = vld [vmem:[#allocation3] ss:$2 sm:$0xf]  ;;  %v2172_v24 = vld [vmem:[#allocation3 + $0x1] ss:$2 sm:$0xf] }
 0x76a   :  { %10868 = vmatmul.mubr.msk.f32.vlgmr.msra.gmra.mrb[8].mxu0 %vm41_vm1, %v2088_v33  ;;  %v2257_v41 = vld [vmem:[#allocation3 + $0x2] ss:$2 sm:$0xf]  ;;  %v2342_v53 = vld [vmem:[#allocation3 + $0x3] ss:$2 sm:$0xf] }
 0x76b   :  { %12414 = vmatpush3.bf16.msra.mxu0 %v12413_v11  ;;  %10886 = vmatprep.mubr.msk.f32.mxu0 %vm13249_vm0, %v13250_v4  ;;  %v2427_v60 = vld [vmem:[#allocation3 + $0x4] ss:$2 sm:$0xf]  ;;  %v9015_v33 = vld [vmem:[%s16312_s7 + $0x30] sm:$0xff] }
 0x76c   :  { %12415 = vmatprep.subr.bf16.mxu0 %v13248_v0  ;;  %v9013_v11 = vld [vmem:[%s16312_s7 + $0x20] sm:$0xff] }
 0x76d   :  { %v12467_v38 = vpack.c.bf16 %v9014_v12, %v9013_v11  ;;  %v9049_v12 = vld [vmem:[%s16312_s7 + $0xf0] sm:$0xff] }
 0x76f   :  { %12417 = vmatpush3.bf16.msra.mxu0 %v12416_v13  ;;  %v9016_v13 = vld [vmem:[%s16312_s7 + $0x38] sm:$0xff] }
 0x770   :  { %12418 = vmatprep.subr.bf16.mxu0 %v13248_v0  ;;  %v12470_v15 = vpack.c.bf16 %v9016_v13, %v9015_v33 }
 0x773   :  { %12420 = vmatpush3.bf16.msra.mxu0 %v12419_v16  ;;  %v9018_v16 = vld [vmem:[%s16312_s7 + $0x40] sm:$0xff] }
 0x774   :  { %12421 = vmatprep.subr.bf16.mxu0 %v13248_v0  ;;  %v12473_v37 = vpack.c.bf16 %v9019_v17, %v9018_v16  ;;  %v9054_v17 = vld [vmem:[%s16312_s7 + $0x110] sm:$0xff] }
 0x777   :  { %12423 = vmatpush3.bf16.msra.mxu0 %v12422_v18  ;;  %v9020_v18 = vld [vmem:[%s16312_s7 + $0x50] sm:$0xff] }
 0x778   :  { %12424 = vmatprep.subr.bf16.mxu0 %v13248_v0 }
 0x77a   :  { %10887 = vmatmul.mubr.msk.f32.vlgmr.msra.gmra.mrb[8].mxu0 %vm41_vm1, %v2172_v24  ;;  %v9026_v24 = vld [vmem:[%s16312_s7 + $0x68] sm:$0xff] }
 0x77b   :  { %12426 = vmatpush3.bf16.msra.mxu0 %v12425_v21  ;;  %10905 = vmatprep.mubr.msk.f32.mxu0 %vm13249_vm0, %v13250_v4  ;;  %v12476_v21 = vpack.c.bf16 %v9021_v19, %v9020_v18 }
 0x77c   :  { %12427 = vmatprep.subr.bf16.mxu0 %v13248_v0 }
 0x77f   :  { %12429 = vmatpush3.bf16.msra.mxu0 %v12428_v25  ;;  %v12479_v25 = vpack.c.bf16 %v9026_v24, %v9025_v23  ;;  %v9064_v24 = vld [vmem:[%s16312_s7 + $0x140] sm:$0xff] }
 0x780   :  { %12430 = vmatprep.subr.bf16.mxu0 %v13248_v0 }
 0x783   :  { %12432 = vmatpush3.bf16.msra.mxu0 %v12431_v28  ;;  %v12482_v28 = vpack.c.bf16 %v9028_v27, %v9027_v26  ;;  %v9061_v27 = vld [vmem:[%s16312_s7 + $0x130] sm:$0xff] }
 0x784   :  { %12433 = vmatprep.subr.bf16.mxu0 %v13248_v0 }
 0x787   :  { %12435 = vmatpush3.bf16.msra.mxu0 %v12434_v31 }
 0x788   :  { %12436 = vmatprep.subr.bf16.mxu0 %v13248_v0 }
 0x78a   :  { %10906 = vmatmul.mubr.msk.f32.vlgmr.msra.gmra.mrb[8].mxu0 %vm41_vm1, %v2257_v41  ;;  %v9032_v41 = vld [vmem:[%s16312_s7 + $0x90] sm:$0xff] }
 0x78b   :  { %12438 = vmatpush3.bf16.msra.mxu0 %v12437_v35  ;;  %10924 = vmatprep.mubr.msk.f32.mxu0 %vm13249_vm0, %v13250_v4  ;;  %v9030_v35 = vld [vmem:[%s16312_s7 + $0x80] sm:$0xff] }
 0x78c   :  { %12439 = vmatprep.subr.bf16.mxu0 %v13248_v0  ;;  %v12485_v40 = vpack.c.bf16 %v9031_v39, %v9030_v35 }
 0x78f   :  { %12441 = vmatpush3.bf16.msra.mxu0 %v12440_v42  ;;  %v9033_v42 = vld [vmem:[%s16312_s7 + $0x98] sm:$0xff] }
 0x790   :  { %12442 = vmatprep.subr.bf16.mxu0 %v13248_v0  ;;  %v12488_v63 = vpack.c.bf16 %v9033_v42, %v9032_v41  ;;  %v9069_v42 = vld [vmem:[%s16312_s7 + $0x160] sm:$0xff] }
 0x793   :  { %12444 = vmatpush3.bf16.msra.mxu0 %v12443_v44  ;;  %v9035_v44 = vld [vmem:[%s16312_s7 + $0xa0] sm:$0xff] }
 0x794   :  { %12445 = vmatprep.subr.bf16.mxu0 %v13248_v0  ;;  %v12491_v46 = vpack.c.bf16 %v9036_v45, %v9035_v44  ;;  %v9071_v44 = vld [vmem:[%s16312_s7 + $0x170] sm:$0xff]  ;;  %v9072_v45 = vld [vmem:[%s16312_s7 + $0x178] sm:$0xff] }
 0x797   :  { %12447 = vmatpush3.bf16.msra.mxu0 %v12446_v47  ;;  %v9037_v47 = vld [vmem:[%s16312_s7 + $0xb0] sm:$0xff] }
 0x798   :  { %12448 = vmatprep.subr.bf16.mxu0 %v13248_v0 }
 0x79a   :  { %10925 = vmatmul.mubr.msk.f32.vlgmr.msra.gmra.mrb[8].mxu0 %vm41_vm1, %v2342_v53  ;;  %v9043_v53 = vld [vmem:[%s16312_s7 + $0xc8] sm:$0xff] }
 0x79b   :  { %12450 = vmatpush3.bf16.msra.mxu0 %v12449_v50  ;;  %10943 = vmatprep.mubr.msk.f32.mxu0 %vm13249_vm0, %v13250_v4  ;;  %v12494_v50 = vpack.c.bf16 %v9038_v48, %v9037_v47  ;;  %v12530_v48 = vpack.c.bf16 %v9072_v45, %v9071_v44  ;;  %v9106_v44 = vld [vmem:[%s16312_s7 + $0x238] sm:$0xff] }
 0x79c   :  { %12451 = vmatprep.subr.bf16.mxu0 %v13248_v0 }
 0x79f   :  { %12453 = vmatpush3.bf16.msra.mxu0 %v12452_v54  ;;  %v12497_v54 = vpack.c.bf16 %v9043_v53, %v9042_v52  ;;  %v9078_v53 = vld [vmem:[%s16312_s7 + $0x190] sm:$0xff] }
 0x7a0   :  { %12454 = vmatprep.subr.bf16.mxu0 %v13248_v0 }
 0x7a3   :  { %12456 = vmatpush3.bf16.msra.mxu0 %v12455_v57  ;;  %v12500_v57 = vpack.c.bf16 %v9045_v56, %v9044_v55  ;;  %v9058_v56 = vld [vmem:[%s16314_s8 + $0x3] ss:$0 sm:$0xff] }
 0x7a4   :  { %12457 = vmatprep.subr.bf16.mxu0 %v13248_v0 }
 0x7a7   :  { %12459 = vmatpush3.bf16.msra.mxu0 %v12458_v59  ;;  %v9024_v59 = vld [vmem:[%s16314_s8 + $0x1] ss:$0 sm:$0xff] }
 0x7a8   :  { %12520 = vmatprep.subr.bf16.mxu0 %v13248_v0 }
 0x7aa   :  { %10944 = vmatmul.mubr.msk.f32.vlgmr.msra.gmra.mrb[8].mxu0 %vm41_vm1, %v2427_v60 }
 0x7ab   :  { %11064 = vmatprep.mubr.msk.f32.mxu0 %vm13249_vm0, %v13250_v4 }
 0x87d   :  { %v2506_v7 = vpop.f32.mrb[8].mxu0 }
 0x87e   :  { %v14407_v8 = vadd.f32 %v8973_v6, %v2506_v7  ;;  %v10945_v9 = vpop.f32.mrb[9].mxu0 }
 0x87f   :  { %v9047_v9 = vld [vmem:[%s16312_s7 + $0xe0] sm:$0xff] }
 0x880   :  { %v2511_v10 = vmax.f32 %v14407_v8, 0.0 }
 0x882   :  { %2513 = vst.msk [vmem:[#allocation4 + $0x2] sm:$0xf] %vm2512_vm4, %v2511_v10  ;;  %v9048_v10 = vld [vmem:[%s16312_s7 + $0xe8] sm:$0xff] }
 0x883   :  { %v12503_v11 = vpack.c.bf16 %v9048_v10, %v9047_v9  ;;  %v9082_v9 = vld [vmem:[%s16312_s7 + $0x1a8] sm:$0xff] }
 0x889   :  { %v2521_v14 = vld [vmem:[#allocation4 + $0x1] sm:$0xf] }
 0x88a   :  { %10955 = vmatmul.mubr.msk.f32.vlgmr.msra.gmra.mrb[20].mxu1 %vm45_vm3, %v2521_v14  ;;  %v2600_v20 = vld [vmem:[#allocation4 + $0x2] sm:$0xf]  ;;  %v9052_v14 = vld [vmem:[%s16312_s7 + $0x100] sm:$0xff] }
 0x88b   :  { %12468 = vmatpush3.bf16.msra.mxu1 %v12467_v38  ;;  %10965 = vmatprep.mubr.msk.f32.mxu1 %vm13249_vm0, %v13250_v4  ;;  %v2680_v22 = vld [vmem:[#allocation4 + $0x3] sm:$0xf]  ;;  %v9050_v38 = vld [vmem:[%s16312_s7 + $0xf8] sm:$0xff] }
 0x88c   :  { %12469 = vmatprep.subr.bf16.mxu1 %v13248_v0  ;;  %v12506_v13 = vpack.c.bf16 %v9050_v38, %v9049_v12 }
 0x88f   :  { %12471 = vmatpush3.bf16.msra.mxu1 %v12470_v15  ;;  %v9053_v15 = vld [vmem:[%s16312_s7 + $0x108] sm:$0xff] }
 0x890   :  { %12472 = vmatprep.subr.bf16.mxu1 %v13248_v0  ;;  %v12509_v16 = vpack.c.bf16 %v9053_v15, %v9052_v14  ;;  %v9088_v15 = vld [vmem:[%s16312_s7 + $0x1d0] sm:$0xff] }
 0x892   :  { %10966 = vmatmul.mubr.msk.f32.vlgmr.msra.gmra.mrb[20].mxu1 %vm45_vm3, %v2600_v20 }
 0x893   :  { %12474 = vmatpush3.bf16.msra.mxu1 %v12473_v37  ;;  %10976 = vmatprep.mubr.msk.f32.mxu1 %vm13249_vm0, %v13250_v4  ;;  %v9055_v37 = vld [vmem:[%s16312_s7 + $0x118] sm:$0xff] }
 0x894   :  { %12475 = vmatprep.subr.bf16.mxu1 %v13248_v0  ;;  %v12512_v19 = vpack.c.bf16 %v9055_v37, %v9054_v17 }
 0x897   :  { %12477 = vmatpush3.bf16.msra.mxu1 %v12476_v21  ;;  %v9059_v21 = vld [vmem:[%s16312_s7 + $0x120] sm:$0xff] }
 0x898   :  { %12478 = vmatprep.subr.bf16.mxu1 %v13248_v0 }
 0x89a   :  { %10977 = vmatmul.mubr.msk.f32.vlgmr.msra.gmra.mrb[20].mxu1 %vm45_vm3, %v2680_v22  ;;  %v9060_v22 = vld [vmem:[%s16312_s7 + $0x128] sm:$0xff] }
 0x89b   :  { %10987 = vmatprep.mubr.msk.f32.mxu1 %vm13249_vm0, %v13250_v4  ;;  %12480 = vmatpush3.bf16.msra.mxu1 %v12479_v25  ;;  %v12515_v23 = vpack.c.bf16 %v9060_v22, %v9059_v21  ;;  %v9065_v25 = vld [vmem:[%s16312_s7 + $0x148] sm:$0xff]  ;;  %v9095_v22 = vld [vmem:[%s16312_s7 + $0x1f0] sm:$0xff] }
 0x89c   :  { %12481 = vmatprep.subr.bf16.mxu1 %v13248_v0  ;;  %v12521_v26 = vpack.c.bf16 %v9065_v25, %v9064_v24  ;;  %v9075_v25 = vld [vmem:[%s16314_s8 + $0x4] ss:$0 sm:$0xff] }
 0x89e   :  { %12522 = vmatpush3.bf16.msra.mxu0 %v12521_v26 }
 0x89f   :  { %12483 = vmatpush3.bf16.msra.mxu1 %v12482_v28  ;;  %v9062_v28 = vld [vmem:[%s16312_s7 + $0x138] sm:$0xff]  ;;  %12523 = vmatprep.subr.bf16.mxu0 %v13248_v0 }
 0x8a0   :  { %12484 = vmatprep.subr.bf16.mxu1 %v13248_v0 }
 0x96d   :  { %v2755_v30 = vpop.f32.mrb[20].mxu1 }
 0x96e   :  { %v13138_v31 = vadd.f32 %v9011_v29, %v2755_v30  ;;  %v10978_v32 = vpop.f32.mrb[21].mxu1  ;;  %v9066_v29 = vld [vmem:[%s16312_s7 + $0x150] sm:$0xff]  ;;  %v12518_v30 = vpack.c.bf16 %v9062_v28, %v9061_v27 }
 0x970   :  { %v2760_v34 = vmax.f32 %v13138_v31, 0.0  ;;  %v9067_v31 = vld [vmem:[%s16312_s7 + $0x158] sm:$0xff] }
 0x971   :  { %v12524_v32 = vpack.c.bf16 %v9067_v31, %v9066_v29  ;;  %v9099_v31 = vld [vmem:[%s16312_s7 + $0x208] sm:$0xff] }
 0x972   :  { %2761 = vst.msk [vmem:[#allocation4 + $0x2] sm:$0xf] %vm2512_vm4, %v2760_v34  ;;  %v9041_v34 = vld [vmem:[%s16314_s8 + $0x2] ss:$0 sm:$0xff] }
 0x973   :  { %12525 = vmatpush3.bf16.msra.mxu0 %v12524_v32 }
 0x974   :  { %12532 = vmatprep.subr.bf16.mxu0 %v13248_v0 }
 0x979   :  { %v2770_v43 = vld [vmem:[#allocation4 + $0x1] sm:$0xf] }
 0x97a   :  { %10988 = vmatmul.mubr.msk.f32.vlgmr.msra.gmra.mrb[22].mxu1 %vm45_vm3, %v2770_v43  ;;  %v2850_v49 = vld [vmem:[#allocation4 + $0x2] sm:$0xf] }
 0x97b   :  { %12486 = vmatpush3.bf16.msra.mxu1 %v12485_v40  ;;  %10998 = vmatprep.mubr.msk.f32.mxu1 %vm13249_vm0, %v13250_v4  ;;  %v2930_v51 = vld [vmem:[#allocation4 + $0x3] sm:$0xf] }
 0x97c   :  { %12487 = vmatprep.subr.bf16.mxu1 %v13248_v0  ;;  %v9070_v43 = vld [vmem:[%s16312_s7 + $0x168] sm:$0xff] }
 0x97f   :  { %12489 = vmatpush3.bf16.msra.mxu1 %v12488_v63  ;;  %v12527_v63 = vpack.c.bf16 %v9070_v43, %v9069_v42  ;;  %v9104_v42 = vld [vmem:[%s16312_s7 + $0x228] sm:$0xff] }
 0x980   :  { %12490 = vmatprep.subr.bf16.mxu1 %v13248_v0 }
 0x982   :  { %10999 = vmatmul.mubr.msk.f32.vlgmr.msra.gmra.mrb[24].mxu1 %vm45_vm3, %v2850_v49 }
 0x983   :  { %12492 = vmatpush3.bf16.msra.mxu1 %v12491_v46  ;;  %11009 = vmatprep.mubr.msk.f32.mxu1 %vm13249_vm0, %v13250_v4 }
 0x984   :  { %12493 = vmatprep.subr.bf16.mxu1 %v13248_v0 }
 0x987   :  { %12495 = vmatpush3.bf16.msra.mxu1 %v12494_v50  ;;  %v9076_v50 = vld [vmem:[%s16312_s7 + $0x180] sm:$0xff] }
 0x988   :  { %12496 = vmatprep.subr.bf16.mxu1 %v13248_v0 }
 0x98a   :  { %11010 = vmatmul.mubr.msk.f32.vlgmr.msra.gmra.mrb[26].mxu1 %vm45_vm3, %v2930_v51  ;;  %v9077_v51 = vld [vmem:[%s16312_s7 + $0x188] sm:$0xff] }
 0x98b   :  { %11020 = vmatprep.mubr.msk.f32.mxu1 %vm13249_vm0, %v13250_v4  ;;  %12498 = vmatpush3.bf16.msra.mxu1 %v12497_v54  ;;  %v12533_v52 = vpack.c.bf16 %v9077_v51, %v9076_v50  ;;  %v9079_v54 = vld [vmem:[%s16312_s7 + $0x198] sm:$0xff]  ;;  %v4442_v50 = vld [vmem:[%s16306_s1 + $0x10] sm:$0xff] }
 0x98c   :  { %12499 = vmatprep.subr.bf16.mxu1 %v13248_v0  ;;  %v12536_v55 = vpack.c.bf16 %v9079_v54, %v9078_v53  ;;  %v4443_v51 = vld [vmem:[%s16306_s1 + $0x18] sm:$0xff]  ;;  %v4444_v54 = vld [vmem:[%s16306_s1 + $0x20] sm:$0xff] }
 0x98d   :  { %v12602_v53 = vpack.c.bf16 %v4443_v51, %v4442_v50  ;;  %v9157_v50 = vld [vmem:[%s16306_s1 + $0x140] sm:$0xff]  ;;  %v9158_v51 = vld [vmem:[%s16306_s1 + $0x148] sm:$0xff] }
 0x98f   :  { %12501 = vmatpush3.bf16.msra.mxu1 %v12500_v57 }
 0x990   :  { %12502 = vmatprep.subr.bf16.mxu1 %v13248_v0 }
 0xa4d   :  { %v2845_v58 = vpop.f32.mrb[22].mxu1 }
 0xa4e   :  { %v10989_v36 = vpop.f32.mrb[23].mxu1  ;;  %v2849_v60 = vadd.f32 %v9024_v59, %v2845_v58 }
 0xa55   :  { %v2925_v61 = vpop.f32.mrb[24].mxu1 }
 0xa56   :  { %v2929_v62 = vadd.f32 %v2925_v61, %v2849_v60  ;;  %v11000_v1 = vpop.f32.mrb[25].mxu1 }
 0xa5d   :  { %v3005_v2 = vpop.f32.mrb[26].mxu1 }
 0xa5e   :  { %v3009_v3 = vadd.f32 %v3005_v2, %v2929_v62  ;;  %v11011_v5 = vpop.f32.mrb[27].mxu1 }
 0xa60   :  { %v14521_v6 = vadd.f32 %v14407_v8, %v3009_v3 }
 0xa62   :  { %v3011_v7 = vmax.f32 %v14521_v6, 0.0 }
 0xa64   :  { %3012 = vst.msk [vmem:[#allocation4 + $0x2] sm:$0xf] %vm2512_vm4, %v3011_v7  ;;  %v9081_v7 = vld [vmem:[%s16312_s7 + $0x1a0] sm:$0xff] }
 0xa65   :  { %v12539_v10 = vpack.c.bf16 %v9082_v9, %v9081_v7  ;;  %v4453_v7 = vld [vmem:[%s16306_s1 + $0x68] sm:$0xff] }
 0xa6b   :  { %v3021_v33 = vld [vmem:[#allocation4 + $0x1] sm:$0xf] }
 0xa6c   :  { %11021 = vmatmul.mubr.msk.f32.vlgmr.msra.gmra.mrb[28].mxu1 %vm45_vm3, %v3021_v33  ;;  %v3101_v18 = vld [vmem:[#allocation4 + $0x2] sm:$0xf]  ;;  %v9086_v33 = vld [vmem:[%s16312_s7 + $0x1c0] sm:$0xff] }
 0xa6d   :  { %12504 = vmatpush3.bf16.msra.mxu1 %v12503_v11  ;;  %11031 = vmatprep.mubr.msk.f32.mxu1 %vm13249_vm0, %v13250_v4  ;;  %v3181_v20 = vld [vmem:[#allocation4 + $0x3] sm:$0xf]  ;;  %v9083_v11 = vld [vmem:[%s16312_s7 + $0x1b0] sm:$0xff] }
 0xa6e   :  { %12505 = vmatprep.subr.bf16.mxu1 %v13248_v0 }
 0xa71   :  { %12507 = vmatpush3.bf16.msra.mxu1 %v12506_v13  ;;  %v9087_v13 = vld [vmem:[%s16312_s7 + $0x1c8] sm:$0xff] }
 0xa72   :  { %12508 = vmatprep.subr.bf16.mxu1 %v13248_v0  ;;  %v12545_v14 = vpack.c.bf16 %v9087_v13, %v9086_v33  ;;  %v4439_v33 = vld [vmem:[#allocation2] ss:$2 sm:$0xff] }
 0xa74   :  { %11032 = vmatmul.mubr.msk.f32.vlgmr.msra.gmra.mrb[28].mxu1 %vm45_vm3, %v3101_v18 }
 0xa75   :  { %12510 = vmatpush3.bf16.msra.mxu1 %v12509_v16  ;;  %11042 = vmatprep.mubr.msk.f32.mxu1 %vm13249_vm0, %v13250_v4  ;;  %v9089_v16 = vld [vmem:[%s16312_s7 + $0x1d8] sm:$0xff] }
 0xa76   :  { %12511 = vmatprep.subr.bf16.mxu1 %v13248_v0  ;;  %v12548_v37 = vpack.c.bf16 %v9089_v16, %v9088_v15  ;;  %v9136_v15 = vld [vmem:[%s16306_s1 + $0x98] sm:$0xff] }
 0xa79   :  { %12513 = vmatpush3.bf16.msra.mxu1 %v12512_v19  ;;  %v9093_v19 = vld [vmem:[%s16312_s7 + $0x1e0] sm:$0xff] }
 0xa7a   :  { %12514 = vmatprep.subr.bf16.mxu1 %v13248_v0 }
 0xa7c   :  { %11043 = vmatmul.mubr.msk.f32.vlgmr.msra.gmra.mrb[28].mxu1 %vm45_vm3, %v3181_v20  ;;  %v9094_v20 = vld [vmem:[%s16312_s7 + $0x1e8] sm:$0xff] }
 0xa7d   :  { %11053 = vmatprep.mubr.msk.f32.mxu1 %vm13249_vm0, %v13250_v4  ;;  %12516 = vmatpush3.bf16.msra.mxu1 %v12515_v23  ;;  %v12551_v21 = vpack.c.bf16 %v9094_v20, %v9093_v19  ;;  %v9096_v23 = vld [vmem:[%s16312_s7 + $0x1f8] sm:$0xff]  ;;  %v9139_v19 = vld [vmem:[%s16306_s1 + $0xb0] sm:$0xff] }
 0xa7e   :  { %12517 = vmatprep.subr.bf16.mxu1 %v13248_v0  ;;  %v12554_v24 = vpack.c.bf16 %v9096_v23, %v9095_v22  ;;  %v9140_v20 = vld [vmem:[%s16306_s1 + $0xb8] sm:$0xff]  ;;  %v9141_v22 = vld [vmem:[%s16306_s1 + $0xc0] sm:$0xff]  ;;  %v9142_v23 = vld [vmem:[%s16306_s1 + $0xc8] sm:$0xff] }
 0xa81   :  { %12519 = vmatpush3.bf16.msra.mxu1 %v12518_v30  ;;  %v9098_v30 = vld [vmem:[%s16312_s7 + $0x200] sm:$0xff] }
 0xa82   :  { %12526 = vmatprep.subr.bf16.mxu1 %v13248_v0  ;;  %v12557_v32 = vpack.c.bf16 %v9099_v31, %v9098_v30  ;;  %v9147_v31 = vld [vmem:[%s16306_s1 + $0xf0] sm:$0xff] }
 0xb4f   :  { %v3256_v35 = vpop.f32.mrb[28].mxu1 }
 0xb50   :  { %v13139_v39 = vadd.f32 %v9041_v34, %v3256_v35  ;;  %v11044_v40 = vpop.f32.mrb[29].mxu1  ;;  %v9100_v34 = vld [vmem:[%s16312_s7 + $0x210] sm:$0xff]  ;;  %v9101_v35 = vld [vmem:[%s16312_s7 + $0x218] sm:$0xff] }
 0xb51   :  { %v12560_v40 = vpack.c.bf16 %v9101_v35, %v9100_v34  ;;  %v9149_v35 = vld [vmem:[%s16306_s1 + $0x100] sm:$0xff] }
 0xb52   :  { %v3261_v41 = vmax.f32 %v13139_v39, 0.0 }
 0xb54   :  { %3262 = vst.msk [vmem:[#allocation4 + $0x2] sm:$0xf] %vm2512_vm4, %v3261_v41  ;;  %v9103_v41 = vld [vmem:[%s16312_s7 + $0x220] sm:$0xff] }
 0xb55   :  { %v12563_v43 = vpack.c.bf16 %v9104_v42, %v9103_v41  ;;  %v9151_v42 = vld [vmem:[%s16306_s1 + $0x110] sm:$0xff] }
 0xb5b   :  { %v3271_v46 = vld [vmem:[#allocation4 + $0x1] sm:$0xf] }
 0xb5c   :  { %v3351_v47 = vld [vmem:[#allocation4 + $0x2] sm:$0xf]  ;;  %11054 = vmatmul.mubr.msk.f32.vlgmr.msra.gmra.mrb[30].mxu1 %vm45_vm3, %v3271_v46 }
 0xb5d   :  { %11065 = vmatmul.mubr.msk.f32.vlgmr.msra.gmra.mrb[10].mxu0 %vm45_vm3, %v3351_v47  ;;  %12528 = vmatpush3.bf16.msra.mxu1 %v12527_v63  ;;  %v3431_v49 = vld [vmem:[#allocation4 + $0x3] sm:$0xf]  ;;  %v9105_v63 = vld [vmem:[%s16312_s7 + $0x230] sm:$0xff]  ;;  %v4440_v47 = vld [vmem:[%s16306_s1] sm:$0xff] }
 0xb5e   :  { %11075 = vmatprep.mubr.msk.f32.mxu1 %vm13249_vm0, %v13250_v4  ;;  %12529 = vmatprep.subr.bf16.mxu1 %v13248_v0  ;;  %v12566_v46 = vpack.c.bf16 %v9106_v44, %v9105_v63  ;;  %v9153_v44 = vld [vmem:[%s16306_s1 + $0x120] sm:$0xff] }
 0xb5f   :  { %11086 = vmatprep.mubr.msk.f32.mxu0 %vm13249_vm0, %v13250_v4  ;;  %12534 = vmatpush3.bf16.msra.mxu0 %v12533_v52 }
 0xb60   :  { %12535 = vmatprep.subr.bf16.mxu0 %v13248_v0 }
 0xb61   :  { %12531 = vmatpush3.bf16.msra.mxu1 %v12530_v48  ;;  %v4441_v48 = vld [vmem:[%s16306_s1 + $0x8] sm:$0xff] }
 0xb62   :  { %12550 = vmatprep.subr.bf16.mxu1 %v13248_v0 }
 0xb63   :  { %12537 = vmatpush3.bf16.msra.mxu0 %v12536_v55  ;;  %v4445_v55 = vld [vmem:[%s16306_s1 + $0x28] sm:$0xff] }
 0xb64   :  { %11076 = vmatmul.mubr.msk.f32.vlgmr.msra.gmra.mrb[32].mxu1 %vm45_vm3, %v3431_v49  ;;  %12538 = vmatprep.subr.bf16.mxu0 %v13248_v0  ;;  %v12599_v49 = vpack.c.bf16 %v4441_v48, %v4440_v47  ;;  %v9155_v47 = vld [vmem:[%s16306_s1 + $0x130] sm:$0xff]  ;;  %v9156_v48 = vld [vmem:[%s16306_s1 + $0x138] sm:$0xff] }
 0xb65   :  { %11119 = vmatprep.mubr.msk.f32.mxu1 %vm13249_vm0, %v13250_v4  ;;  %12552 = vmatpush3.bf16.msra.mxu1 %v12551_v21  ;;  %v12632_v21 = vpack.c.bf16 %v9140_v20, %v9139_v19  ;;  %v9174_v19 = vld [vmem:[%s16306_s1 + $0x1c8] sm:$0xff] }
 0xb66   :  { %12553 = vmatprep.subr.bf16.mxu1 %v13248_v0 }
 0xb69   :  { %12555 = vmatpush3.bf16.msra.mxu1 %v12554_v24  ;;  %v12635_v24 = vpack.c.bf16 %v9142_v23, %v9141_v22  ;;  %v9176_v22 = vld [vmem:[%s16306_s1 + $0x1d8] sm:$0xff] }
 0xb6a   :  { %12556 = vmatprep.subr.bf16.mxu1 %v13248_v0 }
 0xc2f   :  { %v3346_v57 = vpop.f32.mrb[30].mxu1 }
 0xc30   :  { %v3426_v58 = vpop.f32.mrb[10].mxu0  ;;  %v3350_v36 = vadd.f32 %v9058_v56, %v3346_v57  ;;  %v11055_v59 = vpop.f32.mrb[31].mxu1  ;;  %v12605_v56 = vpack.c.bf16 %v4445_v55, %v4444_v54  ;;  %v4446_v57 = vld [vmem:[%s16306_s1 + $0x30] sm:$0xff]  ;;  %v9160_v54 = vld [vmem:[%s16306_s1 + $0x158] sm:$0xff] }
 0xc31   :  { %v11066_v60 = vpop.f32.mrb[11].mxu0  ;;  %v4448_v59 = vld [vmem:[%s16306_s1 + $0x40] sm:$0xff] }
 0xc32   :  { %v3430_v61 = vadd.f32 %v3426_v58, %v3350_v36  ;;  %v4447_v58 = vld [vmem:[%s16306_s1 + $0x38] sm:$0xff]  ;;  %v4449_v60 = vld [vmem:[%s16306_s1 + $0x48] sm:$0xff] }
 0xc33   :  { %v12608_v36 = vpack.c.bf16 %v4447_v58, %v4446_v57  ;;  %v9162_v57 = vld [vmem:[%s16306_s1 + $0x168] sm:$0xff] }
 0xc37   :  { %v3506_v62 = vpop.f32.mrb[32].mxu1 }
 0xc38   :  { %v3510_v1 = vadd.f32 %v3506_v62, %v3430_v61  ;;  %v11077_v2 = vpop.f32.mrb[33].mxu1  ;;  %v12611_v61 = vpack.c.bf16 %v4449_v60, %v4448_v59  ;;  %v4450_v62 = vld [vmem:[%s16306_s1 + $0x50] sm:$0xff]  ;;  %v9164_v59 = vld [vmem:[%s16306_s1 + $0x178] sm:$0xff]  ;;  %v4023_v60 = vld [vmem:[%s16315_s9] sm:$0xff] }
 0xc3a   :  { %v14635_v3 = vadd.f32 %v3510_v1, %v14521_v6  ;;  %v9084_v6 = vld [vmem:[%s16312_s7 + $0x1b8] sm:$0xff] }
 0xc3b   :  { %v12542_v38 = vpack.c.bf16 %v9084_v6, %v9083_v11  ;;  %v4451_v1 = vld [vmem:[%s16306_s1 + $0x58] sm:$0xff] }
 0xc3c   :  { %v3512_v5 = vmax.f32 %v14635_v3, 0.0  ;;  %v12614_v2 = vpack.c.bf16 %v4451_v1, %v4450_v62  ;;  %v4455_v11 = vld [vmem:[%s16306_s1 + $0x78] sm:$0xff]  ;;  %v9165_v1 = vld [vmem:[%s16306_s1 + $0x180] sm:$0xff] }
 0xc3e   :  { %3513 = vst.msk [vmem:[#allocation4 + $0x2] sm:$0xf] %vm2512_vm4, %v3512_v5  ;;  %v4452_v5 = vld [vmem:[%s16306_s1 + $0x60] sm:$0xff] }
 0xc3f   :  { %v12617_v9 = vpack.c.bf16 %v4453_v7, %v4452_v5  ;;  %v9166_v5 = vld [vmem:[%s16306_s1 + $0x188] sm:$0xff]  ;;  %v4025_v7 = vld [vmem:[%s16315_s9 + $0x10] sm:$0xff] }
 0xc45   :  { %v3522_v12 = vld [vmem:[#allocation4 + $0x1] sm:$0xf] }
 0xc46   :  { %11087 = vmatmul.mubr.msk.f32.vlgmr.msra.gmra.mrb[12].mxu0 %vm45_vm3, %v3522_v12  ;;  %v3602_v17 = vld [vmem:[#allocation4 + $0x2] sm:$0xf]  ;;  %v9133_v12 = vld [vmem:[%s16306_s1 + $0x80] sm:$0xff] }
 0xc47   :  { %12540 = vmatpush3.bf16.msra.mxu0 %v12539_v10  ;;  %11097 = vmatprep.mubr.msk.f32.mxu0 %vm13249_vm0, %v13250_v4  ;;  %v3682_v18 = vld [vmem:[#allocation4 + $0x3] sm:$0xf]  ;;  %v4454_v10 = vld [vmem:[%s16306_s1 + $0x70] sm:$0xff] }
 0xc48   :  { %12541 = vmatprep.subr.bf16.mxu0 %v13248_v0  ;;  %v12620_v6 = vpack.c.bf16 %v4455_v11, %v4454_v10  ;;  %v4615_v11 = vld [vmem:[#allocation2 + $0x2] ss:$2 sm:$0xff] }
 0xc4b   :  { %12543 = vmatpush3.bf16.msra.mxu0 %v12542_v38  ;;  %v9134_v38 = vld [vmem:[%s16306_s1 + $0x88] sm:$0xff] }
 0xc4c   :  { %12544 = vmatprep.subr.bf16.mxu0 %v13248_v0  ;;  %v12623_v13 = vpack.c.bf16 %v9134_v38, %v9133_v12  ;;  %v9167_v12 = vld [vmem:[%s16306_s1 + $0x190] sm:$0xff]  ;;  %v9168_v38 = vld [vmem:[%s16306_s1 + $0x198] sm:$0xff] }
 0xc4e   :  { %11098 = vmatmul.mubr.msk.f32.vlgmr.msra.gmra.mrb[12].mxu0 %vm45_vm3, %v3602_v17  ;;  %v9137_v17 = vld [vmem:[%s16306_s1 + $0xa0] sm:$0xff] }
 0xc4f   :  { %12546 = vmatpush3.bf16.msra.mxu0 %v12545_v14  ;;  %11108 = vmatprep.mubr.msk.f32.mxu0 %vm13249_vm0, %v13250_v4  ;;  %v9135_v14 = vld [vmem:[%s16306_s1 + $0x90] sm:$0xff] }
 0xc50   :  { %12547 = vmatprep.subr.bf16.mxu0 %v13248_v0  ;;  %v12626_v16 = vpack.c.bf16 %v9136_v15, %v9135_v14  ;;  %v9170_v14 = vld [vmem:[%s16306_s1 + $0x1a8] sm:$0xff] }
 0xc53   :  { %12549 = vmatpush3.bf16.msra.mxu0 %v12548_v37  ;;  %v9138_v37 = vld [vmem:[%s16306_s1 + $0xa8] sm:$0xff] }
 0xc54   :  { %12568 = vmatprep.subr.bf16.mxu0 %v13248_v0 }
 0xc56   :  { %11109 = vmatmul.mubr.msk.f32.vlgmr.msra.gmra.mrb[12].mxu0 %vm45_vm3, %v3682_v18  ;;  %v12629_v18 = vpack.c.bf16 %v9138_v37, %v9137_v17  ;;  %v9172_v17 = vld [vmem:[%s16306_s1 + $0x1b8] sm:$0xff] }
 0xc57   :  { %11152 = vmatprep.mubr.msk.f32.mxu0 %vm13249_vm0, %v13250_v4 }
 0xd29   :  { %v3757_v26 = vpop.f32.mrb[12].mxu0 }
 0xd2a   :  { %v13140_v27 = vadd.f32 %v9075_v25, %v3757_v26  ;;  %v11110_v28 = vpop.f32.mrb[13].mxu0  ;;  %v9143_v25 = vld [vmem:[%s16306_s1 + $0xd0] sm:$0xff]  ;;  %v9144_v26 = vld [vmem:[%s16306_s1 + $0xd8] sm:$0xff] }
 0xd2b   :  { %v9145_v28 = vld [vmem:[%s16306_s1 + $0xe0] sm:$0xff] }
 0xd2c   :  { %v3762_v29 = vmax.f32 %v13140_v27, 0.0  ;;  %v12638_v27 = vpack.c.bf16 %v9144_v26, %v9143_v25  ;;  %v9178_v25 = vld [vmem:[%s16306_s1 + $0x1e8] sm:$0xff] }
 0xd2e   :  { %3763 = vst.msk [vmem:[#allocation4 + $0x2] sm:$0xf] %vm2512_vm4, %v3762_v29  ;;  %v9146_v29 = vld [vmem:[%s16306_s1 + $0xe8] sm:$0xff] }
 0xd2f   :  { %v12641_v30 = vpack.c.bf16 %v9146_v29, %v9145_v28  ;;  %v9180_v28 = vld [vmem:[%s16306_s1 + $0x1f8] sm:$0xff] }
 0xd35   :  { %v3772_v39 = vld [vmem:[#allocation4 + $0x1] sm:$0xf] }
 0xd36   :  { %11120 = vmatmul.mubr.msk.f32.vlgmr.msra.gmra.mrb[34].mxu1 %vm45_vm3, %v3772_v39  ;;  %v3852_v45 = vld [vmem:[#allocation4 + $0x2] sm:$0xf] }
 0xd37   :  { %12558 = vmatpush3.bf16.msra.mxu1 %v12557_v32  ;;  %11130 = vmatprep.mubr.msk.f32.mxu1 %vm13249_vm0, %v13250_v4  ;;  %v3932_v52 = vld [vmem:[#allocation4 + $0x3] sm:$0xf]  ;;  %v9148_v32 = vld [vmem:[%s16306_s1 + $0xf8] sm:$0xff] }
 0xd38   :  { %12559 = vmatprep.subr.bf16.mxu1 %v13248_v0  ;;  %v12644_v34 = vpack.c.bf16 %v9148_v32, %v9147_v31  ;;  %v9150_v39 = vld [vmem:[%s16306_s1 + $0x108] sm:$0xff] }
 0xd39   :  { %v12647_v41 = vpack.c.bf16 %v9150_v39, %v9149_v35  ;;  %v9182_v31 = vld [vmem:[%s16306_s1 + $0x208] sm:$0xff]  ;;  %v9183_v35 = vld [vmem:[%s16306_s1 + $0x210] sm:$0xff]  ;;  %v9184_v39 = vld [vmem:[%s16306_s1 + $0x218] sm:$0xff] }
 0xd3a   :  { %v4703_v32 = vld [vmem:[#allocation2 + $0x3] ss:$2 sm:$0xff] }
 0xd3b   :  { %12561 = vmatpush3.bf16.msra.mxu1 %v12560_v40  ;;  %v4527_v40 = vld [vmem:[#allocation2 + $0x1] ss:$2 sm:$0xff] }
 0xd3c   :  { %12562 = vmatprep.subr.bf16.mxu1 %v13248_v0 }
 0xd3e   :  { %11131 = vmatmul.mubr.msk.f32.vlgmr.msra.gmra.mrb[36].mxu1 %vm45_vm3, %v3852_v45  ;;  %v9154_v45 = vld [vmem:[%s16306_s1 + $0x128] sm:$0xff] }
 0xd3f   :  { %12564 = vmatpush3.bf16.msra.mxu1 %v12563_v43  ;;  %11141 = vmatprep.mubr.msk.f32.mxu1 %vm13249_vm0, %v13250_v4  ;;  %v9152_v43 = vld [vmem:[%s16306_s1 + $0x118] sm:$0xff] }
 0xd40   :  { %12565 = vmatprep.subr.bf16.mxu1 %v13248_v0  ;;  %v12650_v63 = vpack.c.bf16 %v9152_v43, %v9151_v42  ;;  %v9186_v42 = vld [vmem:[%s16306_s1 + $0x228] sm:$0xff] }
 0xd43   :  { %12567 = vmatpush3.bf16.msra.mxu1 %v12566_v46  ;;  %v12653_v46 = vpack.c.bf16 %v9154_v45, %v9153_v44  ;;  %v9188_v44 = vld [vmem:[%s16306_s1 + $0x238] sm:$0xff] }
 0xd44   :  { %12598 = vmatprep.subr.bf16.mxu1 %v13248_v0 }
 0xd46   :  { %11142 = vmatmul.mubr.msk.f32.vlgmr.msra.gmra.mrb[38].mxu1 %vm45_vm3, %v3932_v52  ;;  %v12659_v52 = vpack.c.bf16 %v9158_v51, %v9157_v50  ;;  %v9192_v50 = vld [vmem:[%s16306_s1 + $0x258] sm:$0xff] }
 0xd47   :  { %12600 = vmatpush3.bf16.msra.mxu1 %v12599_v49  ;;  %11231 = vmatprep.mubr.msk.f32.mxu1 %vm13249_vm0, %v13250_v4  ;;  %v12656_v49 = vpack.c.bf16 %v9156_v48, %v9155_v47  ;;  %v9190_v47 = vld [vmem:[%s16306_s1 + $0x248] sm:$0xff] }
 0xd48   :  { %12601 = vmatprep.subr.bf16.mxu1 %v13248_v0 }
 0xd4b   :  { %12603 = vmatpush3.bf16.msra.mxu1 %v12602_v53  ;;  %v9159_v53 = vld [vmem:[%s16306_s1 + $0x150] sm:$0xff] }
 0xd4c   :  { %12604 = vmatprep.subr.bf16.mxu1 %v13248_v0  ;;  %v12662_v55 = vpack.c.bf16 %v9160_v54, %v9159_v53  ;;  %v9194_v53 = vld [vmem:[%s16306_s1 + $0x268] sm:$0xff] }
 0xd4f   :  { %12606 = vmatpush3.bf16.msra.mxu1 %v12605_v56  ;;  %v9161_v56 = vld [vmem:[%s16306_s1 + $0x160] sm:$0xff] }
 0xd50   :  { %12607 = vmatprep.subr.bf16.mxu1 %v13248_v0  ;;  %v12665_v58 = vpack.c.bf16 %v9162_v57, %v9161_v56  ;;  %v9196_v56 = vld [vmem:[%s16306_s1 + $0x278] sm:$0xff] }
 0xd53   :  { %12609 = vmatpush3.bf16.msra.mxu1 %v12608_v36  ;;  %v9163_v36 = vld [vmem:[%s16306_s1 + $0x170] sm:$0xff] }
 0xd54   :  { %12610 = vmatprep.subr.bf16.mxu1 %v13248_v0  ;;  %v12668_v62 = vpack.c.bf16 %v9164_v59, %v9163_v36 }
 0xd57   :  { %12612 = vmatpush3.bf16.msra.mxu1 %v12611_v61  ;;  %v4024_v61 = vld [vmem:[%s16315_s9 + $0x8] sm:$0xff] }
 0xd58   :  { %12613 = vmatprep.subr.bf16.mxu1 %v13248_v0 }
 0xd5b   :  { %12615 = vmatpush3.bf16.msra.mxu1 %v12614_v2  ;;  %v12569_v2 = vpack.c.bf16 %v4024_v61, %v4023_v60  ;;  %v9092_v60 = vld [vmem:[%s16314_s8 + $0x5] ss:$0 sm:$0xff] }
 0xd5c   :  { %12616 = vmatprep.subr.bf16.mxu1 %v13248_v0 }
 0xd5d   :  { %12570 = vmatpush3.bf16.msra.mxu0 %v12569_v2 }
 0xd5e   :  { %12571 = vmatprep.subr.bf16.mxu0 %v13248_v0 }
 0xd5f   :  { %12618 = vmatpush3.bf16.msra.mxu1 %v12617_v9  ;;  %v4026_v9 = vld [vmem:[%s16315_s9 + $0x18] sm:$0xff] }
 0xd60   :  { %12619 = vmatprep.subr.bf16.mxu1 %v13248_v0  ;;  %v12572_v10 = vpack.c.bf16 %v4026_v9, %v4025_v7 }
 0xd62   :  { %12573 = vmatpush3.bf16.msra.mxu0 %v12572_v10 }
 0xd63   :  { %12621 = vmatpush3.bf16.msra.mxu1 %v12620_v6  ;;  %v12671_v6 = vpack.c.bf16 %v9166_v5, %v9165_v1  ;;  %12574 = vmatprep.subr.bf16.mxu0 %v13248_v0 }
 0xd64   :  { %12622 = vmatprep.subr.bf16.mxu1 %v13248_v0 }
 0xd66   :  { %11232 = vmatmul.mubr.f32.vlgmr.msra.gmra.mrb[40].mxu1 %v4439_v33  ;;  %v12674_v33 = vpack.c.bf16 %v9168_v38, %v9167_v12  ;;  %v9111_v12 = vld [vmem:[%s16315_s9 + $0x28] sm:$0xff] }
 0xd67   :  { %12624 = vmatpush3.bf16.msra.mxu1 %v12623_v13  ;;  %11266 = vmatprep.mubr.msk.f32.mxu1 %vm13249_vm0, %v13250_v4  ;;  %v9169_v13 = vld [vmem:[%s16306_s1 + $0x1a0] sm:$0xff] }
 0xd68   :  { %12625 = vmatprep.subr.bf16.mxu1 %v13248_v0  ;;  %v12677_v15 = vpack.c.bf16 %v9170_v14, %v9169_v13  ;;  %v9115_v14 = vld [vmem:[%s16315_s9 + $0x40] sm:$0xff] }
 0xd6b   :  { %12627 = vmatpush3.bf16.msra.mxu1 %v12626_v16  ;;  %v9171_v16 = vld [vmem:[%s16306_s1 + $0x1b0] sm:$0xff] }
 0xd6c   :  { %12628 = vmatprep.subr.bf16.mxu1 %v13248_v0  ;;  %v12680_v37 = vpack.c.bf16 %v9172_v17, %v9171_v16  ;;  %v9117_v17 = vld [vmem:[%s16315_s9 + $0x50] sm:$0xff] }
 0xd6f   :  { %12630 = vmatpush3.bf16.msra.mxu1 %v12629_v18  ;;  %v9173_v18 = vld [vmem:[%s16306_s1 + $0x1c0] sm:$0xff] }
 0xd70   :  { %12631 = vmatprep.subr.bf16.mxu1 %v13248_v0  ;;  %v12683_v20 = vpack.c.bf16 %v9174_v19, %v9173_v18 }
 0xd73   :  { %12633 = vmatpush3.bf16.msra.mxu1 %v12632_v21  ;;  %v9175_v21 = vld [vmem:[%s16306_s1 + $0x1d0] sm:$0xff] }
 0xd74   :  { %12634 = vmatprep.subr.bf16.mxu1 %v13248_v0  ;;  %v12686_v23 = vpack.c.bf16 %v9176_v22, %v9175_v21  ;;  %v9121_v21 = vld [vmem:[%s16315_s9 + $0x68] sm:$0xff] }
 0xd77   :  { %12636 = vmatpush3.bf16.msra.mxu1 %v12635_v24  ;;  %v9177_v24 = vld [vmem:[%s16306_s1 + $0x1e0] sm:$0xff] }
 0xd78   :  { %12637 = vmatprep.subr.bf16.mxu1 %v13248_v0  ;;  %v12689_v26 = vpack.c.bf16 %v9178_v25, %v9177_v24  ;;  %v9123_v24 = vld [vmem:[%s16315_s9 + $0x78] sm:$0xff] }
 0xd7b   :  { %12639 = vmatpush3.bf16.msra.mxu1 %v12638_v27  ;;  %v9179_v27 = vld [vmem:[%s16306_s1 + $0x1f0] sm:$0xff] }
 0xd7c   :  { %12640 = vmatprep.subr.bf16.mxu1 %v13248_v0  ;;  %v12692_v29 = vpack.c.bf16 %v9180_v28, %v9179_v27  ;;  %v9125_v27 = vld [vmem:[%s16315_s9 + $0x80] sm:$0xff]  ;;  %v9126_v28 = vld [vmem:[%s16315_s9 + $0x88] sm:$0xff] }
 0xd7f   :  { %12642 = vmatpush3.bf16.msra.mxu1 %v12641_v30  ;;  %v9181_v30 = vld [vmem:[%s16306_s1 + $0x200] sm:$0xff] }
 0xd80   :  { %12643 = vmatprep.subr.bf16.mxu1 %v13248_v0 }
 0xd83   :  { %12645 = vmatpush3.bf16.msra.mxu1 %v12644_v34  ;;  %v12695_v34 = vpack.c.bf16 %v9182_v31, %v9181_v30  ;;  %v9127_v30 = vld [vmem:[%s16315_s9 + $0x90] sm:$0xff]  ;;  %v9128_v31 = vld [vmem:[%s16315_s9 + $0x98] sm:$0xff] }
 0xd84   :  { %12646 = vmatprep.subr.bf16.mxu1 %v13248_v0 }
 0xd86   :  { %11267 = vmatmul.mubr.f32.vlgmr.msra.gmra.mrb[40].mxu1 %v4527_v40  ;;  %v12698_v40 = vpack.c.bf16 %v9184_v39, %v9183_v35  ;;  %v4889_v35 = vld [vmem:[%s16308_s3] sm:$0xff]  ;;  %v4890_v39 = vld [vmem:[%s16308_s3 + $0x8] sm:$0xff] }
 0xd87   :  { %12648 = vmatpush3.bf16.msra.mxu1 %v12647_v41  ;;  %11301 = vmatprep.mubr.msk.f32.mxu1 %vm13249_vm0, %v13250_v4  ;;  %v9185_v41 = vld [vmem:[%s16306_s1 + $0x220] sm:$0xff] }
 0xd88   :  { %12649 = vmatprep.subr.bf16.mxu1 %v13248_v0  ;;  %v12701_v43 = vpack.c.bf16 %v9186_v42, %v9185_v41  ;;  %v4891_v41 = vld [vmem:[%s16308_s3 + $0x10] sm:$0xff]  ;;  %v4892_v42 = vld [vmem:[%s16308_s3 + $0x18] sm:$0xff] }
 0xd8b   :  { %12651 = vmatpush3.bf16.msra.mxu1 %v12650_v63  ;;  %v9187_v63 = vld [vmem:[%s16306_s1 + $0x230] sm:$0xff] }
 0xd8c   :  { %12652 = vmatprep.subr.bf16.mxu1 %v13248_v0  ;;  %v12704_v45 = vpack.c.bf16 %v9188_v44, %v9187_v63  ;;  %v12722_v63 = vpack.c.bf16 %v4892_v42, %v4891_v41  ;;  %v4893_v44 = vld [vmem:[%s16308_s3 + $0x20] sm:$0xff] }
 0xd8d   :  { %v9228_v42 = vld [vmem:[%s16308_s3 + $0x100] sm:$0xff] }
 0xd8f   :  { %12654 = vmatpush3.bf16.msra.mxu1 %v12653_v46  ;;  %v9189_v46 = vld [vmem:[%s16306_s1 + $0x240] sm:$0xff] }
 0xd90   :  { %12655 = vmatprep.subr.bf16.mxu1 %v13248_v0  ;;  %v12707_v48 = vpack.c.bf16 %v9190_v47, %v9189_v46  ;;  %v4895_v47 = vld [vmem:[%s16308_s3 + $0x30] sm:$0xff] }
 0xd93   :  { %12657 = vmatpush3.bf16.msra.mxu1 %v12656_v49  ;;  %v9191_v49 = vld [vmem:[%s16306_s1 + $0x250] sm:$0xff] }
 0xd94   :  { %12658 = vmatprep.subr.bf16.mxu1 %v13248_v0  ;;  %v12710_v51 = vpack.c.bf16 %v9192_v50, %v9191_v49  ;;  %v9132_v50 = vld [vmem:[%s16309_s2] ss:$0 sm:$0xff] }
 0xd97   :  { %12660 = vmatpush3.bf16.msra.mxu1 %v12659_v52  ;;  %v9193_v52 = vld [vmem:[%s16306_s1 + $0x260] sm:$0xff] }
 0xd98   :  { %12661 = vmatprep.subr.bf16.mxu1 %v13248_v0  ;;  %v12713_v54 = vpack.c.bf16 %v9194_v53, %v9193_v52 }
 0xd9b   :  { %12663 = vmatpush3.bf16.msra.mxu1 %v12662_v55  ;;  %v9195_v55 = vld [vmem:[%s16306_s1 + $0x270] sm:$0xff] }
 0xd9c   :  { %12664 = vmatprep.subr.bf16.mxu1 %v13248_v0  ;;  %v12716_v57 = vpack.c.bf16 %v9196_v56, %v9195_v55  ;;  %v9199_v55 = vld [vmem:[%s16308_s3 + $0x40] sm:$0xff]  ;;  %v9200_v56 = vld [vmem:[%s16308_s3 + $0x48] sm:$0xff] }
 0xd9f   :  { %12666 = vmatpush3.bf16.msra.mxu1 %v12665_v58  ;;  %v4791_v58 = vld [vmem:[#allocation2 + $0x4] ss:$2 sm:$0xff] }
 0xda0   :  { %12667 = vmatprep.subr.bf16.mxu1 %v13248_v0 }
 0xda3   :  { %12669 = vmatpush3.bf16.msra.mxu1 %v12668_v62 }
 0xda4   :  { %12670 = vmatprep.subr.bf16.mxu1 %v13248_v0 }
 0xda6   :  { %11302 = vmatmul.mubr.f32.vlgmr.msra.gmra.mrb[40].mxu1 %v4615_v11 }
 0xda7   :  { %12672 = vmatpush3.bf16.msra.mxu1 %v12671_v6  ;;  %11336 = vmatprep.mubr.msk.f32.mxu1 %vm13249_vm0, %v13250_v4  ;;  %v9110_v6 = vld [vmem:[%s16315_s9 + $0x20] sm:$0xff] }
 0xda8   :  { %12673 = vmatprep.subr.bf16.mxu1 %v13248_v0  ;;  %v12575_v38 = vpack.c.bf16 %v9111_v12, %v9110_v6  ;;  %v9210_v6 = vld [vmem:[%s16308_s3 + $0x90] sm:$0xff]  ;;  %v9211_v12 = vld [vmem:[%s16308_s3 + $0x98] sm:$0xff] }
 0xdab   :  { %12675 = vmatpush3.bf16.msra.mxu1 %v12674_v33  ;;  %v9112_v33 = vld [vmem:[%s16315_s9 + $0x30] sm:$0xff] }
 0xdac   :  { %12676 = vmatprep.subr.bf16.mxu1 %v13248_v0 }
 0xdaf   :  { %12678 = vmatpush3.bf16.msra.mxu1 %v12677_v15  ;;  %v9116_v15 = vld [vmem:[%s16315_s9 + $0x48] sm:$0xff] }
 0xdb0   :  { %12679 = vmatprep.subr.bf16.mxu1 %v13248_v0  ;;  %v12581_v16 = vpack.c.bf16 %v9116_v15, %v9115_v14  ;;  %v9214_v14 = vld [vmem:[%s16308_s3 + $0xb0] sm:$0xff]  ;;  %v9215_v15 = vld [vmem:[%s16308_s3 + $0xb8] sm:$0xff] }
 0xdb3   :  { %12681 = vmatpush3.bf16.msra.mxu1 %v12680_v37  ;;  %v9118_v37 = vld [vmem:[%s16315_s9 + $0x58] sm:$0xff] }
 0xdb4   :  { %12682 = vmatprep.subr.bf16.mxu1 %v13248_v0  ;;  %v12584_v19 = vpack.c.bf16 %v9118_v37, %v9117_v17  ;;  %v9219_v17 = vld [vmem:[%s16308_s3 + $0xc0] sm:$0xff]  ;;  %v9220_v37 = vld [vmem:[%s16308_s3 + $0xc8] sm:$0xff] }
 0xdb7   :  { %12684 = vmatpush3.bf16.msra.mxu1 %v12683_v20  ;;  %v9120_v20 = vld [vmem:[%s16315_s9 + $0x60] sm:$0xff] }
 0xdb8   :  { %12685 = vmatprep.subr.bf16.mxu1 %v13248_v0  ;;  %v12587_v22 = vpack.c.bf16 %v9121_v21, %v9120_v20  ;;  %v9108_v20 = vld [vmem:[%s16316_s10] ss:$0 sm:$0xff] }
 0xdbb   :  { %12687 = vmatpush3.bf16.msra.mxu1 %v12686_v23  ;;  %v9122_v23 = vld [vmem:[%s16315_s9 + $0x70] sm:$0xff] }
 0xdbc   :  { %12688 = vmatprep.subr.bf16.mxu1 %v13248_v0 }
 0xdbf   :  { %12690 = vmatpush3.bf16.msra.mxu1 %v12689_v26  ;;  %v12590_v26 = vpack.c.bf16 %v9123_v24, %v9122_v23  ;;  %v9221_v24 = vld [vmem:[%s16308_s3 + $0xd0] sm:$0xff] }
 0xdc0   :  { %12691 = vmatprep.subr.bf16.mxu1 %v13248_v0 }
 0xdc3   :  { %12693 = vmatpush3.bf16.msra.mxu1 %v12692_v29  ;;  %v12593_v29 = vpack.c.bf16 %v9126_v28, %v9125_v27  ;;  %v9223_v27 = vld [vmem:[%s16308_s3 + $0xe0] sm:$0xff]  ;;  %v9224_v28 = vld [vmem:[%s16308_s3 + $0xe8] sm:$0xff] }
 0xdc4   :  { %12694 = vmatprep.subr.bf16.mxu1 %v13248_v0 }
 0xdc6   :  { %11337 = vmatmul.mubr.f32.vlgmr.msra.gmra.mrb[40].mxu1 %v4703_v32 }
 0xdc7   :  { %12696 = vmatpush3.bf16.msra.mxu1 %v12695_v34  ;;  %11371 = vmatprep.mubr.msk.f32.mxu1 %vm13249_vm0, %v13250_v4  ;;  %v12596_v34 = vpack.c.bf16 %v9128_v31, %v9127_v30  ;;  %v9225_v30 = vld [vmem:[%s16308_s3 + $0xf0] sm:$0xff]  ;;  %v9226_v31 = vld [vmem:[%s16308_s3 + $0xf8] sm:$0xff] }
 0xdc8   :  { %12697 = vmatprep.subr.bf16.mxu1 %v13248_v0 }
 0xdcb   :  { %12699 = vmatpush3.bf16.msra.mxu1 %v12698_v40  ;;  %v12719_v40 = vpack.c.bf16 %v4890_v39, %v4889_v35 }
 0xdcc   :  { %12700 = vmatprep.subr.bf16.mxu1 %v13248_v0 }
 0xdcf   :  { %12702 = vmatpush3.bf16.msra.mxu1 %v12701_v43 }
 0xdd0   :  { %12703 = vmatprep.subr.bf16.mxu1 %v13248_v0 }
 0xdd3   :  { %12705 = vmatpush3.bf16.msra.mxu1 %v12704_v45  ;;  %v4894_v45 = vld [vmem:[%s16308_s3 + $0x28] sm:$0xff] }
 0xdd4   :  { %12706 = vmatprep.subr.bf16.mxu1 %v13248_v0  ;;  %v12725_v46 = vpack.c.bf16 %v4894_v45, %v4893_v44  ;;  %v9230_v44 = vld [vmem:[%s16308_s3 + $0x110] sm:$0xff]  ;;  %v9231_v45 = vld [vmem:[%s16308_s3 + $0x118] sm:$0xff] }
 0xdd7   :  { %12708 = vmatpush3.bf16.msra.mxu1 %v12707_v48  ;;  %v4896_v48 = vld [vmem:[%s16308_s3 + $0x38] sm:$0xff] }
 0xdd8   :  { %12709 = vmatprep.subr.bf16.mxu1 %v13248_v0  ;;  %v12728_v49 = vpack.c.bf16 %v4896_v48, %v4895_v47  ;;  %v12770_v47 = vpack.c.bf16 %v9231_v45, %v9230_v44  ;;  %v9232_v48 = vld [vmem:[%s16308_s3 + $0x120] sm:$0xff]  ;;  %v9263_v44 = vld [vmem:[%s16308_s3 + $0x1f0] sm:$0xff]  ;;  %v9264_v45 = vld [vmem:[%s16308_s3 + $0x1f8] sm:$0xff] }
 0xddb   :  { %12711 = vmatpush3.bf16.msra.mxu1 %v12710_v51 }
 0xddc   :  { %12712 = vmatprep.subr.bf16.mxu1 %v13248_v0 }
 0xddf   :  { %12714 = vmatpush3.bf16.msra.mxu1 %v12713_v54 }
 0xde0   :  { %12715 = vmatprep.subr.bf16.mxu1 %v13248_v0 }
 0xde3   :  { %12717 = vmatpush3.bf16.msra.mxu1 %v12716_v57  ;;  %v12731_v57 = vpack.c.bf16 %v9200_v56, %v9199_v55  ;;  %v9237_v55 = vld [vmem:[%s16308_s3 + $0x140] sm:$0xff]  ;;  %v9238_v56 = vld [vmem:[%s16308_s3 + $0x148] sm:$0xff] }
 0xde4   :  { %12826 = vmatprep.subr.bf16.mxu1 %v13248_v0 }
 0xde6   :  { %11372 = vmatmul.mubr.f32.vlgmr.msra.gmra.mrb[40].mxu1 %v4791_v58  ;;  %v9201_v58 = vld [vmem:[%s16308_s3 + $0x50] sm:$0xff] }
 0xde7   :  { %11561 = vmatprep.mubr.msk.f32.mxu1 %vm13249_vm0, %v13250_v4 }
 0xe09   :  { %v3847_v36 = vpop.f32.mrb[34].mxu1 }
 0xe0a   :  { %v11121_v59 = vpop.f32.mrb[35].mxu1  ;;  %v3851_v61 = vadd.f32 %v9092_v60, %v3847_v36  ;;  %v9202_v36 = vld [vmem:[%s16308_s3 + $0x58] sm:$0xff] }
 0xe0b   :  { %v12734_v60 = vpack.c.bf16 %v9202_v36, %v9201_v58  ;;  %v9239_v58 = vld [vmem:[%s16308_s3 + $0x150] sm:$0xff]  ;;  %v9240_v36 = vld [vmem:[%s16308_s3 + $0x158] sm:$0xff] }
 0xe11   :  { %v3927_v62 = vpop.f32.mrb[36].mxu1 }
 0xe12   :  { %v3931_v1 = vadd.f32 %v3927_v62, %v3851_v61  ;;  %v11132_v2 = vpop.f32.mrb[37].mxu1  ;;  %v9203_v61 = vld [vmem:[%s16308_s3 + $0x60] sm:$0xff]  ;;  %v9204_v62 = vld [vmem:[%s16308_s3 + $0x68] sm:$0xff] }
 0xe13   :  { %v9205_v2 = vld [vmem:[%s16308_s3 + $0x70] sm:$0xff] }
 0xe19   :  { %v4007_v5 = vpop.f32.mrb[38].mxu1 }
 0xe1a   :  { %v4011_v7 = vadd.f32 %v4007_v5, %v3931_v1  ;;  %v11143_v9 = vpop.f32.mrb[39].mxu1  ;;  %v12737_v1 = vpack.c.bf16 %v9204_v62, %v9203_v61  ;;  %v9206_v5 = vld [vmem:[%s16308_s3 + $0x78] sm:$0xff]  ;;  %v9241_v61 = vld [vmem:[%s16308_s3 + $0x160] sm:$0xff]  ;;  %v9242_v62 = vld [vmem:[%s16308_s3 + $0x168] sm:$0xff] }
 0xe1b   :  { %v9208_v9 = vld [vmem:[%s16308_s3 + $0x80] sm:$0xff] }
 0xe1c   :  { %v4012_v10 = vadd.f32 %v4011_v7, %v14635_v3  ;;  %v9113_v3 = vld [vmem:[%s16315_s9 + $0x38] sm:$0xff]  ;;  %v12740_v7 = vpack.c.bf16 %v9206_v5, %v9205_v2  ;;  %v9243_v2 = vld [vmem:[%s16308_s3 + $0x170] sm:$0xff] }
 0xe1d   :  { %v12578_v13 = vpack.c.bf16 %v9113_v3, %v9112_v33  ;;  %v12746_v33 = vpack.c.bf16 %v9211_v12, %v9210_v6  ;;  %v9212_v3 = vld [vmem:[%s16308_s3 + $0xa0] sm:$0xff]  ;;  %v9244_v5 = vld [vmem:[%s16308_s3 + $0x178] sm:$0xff]  ;;  %v9250_v12 = vld [vmem:[%s16308_s3 + $0x190] sm:$0xff] }
 0xe1e   :  { %v4013_v11 = vadd.f32 %v14407_v8, %v4012_v10  ;;  %v9209_v10 = vld [vmem:[%s16308_s3 + $0x88] sm:$0xff] }
 0xe20   :  { %4014 = vst.msk [vmem:[#allocation4 + $0x2] sm:$0xf] %vm2512_vm4, %v4013_v11  ;;  %v12743_v11 = vpack.c.bf16 %v9209_v10, %v9208_v9  ;;  %v9248_v10 = vld [vmem:[%s16308_s3 + $0x180] sm:$0xff] }
 0xe27   :  { %v4022_v8 = vld [vmem:[#allocation4] ss:$2 sm:$0x3]  ;;  %v4102_v18 = vld [vmem:[#allocation4 + $0x1] ss:$2 sm:$0x3] }
 0xe28   :  { %11153 = vmatmul.mubr.msk.f32.vlgmr.msra.gmra.mrb[14].mxu0 %vm45_vm3, %v4022_v8  ;;  %v4183_v25 = vld [vmem:[#allocation4 + $0x2] ss:$2 sm:$0x3]  ;;  %v4264_v32 = vld [vmem:[#allocation4 + $0x3] ss:$2 sm:$0x3] }
 0xe29   :  { %12576 = vmatpush3.bf16.msra.mxu0 %v12575_v38  ;;  %11163 = vmatprep.mubr.msk.f32.mxu0 %vm13249_vm0, %v13250_v4  ;;  %v4345_v43 = vld [vmem:[#allocation4 + $0x4] ss:$2 sm:$0x3] }
 0xe2a   :  { %12577 = vmatprep.subr.bf16.mxu0 %v13248_v0  ;;  %v9213_v8 = vld [vmem:[%s16308_s3 + $0xa8] sm:$0xff] }
 0xe2d   :  { %12579 = vmatpush3.bf16.msra.mxu0 %v12578_v13  ;;  %v12749_v13 = vpack.c.bf16 %v9213_v8, %v9212_v3  ;;  %v9252_v3 = vld [vmem:[%s16308_s3 + $0x1a0] sm:$0xff]  ;;  %v9253_v8 = vld [vmem:[%s16308_s3 + $0x1a8] sm:$0xff] }
 0xe2e   :  { %12580 = vmatprep.subr.bf16.mxu0 %v13248_v0 }
 0xe30   :  { %11164 = vmatmul.mubr.msk.f32.vlgmr.msra.gmra.mrb[14].mxu0 %vm45_vm3, %v4102_v18  ;;  %v12755_v18 = vpack.c.bf16 %v9220_v37, %v9219_v17  ;;  %v9277_v17 = vld [vmem:[%s16308_s3 + $0x240] sm:$0xff]  ;;  %v9278_v37 = vld [vmem:[%s16308_s3 + $0x248] sm:$0xff] }
 0xe31   :  { %12582 = vmatpush3.bf16.msra.mxu0 %v12581_v16  ;;  %11174 = vmatprep.mubr.msk.f32.mxu0 %vm13249_vm0, %v13250_v4  ;;  %v12752_v16 = vpack.c.bf16 %v9215_v15, %v9214_v14  ;;  %v9254_v14 = vld [vmem:[%s16308_s3 + $0x1b0] sm:$0xff]  ;;  %v9255_v15 = vld [vmem:[%s16308_s3 + $0x1b8] sm:$0xff] }
 0xe32   :  { %12583 = vmatprep.subr.bf16.mxu0 %v13248_v0 }
 0xe35   :  { %12585 = vmatpush3.bf16.msra.mxu0 %v12584_v19 }
 0xe36   :  { %12586 = vmatprep.subr.bf16.mxu0 %v13248_v0 }
 0xe38   :  { %11175 = vmatmul.mubr.msk.f32.vlgmr.msra.gmra.mrb[14].mxu0 %vm45_vm3, %v4183_v25  ;;  %v9222_v25 = vld [vmem:[%s16308_s3 + $0xd8] sm:$0xff] }
 0xe39   :  { %12588 = vmatpush3.bf16.msra.mxu0 %v12587_v22  ;;  %11185 = vmatprep.mubr.msk.f32.mxu0 %vm13249_vm0, %v13250_v4 }
 0xe3a   :  { %12589 = vmatprep.subr.bf16.mxu0 %v13248_v0 }
 0xe3d   :  { %12591 = vmatpush3.bf16.msra.mxu0 %v12590_v26  ;;  %v12758_v26 = vpack.c.bf16 %v9222_v25, %v9221_v24 }
 0xe3e   :  { %12592 = vmatprep.subr.bf16.mxu0 %v13248_v0 }
 0xe40   :  { %11186 = vmatmul.mubr.msk.f32.vlgmr.msra.gmra.mrb[14].mxu0 %vm45_vm3, %v4264_v32  ;;  %v12764_v32 = vpack.c.bf16 %v9226_v31, %v9225_v30  ;;  %v9257_v31 = vld [vmem:[%s16308_s3 + $0x1c0] sm:$0xff] }
 0xe41   :  { %12594 = vmatpush3.bf16.msra.mxu0 %v12593_v29  ;;  %11196 = vmatprep.mubr.msk.f32.mxu0 %vm13249_vm0, %v13250_v4  ;;  %v12761_v29 = vpack.c.bf16 %v9224_v28, %v9223_v27 }
 0xe42   :  { %12595 = vmatprep.subr.bf16.mxu0 %v13248_v0 }
 0xe45   :  { %12597 = vmatpush3.bf16.msra.mxu0 %v12596_v34  ;;  %v9197_v34 = vld [vmem:[%s16310_s4] ss:$0 sm:$0xff] }
 0xe46   :  { %12718 = vmatprep.subr.bf16.mxu0 %v13248_v0 }
 0xe48   :  { %11197 = vmatmul.mubr.msk.f32.vlgmr.msra.gmra.mrb[14].mxu0 %vm45_vm3, %v4345_v43  ;;  %v9229_v43 = vld [vmem:[%s16308_s3 + $0x108] sm:$0xff] }
 0xe49   :  { %12720 = vmatpush3.bf16.msra.mxu0 %v12719_v40  ;;  %11390 = vmatprep.mubr.msk.f32.mxu0 %vm13249_vm0, %v13250_v4 }
 0xe4a   :  { %12721 = vmatprep.subr.bf16.mxu0 %v13248_v0 }
 0xe4d   :  { %12723 = vmatpush3.bf16.msra.mxu0 %v12722_v63  ;;  %v12767_v63 = vpack.c.bf16 %v9229_v43, %v9228_v42  ;;  %v9261_v42 = vld [vmem:[%s16308_s3 + $0x1e0] sm:$0xff]  ;;  %v9262_v43 = vld [vmem:[%s16308_s3 + $0x1e8] sm:$0xff] }
 0xe4e   :  { %12724 = vmatprep.subr.bf16.mxu0 %v13248_v0 }
 0xe51   :  { %12726 = vmatpush3.bf16.msra.mxu0 %v12725_v46 }
 0xe52   :  { %12727 = vmatprep.subr.bf16.mxu0 %v13248_v0 }
 0xe55   :  { %12729 = vmatpush3.bf16.msra.mxu0 %v12728_v49  ;;  %v9233_v49 = vld [vmem:[%s16308_s3 + $0x128] sm:$0xff] }
 0xe56   :  { %12730 = vmatprep.subr.bf16.mxu0 %v13248_v0 }
 0xeb9   :  { %v4874_v51 = vpop.f32.mrb[40].mxu1 }
 0xeba   :  { %v15143_v52 = vadd.f32 %v9132_v50, %v4874_v51  ;;  %v11373_v53 = vpop.f32.mrb[41].mxu1  ;;  %v12773_v50 = vpack.c.bf16 %v9233_v49, %v9232_v48  ;;  %v9234_v51 = vld [vmem:[%s16308_s3 + $0x130] sm:$0xff]  ;;  %v9267_v48 = vld [vmem:[%s16308_s3 + $0x208] sm:$0xff] }
 0xebb   :  { %v9235_v53 = vld [vmem:[%s16308_s3 + $0x138] sm:$0xff] }
 0xebc   :  { %v4879_v54 = vmax.f32 %v15143_v52, 0.0 }
 0xebe   :  { %4880 = vst.msk [vmem:[#allocation3 + $0x2] sm:$0xff] %vm41_vm1, %v4879_v54  ;;  %v12776_v54 = vpack.c.bf16 %v9235_v53, %v9234_v51  ;;  %v9269_v51 = vld [vmem:[%s16308_s3 + $0x218] sm:$0xff] }
 0xec5   :  { %v4888_v59 = vld [vmem:[#allocation3 + $0x1] sm:$0xff] }
 0xec6   :  { %11391 = vmatmul.mubr.msk.f32.vlgmr.msra.gmra.mrb[16].mxu0 %vm41_vm1, %v4888_v59  ;;  %v4971_v38 = vld [vmem:[#allocation3 + $0x2] sm:$0xff] }
 0xec7   :  { %12732 = vmatpush3.bf16.msra.mxu0 %v12731_v57  ;;  %11409 = vmatprep.mubr.msk.f32.mxu0 %vm13249_vm0, %v13250_v4  ;;  %v5054_v19 = vld [vmem:[#allocation3 + $0x3] sm:$0xff]  ;;  %v12779_v57 = vpack.c.bf16 %v9238_v56, %v9237_v55  ;;  %v9271_v56 = vld [vmem:[%s16308_s3 + $0x228] sm:$0xff] }
 0xec8   :  { %12733 = vmatprep.subr.bf16.mxu0 %v13248_v0  ;;  %v9270_v55 = vld [vmem:[%s16308_s3 + $0x220] sm:$0xff] }
 0xecb   :  { %12735 = vmatpush3.bf16.msra.mxu0 %v12734_v60  ;;  %v12782_v60 = vpack.c.bf16 %v9240_v36, %v9239_v58  ;;  %v9272_v58 = vld [vmem:[%s16308_s3 + $0x230] sm:$0xff]  ;;  %v9273_v36 = vld [vmem:[%s16308_s3 + $0x238] sm:$0xff] }
 0xecc   :  { %12736 = vmatprep.subr.bf16.mxu0 %v13248_v0 }
 0xecf   :  { %12738 = vmatpush3.bf16.msra.mxu0 %v12737_v1  ;;  %v12785_v1 = vpack.c.bf16 %v9242_v62, %v9241_v61  ;;  %v9296_v61 = vld [vmem:[%s16308_s3 + $0x2c8] sm:$0xff] }
 0xed0   :  { %12739 = vmatprep.subr.bf16.mxu0 %v13248_v0 }
 0xed3   :  { %12741 = vmatpush3.bf16.msra.mxu0 %v12740_v7  ;;  %v12788_v7 = vpack.c.bf16 %v9244_v5, %v9243_v2  ;;  %v9279_v2 = vld [vmem:[%s16308_s3 + $0x250] sm:$0xff]  ;;  %v9280_v5 = vld [vmem:[%s16308_s3 + $0x258] sm:$0xff] }
 0xed4   :  { %12742 = vmatprep.subr.bf16.mxu0 %v13248_v0 }
 0xed6   :  { %11410 = vmatmul.mubr.msk.f32.vlgmr.msra.gmra.mrb[16].mxu0 %vm41_vm1, %v4971_v38  ;;  %v9251_v38 = vld [vmem:[%s16308_s3 + $0x198] sm:$0xff] }
 0xed7   :  { %12744 = vmatpush3.bf16.msra.mxu0 %v12743_v11  ;;  %11428 = vmatprep.mubr.msk.f32.mxu0 %vm13249_vm0, %v13250_v4  ;;  %v9249_v11 = vld [vmem:[%s16308_s3 + $0x188] sm:$0xff] }
 0xed8   :  { %12745 = vmatprep.subr.bf16.mxu0 %v13248_v0  ;;  %v12791_v6 = vpack.c.bf16 %v9249_v11, %v9248_v10  ;;  %v9298_v10 = vld [vmem:[%s16308_s3 + $0x2d8] sm:$0xff] }
 0xedb   :  { %12747 = vmatpush3.bf16.msra.mxu0 %v12746_v33  ;;  %v12794_v33 = vpack.c.bf16 %v9251_v38, %v9250_v12  ;;  %v9282_v12 = vld [vmem:[%s16308_s3 + $0x268] sm:$0xff] }
 0xedc   :  { %12748 = vmatprep.subr.bf16.mxu0 %v13248_v0 }
 0xedf   :  { %12750 = vmatpush3.bf16.msra.mxu0 %v12749_v13  ;;  %v12797_v13 = vpack.c.bf16 %v9253_v8, %v9252_v3  ;;  %v9300_v3 = vld [vmem:[%s16308_s3 + $0x2e8] sm:$0xff] }
 0xee0   :  { %12751 = vmatprep.subr.bf16.mxu0 %v13248_v0 }
 0xee3   :  { %12753 = vmatpush3.bf16.msra.mxu0 %v12752_v16  ;;  %v12800_v16 = vpack.c.bf16 %v9255_v15, %v9254_v14  ;;  %v9284_v14 = vld [vmem:[%s16308_s3 + $0x278] sm:$0xff]  ;;  %v9301_v15 = vld [vmem:[%s16308_s3 + $0x2f0] sm:$0xff] }
 0xee4   :  { %12754 = vmatprep.subr.bf16.mxu0 %v13248_v0 }
 0xee6   :  { %11429 = vmatmul.mubr.msk.f32.vlgmr.msra.gmra.mrb[16].mxu0 %vm41_vm1, %v5054_v19 }
 0xee7   :  { %12756 = vmatpush3.bf16.msra.mxu0 %v12755_v18  ;;  %11447 = vmatprep.mubr.msk.f32.mxu0 %vm13249_vm0, %v13250_v4  ;;  %v12827_v18 = vpack.c.bf16 %v9278_v37, %v9277_v17  ;;  %v9302_v17 = vld [vmem:[%s16308_s3 + $0x2f8] sm:$0xff] }
 0xee8   :  { %12757 = vmatprep.subr.bf16.mxu0 %v13248_v0  ;;  %v12860_v37 = vpack.c.bf16 %v9302_v17, %v9301_v15  ;;  %v9321_v15 = vld [vmem:[%s16308_s3 + $0x370] sm:$0xff] }
 0xee9   :  { %12828 = vmatpush3.bf16.msra.mxu1 %v12827_v18  ;;  %v9247_v18 = vld [vmem:[%s16310_s4 + $0x2] ss:$0 sm:$0xff] }
 0xeea   :  { %12829 = vmatprep.subr.bf16.mxu1 %v13248_v0 }
 0xeeb   :  { %12759 = vmatpush3.bf16.msra.mxu0 %v12758_v26 }
 0xeec   :  { %12760 = vmatprep.subr.bf16.mxu0 %v13248_v0 }
 0xeef   :  { %12762 = vmatpush3.bf16.msra.mxu0 %v12761_v29 }
 0xef0   :  { %12763 = vmatprep.subr.bf16.mxu0 %v13248_v0 }
 0xef3   :  { %12765 = vmatpush3.bf16.msra.mxu0 %v12764_v32  ;;  %v9258_v32 = vld [vmem:[%s16308_s3 + $0x1c8] sm:$0xff] }
 0xef4   :  { %12766 = vmatprep.subr.bf16.mxu0 %v13248_v0 }
 0xf1b   :  { %v4420_v21 = vpop.f32.mrb[14].mxu0 }
 0xf1c   :  { %v13141_v22 = vadd.f32 %v9108_v20, %v4420_v21  ;;  %v11198_v23 = vpop.f32.mrb[15].mxu0  ;;  %v9218_v21 = vld [vmem:[%s16310_s4 + $0x1] ss:$0 sm:$0xff] }
 0xf1e   :  { %4426 = vst.msk [vmem:[%s16317_s11] sm:$0x3] %vm4425_vm5, %v13141_v22 }
 0xfb9   :  { %v5132_v35 = vpop.f32.mrb[16].mxu0 }
 0xfba   :  { %v13143_v39 = vadd.f32 %v9197_v34, %v5132_v35  ;;  %v11430_v40 = vpop.f32.mrb[17].mxu0  ;;  %v12803_v34 = vpack.c.bf16 %v9258_v32, %v9257_v31  ;;  %v9259_v35 = vld [vmem:[%s16308_s3 + $0x1d0] sm:$0xff]  ;;  %v9290_v32 = vld [vmem:[%s16308_s3 + $0x2a0] sm:$0xff] }
 0xfbc   :  { %v5137_v41 = vmax.f32 %v13143_v39, 0.0  ;;  %v9260_v39 = vld [vmem:[%s16308_s3 + $0x1d8] sm:$0xff] }
 0xfbe   :  { %5138 = vst.msk [vmem:[#allocation3 + $0x2] sm:$0xff] %vm41_vm1, %v5137_v41  ;;  %v12806_v41 = vpack.c.bf16 %v9260_v39, %v9259_v35  ;;  %v9292_v39 = vld [vmem:[%s16308_s3 + $0x2b0] sm:$0xff] }
 0xfc5   :  { %v5146_v46 = vld [vmem:[#allocation3 + $0x1] sm:$0xff] }
 0xfc6   :  { %11448 = vmatmul.mubr.msk.f32.vlgmr.msra.gmra.mrb[18].mxu0 %vm41_vm1, %v5146_v46  ;;  %v5229_v59 = vld [vmem:[#allocation3 + $0x2] sm:$0xff]  ;;  %v12812_v46 = vpack.c.bf16 %v9264_v45, %v9263_v44  ;;  %v9308_v45 = vld [vmem:[%s16308_s3 + $0x310] sm:$0xff] }
 0xfc7   :  { %12768 = vmatpush3.bf16.msra.mxu0 %v12767_v63  ;;  %11466 = vmatprep.mubr.msk.f32.mxu0 %vm13249_vm0, %v13250_v4  ;;  %v5312_v9 = vld [vmem:[#allocation3 + $0x3] sm:$0xff]  ;;  %v12809_v63 = vpack.c.bf16 %v9262_v43, %v9261_v42 }
 0xfc8   :  { %12769 = vmatprep.subr.bf16.mxu0 %v13248_v0  ;;  %v9306_v43 = vld [vmem:[%s16308_s3 + $0x300] sm:$0xff] }
 0xfcb   :  { %12771 = vmatpush3.bf16.msra.mxu0 %v12770_v47  ;;  %v9266_v47 = vld [vmem:[%s16308_s3 + $0x200] sm:$0xff] }
 0xfcc   :  { %12772 = vmatprep.subr.bf16.mxu0 %v13248_v0  ;;  %v12815_v49 = vpack.c.bf16 %v9267_v48, %v9266_v47  ;;  %v9310_v48 = vld [vmem:[%s16308_s3 + $0x320] sm:$0xff] }
 0xfcf   :  { %12774 = vmatpush3.bf16.msra.mxu0 %v12773_v50  ;;  %v9268_v50 = vld [vmem:[%s16308_s3 + $0x210] sm:$0xff] }
 0xfd0   :  { %12775 = vmatprep.subr.bf16.mxu0 %v13248_v0 }
 0xfd3   :  { %12777 = vmatpush3.bf16.msra.mxu0 %v12776_v54  ;;  %v12818_v54 = vpack.c.bf16 %v9269_v51, %v9268_v50  ;;  %v9312_v51 = vld [vmem:[%s16308_s3 + $0x330] sm:$0xff] }
 0xfd4   :  { %12778 = vmatprep.subr.bf16.mxu0 %v13248_v0 }
 0xfd6   :  { %11467 = vmatmul.mubr.msk.f32.vlgmr.msra.gmra.mrb[20].mxu0 %vm41_vm1, %v5229_v59  ;;  %v12824_v59 = vpack.c.bf16 %v9273_v36, %v9272_v58 }
 0xfd7   :  { %12780 = vmatpush3.bf16.msra.mxu0 %v12779_v57  ;;  %11485 = vmatprep.mubr.msk.f32.mxu0 %vm13249_vm0, %v13250_v4  ;;  %v12821_v57 = vpack.c.bf16 %v9271_v56, %v9270_v55  ;;  %v9335_v55 = vld [vmem:[%s16308_s3 + $0x3c0] sm:$0xff]  ;;  %v9336_v56 = vld [vmem:[%s16308_s3 + $0x3c8] sm:$0xff] }
 0xfd8   :  { %12781 = vmatprep.subr.bf16.mxu0 %v13248_v0 }
 0xfdb   :  { %12783 = vmatpush3.bf16.msra.mxu0 %v12782_v60  ;;  %v9295_v60 = vld [vmem:[%s16308_s3 + $0x2c0] sm:$0xff] }
 0xfdc   :  { %12784 = vmatprep.subr.bf16.mxu0 %v13248_v0  ;;  %v12851_v62 = vpack.c.bf16 %v9296_v61, %v9295_v60  ;;  %v9276_v61 = vld [vmem:[%s16310_s4 + $0x3] ss:$0 sm:$0xff] }
 0xfdf   :  { %12786 = vmatpush3.bf16.msra.mxu0 %v12785_v1 }
 0xfe0   :  { %12787 = vmatprep.subr.bf16.mxu0 %v13248_v0 }
 0xfe3   :  { %12789 = vmatpush3.bf16.msra.mxu0 %v12788_v7  ;;  %v12830_v7 = vpack.c.bf16 %v9280_v5, %v9279_v2 }
 0xfe4   :  { %12790 = vmatprep.subr.bf16.mxu0 %v13248_v0 }
 0xfe5   :  { %12831 = vmatpush3.bf16.msra.mxu1 %v12830_v7 }
 0xfe6   :  { %11486 = vmatmul.mubr.msk.f32.vlgmr.msra.gmra.mrb[22].mxu0 %vm41_vm1, %v5312_v9  ;;  %v9297_v9 = vld [vmem:[%s16308_s3 + $0x2d0] sm:$0xff]  ;;  %12832 = vmatprep.subr.bf16.mxu1 %v13248_v0 }
 0xfe7   :  { %11504 = vmatprep.mubr.msk.f32.mxu0 %vm13249_vm0, %v13250_v4  ;;  %12792 = vmatpush3.bf16.msra.mxu0 %v12791_v6  ;;  %v12854_v11 = vpack.c.bf16 %v9298_v10, %v9297_v9  ;;  %v9281_v6 = vld [vmem:[%s16308_s3 + $0x260] sm:$0xff] }
 0xfe8   :  { %12793 = vmatprep.subr.bf16.mxu0 %v13248_v0  ;;  %v12833_v38 = vpack.c.bf16 %v9282_v12, %v9281_v6  ;;  %v9316_v6 = vld [vmem:[%s16308_s3 + $0x348] sm:$0xff] }
 0xfea   :  { %12834 = vmatpush3.bf16.msra.mxu1 %v12833_v38  ;;  %v9317_v38 = vld [vmem:[%s16308_s3 + $0x350] sm:$0xff] }
 0xfeb   :  { %12795 = vmatpush3.bf16.msra.mxu0 %v12794_v33  ;;  %v9299_v33 = vld [vmem:[%s16308_s3 + $0x2e0] sm:$0xff]  ;;  %12835 = vmatprep.subr.bf16.mxu1 %v13248_v0 }
 0xfec   :  { %12796 = vmatprep.subr.bf16.mxu0 %v13248_v0  ;;  %v12857_v8 = vpack.c.bf16 %v9300_v3, %v9299_v33 }
 0xfef   :  { %12798 = vmatpush3.bf16.msra.mxu0 %v12797_v13  ;;  %v9283_v13 = vld [vmem:[%s16308_s3 + $0x270] sm:$0xff] }
 0xff0   :  { %12799 = vmatprep.subr.bf16.mxu0 %v13248_v0 }
 0xff3   :  { %12801 = vmatpush3.bf16.msra.mxu0 %v12800_v16  ;;  %v12836_v16 = vpack.c.bf16 %v9284_v14, %v9283_v13  ;;  %v9320_v13 = vld [vmem:[%s16308_s3 + $0x368] sm:$0xff] }
 0xff4   :  { %12802 = vmatprep.subr.bf16.mxu0 %v13248_v0 }
 0xff5   :  { %12837 = vmatpush3.bf16.msra.mxu1 %v12836_v16  ;;  %v9322_v16 = vld [vmem:[%s16308_s3 + $0x378] sm:$0xff] }
 0xff6   :  { %12838 = vmatprep.subr.bf16.mxu1 %v13248_v0  ;;  %v12884_v17 = vpack.c.bf16 %v9322_v16, %v9321_v15  ;;  %v6442_v16 = vld [vmem:[%s16311_s5 + $0x10] sm:$0xff] }
0x1099   :  { %v5224_v19 = vpop.f32.mrb[18].mxu0 }
0x109a   :  { %v11449_v20 = vpop.f32.mrb[19].mxu0  ;;  %v5228_v22 = vadd.f32 %v9218_v21, %v5224_v19 }
0x10a9   :  { %v5307_v23 = vpop.f32.mrb[20].mxu0 }
0x10aa   :  { %v5311_v24 = vadd.f32 %v5307_v23, %v5228_v22  ;;  %v11468_v25 = vpop.f32.mrb[21].mxu0  ;;  %v9286_v23 = vld [vmem:[%s16308_s3 + $0x280] sm:$0xff] }
0x10b9   :  { %v5390_v26 = vpop.f32.mrb[22].mxu0 }
0x10ba   :  { %v5394_v27 = vadd.f32 %v5390_v26, %v5311_v24  ;;  %v11487_v28 = vpop.f32.mrb[23].mxu0  ;;  %v9287_v24 = vld [vmem:[%s16308_s3 + $0x288] sm:$0xff]  ;;  %v9288_v26 = vld [vmem:[%s16308_s3 + $0x290] sm:$0xff] }
0x10bb   :  { %v12839_v25 = vpack.c.bf16 %v9287_v24, %v9286_v23  ;;  %v9328_v24 = vld [vmem:[%s16308_s3 + $0x3a0] sm:$0xff] }
0x10bc   :  { %v15355_v29 = vadd.f32 %v15143_v52, %v5394_v27  ;;  %v9289_v27 = vld [vmem:[%s16308_s3 + $0x298] sm:$0xff] }
0x10bd   :  { %v12842_v31 = vpack.c.bf16 %v9289_v27, %v9288_v26  ;;  %v9330_v27 = vld [vmem:[%s16308_s3 + $0x3b0] sm:$0xff] }
0x10be   :  { %v5396_v30 = vmax.f32 %v15355_v29, 0.0 }
0x10c0   :  { %5397 = vst.msk [vmem:[#allocation3 + $0x2] sm:$0xff] %vm41_vm1, %v5396_v30 }
0x10c7   :  { %v5405_v40 = vld [vmem:[#allocation3 + $0x1] sm:$0xff] }
0x10c8   :  { %11505 = vmatmul.mubr.msk.f32.vlgmr.msra.gmra.mrb[24].mxu0 %vm41_vm1, %v5405_v40  ;;  %v5488_v53 = vld [vmem:[#allocation3 + $0x2] sm:$0xff] }
0x10c9   :  { %12804 = vmatpush3.bf16.msra.mxu0 %v12803_v34  ;;  %11523 = vmatprep.mubr.msk.f32.mxu0 %vm13249_vm0, %v13250_v4  ;;  %v5571_v1 = vld [vmem:[#allocation3 + $0x3] sm:$0xff]  ;;  %v9291_v34 = vld [vmem:[%s16308_s3 + $0x2a8] sm:$0xff] }
0x10ca   :  { %12805 = vmatprep.subr.bf16.mxu0 %v13248_v0  ;;  %v12845_v35 = vpack.c.bf16 %v9291_v34, %v9290_v32  ;;  %v9293_v40 = vld [vmem:[%s16308_s3 + $0x2b8] sm:$0xff]  ;;  %v9337_v32 = vld [vmem:[%s16308_s3 + $0x3d0] sm:$0xff] }
0x10cb   :  { %v9338_v34 = vld [vmem:[%s16308_s3 + $0x3d8] sm:$0xff] }
0x10cd   :  { %12807 = vmatpush3.bf16.msra.mxu0 %v12806_v41  ;;  %v12848_v41 = vpack.c.bf16 %v9293_v40, %v9292_v39  ;;  %v9339_v39 = vld [vmem:[%s16308_s3 + $0x3e0] sm:$0xff]  ;;  %v9340_v40 = vld [vmem:[%s16308_s3 + $0x3e8] sm:$0xff] }
0x10ce   :  { %12808 = vmatprep.subr.bf16.mxu0 %v13248_v0 }
0x10d1   :  { %12810 = vmatpush3.bf16.msra.mxu0 %v12809_v63  ;;  %v9307_v63 = vld [vmem:[%s16308_s3 + $0x308] sm:$0xff] }
0x10d2   :  { %12811 = vmatprep.subr.bf16.mxu0 %v13248_v0  ;;  %v12863_v44 = vpack.c.bf16 %v9307_v63, %v9306_v43  ;;  %v9342_v43 = vld [vmem:[%s16308_s3 + $0x3f8] sm:$0xff] }
0x10d5   :  { %12813 = vmatpush3.bf16.msra.mxu0 %v12812_v46  ;;  %v9309_v46 = vld [vmem:[%s16308_s3 + $0x318] sm:$0xff] }
0x10d6   :  { %12814 = vmatprep.subr.bf16.mxu0 %v13248_v0  ;;  %v12866_v47 = vpack.c.bf16 %v9309_v46, %v9308_v45 }
0x10d8   :  { %11524 = vmatmul.mubr.msk.f32.vlgmr.msra.gmra.mrb[24].mxu0 %vm41_vm1, %v5488_v53  ;;  %v9313_v53 = vld [vmem:[%s16308_s3 + $0x338] sm:$0xff] }
0x10d9   :  { %12816 = vmatpush3.bf16.msra.mxu0 %v12815_v49  ;;  %11542 = vmatprep.mubr.msk.f32.mxu0 %vm13249_vm0, %v13250_v4  ;;  %v9311_v49 = vld [vmem:[%s16308_s3 + $0x328] sm:$0xff] }
0x10da   :  { %12817 = vmatprep.subr.bf16.mxu0 %v13248_v0  ;;  %v12869_v50 = vpack.c.bf16 %v9311_v49, %v9310_v48  ;;  %v9344_v49 = vld [vmem:[%s16308_s3 + $0x400] sm:$0xff] }
0x10dd   :  { %12819 = vmatpush3.bf16.msra.mxu0 %v12818_v54  ;;  %v12872_v54 = vpack.c.bf16 %v9313_v53, %v9312_v51  ;;  %v9346_v53 = vld [vmem:[%s16308_s3 + $0x410] sm:$0xff] }
0x10de   :  { %12820 = vmatprep.subr.bf16.mxu0 %v13248_v0 }
0x10e1   :  { %12822 = vmatpush3.bf16.msra.mxu0 %v12821_v57  ;;  %v12899_v57 = vpack.c.bf16 %v9336_v56, %v9335_v55 }
0x10e2   :  { %12823 = vmatprep.subr.bf16.mxu0 %v13248_v0 }
0x10e5   :  { %12825 = vmatpush3.bf16.msra.mxu0 %v12824_v59 }
0x10e6   :  { %12850 = vmatprep.subr.bf16.mxu0 %v13248_v0 }
0x10e8   :  { %11543 = vmatmul.mubr.msk.f32.vlgmr.msra.gmra.mrb[24].mxu0 %vm41_vm1, %v5571_v1 }
0x10e9   :  { %12852 = vmatpush3.bf16.msra.mxu0 %v12851_v62  ;;  %11599 = vmatprep.mubr.msk.f32.mxu0 %vm13249_vm0, %v13250_v4 }
0x10ea   :  { %12853 = vmatprep.subr.bf16.mxu0 %v13248_v0 }
0x10ed   :  { %12855 = vmatpush3.bf16.msra.mxu0 %v12854_v11  ;;  %v9315_v11 = vld [vmem:[%s16308_s3 + $0x340] sm:$0xff] }
0x10ee   :  { %12856 = vmatprep.subr.bf16.mxu0 %v13248_v0  ;;  %v12875_v12 = vpack.c.bf16 %v9316_v6, %v9315_v11  ;;  %v9357_v6 = vld [vmem:[%s16308_s3 + $0x460] sm:$0xff] }
0x10f1   :  { %12858 = vmatpush3.bf16.msra.mxu0 %v12857_v8  ;;  %v9319_v8 = vld [vmem:[%s16308_s3 + $0x360] sm:$0xff] }
0x10f2   :  { %12859 = vmatprep.subr.bf16.mxu0 %v13248_v0  ;;  %v12881_v14 = vpack.c.bf16 %v9320_v13, %v9319_v8  ;;  %v6440_v13 = vld [vmem:[%s16311_s5] sm:$0xff] }
0x10f5   :  { %12861 = vmatpush3.bf16.msra.mxu0 %v12860_v37  ;;  %v9324_v37 = vld [vmem:[%s16308_s3 + $0x380] sm:$0xff] }
0x10f6   :  { %12898 = vmatprep.subr.bf16.mxu0 %v13248_v0 }
0x11bb   :  { %v5649_v19 = vpop.f32.mrb[24].mxu0 }
0x11bc   :  { %v13144_v20 = vadd.f32 %v9247_v18, %v5649_v19  ;;  %v11544_v21 = vpop.f32.mrb[25].mxu0  ;;  %v9325_v18 = vld [vmem:[%s16308_s3 + $0x388] sm:$0xff] }
0x11bd   :  { %v12887_v19 = vpack.c.bf16 %v9325_v18, %v9324_v37  ;;  %v9327_v21 = vld [vmem:[%s16308_s3 + $0x398] sm:$0xff]  ;;  %v6444_v18 = vld [vmem:[%s16311_s5 + $0x20] sm:$0xff] }
0x11be   :  { %v5654_v22 = vmax.f32 %v13144_v20, 0.0  ;;  %v9326_v20 = vld [vmem:[%s16308_s3 + $0x390] sm:$0xff] }
0x11bf   :  { %v12890_v23 = vpack.c.bf16 %v9327_v21, %v9326_v20  ;;  %v6446_v21 = vld [vmem:[%s16311_s5 + $0x30] sm:$0xff] }
0x11c0   :  { %5655 = vst.msk [vmem:[#allocation3 + $0x2] sm:$0xff] %vm41_vm1, %v5654_v22 }
0x11c7   :  { %v5663_v28 = vld [vmem:[#allocation3 + $0x1] sm:$0xff] }
0x11c8   :  { %v5829_v30 = vld [vmem:[#allocation3 + $0x3] sm:$0xff]  ;;  %11562 = vmatmul.mubr.msk.f32.vlgmr.msra.gmra.mrb[42].mxu1 %vm41_vm1, %v5663_v28 }
0x11c9   :  { %11600 = vmatmul.mubr.msk.f32.vlgmr.msra.gmra.mrb[26].mxu0 %vm41_vm1, %v5829_v30  ;;  %12840 = vmatpush3.bf16.msra.mxu1 %v12839_v25  ;;  %v5746_v42 = vld [vmem:[#allocation3 + $0x2] sm:$0xff]  ;;  %v9329_v25 = vld [vmem:[%s16308_s3 + $0x3a8] sm:$0xff] }
0x11ca   :  { %11580 = vmatprep.mubr.msk.f32.mxu1 %vm13249_vm0, %v13250_v4  ;;  %12841 = vmatprep.subr.bf16.mxu1 %v13248_v0  ;;  %v12893_v26 = vpack.c.bf16 %v9329_v25, %v9328_v24  ;;  %v9331_v28 = vld [vmem:[%s16308_s3 + $0x3b8] sm:$0xff] }
0x11cb   :  { %11675 = vmatprep.mubr.msk.f32.mxu0 %vm13249_vm0, %v13250_v4  ;;  %12900 = vmatpush3.bf16.msra.mxu0 %v12899_v57  ;;  %v12896_v30 = vpack.c.bf16 %v9331_v28, %v9330_v27  ;;  %v9348_v57 = vld [vmem:[%s16308_s3 + $0x420] sm:$0xff] }
0x11cc   :  { %12901 = vmatprep.subr.bf16.mxu0 %v13248_v0 }
0x11cd   :  { %12843 = vmatpush3.bf16.msra.mxu1 %v12842_v31 }
0x11ce   :  { %12844 = vmatprep.subr.bf16.mxu1 %v13248_v0 }
0x11d1   :  { %12846 = vmatpush3.bf16.msra.mxu1 %v12845_v35  ;;  %v12902_v35 = vpack.c.bf16 %v9338_v34, %v9337_v32 }
0x11d2   :  { %12847 = vmatprep.subr.bf16.mxu1 %v13248_v0 }
0x11d3   :  { %12903 = vmatpush3.bf16.msra.mxu0 %v12902_v35 }
0x11d4   :  { %12904 = vmatprep.subr.bf16.mxu0 %v13248_v0 }
0x11d5   :  { %12849 = vmatpush3.bf16.msra.mxu1 %v12848_v41  ;;  %v12905_v41 = vpack.c.bf16 %v9340_v40, %v9339_v39 }
0x11d6   :  { %12862 = vmatprep.subr.bf16.mxu1 %v13248_v0 }
0x11d7   :  { %12906 = vmatpush3.bf16.msra.mxu0 %v12905_v41  ;;  %v9364_v41 = vld [vmem:[%s16311_s5 + $0x40] sm:$0xff] }
0x11d8   :  { %11581 = vmatmul.mubr.msk.f32.vlgmr.msra.gmra.mrb[44].mxu1 %vm41_vm1, %v5746_v42  ;;  %v9341_v42 = vld [vmem:[%s16308_s3 + $0x3f0] sm:$0xff]  ;;  %12907 = vmatprep.subr.bf16.mxu0 %v13248_v0 }
0x11d9   :  { %11618 = vmatprep.mubr.msk.f32.mxu1 %vm13249_vm0, %v13250_v4  ;;  %12864 = vmatpush3.bf16.msra.mxu1 %v12863_v44  ;;  %v12908_v63 = vpack.c.bf16 %v9342_v43, %v9341_v42  ;;  %v9305_v44 = vld [vmem:[%s16310_s4 + $0x4] ss:$0 sm:$0xff]  ;;  %v9365_v42 = vld [vmem:[%s16311_s5 + $0x48] sm:$0xff] }
0x11da   :  { %12865 = vmatprep.subr.bf16.mxu1 %v13248_v0  ;;  %v12947_v43 = vpack.c.bf16 %v9365_v42, %v9364_v41 }
0x11db   :  { %12909 = vmatpush3.bf16.msra.mxu0 %v12908_v63  ;;  %v9366_v63 = vld [vmem:[%s16311_s5 + $0x50] sm:$0xff] }
0x11dc   :  { %12910 = vmatprep.subr.bf16.mxu0 %v13248_v0 }
0x11dd   :  { %12867 = vmatpush3.bf16.msra.mxu1 %v12866_v47 }
0x11de   :  { %12868 = vmatprep.subr.bf16.mxu1 %v13248_v0 }
0x11e1   :  { %12870 = vmatpush3.bf16.msra.mxu1 %v12869_v50  ;;  %v9345_v50 = vld [vmem:[%s16308_s3 + $0x408] sm:$0xff] }
0x11e2   :  { %12871 = vmatprep.subr.bf16.mxu1 %v13248_v0  ;;  %v12911_v51 = vpack.c.bf16 %v9345_v50, %v9344_v49  ;;  %v9371_v49 = vld [vmem:[%s16311_s5 + $0x78] sm:$0xff] }
0x11e5   :  { %12873 = vmatpush3.bf16.msra.mxu1 %v12872_v54  ;;  %v9347_v54 = vld [vmem:[%s16308_s3 + $0x418] sm:$0xff] }
0x11e6   :  { %12874 = vmatprep.subr.bf16.mxu1 %v13248_v0  ;;  %v12914_v56 = vpack.c.bf16 %v9347_v54, %v9346_v53  ;;  %v9374_v53 = vld [vmem:[%s16311_s5 + $0x88] sm:$0xff] }
0x129b   :  { %v5741_v58 = vpop.f32.mrb[42].mxu1 }
0x129c   :  { %v5907_v36 = vpop.f32.mrb[26].mxu0  ;;  %v11563_v59 = vpop.f32.mrb[43].mxu1  ;;  %v5745_v62 = vadd.f32 %v9276_v61, %v5741_v58  ;;  %v9349_v58 = vld [vmem:[%s16308_s3 + $0x428] sm:$0xff] }
0x129d   :  { %v11601_v60 = vpop.f32.mrb[27].mxu0  ;;  %v9350_v59 = vld [vmem:[%s16308_s3 + $0x430] sm:$0xff] }
0x129e   :  { %v9351_v60 = vld [vmem:[%s16308_s3 + $0x438] sm:$0xff] }
0x129f   :  { %v12920_v61 = vpack.c.bf16 %v9351_v60, %v9350_v59  ;;  %v9378_v59 = vld [vmem:[%s16311_s5 + $0xa8] sm:$0xff] }
0x12ab   :  { %v5824_v1 = vpop.f32.mrb[44].mxu1 }
0x12ac   :  { %v5828_v2 = vadd.f32 %v5824_v1, %v5745_v62  ;;  %v11582_v5 = vpop.f32.mrb[45].mxu1  ;;  %v9353_v62 = vld [vmem:[%s16308_s3 + $0x440] sm:$0xff]  ;;  %v9354_v1 = vld [vmem:[%s16308_s3 + $0x448] sm:$0xff] }
0x12ad   :  { %v9355_v5 = vld [vmem:[%s16308_s3 + $0x450] sm:$0xff] }
0x12ae   :  { %v5911_v7 = vadd.f32 %v5907_v36, %v5828_v2  ;;  %v12917_v36 = vpack.c.bf16 %v9349_v58, %v9348_v57  ;;  %v12923_v2 = vpack.c.bf16 %v9354_v1, %v9353_v62  ;;  %v9380_v62 = vld [vmem:[%s16311_s5 + $0xb8] sm:$0xff] }
0x12b0   :  { %v15553_v9 = vadd.f32 %v5911_v7, %v15355_v29  ;;  %v9318_v29 = vld [vmem:[%s16308_s3 + $0x358] sm:$0xff] }
0x12b1   :  { %v12878_v3 = vpack.c.bf16 %v9318_v29, %v9317_v38  ;;  %v9356_v7 = vld [vmem:[%s16308_s3 + $0x458] sm:$0xff]  ;;  %v9359_v29 = vld [vmem:[%s16308_s3 + $0x470] sm:$0xff] }
0x12b2   :  { %v5913_v10 = vmax.f32 %v15553_v9, 0.0  ;;  %v12926_v11 = vpack.c.bf16 %v9356_v7, %v9355_v5  ;;  %v9383_v5 = vld [vmem:[%s16311_s5 + $0xc8] sm:$0xff] }
0x12b4   :  { %5914 = vst.msk [vmem:[#allocation3 + $0x2] sm:$0xff] %vm41_vm1, %v5913_v10 }
0x12bb   :  { %v5922_v33 = vld [vmem:[#allocation3 + $0x1] sm:$0xff] }
0x12bc   :  { %11619 = vmatmul.mubr.msk.f32.vlgmr.msra.gmra.mrb[46].mxu1 %vm41_vm1, %v5922_v33  ;;  %v6005_v22 = vld [vmem:[#allocation3 + $0x2] sm:$0xff] }
0x12bd   :  { %12876 = vmatpush3.bf16.msra.mxu1 %v12875_v12  ;;  %11637 = vmatprep.mubr.msk.f32.mxu1 %vm13249_vm0, %v13250_v4  ;;  %v6088_v31 = vld [vmem:[#allocation3 + $0x3] sm:$0xff]  ;;  %v9358_v12 = vld [vmem:[%s16308_s3 + $0x468] sm:$0xff] }
0x12be   :  { %12877 = vmatprep.subr.bf16.mxu1 %v13248_v0  ;;  %v12929_v38 = vpack.c.bf16 %v9358_v12, %v9357_v6  ;;  %v9360_v33 = vld [vmem:[%s16308_s3 + $0x478] sm:$0xff] }
0x12c1   :  { %12879 = vmatpush3.bf16.msra.mxu1 %v12878_v3  ;;  %v12932_v3 = vpack.c.bf16 %v9360_v33, %v9359_v29  ;;  %v9387_v29 = vld [vmem:[%s16311_s5 + $0xe8] sm:$0xff] }
0x12c2   :  { %12880 = vmatprep.subr.bf16.mxu1 %v13248_v0 }
0x12c5   :  { %12882 = vmatpush3.bf16.msra.mxu1 %v12881_v14  ;;  %v6441_v14 = vld [vmem:[%s16311_s5 + $0x8] sm:$0xff] }
0x12c6   :  { %12883 = vmatprep.subr.bf16.mxu1 %v13248_v0  ;;  %v12935_v15 = vpack.c.bf16 %v6441_v14, %v6440_v13  ;;  %v9391_v14 = vld [vmem:[%s16311_s5 + $0x100] sm:$0xff] }
0x12c9   :  { %12885 = vmatpush3.bf16.msra.mxu1 %v12884_v17  ;;  %v6443_v17 = vld [vmem:[%s16311_s5 + $0x18] sm:$0xff] }
0x12ca   :  { %12886 = vmatprep.subr.bf16.mxu1 %v13248_v0  ;;  %v12938_v37 = vpack.c.bf16 %v6443_v17, %v6442_v16  ;;  %v9393_v17 = vld [vmem:[%s16311_s5 + $0x110] sm:$0xff] }
0x12cc   :  { %11638 = vmatmul.mubr.msk.f32.vlgmr.msra.gmra.mrb[46].mxu1 %vm41_vm1, %v6005_v22  ;;  %v6447_v22 = vld [vmem:[%s16311_s5 + $0x38] sm:$0xff] }
0x12cd   :  { %12888 = vmatpush3.bf16.msra.mxu1 %v12887_v19  ;;  %11656 = vmatprep.mubr.msk.f32.mxu1 %vm13249_vm0, %v13250_v4  ;;  %v6445_v19 = vld [vmem:[%s16311_s5 + $0x28] sm:$0xff] }
0x12ce   :  { %12889 = vmatprep.subr.bf16.mxu1 %v13248_v0  ;;  %v12941_v20 = vpack.c.bf16 %v6445_v19, %v6444_v18 }
0x12d1   :  { %12891 = vmatpush3.bf16.msra.mxu1 %v12890_v23  ;;  %v12944_v23 = vpack.c.bf16 %v6447_v22, %v6446_v21  ;;  %v9396_v21 = vld [vmem:[%s16311_s5 + $0x128] sm:$0xff] }
0x12d2   :  { %12892 = vmatprep.subr.bf16.mxu1 %v13248_v0 }
0x12d5   :  { %12894 = vmatpush3.bf16.msra.mxu1 %v12893_v26  ;;  %v9334_v26 = vld [vmem:[%s16310_s4 + $0x5] ss:$0 sm:$0xff] }
0x12d6   :  { %12895 = vmatprep.subr.bf16.mxu1 %v13248_v0 }
0x12d9   :  { %12897 = vmatpush3.bf16.msra.mxu1 %v12896_v30 }
0x12da   :  { %12934 = vmatprep.subr.bf16.mxu1 %v13248_v0 }
0x12dc   :  { %11657 = vmatmul.mubr.msk.f32.vlgmr.msra.gmra.mrb[46].mxu1 %vm41_vm1, %v6088_v31 }
0x12dd   :  { %11732 = vmatprep.mubr.msk.f32.mxu1 %vm13249_vm0, %v13250_v4  ;;  %12936 = vmatpush3.bf16.msra.mxu1 %v12935_v15  ;;  %v9392_v15 = vld [vmem:[%s16311_s5 + $0x108] sm:$0xff] }
0x12de   :  { %12937 = vmatprep.subr.bf16.mxu1 %v13248_v0  ;;  %v12983_v16 = vpack.c.bf16 %v9392_v15, %v9391_v14  ;;  %v9427_v14 = vld [vmem:[%s16312_s7 + $0xb8] sm:$0xff] }
0x12e1   :  { %12939 = vmatpush3.bf16.msra.mxu1 %v12938_v37  ;;  %v9394_v37 = vld [vmem:[%s16311_s5 + $0x118] sm:$0xff] }
0x12e2   :  { %12940 = vmatprep.subr.bf16.mxu1 %v13248_v0  ;;  %v12986_v19 = vpack.c.bf16 %v9394_v37, %v9393_v17  ;;  %v9431_v37 = vld [vmem:[%s16312_s7 + $0xc0] sm:$0xff] }
0x12e5   :  { %12942 = vmatpush3.bf16.msra.mxu1 %v12941_v20  ;;  %v9395_v20 = vld [vmem:[%s16311_s5 + $0x120] sm:$0xff] }
0x12e6   :  { %12943 = vmatprep.subr.bf16.mxu1 %v13248_v0  ;;  %v12989_v22 = vpack.c.bf16 %v9396_v21, %v9395_v20  ;;  %v9433_v20 = vld [vmem:[%s16312_s7 + $0xd0] sm:$0xff]  ;;  %v9434_v21 = vld [vmem:[%s16312_s7 + $0xd8] sm:$0xff] }
0x12e9   :  { %12945 = vmatpush3.bf16.msra.mxu1 %v12944_v23  ;;  %v9397_v23 = vld [vmem:[%s16311_s5 + $0x130] sm:$0xff] }
0x12ea   :  { %12946 = vmatprep.subr.bf16.mxu1 %v13248_v0 }
0x13af   :  { %v6166_v45 = vpop.f32.mrb[46].mxu1 }
0x13b0   :  { %v13145_v46 = vadd.f32 %v9305_v44, %v6166_v45  ;;  %v11658_v47 = vpop.f32.mrb[47].mxu1  ;;  %v9368_v45 = vld [vmem:[%s16311_s5 + $0x60] sm:$0xff] }
0x13b2   :  { %v6171_v48 = vmax.f32 %v13145_v46, 0.0  ;;  %v9369_v46 = vld [vmem:[%s16311_s5 + $0x68] sm:$0xff] }
0x13b3   :  { %v12953_v47 = vpack.c.bf16 %v9369_v46, %v9368_v45 }
0x13b4   :  { %6172 = vst.msk [vmem:[#allocation3 + $0x2] sm:$0xff] %vm41_vm1, %v6171_v48  ;;  %v9370_v48 = vld [vmem:[%s16311_s5 + $0x70] sm:$0xff] }
0x13b5   :  { %v12956_v50 = vpack.c.bf16 %v9371_v49, %v9370_v48  ;;  %v9408_v48 = vld [vmem:[%s16312_s7 + $0x48] sm:$0xff] }
0x13bb   :  { %v6180_v55 = vld [vmem:[#allocation3 + $0x1] sm:$0xff] }
0x13bc   :  { %11676 = vmatmul.mubr.msk.f32.vlgmr.msra.gmra.mrb[28].mxu0 %vm41_vm1, %v6180_v55  ;;  %v6263_v10 = vld [vmem:[#allocation3 + $0x2] sm:$0xff]  ;;  %v9375_v55 = vld [vmem:[%s16311_s5 + $0x90] sm:$0xff] }
0x13bd   :  { %12912 = vmatpush3.bf16.msra.mxu0 %v12911_v51  ;;  %11694 = vmatprep.mubr.msk.f32.mxu0 %vm13249_vm0, %v13250_v4  ;;  %v6346_v8 = vld [vmem:[#allocation3 + $0x3] sm:$0xff] }
0x13be   :  { %12913 = vmatprep.subr.bf16.mxu0 %v13248_v0  ;;  %v9373_v51 = vld [vmem:[%s16311_s5 + $0x80] sm:$0xff] }
0x13bf   :  { %v12959_v54 = vpack.c.bf16 %v9374_v53, %v9373_v51  ;;  %v9410_v51 = vld [vmem:[%s16312_s7 + $0x58] sm:$0xff] }
0x13c1   :  { %12915 = vmatpush3.bf16.msra.mxu0 %v12914_v56  ;;  %v9376_v56 = vld [vmem:[%s16311_s5 + $0x98] sm:$0xff] }
0x13c2   :  { %12916 = vmatprep.subr.bf16.mxu0 %v13248_v0  ;;  %v12962_v58 = vpack.c.bf16 %v9376_v56, %v9375_v55  ;;  %v9414_v56 = vld [vmem:[%s16312_s7 + $0x60] sm:$0xff] }
0x13c5   :  { %12918 = vmatpush3.bf16.msra.mxu0 %v12917_v36  ;;  %v9377_v36 = vld [vmem:[%s16311_s5 + $0xa0] sm:$0xff] }
0x13c6   :  { %12919 = vmatprep.subr.bf16.mxu0 %v13248_v0  ;;  %v12965_v60 = vpack.c.bf16 %v9378_v59, %v9377_v36  ;;  %v9416_v36 = vld [vmem:[%s16312_s7 + $0x70] sm:$0xff]  ;;  %v9417_v59 = vld [vmem:[%s16312_s7 + $0x78] sm:$0xff] }
0x13c9   :  { %12921 = vmatpush3.bf16.msra.mxu0 %v12920_v61  ;;  %v9379_v61 = vld [vmem:[%s16311_s5 + $0xb0] sm:$0xff] }
0x13ca   :  { %12922 = vmatprep.subr.bf16.mxu0 %v13248_v0  ;;  %v12968_v1 = vpack.c.bf16 %v9380_v62, %v9379_v61  ;;  %v9400_v61 = vld [vmem:[%s16314_s8] ss:$0 sm:$0xff] }
0x13cc   :  { %11695 = vmatmul.mubr.msk.f32.vlgmr.msra.gmra.mrb[30].mxu0 %vm41_vm1, %v6263_v10  ;;  %v9384_v10 = vld [vmem:[%s16311_s5 + $0xd0] sm:$0xff] }
0x13cd   :  { %12924 = vmatpush3.bf16.msra.mxu0 %v12923_v2  ;;  %11713 = vmatprep.mubr.msk.f32.mxu0 %vm13249_vm0, %v13250_v4  ;;  %v9382_v2 = vld [vmem:[%s16311_s5 + $0xc0] sm:$0xff] }
0x13ce   :  { %12925 = vmatprep.subr.bf16.mxu0 %v13248_v0  ;;  %v12971_v7 = vpack.c.bf16 %v9383_v5, %v9382_v2 }
0x13d1   :  { %12927 = vmatpush3.bf16.msra.mxu0 %v12926_v11  ;;  %v9385_v11 = vld [vmem:[%s16311_s5 + $0xd8] sm:$0xff] }
0x13d2   :  { %12928 = vmatprep.subr.bf16.mxu0 %v13248_v0  ;;  %v12974_v12 = vpack.c.bf16 %v9385_v11, %v9384_v10  ;;  %v9420_v10 = vld [vmem:[%s16312_s7 + $0x88] sm:$0xff] }
0x13d5   :  { %12930 = vmatpush3.bf16.msra.mxu0 %v12929_v38  ;;  %v9386_v38 = vld [vmem:[%s16311_s5 + $0xe0] sm:$0xff] }
0x13d6   :  { %12931 = vmatprep.subr.bf16.mxu0 %v13248_v0  ;;  %v12977_v33 = vpack.c.bf16 %v9387_v29, %v9386_v38 }
0x13d9   :  { %12933 = vmatpush3.bf16.msra.mxu0 %v12932_v3  ;;  %v9388_v3 = vld [vmem:[%s16311_s5 + $0xf0] sm:$0xff] }
0x13da   :  { %12994 = vmatprep.subr.bf16.mxu0 %v13248_v0 }
0x13dc   :  { %11714 = vmatmul.mubr.msk.f32.vlgmr.msra.gmra.mrb[32].mxu0 %vm41_vm1, %v6346_v8  ;;  %v9389_v8 = vld [vmem:[%s16311_s5 + $0xf8] sm:$0xff] }
0x13dd   :  { %11819 = vmatprep.mubr.msk.f32.mxu0 %vm13249_vm0, %v13250_v4  ;;  %v12980_v13 = vpack.c.bf16 %v9389_v8, %v9388_v3  ;;  %v9425_v3 = vld [vmem:[%s16312_s7 + $0xa8] sm:$0xff] }
0x148f   :  { %v6258_v24 = vpop.f32.mrb[28].mxu0 }
0x1490   :  { %v11677_v25 = vpop.f32.mrb[29].mxu0  ;;  %v6262_v27 = vadd.f32 %v9334_v26, %v6258_v24  ;;  %v9398_v24 = vld [vmem:[%s16311_s5 + $0x138] sm:$0xff] }
0x1491   :  { %v12992_v25 = vpack.c.bf16 %v9398_v24, %v9397_v23 }
0x149f   :  { %v6341_v28 = vpop.f32.mrb[30].mxu0 }
0x14a0   :  { %v6345_v30 = vadd.f32 %v6341_v28, %v6262_v27  ;;  %v11696_v31 = vpop.f32.mrb[31].mxu0  ;;  %v6864_v27 = vld [vmem:[%s16312_s7] sm:$0xff]  ;;  %v6865_v28 = vld [vmem:[%s16312_s7 + $0x8] sm:$0xff] }
0x14a1   :  { %v6866_v31 = vld [vmem:[%s16312_s7 + $0x10] sm:$0xff] }
0x14af   :  { %v6424_v32 = vpop.f32.mrb[32].mxu0 }
0x14b0   :  { %v6428_v34 = vadd.f32 %v6424_v32, %v6345_v30  ;;  %v11715_v35 = vpop.f32.mrb[33].mxu0  ;;  %v12995_v30 = vpack.c.bf16 %v6865_v28, %v6864_v27  ;;  %v6867_v32 = vld [vmem:[%s16312_s7 + $0x18] sm:$0xff] }
0x14b1   :  { %v9362_v35 = vld [vmem:[%s16313_s6] ss:$0 sm:$0xff] }
0x14b2   :  { %v6429_v39 = vadd.f32 %v6428_v34, %v15553_v9  ;;  %v9367_v9 = vld [vmem:[%s16311_s5 + $0x58] sm:$0xff]  ;;  %12996 = vmatpush3.bf16.msra.mxu0 %v12995_v30  ;;  %v12998_v34 = vpack.c.bf16 %v6867_v32, %v6866_v31 }
0x14b3   :  { %v12950_v44 = vpack.c.bf16 %v9367_v9, %v9366_v63  ;;  %12997 = vmatprep.subr.bf16.mxu0 %v13248_v0  ;;  %v9403_v63 = vld [vmem:[%s16312_s7 + $0x28] sm:$0xff] }
0x14b4   :  { %v6430_v40 = vadd.f32 %v15143_v52, %v6429_v39 }
0x14b6   :  { %6431 = vst.msk [vmem:[#allocation3 + $0x2] sm:$0xff] %vm41_vm1, %v6430_v40  ;;  %12999 = vmatpush3.bf16.msra.mxu0 %v12998_v34 }
0x14b7   :  { %13000 = vmatprep.subr.bf16.mxu0 %v13248_v0 }
0x14bd   :  { %v6439_v52 = vld [vmem:[#allocation3] ss:$2 sm:$0xf]  ;;  %v6522_v57 = vld [vmem:[#allocation3 + $0x1] ss:$2 sm:$0xf] }
0x14be   :  { %11733 = vmatmul.mubr.msk.f32.vlgmr.msra.gmra.mrb[48].mxu1 %vm41_vm1, %v6439_v52  ;;  %v6605_v6 = vld [vmem:[#allocation3 + $0x2] ss:$2 sm:$0xf]  ;;  %v6688_v18 = vld [vmem:[#allocation3 + $0x3] ss:$2 sm:$0xf] }
0x14bf   :  { %12948 = vmatpush3.bf16.msra.mxu1 %v12947_v43  ;;  %11751 = vmatprep.mubr.msk.f32.mxu1 %vm13249_vm0, %v13250_v4  ;;  %v6771_v26 = vld [vmem:[#allocation3 + $0x4] ss:$2 sm:$0xf]  ;;  %v9404_v52 = vld [vmem:[%s16312_s7 + $0x30] sm:$0xff] }
0x14c0   :  { %12949 = vmatprep.subr.bf16.mxu1 %v13248_v0  ;;  %v9402_v43 = vld [vmem:[%s16312_s7 + $0x20] sm:$0xff] }
0x14c1   :  { %v13001_v9 = vpack.c.bf16 %v9403_v63, %v9402_v43  ;;  %v9438_v63 = vld [vmem:[%s16312_s7 + $0xf0] sm:$0xff] }
0x14c3   :  { %12951 = vmatpush3.bf16.msra.mxu1 %v12950_v44  ;;  %v9405_v44 = vld [vmem:[%s16312_s7 + $0x38] sm:$0xff] }
0x14c4   :  { %12952 = vmatprep.subr.bf16.mxu1 %v13248_v0  ;;  %v13004_v46 = vpack.c.bf16 %v9405_v44, %v9404_v52 }
0x14c7   :  { %12954 = vmatpush3.bf16.msra.mxu1 %v12953_v47  ;;  %v9407_v47 = vld [vmem:[%s16312_s7 + $0x40] sm:$0xff] }
0x14c8   :  { %12955 = vmatprep.subr.bf16.mxu1 %v13248_v0  ;;  %v13007_v49 = vpack.c.bf16 %v9408_v48, %v9407_v47  ;;  %v9443_v48 = vld [vmem:[%s16312_s7 + $0x110] sm:$0xff] }
0x14cb   :  { %12957 = vmatpush3.bf16.msra.mxu1 %v12956_v50  ;;  %v9409_v50 = vld [vmem:[%s16312_s7 + $0x50] sm:$0xff] }
0x14cc   :  { %12958 = vmatprep.subr.bf16.mxu1 %v13248_v0 }
0x14ce   :  { %11752 = vmatmul.mubr.msk.f32.vlgmr.msra.gmra.mrb[48].mxu1 %vm41_vm1, %v6522_v57  ;;  %v9415_v57 = vld [vmem:[%s16312_s7 + $0x68] sm:$0xff] }
0x14cf   :  { %12960 = vmatpush3.bf16.msra.mxu1 %v12959_v54  ;;  %11770 = vmatprep.mubr.msk.f32.mxu1 %vm13249_vm0, %v13250_v4  ;;  %v13010_v54 = vpack.c.bf16 %v9410_v51, %v9409_v50 }
0x14d0   :  { %12961 = vmatprep.subr.bf16.mxu1 %v13248_v0 }
0x14d3   :  { %12963 = vmatpush3.bf16.msra.mxu1 %v12962_v58  ;;  %v13013_v58 = vpack.c.bf16 %v9415_v57, %v9414_v56  ;;  %v9453_v57 = vld [vmem:[%s16312_s7 + $0x140] sm:$0xff] }
0x14d4   :  { %12964 = vmatprep.subr.bf16.mxu1 %v13248_v0 }
0x14d7   :  { %12966 = vmatpush3.bf16.msra.mxu1 %v12965_v60  ;;  %v13016_v60 = vpack.c.bf16 %v9417_v59, %v9416_v36  ;;  %v9450_v59 = vld [vmem:[%s16312_s7 + $0x130] sm:$0xff] }
0x14d8   :  { %12967 = vmatprep.subr.bf16.mxu1 %v13248_v0 }
0x14db   :  { %12969 = vmatpush3.bf16.msra.mxu1 %v12968_v1 }
0x14dc   :  { %12970 = vmatprep.subr.bf16.mxu1 %v13248_v0 }
0x14de   :  { %11771 = vmatmul.mubr.msk.f32.vlgmr.msra.gmra.mrb[48].mxu1 %vm41_vm1, %v6605_v6  ;;  %v9421_v6 = vld [vmem:[%s16312_s7 + $0x90] sm:$0xff] }
0x14df   :  { %12972 = vmatpush3.bf16.msra.mxu1 %v12971_v7  ;;  %11789 = vmatprep.mubr.msk.f32.mxu1 %vm13249_vm0, %v13250_v4  ;;  %v9419_v7 = vld [vmem:[%s16312_s7 + $0x80] sm:$0xff] }
0x14e0   :  { %12973 = vmatprep.subr.bf16.mxu1 %v13248_v0  ;;  %v13019_v11 = vpack.c.bf16 %v9420_v10, %v9419_v7 }
0x14e3   :  { %12975 = vmatpush3.bf16.msra.mxu1 %v12974_v12  ;;  %v9422_v12 = vld [vmem:[%s16312_s7 + $0x98] sm:$0xff] }
0x14e4   :  { %12976 = vmatprep.subr.bf16.mxu1 %v13248_v0  ;;  %v13022_v29 = vpack.c.bf16 %v9422_v12, %v9421_v6  ;;  %v9458_v12 = vld [vmem:[%s16312_s7 + $0x160] sm:$0xff] }
0x14e7   :  { %12978 = vmatpush3.bf16.msra.mxu1 %v12977_v33  ;;  %v9424_v33 = vld [vmem:[%s16312_s7 + $0xa0] sm:$0xff] }
0x14e8   :  { %12979 = vmatprep.subr.bf16.mxu1 %v13248_v0  ;;  %v13025_v8 = vpack.c.bf16 %v9425_v3, %v9424_v33  ;;  %v9460_v33 = vld [vmem:[%s16312_s7 + $0x170] sm:$0xff]  ;;  %v9461_v3 = vld [vmem:[%s16312_s7 + $0x178] sm:$0xff] }
0x14eb   :  { %12981 = vmatpush3.bf16.msra.mxu1 %v12980_v13  ;;  %v9426_v13 = vld [vmem:[%s16312_s7 + $0xb0] sm:$0xff] }
0x14ec   :  { %12982 = vmatprep.subr.bf16.mxu1 %v13248_v0 }
0x14ee   :  { %11790 = vmatmul.mubr.msk.f32.vlgmr.msra.gmra.mrb[48].mxu1 %vm41_vm1, %v6688_v18  ;;  %v9432_v18 = vld [vmem:[%s16312_s7 + $0xc8] sm:$0xff] }
0x14ef   :  { %12984 = vmatpush3.bf16.msra.mxu1 %v12983_v16  ;;  %11808 = vmatprep.mubr.msk.f32.mxu1 %vm13249_vm0, %v13250_v4  ;;  %v13028_v16 = vpack.c.bf16 %v9427_v14, %v9426_v13  ;;  %v13064_v14 = vpack.c.bf16 %v9461_v3, %v9460_v33  ;;  %v9495_v33 = vld [vmem:[%s16312_s7 + $0x238] sm:$0xff] }
0x14f0   :  { %12985 = vmatprep.subr.bf16.mxu1 %v13248_v0 }
0x14f3   :  { %12987 = vmatpush3.bf16.msra.mxu1 %v12986_v19  ;;  %v13031_v19 = vpack.c.bf16 %v9432_v18, %v9431_v37  ;;  %v9467_v18 = vld [vmem:[%s16312_s7 + $0x190] sm:$0xff] }
0x14f4   :  { %12988 = vmatprep.subr.bf16.mxu1 %v13248_v0 }
0x14f7   :  { %12990 = vmatpush3.bf16.msra.mxu1 %v12989_v22  ;;  %v13034_v22 = vpack.c.bf16 %v9434_v21, %v9433_v20  ;;  %v9447_v21 = vld [vmem:[%s16314_s8 + $0x3] ss:$0 sm:$0xff] }
0x14f8   :  { %12991 = vmatprep.subr.bf16.mxu1 %v13248_v0 }
0x14fb   :  { %12993 = vmatpush3.bf16.msra.mxu1 %v12992_v25  ;;  %v9413_v25 = vld [vmem:[%s16314_s8 + $0x1] ss:$0 sm:$0xff] }
0x14fc   :  { %13054 = vmatprep.subr.bf16.mxu1 %v13248_v0 }
0x14fe   :  { %11809 = vmatmul.mubr.msk.f32.vlgmr.msra.gmra.mrb[48].mxu1 %vm41_vm1, %v6771_v26 }
0x14ff   :  { %11929 = vmatprep.mubr.msk.f32.mxu1 %vm13249_vm0, %v13250_v4 }
0x15d1   :  { %v6849_v39 = vpop.f32.mrb[48].mxu1 }
0x15d2   :  { %v15890_v40 = vadd.f32 %v9362_v35, %v6849_v39  ;;  %v11810_v41 = vpop.f32.mrb[49].mxu1 }
0x15d3   :  { %v9436_v41 = vld [vmem:[%s16312_s7 + $0xe0] sm:$0xff] }
0x15d4   :  { %v6854_v42 = vmax.f32 %v15890_v40, 0.0 }
0x15d6   :  { %6855 = vst.msk [vmem:[#allocation4 + $0x2] sm:$0xf] %vm2512_vm4, %v6854_v42  ;;  %v9437_v42 = vld [vmem:[%s16312_s7 + $0xe8] sm:$0xff] }
0x15d7   :  { %v13037_v43 = vpack.c.bf16 %v9437_v42, %v9436_v41  ;;  %v9471_v41 = vld [vmem:[%s16312_s7 + $0x1a8] sm:$0xff] }
0x15dd   :  { %v6863_v45 = vld [vmem:[#allocation4 + $0x1] sm:$0xf] }
0x15de   :  { %11820 = vmatmul.mubr.msk.f32.vlgmr.msra.gmra.mrb[34].mxu0 %vm45_vm3, %v6863_v45  ;;  %v6942_v53 = vld [vmem:[#allocation4 + $0x2] sm:$0xf]  ;;  %v9441_v45 = vld [vmem:[%s16312_s7 + $0x100] sm:$0xff] }
0x15df   :  { %13002 = vmatpush3.bf16.msra.mxu0 %v13001_v9  ;;  %11830 = vmatprep.mubr.msk.f32.mxu0 %vm13249_vm0, %v13250_v4  ;;  %v7021_v55 = vld [vmem:[#allocation4 + $0x3] sm:$0xf]  ;;  %v9439_v9 = vld [vmem:[%s16312_s7 + $0xf8] sm:$0xff] }
0x15e0   :  { %13003 = vmatprep.subr.bf16.mxu0 %v13248_v0  ;;  %v13040_v44 = vpack.c.bf16 %v9439_v9, %v9438_v63 }
0x15e3   :  { %13005 = vmatpush3.bf16.msra.mxu0 %v13004_v46  ;;  %v9442_v46 = vld [vmem:[%s16312_s7 + $0x108] sm:$0xff] }
0x15e4   :  { %13006 = vmatprep.subr.bf16.mxu0 %v13248_v0  ;;  %v13043_v47 = vpack.c.bf16 %v9442_v46, %v9441_v45  ;;  %v9477_v46 = vld [vmem:[%s16312_s7 + $0x1d0] sm:$0xff] }
0x15e6   :  { %11831 = vmatmul.mubr.msk.f32.vlgmr.msra.gmra.mrb[34].mxu0 %vm45_vm3, %v6942_v53 }
0x15e7   :  { %13008 = vmatpush3.bf16.msra.mxu0 %v13007_v49  ;;  %11841 = vmatprep.mubr.msk.f32.mxu0 %vm13249_vm0, %v13250_v4  ;;  %v9444_v49 = vld [vmem:[%s16312_s7 + $0x118] sm:$0xff] }
0x15e8   :  { %13009 = vmatprep.subr.bf16.mxu0 %v13248_v0  ;;  %v13046_v51 = vpack.c.bf16 %v9444_v49, %v9443_v48 }
0x15eb   :  { %13011 = vmatpush3.bf16.msra.mxu0 %v13010_v54  ;;  %v9448_v54 = vld [vmem:[%s16312_s7 + $0x120] sm:$0xff] }
0x15ec   :  { %13012 = vmatprep.subr.bf16.mxu0 %v13248_v0 }
0x15ee   :  { %11842 = vmatmul.mubr.msk.f32.vlgmr.msra.gmra.mrb[34].mxu0 %vm45_vm3, %v7021_v55  ;;  %v9449_v55 = vld [vmem:[%s16312_s7 + $0x128] sm:$0xff] }
0x15ef   :  { %11852 = vmatprep.mubr.msk.f32.mxu0 %vm13249_vm0, %v13250_v4  ;;  %13014 = vmatpush3.bf16.msra.mxu0 %v13013_v58  ;;  %v13049_v56 = vpack.c.bf16 %v9449_v55, %v9448_v54  ;;  %v9454_v58 = vld [vmem:[%s16312_s7 + $0x148] sm:$0xff]  ;;  %v9484_v55 = vld [vmem:[%s16312_s7 + $0x1f0] sm:$0xff] }
0x15f0   :  { %13015 = vmatprep.subr.bf16.mxu0 %v13248_v0  ;;  %v13055_v36 = vpack.c.bf16 %v9454_v58, %v9453_v57  ;;  %v9464_v58 = vld [vmem:[%s16314_s8 + $0x4] ss:$0 sm:$0xff] }
0x15f2   :  { %13056 = vmatpush3.bf16.msra.mxu1 %v13055_v36 }
0x15f3   :  { %13017 = vmatpush3.bf16.msra.mxu0 %v13016_v60  ;;  %v9451_v60 = vld [vmem:[%s16312_s7 + $0x138] sm:$0xff]  ;;  %13057 = vmatprep.subr.bf16.mxu1 %v13248_v0 }
0x15f4   :  { %13018 = vmatprep.subr.bf16.mxu0 %v13248_v0 }
0x16c1   :  { %v7095_v62 = vpop.f32.mrb[34].mxu0 }
0x16c2   :  { %v13147_v1 = vadd.f32 %v9400_v61, %v7095_v62  ;;  %v11843_v2 = vpop.f32.mrb[35].mxu0  ;;  %v9455_v61 = vld [vmem:[%s16312_s7 + $0x150] sm:$0xff]  ;;  %v13052_v62 = vpack.c.bf16 %v9451_v60, %v9450_v59 }
0x16c4   :  { %v7100_v5 = vmax.f32 %v13147_v1, 0.0  ;;  %v9456_v1 = vld [vmem:[%s16312_s7 + $0x158] sm:$0xff] }
0x16c5   :  { %v13058_v2 = vpack.c.bf16 %v9456_v1, %v9455_v61  ;;  %v9488_v1 = vld [vmem:[%s16312_s7 + $0x208] sm:$0xff] }
0x16c6   :  { %7101 = vst.msk [vmem:[#allocation4 + $0x2] sm:$0xf] %vm2512_vm4, %v7100_v5  ;;  %v9430_v5 = vld [vmem:[%s16314_s8 + $0x2] ss:$0 sm:$0xff] }
0x16c7   :  { %13059 = vmatpush3.bf16.msra.mxu1 %v13058_v2 }
0x16c8   :  { %13066 = vmatprep.subr.bf16.mxu1 %v13248_v0 }
0x16cd   :  { %v7109_v38 = vld [vmem:[#allocation4 + $0x1] sm:$0xf] }
0x16ce   :  { %11853 = vmatmul.mubr.msk.f32.vlgmr.msra.gmra.mrb[36].mxu0 %vm45_vm3, %v7109_v38  ;;  %v7188_v15 = vld [vmem:[#allocation4 + $0x2] sm:$0xf] }
0x16cf   :  { %13020 = vmatpush3.bf16.msra.mxu0 %v13019_v11  ;;  %11863 = vmatprep.mubr.msk.f32.mxu0 %vm13249_vm0, %v13250_v4  ;;  %v7267_v17 = vld [vmem:[#allocation4 + $0x3] sm:$0xf] }
0x16d0   :  { %13021 = vmatprep.subr.bf16.mxu0 %v13248_v0  ;;  %v9459_v38 = vld [vmem:[%s16312_s7 + $0x168] sm:$0xff] }
0x16d3   :  { %13023 = vmatpush3.bf16.msra.mxu0 %v13022_v29  ;;  %v13061_v29 = vpack.c.bf16 %v9459_v38, %v9458_v12  ;;  %v9493_v12 = vld [vmem:[%s16312_s7 + $0x228] sm:$0xff] }
0x16d4   :  { %13024 = vmatprep.subr.bf16.mxu0 %v13248_v0 }
0x16d6   :  { %11864 = vmatmul.mubr.msk.f32.vlgmr.msra.gmra.mrb[38].mxu0 %vm45_vm3, %v7188_v15 }
0x16d7   :  { %13026 = vmatpush3.bf16.msra.mxu0 %v13025_v8  ;;  %11874 = vmatprep.mubr.msk.f32.mxu0 %vm13249_vm0, %v13250_v4 }
0x16d8   :  { %13027 = vmatprep.subr.bf16.mxu0 %v13248_v0 }
0x16db   :  { %13029 = vmatpush3.bf16.msra.mxu0 %v13028_v16  ;;  %v9465_v16 = vld [vmem:[%s16312_s7 + $0x180] sm:$0xff] }
0x16dc   :  { %13030 = vmatprep.subr.bf16.mxu0 %v13248_v0 }
0x16de   :  { %11875 = vmatmul.mubr.msk.f32.vlgmr.msra.gmra.mrb[40].mxu0 %vm45_vm3, %v7267_v17  ;;  %v9466_v17 = vld [vmem:[%s16312_s7 + $0x188] sm:$0xff] }
0x16df   :  { %11885 = vmatprep.mubr.msk.f32.mxu0 %vm13249_vm0, %v13250_v4  ;;  %13032 = vmatpush3.bf16.msra.mxu0 %v13031_v19  ;;  %v13067_v37 = vpack.c.bf16 %v9466_v17, %v9465_v16  ;;  %v9468_v19 = vld [vmem:[%s16312_s7 + $0x198] sm:$0xff]  ;;  %v8345_v17 = vld [vmem:[%s16315_s9 + $0x10] sm:$0xff] }
0x16e0   :  { %13033 = vmatprep.subr.bf16.mxu0 %v13248_v0  ;;  %v13070_v20 = vpack.c.bf16 %v9468_v19, %v9467_v18 }
0x16e3   :  { %13035 = vmatpush3.bf16.msra.mxu0 %v13034_v22 }
0x16e4   :  { %13036 = vmatprep.subr.bf16.mxu0 %v13248_v0 }
0x17a1   :  { %v7183_v23 = vpop.f32.mrb[36].mxu0 }
0x17a2   :  { %v11854_v24 = vpop.f32.mrb[37].mxu0  ;;  %v7187_v26 = vadd.f32 %v9413_v25, %v7183_v23 }
0x17a9   :  { %v7262_v27 = vpop.f32.mrb[38].mxu0 }
0x17aa   :  { %v7266_v28 = vadd.f32 %v7262_v27, %v7187_v26  ;;  %v11865_v30 = vpop.f32.mrb[39].mxu0 }
0x17b1   :  { %v7341_v31 = vpop.f32.mrb[40].mxu0 }
0x17b2   :  { %v7345_v32 = vadd.f32 %v7341_v31, %v7266_v28  ;;  %v11876_v34 = vpop.f32.mrb[41].mxu0 }
0x17b4   :  { %v16004_v35 = vadd.f32 %v15890_v40, %v7345_v32 }
0x17b6   :  { %v7347_v39 = vmax.f32 %v16004_v35, 0.0 }
0x17b8   :  { %7348 = vst.msk [vmem:[#allocation4 + $0x2] sm:$0xf] %vm2512_vm4, %v7347_v39  ;;  %v9470_v39 = vld [vmem:[%s16312_s7 + $0x1a0] sm:$0xff] }
0x17b9   :  { %v13073_v42 = vpack.c.bf16 %v9471_v41, %v9470_v39  ;;  %v9500_v39 = vld [vmem:[%s16315_s9 + $0x28] sm:$0xff] }
0x17bf   :  { %v7356_v52 = vld [vmem:[#allocation4 + $0x1] sm:$0xf] }
0x17c0   :  { %11886 = vmatmul.mubr.msk.f32.vlgmr.msra.gmra.mrb[42].mxu0 %vm45_vm3, %v7356_v52  ;;  %v7435_v50 = vld [vmem:[#allocation4 + $0x2] sm:$0xf]  ;;  %v9475_v52 = vld [vmem:[%s16312_s7 + $0x1c0] sm:$0xff] }
0x17c1   :  { %13038 = vmatpush3.bf16.msra.mxu0 %v13037_v43  ;;  %11896 = vmatprep.mubr.msk.f32.mxu0 %vm13249_vm0, %v13250_v4  ;;  %v7514_v53 = vld [vmem:[#allocation4 + $0x3] sm:$0xf]  ;;  %v9472_v43 = vld [vmem:[%s16312_s7 + $0x1b0] sm:$0xff] }
0x17c2   :  { %13039 = vmatprep.subr.bf16.mxu0 %v13248_v0 }
0x17c5   :  { %13041 = vmatpush3.bf16.msra.mxu0 %v13040_v44  ;;  %v9476_v44 = vld [vmem:[%s16312_s7 + $0x1c8] sm:$0xff] }
0x17c6   :  { %13042 = vmatprep.subr.bf16.mxu0 %v13248_v0  ;;  %v13079_v45 = vpack.c.bf16 %v9476_v44, %v9475_v52  ;;  %v9506_v52 = vld [vmem:[%s16315_s9 + $0x50] sm:$0xff]  ;;  %v9507_v44 = vld [vmem:[%s16315_s9 + $0x58] sm:$0xff] }
0x17c8   :  { %11897 = vmatmul.mubr.msk.f32.vlgmr.msra.gmra.mrb[42].mxu0 %vm45_vm3, %v7435_v50 }
0x17c9   :  { %13044 = vmatpush3.bf16.msra.mxu0 %v13043_v47  ;;  %11907 = vmatprep.mubr.msk.f32.mxu0 %vm13249_vm0, %v13250_v4  ;;  %v9478_v47 = vld [vmem:[%s16312_s7 + $0x1d8] sm:$0xff] }
0x17ca   :  { %13045 = vmatprep.subr.bf16.mxu0 %v13248_v0  ;;  %v13082_v49 = vpack.c.bf16 %v9478_v47, %v9477_v46  ;;  %v13118_v46 = vpack.c.bf16 %v9507_v44, %v9506_v52  ;;  %v9509_v47 = vld [vmem:[%s16315_s9 + $0x60] sm:$0xff] }
0x17cd   :  { %13047 = vmatpush3.bf16.msra.mxu0 %v13046_v51  ;;  %v9482_v51 = vld [vmem:[%s16312_s7 + $0x1e0] sm:$0xff] }
0x17ce   :  { %13048 = vmatprep.subr.bf16.mxu0 %v13248_v0 }
0x17d0   :  { %11908 = vmatmul.mubr.msk.f32.vlgmr.msra.gmra.mrb[42].mxu0 %vm45_vm3, %v7514_v53  ;;  %v9483_v53 = vld [vmem:[%s16312_s7 + $0x1e8] sm:$0xff] }
0x17d1   :  { %11918 = vmatprep.mubr.msk.f32.mxu0 %vm13249_vm0, %v13250_v4  ;;  %13050 = vmatpush3.bf16.msra.mxu0 %v13049_v56  ;;  %v13085_v54 = vpack.c.bf16 %v9483_v53, %v9482_v51  ;;  %v9485_v56 = vld [vmem:[%s16312_s7 + $0x1f8] sm:$0xff] }
0x17d2   :  { %13051 = vmatprep.subr.bf16.mxu0 %v13248_v0  ;;  %v13088_v57 = vpack.c.bf16 %v9485_v56, %v9484_v55  ;;  %v9512_v51 = vld [vmem:[%s16315_s9 + $0x78] sm:$0xff]  ;;  %v9514_v55 = vld [vmem:[%s16315_s9 + $0x80] sm:$0xff]  ;;  %v9515_v56 = vld [vmem:[%s16315_s9 + $0x88] sm:$0xff] }
0x17d5   :  { %13053 = vmatpush3.bf16.msra.mxu0 %v13052_v62  ;;  %v9487_v62 = vld [vmem:[%s16312_s7 + $0x200] sm:$0xff] }
0x17d6   :  { %13060 = vmatprep.subr.bf16.mxu0 %v13248_v0  ;;  %v13091_v2 = vpack.c.bf16 %v9488_v1, %v9487_v62  ;;  %v9497_v62 = vld [vmem:[%s16316_s10] ss:$0 sm:$0xff] }
0x18a3   :  { %v7588_v7 = vpop.f32.mrb[42].mxu0 }
0x18a4   :  { %v13148_v10 = vadd.f32 %v9430_v5, %v7588_v7  ;;  %v11909_v11 = vpop.f32.mrb[43].mxu0  ;;  %v9489_v5 = vld [vmem:[%s16312_s7 + $0x210] sm:$0xff]  ;;  %v9490_v7 = vld [vmem:[%s16312_s7 + $0x218] sm:$0xff] }
0x18a5   :  { %v13094_v11 = vpack.c.bf16 %v9490_v7, %v9489_v5 }
0x18a6   :  { %v7593_v6 = vmax.f32 %v13148_v10, 0.0 }
0x18a8   :  { %7594 = vst.msk [vmem:[#allocation4 + $0x2] sm:$0xf] %vm2512_vm4, %v7593_v6  ;;  %v9492_v6 = vld [vmem:[%s16312_s7 + $0x220] sm:$0xff] }
0x18a9   :  { %v13097_v38 = vpack.c.bf16 %v9493_v12, %v9492_v6 }
0x18af   :  { %v7602_v8 = vld [vmem:[#allocation4 + $0x1] sm:$0xf] }
0x18b0   :  { %v7681_v13 = vld [vmem:[#allocation4 + $0x2] sm:$0xf]  ;;  %11919 = vmatmul.mubr.msk.f32.vlgmr.msra.gmra.mrb[44].mxu0 %vm45_vm3, %v7602_v8 }
0x18b1   :  { %11930 = vmatmul.mubr.msk.f32.vlgmr.msra.gmra.mrb[50].mxu1 %vm45_vm3, %v7681_v13  ;;  %13062 = vmatpush3.bf16.msra.mxu0 %v13061_v29  ;;  %v7760_v15 = vld [vmem:[#allocation4 + $0x3] sm:$0xf]  ;;  %v9494_v29 = vld [vmem:[%s16312_s7 + $0x230] sm:$0xff] }
0x18b2   :  { %11940 = vmatprep.mubr.msk.f32.mxu0 %vm13249_vm0, %v13250_v4  ;;  %13063 = vmatprep.subr.bf16.mxu0 %v13248_v0  ;;  %v13100_v8 = vpack.c.bf16 %v9495_v33, %v9494_v29 }
0x18b3   :  { %11951 = vmatprep.mubr.msk.f32.mxu1 %vm13249_vm0, %v13250_v4  ;;  %13068 = vmatpush3.bf16.msra.mxu1 %v13067_v37  ;;  %v8346_v37 = vld [vmem:[%s16315_s9 + $0x18] sm:$0xff] }
0x18b4   :  { %13069 = vmatprep.subr.bf16.mxu1 %v13248_v0  ;;  %v13106_v18 = vpack.c.bf16 %v8346_v37, %v8345_v17 }
0x18b5   :  { %13065 = vmatpush3.bf16.msra.mxu0 %v13064_v14  ;;  %v8343_v14 = vld [vmem:[%s16315_s9] sm:$0xff] }
0x18b6   :  { %13084 = vmatprep.subr.bf16.mxu0 %v13248_v0 }
0x18b7   :  { %13071 = vmatpush3.bf16.msra.mxu1 %v13070_v20 }
0x18b8   :  { %11941 = vmatmul.mubr.msk.f32.vlgmr.msra.gmra.mrb[46].mxu0 %vm45_vm3, %v7760_v15  ;;  %13072 = vmatprep.subr.bf16.mxu1 %v13248_v0  ;;  %v8344_v15 = vld [vmem:[%s16315_s9 + $0x8] sm:$0xff] }
0x18b9   :  { %11984 = vmatprep.mubr.msk.f32.mxu0 %vm13249_vm0, %v13250_v4  ;;  %13086 = vmatpush3.bf16.msra.mxu0 %v13085_v54  ;;  %v13103_v16 = vpack.c.bf16 %v8344_v15, %v8343_v14 }
0x18ba   :  { %13087 = vmatprep.subr.bf16.mxu0 %v13248_v0 }
0x18bd   :  { %13089 = vmatpush3.bf16.msra.mxu0 %v13088_v57  ;;  %v13127_v57 = vpack.c.bf16 %v9515_v56, %v9514_v55 }
0x18be   :  { %13090 = vmatprep.subr.bf16.mxu0 %v13248_v0 }
0x1983   :  { %v7676_v22 = vpop.f32.mrb[44].mxu0 }
0x1984   :  { %v7755_v23 = vpop.f32.mrb[50].mxu1  ;;  %v7680_v24 = vadd.f32 %v9447_v21, %v7676_v22  ;;  %v11920_v25 = vpop.f32.mrb[45].mxu0  ;;  %v9481_v21 = vld [vmem:[%s16314_s8 + $0x5] ss:$0 sm:$0xff] }
0x1985   :  { %v11931_v26 = vpop.f32.mrb[51].mxu1 }
0x1986   :  { %v7759_v27 = vadd.f32 %v7755_v23, %v7680_v24 }
0x198b   :  { %v7834_v28 = vpop.f32.mrb[46].mxu0 }
0x198c   :  { %v7838_v30 = vadd.f32 %v7834_v28, %v7759_v27  ;;  %v11942_v31 = vpop.f32.mrb[47].mxu0 }
0x198e   :  { %v16118_v32 = vadd.f32 %v7838_v30, %v16004_v35  ;;  %v9473_v35 = vld [vmem:[%s16312_s7 + $0x1b8] sm:$0xff] }
0x198f   :  { %v13076_v9 = vpack.c.bf16 %v9473_v35, %v9472_v43  ;;  %v9504_v35 = vld [vmem:[%s16315_s9 + $0x40] sm:$0xff] }
0x1990   :  { %v7840_v34 = vmax.f32 %v16118_v32, 0.0 }
0x1992   :  { %7841 = vst.msk [vmem:[#allocation4 + $0x2] sm:$0xf] %vm2512_vm4, %v7840_v34  ;;  %v9499_v34 = vld [vmem:[%s16315_s9 + $0x20] sm:$0xff] }
0x1993   :  { %v13109_v41 = vpack.c.bf16 %v9500_v39, %v9499_v34 }
0x1999   :  { %v7849_v63 = vld [vmem:[#allocation4 + $0x1] sm:$0xf] }
0x199a   :  { %11952 = vmatmul.mubr.msk.f32.vlgmr.msra.gmra.mrb[52].mxu1 %vm45_vm3, %v7849_v63  ;;  %v7928_v48 = vld [vmem:[#allocation4 + $0x2] sm:$0xf] }
0x199b   :  { %13074 = vmatpush3.bf16.msra.mxu1 %v13073_v42  ;;  %11962 = vmatprep.mubr.msk.f32.mxu1 %vm13249_vm0, %v13250_v4  ;;  %v8007_v50 = vld [vmem:[#allocation4 + $0x3] sm:$0xf]  ;;  %v9501_v42 = vld [vmem:[%s16315_s9 + $0x30] sm:$0xff] }
0x199c   :  { %13075 = vmatprep.subr.bf16.mxu1 %v13248_v0  ;;  %v9505_v63 = vld [vmem:[%s16315_s9 + $0x48] sm:$0xff] }
0x199f   :  { %13077 = vmatpush3.bf16.msra.mxu1 %v13076_v9  ;;  %v13115_v9 = vpack.c.bf16 %v9505_v63, %v9504_v35 }
0x19a0   :  { %13078 = vmatprep.subr.bf16.mxu1 %v13248_v0 }
0x19a2   :  { %11963 = vmatmul.mubr.msk.f32.vlgmr.msra.gmra.mrb[52].mxu1 %vm45_vm3, %v7928_v48  ;;  %v9510_v48 = vld [vmem:[%s16315_s9 + $0x68] sm:$0xff] }
0x19a3   :  { %13080 = vmatpush3.bf16.msra.mxu1 %v13079_v45  ;;  %11973 = vmatprep.mubr.msk.f32.mxu1 %vm13249_vm0, %v13250_v4 }
0x19a4   :  { %13081 = vmatprep.subr.bf16.mxu1 %v13248_v0 }
0x19a7   :  { %13083 = vmatpush3.bf16.msra.mxu1 %v13082_v49  ;;  %v13121_v49 = vpack.c.bf16 %v9510_v48, %v9509_v47 }
0x19a8   :  { %13102 = vmatprep.subr.bf16.mxu1 %v13248_v0 }
0x19aa   :  { %11974 = vmatmul.mubr.msk.f32.vlgmr.msra.gmra.mrb[52].mxu1 %vm45_vm3, %v8007_v50  ;;  %v9511_v50 = vld [vmem:[%s16315_s9 + $0x70] sm:$0xff] }
0x19ab   :  { %12017 = vmatprep.mubr.msk.f32.mxu1 %vm13249_vm0, %v13250_v4  ;;  %13104 = vmatpush3.bf16.msra.mxu1 %v13103_v16  ;;  %v13124_v54 = vpack.c.bf16 %v9512_v51, %v9511_v50 }
0x19ac   :  { %13105 = vmatprep.subr.bf16.mxu1 %v13248_v0 }
0x19af   :  { %13107 = vmatpush3.bf16.msra.mxu1 %v13106_v18 }
0x19b0   :  { %13108 = vmatprep.subr.bf16.mxu1 %v13248_v0 }
0x1a7d   :  { %v8081_v36 = vpop.f32.mrb[52].mxu1 }
0x1a7e   :  { %v13149_v59 = vadd.f32 %v9464_v58, %v8081_v36  ;;  %v11975_v60 = vpop.f32.mrb[53].mxu1  ;;  %v9516_v58 = vld [vmem:[%s16315_s9 + $0x90] sm:$0xff]  ;;  %v9517_v36 = vld [vmem:[%s16315_s9 + $0x98] sm:$0xff] }
0x1a7f   :  { %v13130_v60 = vpack.c.bf16 %v9517_v36, %v9516_v58 }
0x1a80   :  { %v8086_v61 = vmax.f32 %v13149_v59, 0.0 }
0x1a82   :  { %8087 = vst.msk [vmem:[#allocation4 + $0x2] sm:$0xf] %vm2512_vm4, %v8086_v61 }
0x1a89   :  { %v8095_v10 = vld [vmem:[#allocation4 + $0x1] sm:$0xf] }
0x1a8a   :  { %11985 = vmatmul.mubr.msk.f32.vlgmr.msra.gmra.mrb[48].mxu0 %vm45_vm3, %v8095_v10  ;;  %v8174_v3 = vld [vmem:[#allocation4 + $0x2] sm:$0xf] }
0x1a8b   :  { %13092 = vmatpush3.bf16.msra.mxu0 %v13091_v2  ;;  %11995 = vmatprep.mubr.msk.f32.mxu0 %vm13249_vm0, %v13250_v4  ;;  %v8253_v13 = vld [vmem:[#allocation4 + $0x3] sm:$0xf] }
0x1a8c   :  { %13093 = vmatprep.subr.bf16.mxu0 %v13248_v0 }
0x1a8f   :  { %13095 = vmatpush3.bf16.msra.mxu0 %v13094_v11 }
0x1a90   :  { %13096 = vmatprep.subr.bf16.mxu0 %v13248_v0 }
0x1a92   :  { %11996 = vmatmul.mubr.msk.f32.vlgmr.msra.gmra.mrb[50].mxu0 %vm45_vm3, %v8174_v3 }
0x1a93   :  { %13098 = vmatpush3.bf16.msra.mxu0 %v13097_v38  ;;  %12006 = vmatprep.mubr.msk.f32.mxu0 %vm13249_vm0, %v13250_v4 }
0x1a94   :  { %13099 = vmatprep.subr.bf16.mxu0 %v13248_v0 }
0x1a97   :  { %13101 = vmatpush3.bf16.msra.mxu0 %v13100_v8 }
0x1a9a   :  { %12007 = vmatmul.mubr.msk.f32.vlgmr.msra.gmra.mrb[52].mxu0 %vm45_vm3, %v8253_v13 }
0x1b5d   :  { %v8169_v19 = vpop.f32.mrb[48].mxu0 }
0x1b5e   :  { %v11986_v20 = vpop.f32.mrb[49].mxu0  ;;  %v8173_v22 = vadd.f32 %v9481_v21, %v8169_v19 }
0x1b65   :  { %v8248_v23 = vpop.f32.mrb[50].mxu0 }
0x1b66   :  { %v8252_v24 = vadd.f32 %v8248_v23, %v8173_v22  ;;  %v11997_v25 = vpop.f32.mrb[51].mxu0 }
0x1b6d   :  { %v8327_v26 = vpop.f32.mrb[52].mxu0 }
0x1b6e   :  { %v8331_v27 = vadd.f32 %v8327_v26, %v8252_v24  ;;  %v12008_v28 = vpop.f32.mrb[53].mxu0 }
0x1b70   :  { %v8332_v30 = vadd.f32 %v8331_v27, %v16118_v32  ;;  %v9502_v32 = vld [vmem:[%s16315_s9 + $0x38] sm:$0xff] }
0x1b71   :  { %v13112_v43 = vpack.c.bf16 %v9502_v32, %v9501_v42 }
0x1b72   :  { %v8333_v31 = vadd.f32 %v15890_v40, %v8332_v30 }
0x1b74   :  { %8334 = vst.msk [vmem:[#allocation4 + $0x2] sm:$0xf] %vm2512_vm4, %v8333_v31 }
0x1b7b   :  { %v8342_v40 = vld [vmem:[#allocation4] ss:$2 sm:$0x3]  ;;  %v8421_v45 = vld [vmem:[#allocation4 + $0x1] ss:$2 sm:$0x3] }
0x1b7c   :  { %12018 = vmatmul.mubr.msk.f32.vlgmr.msra.gmra.mrb[54].mxu1 %vm45_vm3, %v8342_v40  ;;  %v8500_v53 = vld [vmem:[#allocation4 + $0x2] ss:$2 sm:$0x3]  ;;  %v8579_v59 = vld [vmem:[#allocation4 + $0x3] ss:$2 sm:$0x3] }
0x1b7d   :  { %13110 = vmatpush3.bf16.msra.mxu1 %v13109_v41  ;;  %12028 = vmatprep.mubr.msk.f32.mxu1 %vm13249_vm0, %v13250_v4  ;;  %v8658_v61 = vld [vmem:[#allocation4 + $0x4] ss:$2 sm:$0x3] }
0x1b7e   :  { %13111 = vmatprep.subr.bf16.mxu1 %v13248_v0 }
0x1b81   :  { %13113 = vmatpush3.bf16.msra.mxu1 %v13112_v43 }
0x1b82   :  { %13114 = vmatprep.subr.bf16.mxu1 %v13248_v0 }
0x1b84   :  { %12029 = vmatmul.mubr.msk.f32.vlgmr.msra.gmra.mrb[54].mxu1 %vm45_vm3, %v8421_v45 }
0x1b85   :  { %13116 = vmatpush3.bf16.msra.mxu1 %v13115_v9  ;;  %12039 = vmatprep.mubr.msk.f32.mxu1 %vm13249_vm0, %v13250_v4 }
0x1b86   :  { %13117 = vmatprep.subr.bf16.mxu1 %v13248_v0 }
0x1b89   :  { %13119 = vmatpush3.bf16.msra.mxu1 %v13118_v46 }
0x1b8a   :  { %13120 = vmatprep.subr.bf16.mxu1 %v13248_v0 }
0x1b8c   :  { %12040 = vmatmul.mubr.msk.f32.vlgmr.msra.gmra.mrb[54].mxu1 %vm45_vm3, %v8500_v53 }
0x1b8d   :  { %13122 = vmatpush3.bf16.msra.mxu1 %v13121_v49  ;;  %12050 = vmatprep.mubr.msk.f32.mxu1 %vm13249_vm0, %v13250_v4 }
0x1b8e   :  { %13123 = vmatprep.subr.bf16.mxu1 %v13248_v0 }
0x1b91   :  { %13125 = vmatpush3.bf16.msra.mxu1 %v13124_v54 }
0x1b92   :  { %13126 = vmatprep.subr.bf16.mxu1 %v13248_v0 }
0x1b94   :  { %12051 = vmatmul.mubr.msk.f32.vlgmr.msra.gmra.mrb[54].mxu1 %vm45_vm3, %v8579_v59 }
0x1b95   :  { %13128 = vmatpush3.bf16.msra.mxu1 %v13127_v57  ;;  %12061 = vmatprep.mubr.msk.f32.mxu1 %vm13249_vm0, %v13250_v4 }
0x1b96   :  { %13129 = vmatprep.subr.bf16.mxu1 %v13248_v0 }
0x1b99   :  { %13131 = vmatpush3.bf16.msra.mxu1 %v13130_v60 }
0x1b9c   :  { %12062 = vmatmul.mubr.msk.f32.vlgmr.msra.gmra.mrb[54].mxu1 %vm45_vm3, %v8658_v61 }
0x1c6f   :  { %v8732_v1 = vpop.f32.mrb[54].mxu1 }
0x1c70   :  { %v13150_v2 = vadd.f32 %v9497_v62, %v8732_v1  ;;  %v12063_v5 = vpop.f32.mrb[55].mxu1 }
0x1c72   :  { %9519 = vst.msk [vmem:[%s16317_s11 + $0x2] sm:$0x3] %vm4425_vm5, %v13150_v2 }

</bundles_post_ra>
